<compile_context>
chip_gen: v7x
topology: tpu7x:2x2x1
jax: 0.10.0
libtpu: 0.0.40
codegen_flags: <defaults>
</compile_context>

<pallas_src>
import math
import functools

import jax
import jax.numpy as jnp
from jax.experimental import pallas as pl
from jax.experimental.pallas import tpu as pltpu


MATMUL_DTYPE = jnp.bfloat16   # MXU-operand dtype (f32 accumulation); jnp.float32 for exact
LN_EPS = 1e-5
DIM_FEEDFORWARD = 2048        # torch nn.Transformer default


# ---------------------------------------------------------------------------
# In-kernel building blocks (plain jnp on arrays, traced inside the kernel)
# ---------------------------------------------------------------------------

def _layer_norm(x, w, b, eps):
    mean = jnp.mean(x, axis=-1, keepdims=True)
    c = x - mean
    var = jnp.mean(c * c, axis=-1, keepdims=True)
    return c * jax.lax.rsqrt(var + eps) * w + b


def _ffn(x, l1_w, l1_b, l2_w, l2_b):
    cdt = l1_w.dtype
    h = jnp.dot(x.astype(cdt), l1_w, preferred_element_type=jnp.float32) + l1_b
    h = jnp.maximum(h, 0.0)
    return jnp.dot(h.astype(cdt), l2_w, preferred_element_type=jnp.float32) + l2_b


def _mha(x_q, x_kv, qkv_w, qkv_b, out_w, out_b, *, nhead, self_attn):
    """Multi-head attention for ONE batch element. x_q: (Sq, E), x_kv: (Sk, E)."""
    E = x_q.shape[-1]
    hd = E // nhead
    scale = 1.0 / math.sqrt(hd)
    cdt = qkv_w.dtype
    if self_attn:
        qkv = jnp.dot(x_q.astype(cdt), qkv_w,
                      preferred_element_type=jnp.float32) + qkv_b        # (Sq, 3E)
        q, k, v = qkv[:, :E], qkv[:, E:2 * E], qkv[:, 2 * E:]
    else:
        q = jnp.dot(x_q.astype(cdt), qkv_w[:, :E],
                    preferred_element_type=jnp.float32) + qkv_b[:, :E]   # (Sq, E)
        kv = jnp.dot(x_kv.astype(cdt), qkv_w[:, E:],
                     preferred_element_type=jnp.float32) + qkv_b[:, E:]  # (Sk, 2E)
        k, v = kv[:, :E], kv[:, E:]
    heads = []
    for h in range(nhead):
        sl = slice(h * hd, (h + 1) * hd)
        qh, kh, vh = q[:, sl], k[:, sl], v[:, sl]
        # q @ k^T without materializing a transpose of K.
        s = jax.lax.dot_general(qh, kh, (((1,), (1,)), ((), ())),
                                preferred_element_type=jnp.float32) * scale
        m = jnp.max(s, axis=-1, keepdims=True)
        p = jnp.exp(s - m)
        p = p * pl.reciprocal(jnp.sum(p, axis=-1, keepdims=True), approx=True)
        heads.append(jnp.dot(p, vh, preferred_element_type=jnp.float32))
    attn = jnp.concatenate(heads, axis=-1)                               # (Sq, E)
    return jnp.dot(attn.astype(cdt), out_w,
                   preferred_element_type=jnp.float32) + out_b


# ---------------------------------------------------------------------------
# One fused kernel: encoder stack + decoder stack + logits head
# ---------------------------------------------------------------------------

def _fused_transformer_kernel(*refs, n_enc, n_dec, nhead, eps):
    (src_ref, tgt_ref,
     e_qkv_w, e_qkv_b, e_out_w, e_out_b,
     e_n1_w, e_n1_b, e_l1_w, e_l1_b, e_l2_w, e_l2_b, e_n2_w, e_n2_b,
     enc_n_w, enc_n_b,
     d_sa_qkv_w, d_sa_qkv_b, d_sa_out_w, d_sa_out_b,
     d_ca_qkv_w, d_ca_qkv_b, d_ca_out_w, d_ca_out_b,
     d_n1_w, d_n1_b, d_n2_w, d_n2_b, d_n3_w, d_n3_b,
     d_l1_w, d_l1_b, d_l2_w, d_l2_b,
     dec_n_w, dec_n_b, head_w, head_b,
     out_ref) = refs

    # ---- encoder stack (fully unrolled; weights stay VMEM-resident) ----
    x = src_ref[0].astype(jnp.float32)                          # (Ss, E)
    for l in range(n_enc):
        a = _mha(x, x, e_qkv_w[l], e_qkv_b[l], e_out_w[l], e_out_b[l],
                 nhead=nhead, self_attn=True)
        x = _layer_norm(x + a, e_n1_w[l], e_n1_b[l], eps)
        f = _ffn(x, e_l1_w[l], e_l1_b[l], e_l2_w[l], e_l2_b[l])
        x = _layer_norm(x + f, e_n2_w[l], e_n2_b[l], eps)
    memory = _layer_norm(x, enc_n_w[...], enc_n_b[...], eps)     # final encoder LN

    # ---- decoder stack ----
    y = tgt_ref[0].astype(jnp.float32)                          # (St, E)
    for l in range(n_dec):
        a = _mha(y, y, d_sa_qkv_w[l], d_sa_qkv_b[l], d_sa_out_w[l],
                 d_sa_out_b[l], nhead=nhead, self_attn=True)
        y = _layer_norm(y + a, d_n1_w[l], d_n1_b[l], eps)
        a = _mha(y, memory, d_ca_qkv_w[l], d_ca_qkv_b[l], d_ca_out_w[l],
                 d_ca_out_b[l], nhead=nhead, self_attn=False)
        y = _layer_norm(y + a, d_n2_w[l], d_n2_b[l], eps)
        f = _ffn(y, d_l1_w[l], d_l1_b[l], d_l2_w[l], d_l2_b[l])
        y = _layer_norm(y + f, d_n3_w[l], d_n3_b[l], eps)
    y = _layer_norm(y, dec_n_w[...], dec_n_b[...], eps)          # final decoder LN

    # ---- lane-dense (128-padded) logits projection ----
    hw = head_w[...]
    logits = jnp.dot(y.astype(hw.dtype), hw,
                     preferred_element_type=jnp.float32) + head_b[...]
    out_ref[0] = logits.astype(out_ref.dtype)


_PACKED_WEIGHT_KEYS = (
    "e_qkv_w", "e_qkv_b", "e_out_w", "e_out_b",
    "e_n1_w", "e_n1_b", "e_l1_w", "e_l1_b", "e_l2_w", "e_l2_b",
    "e_n2_w", "e_n2_b",
    "enc_n_w", "enc_n_b",
    "d_sa_qkv_w", "d_sa_qkv_b", "d_sa_out_w", "d_sa_out_b",
    "d_ca_qkv_w", "d_ca_qkv_b", "d_ca_out_w", "d_ca_out_b",
    "d_n1_w", "d_n1_b", "d_n2_w", "d_n2_b", "d_n3_w", "d_n3_b",
    "d_l1_w", "d_l1_b", "d_l2_w", "d_l2_b",
    "dec_n_w", "dec_n_b", "head_w", "head_b",
)


def _full_spec(shape):
    zeros = (0,) * len(shape)
    return pl.BlockSpec(shape, lambda i: zeros)


def fused_transformer_pair(src_b, tgt_b, pp, *, nhead, n_enc, n_dec, eps=LN_EPS):
    """src_b: (N, Ss, E) f32, tgt_b: (N, St, E) f32 -> padded logits (N, St, Vpad)."""
    N, Ss, E = src_b.shape
    St = tgt_b.shape[1]
    Vpad = pp["head_w"].shape[-1]
    weights = [pp[k] for k in _PACKED_WEIGHT_KEYS]

    in_specs = ([pl.BlockSpec((1, Ss, E), lambda i: (i, 0, 0)),
                 pl.BlockSpec((1, St, E), lambda i: (i, 0, 0))]
                + [_full_spec(a.shape) for a in weights])

    kernel = functools.partial(_fused_transformer_kernel,
                               n_enc=n_enc, n_dec=n_dec, nhead=nhead, eps=eps)

    return pl.pallas_call(
        kernel,
        out_shape=jax.ShapeDtypeStruct((N, St, Vpad), jnp.float32),
        grid=(N,),
        in_specs=in_specs,
        out_specs=pl.BlockSpec((1, St, Vpad), lambda i: (i, 0, 0)),
        compiler_params=pltpu.CompilerParams(
            dimension_semantics=("parallel",)),
    )(src_b, tgt_b, *weights)


# ---------------------------------------------------------------------------
# Forward pass (embedding gather + layout glue in plain JAX; one fused kernel)
# ---------------------------------------------------------------------------

def esoteric_multi_encoder_decoder_forward(
        packed_params, src, tgt, *, cfg,
        src_mask=None, tgt_mask=None, memory_mask=None,
        src_key_padding_mask=None, tgt_key_padding_mask=None,
        memory_key_padding_mask=None):
    # TODO(synk): attention/key-padding masks not implemented (forward is called
    # with the default None masks, matching the reference usage).
    assert all(m is None for m in (src_mask, tgt_mask, memory_mask,
                                   src_key_padding_mask, tgt_key_padding_mask,
                                   memory_key_padding_mask))
    outputs = []
    for pp, pc in zip(packed_params["pairs"], cfg):
        # NOTE: the reference module re-assigns src/tgt to their embeddings
        # inside the loop, so only n_enc_dec_pairs == 1 is executable in
        # PyTorch; we mirror that behaviour exactly.
        src = jnp.take(pp["embedding"], src, axis=0)       # (Ss, N, E) gather (glue)
        tgt = jnp.take(pp["embedding"], tgt, axis=0)       # (St, N, E)
        src_b = jnp.transpose(src, (1, 0, 2))              # batch-major for the kernel
        tgt_b = jnp.transpose(tgt, (1, 0, 2))
        logits = fused_transformer_pair(src_b, tgt_b, pp, nhead=pc["nhead"],
                                        n_enc=pc["n_enc"], n_dec=pc["n_dec"])
        logits = logits[:, :, :pc["ntoken"]]               # drop lane padding
        outputs.append(jnp.transpose(logits, (1, 0, 2)))   # (St, N, ntoken)
    return outputs


# ---------------------------------------------------------------------------
# Deterministic parameter initialization (shapes follow the module __init__)
# ---------------------------------------------------------------------------

class KeyGen:
    def __init__(self, key):
        self.key = key
        self.i = 0

    def __call__(self):
        self.i += 1
        return jax.random.fold_in(self.key, self.i)


def _uniform(key, shape, bound):
    return jax.random.uniform(key, shape, jnp.float32, -bound, bound)


def init_mha_params(kg, E):
    b = 1.0 / math.sqrt(E)
    return {
        "in_proj_weight": _uniform(kg(), (3 * E, E), b),
        "in_proj_bias": _uniform(kg(), (3 * E,), b),
        "out_proj_weight": _uniform(kg(), (E, E), b),
        "out_proj_bias": _uniform(kg(), (E,), b),
    }


def _init_ffn_and_norms(kg, E, dff, n_norms):
    p = {
        "linear1_w": _uniform(kg(), (dff, E), 1.0 / math.sqrt(E)),
        "linear1_b": _uniform(kg(), (dff,), 1.0 / math.sqrt(E)),
        "linear2_w": _uniform(kg(), (E, dff), 1.0 / math.sqrt(dff)),
        "linear2_b": _uniform(kg(), (E,), 1.0 / math.sqrt(dff)),
    }
    for n in range(1, n_norms + 1):
        p[f"norm{n}_w"] = jnp.ones((E,), jnp.float32)
        p[f"norm{n}_b"] = jnp.zeros((E,), jnp.float32)
    return p


def init_encoder_layer(kg, E, dff):
    p = {"self_attn": init_mha_params(kg, E)}
    p.update(_init_ffn_and_norms(kg, E, dff, n_norms=2))
    return p


def init_decoder_layer(kg, E, dff):
    p = {"self_attn": init_mha_params(kg, E),
         "cross_attn": init_mha_params(kg, E)}
    p.update(_init_ffn_and_norms(kg, E, dff, n_norms=3))
    return p


def init_params(key, n_enc_dec_pairs, ntoken, ninp, nhead, nhid, nlayers):
    # nn.Transformer(ninp, nhead, nhid, nlayers, dropout):
    #   num_encoder_layers = nhid, num_decoder_layers = nlayers,
    #   dim_feedforward = 2048 (PyTorch default).
    dff = DIM_FEEDFORWARD
    kg = KeyGen(key)
    pairs = []
    for _ in range(n_enc_dec_pairs):
        transformer = {
            "encoder_layers": [init_encoder_layer(kg, ninp, dff) for _ in range(nhid)],
            "decoder_layers": [init_decoder_layer(kg, ninp, dff) for _ in range(nlayers)],
            "encoder_norm_w": jnp.ones((ninp,), jnp.float32),
            "encoder_norm_b": jnp.zeros((ninp,), jnp.float32),
            "decoder_norm_w": jnp.ones((ninp,), jnp.float32),
            "decoder_norm_b": jnp.zeros((ninp,), jnp.float32),
        }
        pairs.append({
            "embedding": jax.random.normal(kg(), (ntoken, ninp), jnp.float32),
            "transformer": transformer,
            "decoder_w": _uniform(kg(), (ntoken, ninp), 1.0 / math.sqrt(ninp)),
            "decoder_b": _uniform(kg(), (ntoken,), 1.0 / math.sqrt(ninp)),
            "nhead": nhead,
        })
    return {"pairs": pairs}


# ---------------------------------------------------------------------------
# Pack raw (PyTorch-shaped) params into kernel-ready arrays (one-time cost):
# stack per-layer weights, pre-transpose to (K, N), cast matmul weights to
# MATMUL_DTYPE, pad the logits head to a lane-dense width.
# ---------------------------------------------------------------------------

def pack_params(params, matmul_dtype=MATMUL_DTYPE):
    packed_pairs, cfg = [], []
    for pair in params["pairs"]:
        t = pair["transformer"]
        enc, dec = t["encoder_layers"], t["decoder_layers"]

        def stack_wT(layers, get):      # (L, K, N), pre-transposed, matmul dtype
            return jnp.stack([get(l).T for l in layers]).astype(matmul_dtype)

        def stack_vec(layers, get):     # (L, 1, dim) float32 (biases / LN params)
            return jnp.stack([get(l).reshape(1, -1) for l in layers]
                             ).astype(jnp.float32)

        E = t["encoder_norm_w"].shape[0]
        V = pair["decoder_b"].shape[0]
        Vpad = ((V + 127) // 128) * 128                 # lane-dense logits output
        head_w = jnp.zeros((E, Vpad), jnp.float32).at[:, :V].set(pair["decoder_w"].T)
        head_b = jnp.zeros((1, Vpad), jnp.float32).at[:, :V].set(pair["decoder_b"])

        pp = {
            "embedding": pair["embedding"].astype(jnp.float32),
            # encoder layers (stacked along a leading layer axis)
            "e_qkv_w": stack_wT(enc, lambda l: l["self_attn"]["in_proj_weight"]),
            "e_qkv_b": stack_vec(enc, lambda l: l["self_attn"]["in_proj_bias"]),
            "e_out_w": stack_wT(enc, lambda l: l["self_attn"]["out_proj_weight"]),
            "e_out_b": stack_vec(enc, lambda l: l["self_attn"]["out_proj_bias"]),
            "e_n1_w": stack_vec(enc, lambda l: l["norm1_w"]),
            "e_n1_b": stack_vec(enc, lambda l: l["norm1_b"]),
            "e_l1_w": stack_wT(enc, lambda l: l["linear1_w"]),
            "e_l1_b": stack_vec(enc, lambda l: l["linear1_b"]),
            "e_l2_w": stack_wT(enc, lambda l: l["linear2_w"]),
            "e_l2_b": stack_vec(enc, lambda l: l["linear2_b"]),
            "e_n2_w": stack_vec(enc, lambda l: l["norm2_w"]),
            "e_n2_b": stack_vec(enc, lambda l: l["norm2_b"]),
            "enc_n_w": t["encoder_norm_w"].reshape(1, -1).astype(jnp.float32),
            "enc_n_b": t["encoder_norm_b"].reshape(1, -1).astype(jnp.float32),
            # decoder layers
            "d_sa_qkv_w": stack_wT(dec, lambda l: l["self_attn"]["in_proj_weight"]),
            "d_sa_qkv_b": stack_vec(dec, lambda l: l["self_attn"]["in_proj_bias"]),
            "d_sa_out_w": stack_wT(dec, lambda l: l["self_attn"]["out_proj_weight"]),
            "d_sa_out_b": stack_vec(dec, lambda l: l["self_attn"]["out_proj_bias"]),
            "d_ca_qkv_w": stack_wT(dec, lambda l: l["cross_attn"]["in_proj_weight"]),
            "d_ca_qkv_b": stack_vec(dec, lambda l: l["cross_attn"]["in_proj_bias"]),
            "d_ca_out_w": stack_wT(dec, lambda l: l["cross_attn"]["out_proj_weight"]),
            "d_ca_out_b": stack_vec(dec, lambda l: l["cross_attn"]["out_proj_bias"]),
            "d_n1_w": stack_vec(dec, lambda l: l["norm1_w"]),
            "d_n1_b": stack_vec(dec, lambda l: l["norm1_b"]),
            "d_n2_w": stack_vec(dec, lambda l: l["norm2_w"]),
            "d_n2_b": stack_vec(dec, lambda l: l["norm2_b"]),
            "d_n3_w": stack_vec(dec, lambda l: l["norm3_w"]),
            "d_n3_b": stack_vec(dec, lambda l: l["norm3_b"]),
            "d_l1_w": stack_wT(dec, lambda l: l["linear1_w"]),
            "d_l1_b": stack_vec(dec, lambda l: l["linear1_b"]),
            "d_l2_w": stack_wT(dec, lambda l: l["linear2_w"]),
            "d_l2_b": stack_vec(dec, lambda l: l["linear2_b"]),
            "dec_n_w": t["decoder_norm_w"].reshape(1, -1).astype(jnp.float32),
            "dec_n_b": t["decoder_norm_b"].reshape(1, -1).astype(jnp.float32),
            "head_w": head_w.astype(matmul_dtype),
            "head_b": head_b,
        }
        packed_pairs.append(pp)
        cfg.append({"nhead": int(pair["nhead"]), "n_enc": len(enc),
                    "n_dec": len(dec), "ntoken": int(V)})
    return {"pairs": packed_pairs}, tuple(cfg)


# ---------------------------------------------------------------------------

if __name__ == "__main__":
    key = jax.random.PRNGKey(0)
    n_enc_dec_pairs = 1          # reference module only runs for 1 pair (see NOTE above)
    ntoken, ninp, nhead = 50, 32, 4
    nhid, nlayers = 2, 2         # -> num_encoder_layers=2, num_decoder_layers=2
    S_src, S_tgt, N = 10, 8, 2

    raw_params = init_params(jax.random.fold_in(key, 1),
                             n_enc_dec_pairs, ntoken, ninp, nhead, nhid, nlayers)
    packed_params, cfg = pack_params(raw_params)

    src = jax.random.randint(jax.random.fold_in(key, 2), (S_src, N), 0, ntoken, dtype=jnp.int32)
    tgt = jax.random.randint(jax.random.fold_in(key, 3), (S_tgt, N), 0, ntoken, dtype=jnp.int32)

    fwd = jax.jit(functools.partial(esoteric_multi_encoder_decoder_forward, cfg=cfg))
    outs = jax.block_until_ready(fwd(packed_params, src, tgt))

    assert len(outs) == n_enc_dec_pairs
    assert outs[0].shape == (S_tgt, N, ntoken)
    assert outs[0].dtype == jnp.float32
    assert bool(jnp.all(jnp.isfinite(outs[0])))
    print("KERNEL_OK")
</pallas_src>

<mosaic_0001>
module attributes {stable_mosaic.version = 11 : i64} {
  func.func @_fused_transformer_kernel(%arg0: i32, %arg1: memref<1x10x32xf32, #tpu.memory_space<vmem>>, %arg2: memref<1x8x32xf32, #tpu.memory_space<vmem>>, %arg3: memref<2x32x96xbf16, #tpu.memory_space<vmem>>, %arg4: memref<2x1x96xf32, #tpu.memory_space<vmem>>, %arg5: memref<2x32x32xbf16, #tpu.memory_space<vmem>>, %arg6: memref<2x1x32xf32, #tpu.memory_space<vmem>>, %arg7: memref<2x1x32xf32, #tpu.memory_space<vmem>>, %arg8: memref<2x1x32xf32, #tpu.memory_space<vmem>>, %arg9: memref<2x32x2048xbf16, #tpu.memory_space<vmem>>, %arg10: memref<2x1x2048xf32, #tpu.memory_space<vmem>>, %arg11: memref<2x2048x32xbf16, #tpu.memory_space<vmem>>, %arg12: memref<2x1x32xf32, #tpu.memory_space<vmem>>, %arg13: memref<2x1x32xf32, #tpu.memory_space<vmem>>, %arg14: memref<2x1x32xf32, #tpu.memory_space<vmem>>, %arg15: memref<1x32xf32, #tpu.memory_space<vmem>>, %arg16: memref<1x32xf32, #tpu.memory_space<vmem>>, %arg17: memref<2x32x96xbf16, #tpu.memory_space<vmem>>, %arg18: memref<2x1x96xf32, #tpu.memory_space<vmem>>, %arg19: memref<2x32x32xbf16, #tpu.memory_space<vmem>>, %arg20: memref<2x1x32xf32, #tpu.memory_space<vmem>>, %arg21: memref<2x32x96xbf16, #tpu.memory_space<vmem>>, %arg22: memref<2x1x96xf32, #tpu.memory_space<vmem>>, %arg23: memref<2x32x32xbf16, #tpu.memory_space<vmem>>, %arg24: memref<2x1x32xf32, #tpu.memory_space<vmem>>, %arg25: memref<2x1x32xf32, #tpu.memory_space<vmem>>, %arg26: memref<2x1x32xf32, #tpu.memory_space<vmem>>, %arg27: memref<2x1x32xf32, #tpu.memory_space<vmem>>, %arg28: memref<2x1x32xf32, #tpu.memory_space<vmem>>, %arg29: memref<2x1x32xf32, #tpu.memory_space<vmem>>, %arg30: memref<2x1x32xf32, #tpu.memory_space<vmem>>, %arg31: memref<2x32x2048xbf16, #tpu.memory_space<vmem>>, %arg32: memref<2x1x2048xf32, #tpu.memory_space<vmem>>, %arg33: memref<2x2048x32xbf16, #tpu.memory_space<vmem>>, %arg34: memref<2x1x32xf32, #tpu.memory_space<vmem>>, %arg35: memref<1x32xf32, #tpu.memory_space<vmem>>, %arg36: memref<1x32xf32, #tpu.memory_space<vmem>>, %arg37: memref<32x128xbf16, #tpu.memory_space<vmem>>, %arg38: memref<1x128xf32, #tpu.memory_space<vmem>>, %arg39: memref<1x8x128xf32, #tpu.memory_space<vmem>>) attributes {dimension_semantics = [#tpu.dimension_semantics<parallel>], iteration_bounds = array<i64: 2>, scalar_prefetch = 0 : i64, scratch_operands = 0 : i64, tpu.core_type = #tpu.core_type<tc>, window_params = [{transform_indices = @transform_0, window_bounds = array<i64: 1, 10, 32>}, {transform_indices = @transform_1, window_bounds = array<i64: 1, 8, 32>}, {pipeline_mode = #tpu.pipeline_mode<synchronous>, transform_indices = @transform_2, window_bounds = array<i64: 2, 32, 96>}, {pipeline_mode = #tpu.pipeline_mode<synchronous>, transform_indices = @transform_3, window_bounds = array<i64: 2, 1, 96>}, {pipeline_mode = #tpu.pipeline_mode<synchronous>, transform_indices = @transform_4, window_bounds = array<i64: 2, 32, 32>}, {pipeline_mode = #tpu.pipeline_mode<synchronous>, transform_indices = @transform_5, window_bounds = array<i64: 2, 1, 32>}, {pipeline_mode = #tpu.pipeline_mode<synchronous>, transform_indices = @transform_6, window_bounds = array<i64: 2, 1, 32>}, {pipeline_mode = #tpu.pipeline_mode<synchronous>, transform_indices = @transform_7, window_bounds = array<i64: 2, 1, 32>}, {pipeline_mode = #tpu.pipeline_mode<synchronous>, transform_indices = @transform_8, window_bounds = array<i64: 2, 32, 2048>}, {pipeline_mode = #tpu.pipeline_mode<synchronous>, transform_indices = @transform_9, window_bounds = array<i64: 2, 1, 2048>}, {pipeline_mode = #tpu.pipeline_mode<synchronous>, transform_indices = @transform_10, window_bounds = array<i64: 2, 2048, 32>}, {pipeline_mode = #tpu.pipeline_mode<synchronous>, transform_indices = @transform_11, window_bounds = array<i64: 2, 1, 32>}, {pipeline_mode = #tpu.pipeline_mode<synchronous>, transform_indices = @transform_12, window_bounds = array<i64: 2, 1, 32>}, {pipeline_mode = #tpu.pipeline_mode<synchronous>, transform_indices = @transform_13, window_bounds = array<i64: 2, 1, 32>}, {pipeline_mode = #tpu.pipeline_mode<synchronous>, transform_indices = @transform_14, window_bounds = array<i64: 1, 32>}, {pipeline_mode = #tpu.pipeline_mode<synchronous>, transform_indices = @transform_15, window_bounds = array<i64: 1, 32>}, {pipeline_mode = #tpu.pipeline_mode<synchronous>, transform_indices = @transform_16, window_bounds = array<i64: 2, 32, 96>}, {pipeline_mode = #tpu.pipeline_mode<synchronous>, transform_indices = @transform_17, window_bounds = array<i64: 2, 1, 96>}, {pipeline_mode = #tpu.pipeline_mode<synchronous>, transform_indices = @transform_18, window_bounds = array<i64: 2, 32, 32>}, {pipeline_mode = #tpu.pipeline_mode<synchronous>, transform_indices = @transform_19, window_bounds = array<i64: 2, 1, 32>}, {pipeline_mode = #tpu.pipeline_mode<synchronous>, transform_indices = @transform_20, window_bounds = array<i64: 2, 32, 96>}, {pipeline_mode = #tpu.pipeline_mode<synchronous>, transform_indices = @transform_21, window_bounds = array<i64: 2, 1, 96>}, {pipeline_mode = #tpu.pipeline_mode<synchronous>, transform_indices = @transform_22, window_bounds = array<i64: 2, 32, 32>}, {pipeline_mode = #tpu.pipeline_mode<synchronous>, transform_indices = @transform_23, window_bounds = array<i64: 2, 1, 32>}, {pipeline_mode = #tpu.pipeline_mode<synchronous>, transform_indices = @transform_24, window_bounds = array<i64: 2, 1, 32>}, {pipeline_mode = #tpu.pipeline_mode<synchronous>, transform_indices = @transform_25, window_bounds = array<i64: 2, 1, 32>}, {pipeline_mode = #tpu.pipeline_mode<synchronous>, transform_indices = @transform_26, window_bounds = array<i64: 2, 1, 32>}, {pipeline_mode = #tpu.pipeline_mode<synchronous>, transform_indices = @transform_27, window_bounds = array<i64: 2, 1, 32>}, {pipeline_mode = #tpu.pipeline_mode<synchronous>, transform_indices = @transform_28, window_bounds = array<i64: 2, 1, 32>}, {pipeline_mode = #tpu.pipeline_mode<synchronous>, transform_indices = @transform_29, window_bounds = array<i64: 2, 1, 32>}, {pipeline_mode = #tpu.pipeline_mode<synchronous>, transform_indices = @transform_30, window_bounds = array<i64: 2, 32, 2048>}, {pipeline_mode = #tpu.pipeline_mode<synchronous>, transform_indices = @transform_31, window_bounds = array<i64: 2, 1, 2048>}, {pipeline_mode = #tpu.pipeline_mode<synchronous>, transform_indices = @transform_32, window_bounds = array<i64: 2, 2048, 32>}, {pipeline_mode = #tpu.pipeline_mode<synchronous>, transform_indices = @transform_33, window_bounds = array<i64: 2, 1, 32>}, {pipeline_mode = #tpu.pipeline_mode<synchronous>, transform_indices = @transform_34, window_bounds = array<i64: 1, 32>}, {pipeline_mode = #tpu.pipeline_mode<synchronous>, transform_indices = @transform_35, window_bounds = array<i64: 1, 32>}, {pipeline_mode = #tpu.pipeline_mode<synchronous>, transform_indices = @transform_36, window_bounds = array<i64: 32, 128>}, {pipeline_mode = #tpu.pipeline_mode<synchronous>, transform_indices = @transform_37, window_bounds = array<i64: 1, 128>}, {transform_indices = @transform_38, window_bounds = array<i64: 1, 8, 128>}]} {
    %c0 = arith.constant 0 : index
    %c0_0 = arith.constant 0 : index
    %c0_1 = arith.constant 0 : index
    %0 = vector.load %arg1[%c0, %c0_0, %c0_1] : memref<1x10x32xf32, #tpu.memory_space<vmem>>, vector<1x10x32xf32>
    %1 = vector.shape_cast %0 : vector<1x10x32xf32> to vector<10x32xf32>
    %c0_2 = arith.constant 0 : index
    %c0_3 = arith.constant 0 : index
    %c0_4 = arith.constant 0 : index
    %2 = vector.load %arg3[%c0_2, %c0_3, %c0_4] : memref<2x32x96xbf16, #tpu.memory_space<vmem>>, vector<1x32x96xbf16>
    %3 = vector.shape_cast %2 : vector<1x32x96xbf16> to vector<32x96xbf16>
    %c0_5 = arith.constant 0 : index
    %c0_6 = arith.constant 0 : index
    %c0_7 = arith.constant 0 : index
    %4 = vector.load %arg4[%c0_5, %c0_6, %c0_7] : memref<2x1x96xf32, #tpu.memory_space<vmem>>, vector<1x1x96xf32>
    %5 = vector.shape_cast %4 : vector<1x1x96xf32> to vector<1x96xf32>
    %c0_8 = arith.constant 0 : index
    %c0_9 = arith.constant 0 : index
    %c0_10 = arith.constant 0 : index
    %6 = vector.load %arg5[%c0_8, %c0_9, %c0_10] : memref<2x32x32xbf16, #tpu.memory_space<vmem>>, vector<1x32x32xbf16>
    %7 = vector.shape_cast %6 : vector<1x32x32xbf16> to vector<32x32xbf16>
    %c0_11 = arith.constant 0 : index
    %c0_12 = arith.constant 0 : index
    %c0_13 = arith.constant 0 : index
    %8 = vector.load %arg6[%c0_11, %c0_12, %c0_13] : memref<2x1x32xf32, #tpu.memory_space<vmem>>, vector<1x1x32xf32>
    %9 = vector.shape_cast %8 : vector<1x1x32xf32> to vector<1x32xf32>
    %10 = arith.truncf %1 : vector<10x32xf32> to vector<10x32xbf16>
    %cst = arith.constant dense<0.000000e+00> : vector<10x96xf32>
    %11 = tpu.matmul %10, %3, %cst {dimension_numbers = #tpu.dot_dimension_numbers<[1], [0], [0], [1], [0, 0, 1, 1], [], []>} : vector<10x32xbf16>, vector<32x96xbf16>, vector<10x96xf32> -> vector<10x96xf32>
    %12 = vector.broadcast %5 : vector<1x96xf32> to vector<10x96xf32>
    %13 = arith.addf %11, %12 : vector<10x96xf32>
    %14 = vector.extract_strided_slice %13 {offsets = [0, 0], sizes = [10, 32], strides = [1, 1]} : vector<10x96xf32> to vector<10x32xf32>
    %15 = vector.extract_strided_slice %13 {offsets = [0, 32], sizes = [10, 32], strides = [1, 1]} : vector<10x96xf32> to vector<10x32xf32>
    %16 = vector.extract_strided_slice %13 {offsets = [0, 64], sizes = [10, 32], strides = [1, 1]} : vector<10x96xf32> to vector<10x32xf32>
    %17 = vector.extract_strided_slice %14 {offsets = [0, 0], sizes = [10, 8], strides = [1, 1]} : vector<10x32xf32> to vector<10x8xf32>
    %18 = vector.extract_strided_slice %15 {offsets = [0, 0], sizes = [10, 8], strides = [1, 1]} : vector<10x32xf32> to vector<10x8xf32>
    %19 = vector.extract_strided_slice %16 {offsets = [0, 0], sizes = [10, 8], strides = [1, 1]} : vector<10x32xf32> to vector<10x8xf32>
    %cst_14 = arith.constant dense<0.000000e+00> : vector<10x10xf32>
    %20 = tpu.matmul %17, %18, %cst_14 {dimension_numbers = #tpu.dot_dimension_numbers<[1], [1], [0], [0], [0, 0, 1, 0], [], []>} : vector<10x8xf32>, vector<10x8xf32>, vector<10x10xf32> -> vector<10x10xf32>
    %cst_15 = arith.constant 0.353553385 : f32
    %21 = vector.broadcast %cst_15 : f32 to vector<10x10xf32>
    %22 = arith.mulf %20, %21 : vector<10x10xf32>
    %cst_16 = arith.constant dense<0xFF800000> : vector<10xf32>
    %23 = vector.multi_reduction <maximumf>, %22, %cst_16 [1] : vector<10x10xf32> to vector<10xf32>
    %24 = vector.shape_cast %23 : vector<10xf32> to vector<10x1xf32>
    %25 = vector.broadcast %24 : vector<10x1xf32> to vector<10x10xf32>
    %26 = arith.subf %22, %25 : vector<10x10xf32>
    %27 = math.exp %26 : vector<10x10xf32>
    %cst_17 = arith.constant dense<0.000000e+00> : vector<10xf32>
    %28 = vector.multi_reduction <add>, %27, %cst_17 [1] : vector<10x10xf32> to vector<10xf32>
    %29 = vector.shape_cast %28 : vector<10xf32> to vector<10x1xf32>
    %30 = tpu.reciprocal %29 {approx = true} : vector<10x1xf32> -> vector<10x1xf32>
    %31 = vector.broadcast %30 : vector<10x1xf32> to vector<10x10xf32>
    %32 = arith.mulf %27, %31 : vector<10x10xf32>
    %cst_18 = arith.constant dense<0.000000e+00> : vector<10x8xf32>
    %33 = tpu.matmul %32, %19, %cst_18 {dimension_numbers = #tpu.dot_dimension_numbers<[1], [0], [0], [1], [0, 0, 1, 1], [], []>} : vector<10x10xf32>, vector<10x8xf32>, vector<10x8xf32> -> vector<10x8xf32>
    %34 = vector.extract_strided_slice %14 {offsets = [0, 8], sizes = [10, 8], strides = [1, 1]} : vector<10x32xf32> to vector<10x8xf32>
    %35 = vector.extract_strided_slice %15 {offsets = [0, 8], sizes = [10, 8], strides = [1, 1]} : vector<10x32xf32> to vector<10x8xf32>
    %36 = vector.extract_strided_slice %16 {offsets = [0, 8], sizes = [10, 8], strides = [1, 1]} : vector<10x32xf32> to vector<10x8xf32>
    %cst_19 = arith.constant dense<0.000000e+00> : vector<10x10xf32>
    %37 = tpu.matmul %34, %35, %cst_19 {dimension_numbers = #tpu.dot_dimension_numbers<[1], [1], [0], [0], [0, 0, 1, 0], [], []>} : vector<10x8xf32>, vector<10x8xf32>, vector<10x10xf32> -> vector<10x10xf32>
    %cst_20 = arith.constant 0.353553385 : f32
    %38 = vector.broadcast %cst_20 : f32 to vector<10x10xf32>
    %39 = arith.mulf %37, %38 : vector<10x10xf32>
    %cst_21 = arith.constant dense<0xFF800000> : vector<10xf32>
    %40 = vector.multi_reduction <maximumf>, %39, %cst_21 [1] : vector<10x10xf32> to vector<10xf32>
    %41 = vector.shape_cast %40 : vector<10xf32> to vector<10x1xf32>
    %42 = vector.broadcast %41 : vector<10x1xf32> to vector<10x10xf32>
    %43 = arith.subf %39, %42 : vector<10x10xf32>
    %44 = math.exp %43 : vector<10x10xf32>
    %cst_22 = arith.constant dense<0.000000e+00> : vector<10xf32>
    %45 = vector.multi_reduction <add>, %44, %cst_22 [1] : vector<10x10xf32> to vector<10xf32>
    %46 = vector.shape_cast %45 : vector<10xf32> to vector<10x1xf32>
    %47 = tpu.reciprocal %46 {approx = true} : vector<10x1xf32> -> vector<10x1xf32>
    %48 = vector.broadcast %47 : vector<10x1xf32> to vector<10x10xf32>
    %49 = arith.mulf %44, %48 : vector<10x10xf32>
    %cst_23 = arith.constant dense<0.000000e+00> : vector<10x8xf32>
    %50 = tpu.matmul %49, %36, %cst_23 {dimension_numbers = #tpu.dot_dimension_numbers<[1], [0], [0], [1], [0, 0, 1, 1], [], []>} : vector<10x10xf32>, vector<10x8xf32>, vector<10x8xf32> -> vector<10x8xf32>
    %51 = vector.extract_strided_slice %14 {offsets = [0, 16], sizes = [10, 8], strides = [1, 1]} : vector<10x32xf32> to vector<10x8xf32>
    %52 = vector.extract_strided_slice %15 {offsets = [0, 16], sizes = [10, 8], strides = [1, 1]} : vector<10x32xf32> to vector<10x8xf32>
    %53 = vector.extract_strided_slice %16 {offsets = [0, 16], sizes = [10, 8], strides = [1, 1]} : vector<10x32xf32> to vector<10x8xf32>
    %cst_24 = arith.constant dense<0.000000e+00> : vector<10x10xf32>
    %54 = tpu.matmul %51, %52, %cst_24 {dimension_numbers = #tpu.dot_dimension_numbers<[1], [1], [0], [0], [0, 0, 1, 0], [], []>} : vector<10x8xf32>, vector<10x8xf32>, vector<10x10xf32> -> vector<10x10xf32>
    %cst_25 = arith.constant 0.353553385 : f32
    %55 = vector.broadcast %cst_25 : f32 to vector<10x10xf32>
    %56 = arith.mulf %54, %55 : vector<10x10xf32>
    %cst_26 = arith.constant dense<0xFF800000> : vector<10xf32>
    %57 = vector.multi_reduction <maximumf>, %56, %cst_26 [1] : vector<10x10xf32> to vector<10xf32>
    %58 = vector.shape_cast %57 : vector<10xf32> to vector<10x1xf32>
    %59 = vector.broadcast %58 : vector<10x1xf32> to vector<10x10xf32>
    %60 = arith.subf %56, %59 : vector<10x10xf32>
    %61 = math.exp %60 : vector<10x10xf32>
    %cst_27 = arith.constant dense<0.000000e+00> : vector<10xf32>
    %62 = vector.multi_reduction <add>, %61, %cst_27 [1] : vector<10x10xf32> to vector<10xf32>
    %63 = vector.shape_cast %62 : vector<10xf32> to vector<10x1xf32>
    %64 = tpu.reciprocal %63 {approx = true} : vector<10x1xf32> -> vector<10x1xf32>
    %65 = vector.broadcast %64 : vector<10x1xf32> to vector<10x10xf32>
    %66 = arith.mulf %61, %65 : vector<10x10xf32>
    %cst_28 = arith.constant dense<0.000000e+00> : vector<10x8xf32>
    %67 = tpu.matmul %66, %53, %cst_28 {dimension_numbers = #tpu.dot_dimension_numbers<[1], [0], [0], [1], [0, 0, 1, 1], [], []>} : vector<10x10xf32>, vector<10x8xf32>, vector<10x8xf32> -> vector<10x8xf32>
    %68 = vector.extract_strided_slice %14 {offsets = [0, 24], sizes = [10, 8], strides = [1, 1]} : vector<10x32xf32> to vector<10x8xf32>
    %69 = vector.extract_strided_slice %15 {offsets = [0, 24], sizes = [10, 8], strides = [1, 1]} : vector<10x32xf32> to vector<10x8xf32>
    %70 = vector.extract_strided_slice %16 {offsets = [0, 24], sizes = [10, 8], strides = [1, 1]} : vector<10x32xf32> to vector<10x8xf32>
    %cst_29 = arith.constant dense<0.000000e+00> : vector<10x10xf32>
    %71 = tpu.matmul %68, %69, %cst_29 {dimension_numbers = #tpu.dot_dimension_numbers<[1], [1], [0], [0], [0, 0, 1, 0], [], []>} : vector<10x8xf32>, vector<10x8xf32>, vector<10x10xf32> -> vector<10x10xf32>
    %cst_30 = arith.constant 0.353553385 : f32
    %72 = vector.broadcast %cst_30 : f32 to vector<10x10xf32>
    %73 = arith.mulf %71, %72 : vector<10x10xf32>
    %cst_31 = arith.constant dense<0xFF800000> : vector<10xf32>
    %74 = vector.multi_reduction <maximumf>, %73, %cst_31 [1] : vector<10x10xf32> to vector<10xf32>
    %75 = vector.shape_cast %74 : vector<10xf32> to vector<10x1xf32>
    %76 = vector.broadcast %75 : vector<10x1xf32> to vector<10x10xf32>
    %77 = arith.subf %73, %76 : vector<10x10xf32>
    %78 = math.exp %77 : vector<10x10xf32>
    %cst_32 = arith.constant dense<0.000000e+00> : vector<10xf32>
    %79 = vector.multi_reduction <add>, %78, %cst_32 [1] : vector<10x10xf32> to vector<10xf32>
    %80 = vector.shape_cast %79 : vector<10xf32> to vector<10x1xf32>
    %81 = tpu.reciprocal %80 {approx = true} : vector<10x1xf32> -> vector<10x1xf32>
    %82 = vector.broadcast %81 : vector<10x1xf32> to vector<10x10xf32>
    %83 = arith.mulf %78, %82 : vector<10x10xf32>
    %cst_33 = arith.constant dense<0.000000e+00> : vector<10x8xf32>
    %84 = tpu.matmul %83, %70, %cst_33 {dimension_numbers = #tpu.dot_dimension_numbers<[1], [0], [0], [1], [0, 0, 1, 1], [], []>} : vector<10x10xf32>, vector<10x8xf32>, vector<10x8xf32> -> vector<10x8xf32>
    %85 = tpu.concatenate %33, %50, %67, %84 in 1 : vector<10x8xf32>, vector<10x8xf32>, vector<10x8xf32>, vector<10x8xf32> -> vector<10x32xf32>
    %86 = arith.truncf %85 : vector<10x32xf32> to vector<10x32xbf16>
    %cst_34 = arith.constant dense<0.000000e+00> : vector<10x32xf32>
    %87 = tpu.matmul %86, %7, %cst_34 {dimension_numbers = #tpu.dot_dimension_numbers<[1], [0], [0], [1], [0, 0, 1, 1], [], []>} : vector<10x32xbf16>, vector<32x32xbf16>, vector<10x32xf32> -> vector<10x32xf32>
    %88 = vector.broadcast %9 : vector<1x32xf32> to vector<10x32xf32>
    %89 = arith.addf %87, %88 : vector<10x32xf32>
    %90 = arith.addf %1, %89 : vector<10x32xf32>
    %c0_35 = arith.constant 0 : index
    %c0_36 = arith.constant 0 : index
    %c0_37 = arith.constant 0 : index
    %91 = vector.load %arg7[%c0_35, %c0_36, %c0_37] : memref<2x1x32xf32, #tpu.memory_space<vmem>>, vector<1x1x32xf32>
    %92 = vector.shape_cast %91 : vector<1x1x32xf32> to vector<1x32xf32>
    %c0_38 = arith.constant 0 : index
    %c0_39 = arith.constant 0 : index
    %c0_40 = arith.constant 0 : index
    %93 = vector.load %arg8[%c0_38, %c0_39, %c0_40] : memref<2x1x32xf32, #tpu.memory_space<vmem>>, vector<1x1x32xf32>
    %94 = vector.shape_cast %93 : vector<1x1x32xf32> to vector<1x32xf32>
    %cst_41 = arith.constant dense<0.000000e+00> : vector<10xf32>
    %95 = vector.multi_reduction <add>, %90, %cst_41 [1] : vector<10x32xf32> to vector<10xf32>
    %96 = vector.shape_cast %95 : vector<10xf32> to vector<10x1xf32>
    %cst_42 = arith.constant 3.200000e+01 : f32
    %97 = vector.broadcast %cst_42 : f32 to vector<10x1xf32>
    %98 = arith.divf %96, %97 : vector<10x1xf32>
    %99 = vector.broadcast %98 : vector<10x1xf32> to vector<10x32xf32>
    %100 = arith.subf %90, %99 : vector<10x32xf32>
    %101 = arith.mulf %100, %100 : vector<10x32xf32>
    %cst_43 = arith.constant dense<0.000000e+00> : vector<10xf32>
    %102 = vector.multi_reduction <add>, %101, %cst_43 [1] : vector<10x32xf32> to vector<10xf32>
    %103 = vector.shape_cast %102 : vector<10xf32> to vector<10x1xf32>
    %cst_44 = arith.constant 3.200000e+01 : f32
    %104 = vector.broadcast %cst_44 : f32 to vector<10x1xf32>
    %105 = arith.divf %103, %104 : vector<10x1xf32>
    %cst_45 = arith.constant 9.99999974E-6 : f32
    %106 = vector.broadcast %cst_45 : f32 to vector<10x1xf32>
    %107 = arith.addf %105, %106 : vector<10x1xf32>
    %108 = math.rsqrt %107 : vector<10x1xf32>
    %109 = vector.broadcast %108 : vector<10x1xf32> to vector<10x32xf32>
    %110 = arith.mulf %100, %109 : vector<10x32xf32>
    %111 = vector.broadcast %92 : vector<1x32xf32> to vector<10x32xf32>
    %112 = arith.mulf %110, %111 : vector<10x32xf32>
    %113 = vector.broadcast %94 : vector<1x32xf32> to vector<10x32xf32>
    %114 = arith.addf %112, %113 : vector<10x32xf32>
    %c0_46 = arith.constant 0 : index
    %c0_47 = arith.constant 0 : index
    %c0_48 = arith.constant 0 : index
    %115 = vector.load %arg9[%c0_46, %c0_47, %c0_48] : memref<2x32x2048xbf16, #tpu.memory_space<vmem>>, vector<1x32x2048xbf16>
    %116 = vector.shape_cast %115 : vector<1x32x2048xbf16> to vector<32x2048xbf16>
    %c0_49 = arith.constant 0 : index
    %c0_50 = arith.constant 0 : index
    %c0_51 = arith.constant 0 : index
    %117 = vector.load %arg10[%c0_49, %c0_50, %c0_51] : memref<2x1x2048xf32, #tpu.memory_space<vmem>>, vector<1x1x2048xf32>
    %118 = vector.shape_cast %117 : vector<1x1x2048xf32> to vector<1x2048xf32>
    %c0_52 = arith.constant 0 : index
    %c0_53 = arith.constant 0 : index
    %c0_54 = arith.constant 0 : index
    %119 = vector.load %arg11[%c0_52, %c0_53, %c0_54] : memref<2x2048x32xbf16, #tpu.memory_space<vmem>>, vector<1x2048x32xbf16>
    %120 = vector.shape_cast %119 : vector<1x2048x32xbf16> to vector<2048x32xbf16>
    %c0_55 = arith.constant 0 : index
    %c0_56 = arith.constant 0 : index
    %c0_57 = arith.constant 0 : index
    %121 = vector.load %arg12[%c0_55, %c0_56, %c0_57] : memref<2x1x32xf32, #tpu.memory_space<vmem>>, vector<1x1x32xf32>
    %122 = vector.shape_cast %121 : vector<1x1x32xf32> to vector<1x32xf32>
    %123 = arith.truncf %114 : vector<10x32xf32> to vector<10x32xbf16>
    %cst_58 = arith.constant dense<0.000000e+00> : vector<10x2048xf32>
    %124 = tpu.matmul %123, %116, %cst_58 {dimension_numbers = #tpu.dot_dimension_numbers<[1], [0], [0], [1], [0, 0, 1, 1], [], []>} : vector<10x32xbf16>, vector<32x2048xbf16>, vector<10x2048xf32> -> vector<10x2048xf32>
    %125 = vector.broadcast %118 : vector<1x2048xf32> to vector<10x2048xf32>
    %126 = arith.addf %124, %125 : vector<10x2048xf32>
    %cst_59 = arith.constant 0.000000e+00 : f32
    %127 = vector.broadcast %cst_59 : f32 to vector<10x2048xf32>
    %128 = arith.maximumf %126, %127 : vector<10x2048xf32>
    %129 = arith.truncf %128 : vector<10x2048xf32> to vector<10x2048xbf16>
    %cst_60 = arith.constant dense<0.000000e+00> : vector<10x32xf32>
    %130 = tpu.matmul %129, %120, %cst_60 {dimension_numbers = #tpu.dot_dimension_numbers<[1], [0], [0], [1], [0, 0, 1, 1], [], []>} : vector<10x2048xbf16>, vector<2048x32xbf16>, vector<10x32xf32> -> vector<10x32xf32>
    %131 = vector.broadcast %122 : vector<1x32xf32> to vector<10x32xf32>
    %132 = arith.addf %130, %131 : vector<10x32xf32>
    %133 = arith.addf %114, %132 : vector<10x32xf32>
    %c0_61 = arith.constant 0 : index
    %c0_62 = arith.constant 0 : index
    %c0_63 = arith.constant 0 : index
    %134 = vector.load %arg13[%c0_61, %c0_62, %c0_63] : memref<2x1x32xf32, #tpu.memory_space<vmem>>, vector<1x1x32xf32>
    %135 = vector.shape_cast %134 : vector<1x1x32xf32> to vector<1x32xf32>
    %c0_64 = arith.constant 0 : index
    %c0_65 = arith.constant 0 : index
    %c0_66 = arith.constant 0 : index
    %136 = vector.load %arg14[%c0_64, %c0_65, %c0_66] : memref<2x1x32xf32, #tpu.memory_space<vmem>>, vector<1x1x32xf32>
    %137 = vector.shape_cast %136 : vector<1x1x32xf32> to vector<1x32xf32>
    %cst_67 = arith.constant dense<0.000000e+00> : vector<10xf32>
    %138 = vector.multi_reduction <add>, %133, %cst_67 [1] : vector<10x32xf32> to vector<10xf32>
    %139 = vector.shape_cast %138 : vector<10xf32> to vector<10x1xf32>
    %cst_68 = arith.constant 3.200000e+01 : f32
    %140 = vector.broadcast %cst_68 : f32 to vector<10x1xf32>
    %141 = arith.divf %139, %140 : vector<10x1xf32>
    %142 = vector.broadcast %141 : vector<10x1xf32> to vector<10x32xf32>
    %143 = arith.subf %133, %142 : vector<10x32xf32>
    %144 = arith.mulf %143, %143 : vector<10x32xf32>
    %cst_69 = arith.constant dense<0.000000e+00> : vector<10xf32>
    %145 = vector.multi_reduction <add>, %144, %cst_69 [1] : vector<10x32xf32> to vector<10xf32>
    %146 = vector.shape_cast %145 : vector<10xf32> to vector<10x1xf32>
    %cst_70 = arith.constant 3.200000e+01 : f32
    %147 = vector.broadcast %cst_70 : f32 to vector<10x1xf32>
    %148 = arith.divf %146, %147 : vector<10x1xf32>
    %cst_71 = arith.constant 9.99999974E-6 : f32
    %149 = vector.broadcast %cst_71 : f32 to vector<10x1xf32>
    %150 = arith.addf %148, %149 : vector<10x1xf32>
    %151 = math.rsqrt %150 : vector<10x1xf32>
    %152 = vector.broadcast %151 : vector<10x1xf32> to vector<10x32xf32>
    %153 = arith.mulf %143, %152 : vector<10x32xf32>
    %154 = vector.broadcast %135 : vector<1x32xf32> to vector<10x32xf32>
    %155 = arith.mulf %153, %154 : vector<10x32xf32>
    %156 = vector.broadcast %137 : vector<1x32xf32> to vector<10x32xf32>
    %157 = arith.addf %155, %156 : vector<10x32xf32>
    %c1 = arith.constant 1 : index
    %c0_72 = arith.constant 0 : index
    %c0_73 = arith.constant 0 : index
    %158 = vector.load %arg3[%c1, %c0_72, %c0_73] : memref<2x32x96xbf16, #tpu.memory_space<vmem>>, vector<1x32x96xbf16>
    %159 = vector.shape_cast %158 : vector<1x32x96xbf16> to vector<32x96xbf16>
    %c1_74 = arith.constant 1 : index
    %c0_75 = arith.constant 0 : index
    %c0_76 = arith.constant 0 : index
    %160 = vector.load %arg4[%c1_74, %c0_75, %c0_76] : memref<2x1x96xf32, #tpu.memory_space<vmem>>, vector<1x1x96xf32>
    %161 = vector.shape_cast %160 : vector<1x1x96xf32> to vector<1x96xf32>
    %c1_77 = arith.constant 1 : index
    %c0_78 = arith.constant 0 : index
    %c0_79 = arith.constant 0 : index
    %162 = vector.load %arg5[%c1_77, %c0_78, %c0_79] : memref<2x32x32xbf16, #tpu.memory_space<vmem>>, vector<1x32x32xbf16>
    %163 = vector.shape_cast %162 : vector<1x32x32xbf16> to vector<32x32xbf16>
    %c1_80 = arith.constant 1 : index
    %c0_81 = arith.constant 0 : index
    %c0_82 = arith.constant 0 : index
    %164 = vector.load %arg6[%c1_80, %c0_81, %c0_82] : memref<2x1x32xf32, #tpu.memory_space<vmem>>, vector<1x1x32xf32>
    %165 = vector.shape_cast %164 : vector<1x1x32xf32> to vector<1x32xf32>
    %166 = arith.truncf %157 : vector<10x32xf32> to vector<10x32xbf16>
    %cst_83 = arith.constant dense<0.000000e+00> : vector<10x96xf32>
    %167 = tpu.matmul %166, %159, %cst_83 {dimension_numbers = #tpu.dot_dimension_numbers<[1], [0], [0], [1], [0, 0, 1, 1], [], []>} : vector<10x32xbf16>, vector<32x96xbf16>, vector<10x96xf32> -> vector<10x96xf32>
    %168 = vector.broadcast %161 : vector<1x96xf32> to vector<10x96xf32>
    %169 = arith.addf %167, %168 : vector<10x96xf32>
    %170 = vector.extract_strided_slice %169 {offsets = [0, 0], sizes = [10, 32], strides = [1, 1]} : vector<10x96xf32> to vector<10x32xf32>
    %171 = vector.extract_strided_slice %169 {offsets = [0, 32], sizes = [10, 32], strides = [1, 1]} : vector<10x96xf32> to vector<10x32xf32>
    %172 = vector.extract_strided_slice %169 {offsets = [0, 64], sizes = [10, 32], strides = [1, 1]} : vector<10x96xf32> to vector<10x32xf32>
    %173 = vector.extract_strided_slice %170 {offsets = [0, 0], sizes = [10, 8], strides = [1, 1]} : vector<10x32xf32> to vector<10x8xf32>
    %174 = vector.extract_strided_slice %171 {offsets = [0, 0], sizes = [10, 8], strides = [1, 1]} : vector<10x32xf32> to vector<10x8xf32>
    %175 = vector.extract_strided_slice %172 {offsets = [0, 0], sizes = [10, 8], strides = [1, 1]} : vector<10x32xf32> to vector<10x8xf32>
    %cst_84 = arith.constant dense<0.000000e+00> : vector<10x10xf32>
    %176 = tpu.matmul %173, %174, %cst_84 {dimension_numbers = #tpu.dot_dimension_numbers<[1], [1], [0], [0], [0, 0, 1, 0], [], []>} : vector<10x8xf32>, vector<10x8xf32>, vector<10x10xf32> -> vector<10x10xf32>
    %cst_85 = arith.constant 0.353553385 : f32
    %177 = vector.broadcast %cst_85 : f32 to vector<10x10xf32>
    %178 = arith.mulf %176, %177 : vector<10x10xf32>
    %cst_86 = arith.constant dense<0xFF800000> : vector<10xf32>
    %179 = vector.multi_reduction <maximumf>, %178, %cst_86 [1] : vector<10x10xf32> to vector<10xf32>
    %180 = vector.shape_cast %179 : vector<10xf32> to vector<10x1xf32>
    %181 = vector.broadcast %180 : vector<10x1xf32> to vector<10x10xf32>
    %182 = arith.subf %178, %181 : vector<10x10xf32>
    %183 = math.exp %182 : vector<10x10xf32>
    %cst_87 = arith.constant dense<0.000000e+00> : vector<10xf32>
    %184 = vector.multi_reduction <add>, %183, %cst_87 [1] : vector<10x10xf32> to vector<10xf32>
    %185 = vector.shape_cast %184 : vector<10xf32> to vector<10x1xf32>
    %186 = tpu.reciprocal %185 {approx = true} : vector<10x1xf32> -> vector<10x1xf32>
    %187 = vector.broadcast %186 : vector<10x1xf32> to vector<10x10xf32>
    %188 = arith.mulf %183, %187 : vector<10x10xf32>
    %cst_88 = arith.constant dense<0.000000e+00> : vector<10x8xf32>
    %189 = tpu.matmul %188, %175, %cst_88 {dimension_numbers = #tpu.dot_dimension_numbers<[1], [0], [0], [1], [0, 0, 1, 1], [], []>} : vector<10x10xf32>, vector<10x8xf32>, vector<10x8xf32> -> vector<10x8xf32>
    %190 = vector.extract_strided_slice %170 {offsets = [0, 8], sizes = [10, 8], strides = [1, 1]} : vector<10x32xf32> to vector<10x8xf32>
    %191 = vector.extract_strided_slice %171 {offsets = [0, 8], sizes = [10, 8], strides = [1, 1]} : vector<10x32xf32> to vector<10x8xf32>
    %192 = vector.extract_strided_slice %172 {offsets = [0, 8], sizes = [10, 8], strides = [1, 1]} : vector<10x32xf32> to vector<10x8xf32>
    %cst_89 = arith.constant dense<0.000000e+00> : vector<10x10xf32>
    %193 = tpu.matmul %190, %191, %cst_89 {dimension_numbers = #tpu.dot_dimension_numbers<[1], [1], [0], [0], [0, 0, 1, 0], [], []>} : vector<10x8xf32>, vector<10x8xf32>, vector<10x10xf32> -> vector<10x10xf32>
    %cst_90 = arith.constant 0.353553385 : f32
    %194 = vector.broadcast %cst_90 : f32 to vector<10x10xf32>
    %195 = arith.mulf %193, %194 : vector<10x10xf32>
    %cst_91 = arith.constant dense<0xFF800000> : vector<10xf32>
    %196 = vector.multi_reduction <maximumf>, %195, %cst_91 [1] : vector<10x10xf32> to vector<10xf32>
    %197 = vector.shape_cast %196 : vector<10xf32> to vector<10x1xf32>
    %198 = vector.broadcast %197 : vector<10x1xf32> to vector<10x10xf32>
    %199 = arith.subf %195, %198 : vector<10x10xf32>
    %200 = math.exp %199 : vector<10x10xf32>
    %cst_92 = arith.constant dense<0.000000e+00> : vector<10xf32>
    %201 = vector.multi_reduction <add>, %200, %cst_92 [1] : vector<10x10xf32> to vector<10xf32>
    %202 = vector.shape_cast %201 : vector<10xf32> to vector<10x1xf32>
    %203 = tpu.reciprocal %202 {approx = true} : vector<10x1xf32> -> vector<10x1xf32>
    %204 = vector.broadcast %203 : vector<10x1xf32> to vector<10x10xf32>
    %205 = arith.mulf %200, %204 : vector<10x10xf32>
    %cst_93 = arith.constant dense<0.000000e+00> : vector<10x8xf32>
    %206 = tpu.matmul %205, %192, %cst_93 {dimension_numbers = #tpu.dot_dimension_numbers<[1], [0], [0], [1], [0, 0, 1, 1], [], []>} : vector<10x10xf32>, vector<10x8xf32>, vector<10x8xf32> -> vector<10x8xf32>
    %207 = vector.extract_strided_slice %170 {offsets = [0, 16], sizes = [10, 8], strides = [1, 1]} : vector<10x32xf32> to vector<10x8xf32>
    %208 = vector.extract_strided_slice %171 {offsets = [0, 16], sizes = [10, 8], strides = [1, 1]} : vector<10x32xf32> to vector<10x8xf32>
    %209 = vector.extract_strided_slice %172 {offsets = [0, 16], sizes = [10, 8], strides = [1, 1]} : vector<10x32xf32> to vector<10x8xf32>
    %cst_94 = arith.constant dense<0.000000e+00> : vector<10x10xf32>
    %210 = tpu.matmul %207, %208, %cst_94 {dimension_numbers = #tpu.dot_dimension_numbers<[1], [1], [0], [0], [0, 0, 1, 0], [], []>} : vector<10x8xf32>, vector<10x8xf32>, vector<10x10xf32> -> vector<10x10xf32>
    %cst_95 = arith.constant 0.353553385 : f32
    %211 = vector.broadcast %cst_95 : f32 to vector<10x10xf32>
    %212 = arith.mulf %210, %211 : vector<10x10xf32>
    %cst_96 = arith.constant dense<0xFF800000> : vector<10xf32>
    %213 = vector.multi_reduction <maximumf>, %212, %cst_96 [1] : vector<10x10xf32> to vector<10xf32>
    %214 = vector.shape_cast %213 : vector<10xf32> to vector<10x1xf32>
    %215 = vector.broadcast %214 : vector<10x1xf32> to vector<10x10xf32>
    %216 = arith.subf %212, %215 : vector<10x10xf32>
    %217 = math.exp %216 : vector<10x10xf32>
    %cst_97 = arith.constant dense<0.000000e+00> : vector<10xf32>
    %218 = vector.multi_reduction <add>, %217, %cst_97 [1] : vector<10x10xf32> to vector<10xf32>
    %219 = vector.shape_cast %218 : vector<10xf32> to vector<10x1xf32>
    %220 = tpu.reciprocal %219 {approx = true} : vector<10x1xf32> -> vector<10x1xf32>
    %221 = vector.broadcast %220 : vector<10x1xf32> to vector<10x10xf32>
    %222 = arith.mulf %217, %221 : vector<10x10xf32>
    %cst_98 = arith.constant dense<0.000000e+00> : vector<10x8xf32>
    %223 = tpu.matmul %222, %209, %cst_98 {dimension_numbers = #tpu.dot_dimension_numbers<[1], [0], [0], [1], [0, 0, 1, 1], [], []>} : vector<10x10xf32>, vector<10x8xf32>, vector<10x8xf32> -> vector<10x8xf32>
    %224 = vector.extract_strided_slice %170 {offsets = [0, 24], sizes = [10, 8], strides = [1, 1]} : vector<10x32xf32> to vector<10x8xf32>
    %225 = vector.extract_strided_slice %171 {offsets = [0, 24], sizes = [10, 8], strides = [1, 1]} : vector<10x32xf32> to vector<10x8xf32>
    %226 = vector.extract_strided_slice %172 {offsets = [0, 24], sizes = [10, 8], strides = [1, 1]} : vector<10x32xf32> to vector<10x8xf32>
    %cst_99 = arith.constant dense<0.000000e+00> : vector<10x10xf32>
    %227 = tpu.matmul %224, %225, %cst_99 {dimension_numbers = #tpu.dot_dimension_numbers<[1], [1], [0], [0], [0, 0, 1, 0], [], []>} : vector<10x8xf32>, vector<10x8xf32>, vector<10x10xf32> -> vector<10x10xf32>
    %cst_100 = arith.constant 0.353553385 : f32
    %228 = vector.broadcast %cst_100 : f32 to vector<10x10xf32>
    %229 = arith.mulf %227, %228 : vector<10x10xf32>
    %cst_101 = arith.constant dense<0xFF800000> : vector<10xf32>
    %230 = vector.multi_reduction <maximumf>, %229, %cst_101 [1] : vector<10x10xf32> to vector<10xf32>
    %231 = vector.shape_cast %230 : vector<10xf32> to vector<10x1xf32>
    %232 = vector.broadcast %231 : vector<10x1xf32> to vector<10x10xf32>
    %233 = arith.subf %229, %232 : vector<10x10xf32>
    %234 = math.exp %233 : vector<10x10xf32>
    %cst_102 = arith.constant dense<0.000000e+00> : vector<10xf32>
    %235 = vector.multi_reduction <add>, %234, %cst_102 [1] : vector<10x10xf32> to vector<10xf32>
    %236 = vector.shape_cast %235 : vector<10xf32> to vector<10x1xf32>
    %237 = tpu.reciprocal %236 {approx = true} : vector<10x1xf32> -> vector<10x1xf32>
    %238 = vector.broadcast %237 : vector<10x1xf32> to vector<10x10xf32>
    %239 = arith.mulf %234, %238 : vector<10x10xf32>
    %cst_103 = arith.constant dense<0.000000e+00> : vector<10x8xf32>
    %240 = tpu.matmul %239, %226, %cst_103 {dimension_numbers = #tpu.dot_dimension_numbers<[1], [0], [0], [1], [0, 0, 1, 1], [], []>} : vector<10x10xf32>, vector<10x8xf32>, vector<10x8xf32> -> vector<10x8xf32>
    %241 = tpu.concatenate %189, %206, %223, %240 in 1 : vector<10x8xf32>, vector<10x8xf32>, vector<10x8xf32>, vector<10x8xf32> -> vector<10x32xf32>
    %242 = arith.truncf %241 : vector<10x32xf32> to vector<10x32xbf16>
    %cst_104 = arith.constant dense<0.000000e+00> : vector<10x32xf32>
    %243 = tpu.matmul %242, %163, %cst_104 {dimension_numbers = #tpu.dot_dimension_numbers<[1], [0], [0], [1], [0, 0, 1, 1], [], []>} : vector<10x32xbf16>, vector<32x32xbf16>, vector<10x32xf32> -> vector<10x32xf32>
    %244 = vector.broadcast %165 : vector<1x32xf32> to vector<10x32xf32>
    %245 = arith.addf %243, %244 : vector<10x32xf32>
    %246 = arith.addf %157, %245 : vector<10x32xf32>
    %c1_105 = arith.constant 1 : index
    %c0_106 = arith.constant 0 : index
    %c0_107 = arith.constant 0 : index
    %247 = vector.load %arg7[%c1_105, %c0_106, %c0_107] : memref<2x1x32xf32, #tpu.memory_space<vmem>>, vector<1x1x32xf32>
    %248 = vector.shape_cast %247 : vector<1x1x32xf32> to vector<1x32xf32>
    %c1_108 = arith.constant 1 : index
    %c0_109 = arith.constant 0 : index
    %c0_110 = arith.constant 0 : index
    %249 = vector.load %arg8[%c1_108, %c0_109, %c0_110] : memref<2x1x32xf32, #tpu.memory_space<vmem>>, vector<1x1x32xf32>
    %250 = vector.shape_cast %249 : vector<1x1x32xf32> to vector<1x32xf32>
    %cst_111 = arith.constant dense<0.000000e+00> : vector<10xf32>
    %251 = vector.multi_reduction <add>, %246, %cst_111 [1] : vector<10x32xf32> to vector<10xf32>
    %252 = vector.shape_cast %251 : vector<10xf32> to vector<10x1xf32>
    %cst_112 = arith.constant 3.200000e+01 : f32
    %253 = vector.broadcast %cst_112 : f32 to vector<10x1xf32>
    %254 = arith.divf %252, %253 : vector<10x1xf32>
    %255 = vector.broadcast %254 : vector<10x1xf32> to vector<10x32xf32>
    %256 = arith.subf %246, %255 : vector<10x32xf32>
    %257 = arith.mulf %256, %256 : vector<10x32xf32>
    %cst_113 = arith.constant dense<0.000000e+00> : vector<10xf32>
    %258 = vector.multi_reduction <add>, %257, %cst_113 [1] : vector<10x32xf32> to vector<10xf32>
    %259 = vector.shape_cast %258 : vector<10xf32> to vector<10x1xf32>
    %cst_114 = arith.constant 3.200000e+01 : f32
    %260 = vector.broadcast %cst_114 : f32 to vector<10x1xf32>
    %261 = arith.divf %259, %260 : vector<10x1xf32>
    %cst_115 = arith.constant 9.99999974E-6 : f32
    %262 = vector.broadcast %cst_115 : f32 to vector<10x1xf32>
    %263 = arith.addf %261, %262 : vector<10x1xf32>
    %264 = math.rsqrt %263 : vector<10x1xf32>
    %265 = vector.broadcast %264 : vector<10x1xf32> to vector<10x32xf32>
    %266 = arith.mulf %256, %265 : vector<10x32xf32>
    %267 = vector.broadcast %248 : vector<1x32xf32> to vector<10x32xf32>
    %268 = arith.mulf %266, %267 : vector<10x32xf32>
    %269 = vector.broadcast %250 : vector<1x32xf32> to vector<10x32xf32>
    %270 = arith.addf %268, %269 : vector<10x32xf32>
    %c1_116 = arith.constant 1 : index
    %c0_117 = arith.constant 0 : index
    %c0_118 = arith.constant 0 : index
    %271 = vector.load %arg9[%c1_116, %c0_117, %c0_118] : memref<2x32x2048xbf16, #tpu.memory_space<vmem>>, vector<1x32x2048xbf16>
    %272 = vector.shape_cast %271 : vector<1x32x2048xbf16> to vector<32x2048xbf16>
    %c1_119 = arith.constant 1 : index
    %c0_120 = arith.constant 0 : index
    %c0_121 = arith.constant 0 : index
    %273 = vector.load %arg10[%c1_119, %c0_120, %c0_121] : memref<2x1x2048xf32, #tpu.memory_space<vmem>>, vector<1x1x2048xf32>
    %274 = vector.shape_cast %273 : vector<1x1x2048xf32> to vector<1x2048xf32>
    %c1_122 = arith.constant 1 : index
    %c0_123 = arith.constant 0 : index
    %c0_124 = arith.constant 0 : index
    %275 = vector.load %arg11[%c1_122, %c0_123, %c0_124] : memref<2x2048x32xbf16, #tpu.memory_space<vmem>>, vector<1x2048x32xbf16>
    %276 = vector.shape_cast %275 : vector<1x2048x32xbf16> to vector<2048x32xbf16>
    %c1_125 = arith.constant 1 : index
    %c0_126 = arith.constant 0 : index
    %c0_127 = arith.constant 0 : index
    %277 = vector.load %arg12[%c1_125, %c0_126, %c0_127] : memref<2x1x32xf32, #tpu.memory_space<vmem>>, vector<1x1x32xf32>
    %278 = vector.shape_cast %277 : vector<1x1x32xf32> to vector<1x32xf32>
    %279 = arith.truncf %270 : vector<10x32xf32> to vector<10x32xbf16>
    %cst_128 = arith.constant dense<0.000000e+00> : vector<10x2048xf32>
    %280 = tpu.matmul %279, %272, %cst_128 {dimension_numbers = #tpu.dot_dimension_numbers<[1], [0], [0], [1], [0, 0, 1, 1], [], []>} : vector<10x32xbf16>, vector<32x2048xbf16>, vector<10x2048xf32> -> vector<10x2048xf32>
    %281 = vector.broadcast %274 : vector<1x2048xf32> to vector<10x2048xf32>
    %282 = arith.addf %280, %281 : vector<10x2048xf32>
    %cst_129 = arith.constant 0.000000e+00 : f32
    %283 = vector.broadcast %cst_129 : f32 to vector<10x2048xf32>
    %284 = arith.maximumf %282, %283 : vector<10x2048xf32>
    %285 = arith.truncf %284 : vector<10x2048xf32> to vector<10x2048xbf16>
    %cst_130 = arith.constant dense<0.000000e+00> : vector<10x32xf32>
    %286 = tpu.matmul %285, %276, %cst_130 {dimension_numbers = #tpu.dot_dimension_numbers<[1], [0], [0], [1], [0, 0, 1, 1], [], []>} : vector<10x2048xbf16>, vector<2048x32xbf16>, vector<10x32xf32> -> vector<10x32xf32>
    %287 = vector.broadcast %278 : vector<1x32xf32> to vector<10x32xf32>
    %288 = arith.addf %286, %287 : vector<10x32xf32>
    %289 = arith.addf %270, %288 : vector<10x32xf32>
    %c1_131 = arith.constant 1 : index
    %c0_132 = arith.constant 0 : index
    %c0_133 = arith.constant 0 : index
    %290 = vector.load %arg13[%c1_131, %c0_132, %c0_133] : memref<2x1x32xf32, #tpu.memory_space<vmem>>, vector<1x1x32xf32>
    %291 = vector.shape_cast %290 : vector<1x1x32xf32> to vector<1x32xf32>
    %c1_134 = arith.constant 1 : index
    %c0_135 = arith.constant 0 : index
    %c0_136 = arith.constant 0 : index
    %292 = vector.load %arg14[%c1_134, %c0_135, %c0_136] : memref<2x1x32xf32, #tpu.memory_space<vmem>>, vector<1x1x32xf32>
    %293 = vector.shape_cast %292 : vector<1x1x32xf32> to vector<1x32xf32>
    %cst_137 = arith.constant dense<0.000000e+00> : vector<10xf32>
    %294 = vector.multi_reduction <add>, %289, %cst_137 [1] : vector<10x32xf32> to vector<10xf32>
    %295 = vector.shape_cast %294 : vector<10xf32> to vector<10x1xf32>
    %cst_138 = arith.constant 3.200000e+01 : f32
    %296 = vector.broadcast %cst_138 : f32 to vector<10x1xf32>
    %297 = arith.divf %295, %296 : vector<10x1xf32>
    %298 = vector.broadcast %297 : vector<10x1xf32> to vector<10x32xf32>
    %299 = arith.subf %289, %298 : vector<10x32xf32>
    %300 = arith.mulf %299, %299 : vector<10x32xf32>
    %cst_139 = arith.constant dense<0.000000e+00> : vector<10xf32>
    %301 = vector.multi_reduction <add>, %300, %cst_139 [1] : vector<10x32xf32> to vector<10xf32>
    %302 = vector.shape_cast %301 : vector<10xf32> to vector<10x1xf32>
    %cst_140 = arith.constant 3.200000e+01 : f32
    %303 = vector.broadcast %cst_140 : f32 to vector<10x1xf32>
    %304 = arith.divf %302, %303 : vector<10x1xf32>
    %cst_141 = arith.constant 9.99999974E-6 : f32
    %305 = vector.broadcast %cst_141 : f32 to vector<10x1xf32>
    %306 = arith.addf %304, %305 : vector<10x1xf32>
    %307 = math.rsqrt %306 : vector<10x1xf32>
    %308 = vector.broadcast %307 : vector<10x1xf32> to vector<10x32xf32>
    %309 = arith.mulf %299, %308 : vector<10x32xf32>
    %310 = vector.broadcast %291 : vector<1x32xf32> to vector<10x32xf32>
    %311 = arith.mulf %309, %310 : vector<10x32xf32>
    %312 = vector.broadcast %293 : vector<1x32xf32> to vector<10x32xf32>
    %313 = arith.addf %311, %312 : vector<10x32xf32>
    %c0_142 = arith.constant 0 : index
    %c0_143 = arith.constant 0 : index
    %314 = vector.load %arg15[%c0_142, %c0_143] : memref<1x32xf32, #tpu.memory_space<vmem>>, vector<1x32xf32>
    %c0_144 = arith.constant 0 : index
    %c0_145 = arith.constant 0 : index
    %315 = vector.load %arg16[%c0_144, %c0_145] : memref<1x32xf32, #tpu.memory_space<vmem>>, vector<1x32xf32>
    %cst_146 = arith.constant dense<0.000000e+00> : vector<10xf32>
    %316 = vector.multi_reduction <add>, %313, %cst_146 [1] : vector<10x32xf32> to vector<10xf32>
    %317 = vector.shape_cast %316 : vector<10xf32> to vector<10x1xf32>
    %cst_147 = arith.constant 3.200000e+01 : f32
    %318 = vector.broadcast %cst_147 : f32 to vector<10x1xf32>
    %319 = arith.divf %317, %318 : vector<10x1xf32>
    %320 = vector.broadcast %319 : vector<10x1xf32> to vector<10x32xf32>
    %321 = arith.subf %313, %320 : vector<10x32xf32>
    %322 = arith.mulf %321, %321 : vector<10x32xf32>
    %cst_148 = arith.constant dense<0.000000e+00> : vector<10xf32>
    %323 = vector.multi_reduction <add>, %322, %cst_148 [1] : vector<10x32xf32> to vector<10xf32>
    %324 = vector.shape_cast %323 : vector<10xf32> to vector<10x1xf32>
    %cst_149 = arith.constant 3.200000e+01 : f32
    %325 = vector.broadcast %cst_149 : f32 to vector<10x1xf32>
    %326 = arith.divf %324, %325 : vector<10x1xf32>
    %cst_150 = arith.constant 9.99999974E-6 : f32
    %327 = vector.broadcast %cst_150 : f32 to vector<10x1xf32>
    %328 = arith.addf %326, %327 : vector<10x1xf32>
    %329 = math.rsqrt %328 : vector<10x1xf32>
    %330 = vector.broadcast %329 : vector<10x1xf32> to vector<10x32xf32>
    %331 = arith.mulf %321, %330 : vector<10x32xf32>
    %332 = vector.broadcast %314 : vector<1x32xf32> to vector<10x32xf32>
    %333 = arith.mulf %331, %332 : vector<10x32xf32>
    %334 = vector.broadcast %315 : vector<1x32xf32> to vector<10x32xf32>
    %335 = arith.addf %333, %334 : vector<10x32xf32>
    %c0_151 = arith.constant 0 : index
    %c0_152 = arith.constant 0 : index
    %c0_153 = arith.constant 0 : index
    %336 = vector.load %arg2[%c0_151, %c0_152, %c0_153] : memref<1x8x32xf32, #tpu.memory_space<vmem>>, vector<1x8x32xf32>
    %337 = vector.shape_cast %336 : vector<1x8x32xf32> to vector<8x32xf32>
    %c0_154 = arith.constant 0 : index
    %c0_155 = arith.constant 0 : index
    %c0_156 = arith.constant 0 : index
    %338 = vector.load %arg17[%c0_154, %c0_155, %c0_156] : memref<2x32x96xbf16, #tpu.memory_space<vmem>>, vector<1x32x96xbf16>
    %339 = vector.shape_cast %338 : vector<1x32x96xbf16> to vector<32x96xbf16>
    %c0_157 = arith.constant 0 : index
    %c0_158 = arith.constant 0 : index
    %c0_159 = arith.constant 0 : index
    %340 = vector.load %arg18[%c0_157, %c0_158, %c0_159] : memref<2x1x96xf32, #tpu.memory_space<vmem>>, vector<1x1x96xf32>
    %341 = vector.shape_cast %340 : vector<1x1x96xf32> to vector<1x96xf32>
    %c0_160 = arith.constant 0 : index
    %c0_161 = arith.constant 0 : index
    %c0_162 = arith.constant 0 : index
    %342 = vector.load %arg19[%c0_160, %c0_161, %c0_162] : memref<2x32x32xbf16, #tpu.memory_space<vmem>>, vector<1x32x32xbf16>
    %343 = vector.shape_cast %342 : vector<1x32x32xbf16> to vector<32x32xbf16>
    %c0_163 = arith.constant 0 : index
    %c0_164 = arith.constant 0 : index
    %c0_165 = arith.constant 0 : index
    %344 = vector.load %arg20[%c0_163, %c0_164, %c0_165] : memref<2x1x32xf32, #tpu.memory_space<vmem>>, vector<1x1x32xf32>
    %345 = vector.shape_cast %344 : vector<1x1x32xf32> to vector<1x32xf32>
    %346 = arith.truncf %337 : vector<8x32xf32> to vector<8x32xbf16>
    %cst_166 = arith.constant dense<0.000000e+00> : vector<8x96xf32>
    %347 = tpu.matmul %346, %339, %cst_166 {dimension_numbers = #tpu.dot_dimension_numbers<[1], [0], [0], [1], [0, 0, 1, 1], [], []>} : vector<8x32xbf16>, vector<32x96xbf16>, vector<8x96xf32> -> vector<8x96xf32>
    %348 = vector.broadcast %341 : vector<1x96xf32> to vector<8x96xf32>
    %349 = arith.addf %347, %348 : vector<8x96xf32>
    %350 = vector.extract_strided_slice %349 {offsets = [0, 0], sizes = [8, 32], strides = [1, 1]} : vector<8x96xf32> to vector<8x32xf32>
    %351 = vector.extract_strided_slice %349 {offsets = [0, 32], sizes = [8, 32], strides = [1, 1]} : vector<8x96xf32> to vector<8x32xf32>
    %352 = vector.extract_strided_slice %349 {offsets = [0, 64], sizes = [8, 32], strides = [1, 1]} : vector<8x96xf32> to vector<8x32xf32>
    %353 = vector.extract_strided_slice %350 {offsets = [0, 0], sizes = [8, 8], strides = [1, 1]} : vector<8x32xf32> to vector<8x8xf32>
    %354 = vector.extract_strided_slice %351 {offsets = [0, 0], sizes = [8, 8], strides = [1, 1]} : vector<8x32xf32> to vector<8x8xf32>
    %355 = vector.extract_strided_slice %352 {offsets = [0, 0], sizes = [8, 8], strides = [1, 1]} : vector<8x32xf32> to vector<8x8xf32>
    %cst_167 = arith.constant dense<0.000000e+00> : vector<8x8xf32>
    %356 = tpu.matmul %353, %354, %cst_167 {dimension_numbers = #tpu.dot_dimension_numbers<[1], [1], [0], [0], [0, 0, 1, 0], [], []>} : vector<8x8xf32>, vector<8x8xf32>, vector<8x8xf32> -> vector<8x8xf32>
    %cst_168 = arith.constant 0.353553385 : f32
    %357 = vector.broadcast %cst_168 : f32 to vector<8x8xf32>
    %358 = arith.mulf %356, %357 : vector<8x8xf32>
    %cst_169 = arith.constant dense<0xFF800000> : vector<8xf32>
    %359 = vector.multi_reduction <maximumf>, %358, %cst_169 [1] : vector<8x8xf32> to vector<8xf32>
    %360 = vector.shape_cast %359 : vector<8xf32> to vector<8x1xf32>
    %361 = vector.broadcast %360 : vector<8x1xf32> to vector<8x8xf32>
    %362 = arith.subf %358, %361 : vector<8x8xf32>
    %363 = math.exp %362 : vector<8x8xf32>
    %cst_170 = arith.constant dense<0.000000e+00> : vector<8xf32>
    %364 = vector.multi_reduction <add>, %363, %cst_170 [1] : vector<8x8xf32> to vector<8xf32>
    %365 = vector.shape_cast %364 : vector<8xf32> to vector<8x1xf32>
    %366 = tpu.reciprocal %365 {approx = true} : vector<8x1xf32> -> vector<8x1xf32>
    %367 = vector.broadcast %366 : vector<8x1xf32> to vector<8x8xf32>
    %368 = arith.mulf %363, %367 : vector<8x8xf32>
    %cst_171 = arith.constant dense<0.000000e+00> : vector<8x8xf32>
    %369 = tpu.matmul %368, %355, %cst_171 {dimension_numbers = #tpu.dot_dimension_numbers<[1], [0], [0], [1], [0, 0, 1, 1], [], []>} : vector<8x8xf32>, vector<8x8xf32>, vector<8x8xf32> -> vector<8x8xf32>
    %370 = vector.extract_strided_slice %350 {offsets = [0, 8], sizes = [8, 8], strides = [1, 1]} : vector<8x32xf32> to vector<8x8xf32>
    %371 = vector.extract_strided_slice %351 {offsets = [0, 8], sizes = [8, 8], strides = [1, 1]} : vector<8x32xf32> to vector<8x8xf32>
    %372 = vector.extract_strided_slice %352 {offsets = [0, 8], sizes = [8, 8], strides = [1, 1]} : vector<8x32xf32> to vector<8x8xf32>
    %cst_172 = arith.constant dense<0.000000e+00> : vector<8x8xf32>
    %373 = tpu.matmul %370, %371, %cst_172 {dimension_numbers = #tpu.dot_dimension_numbers<[1], [1], [0], [0], [0, 0, 1, 0], [], []>} : vector<8x8xf32>, vector<8x8xf32>, vector<8x8xf32> -> vector<8x8xf32>
    %cst_173 = arith.constant 0.353553385 : f32
    %374 = vector.broadcast %cst_173 : f32 to vector<8x8xf32>
    %375 = arith.mulf %373, %374 : vector<8x8xf32>
    %cst_174 = arith.constant dense<0xFF800000> : vector<8xf32>
    %376 = vector.multi_reduction <maximumf>, %375, %cst_174 [1] : vector<8x8xf32> to vector<8xf32>
    %377 = vector.shape_cast %376 : vector<8xf32> to vector<8x1xf32>
    %378 = vector.broadcast %377 : vector<8x1xf32> to vector<8x8xf32>
    %379 = arith.subf %375, %378 : vector<8x8xf32>
    %380 = math.exp %379 : vector<8x8xf32>
    %cst_175 = arith.constant dense<0.000000e+00> : vector<8xf32>
    %381 = vector.multi_reduction <add>, %380, %cst_175 [1] : vector<8x8xf32> to vector<8xf32>
    %382 = vector.shape_cast %381 : vector<8xf32> to vector<8x1xf32>
    %383 = tpu.reciprocal %382 {approx = true} : vector<8x1xf32> -> vector<8x1xf32>
    %384 = vector.broadcast %383 : vector<8x1xf32> to vector<8x8xf32>
    %385 = arith.mulf %380, %384 : vector<8x8xf32>
    %cst_176 = arith.constant dense<0.000000e+00> : vector<8x8xf32>
    %386 = tpu.matmul %385, %372, %cst_176 {dimension_numbers = #tpu.dot_dimension_numbers<[1], [0], [0], [1], [0, 0, 1, 1], [], []>} : vector<8x8xf32>, vector<8x8xf32>, vector<8x8xf32> -> vector<8x8xf32>
    %387 = vector.extract_strided_slice %350 {offsets = [0, 16], sizes = [8, 8], strides = [1, 1]} : vector<8x32xf32> to vector<8x8xf32>
    %388 = vector.extract_strided_slice %351 {offsets = [0, 16], sizes = [8, 8], strides = [1, 1]} : vector<8x32xf32> to vector<8x8xf32>
    %389 = vector.extract_strided_slice %352 {offsets = [0, 16], sizes = [8, 8], strides = [1, 1]} : vector<8x32xf32> to vector<8x8xf32>
    %cst_177 = arith.constant dense<0.000000e+00> : vector<8x8xf32>
    %390 = tpu.matmul %387, %388, %cst_177 {dimension_numbers = #tpu.dot_dimension_numbers<[1], [1], [0], [0], [0, 0, 1, 0], [], []>} : vector<8x8xf32>, vector<8x8xf32>, vector<8x8xf32> -> vector<8x8xf32>
    %cst_178 = arith.constant 0.353553385 : f32
    %391 = vector.broadcast %cst_178 : f32 to vector<8x8xf32>
    %392 = arith.mulf %390, %391 : vector<8x8xf32>
    %cst_179 = arith.constant dense<0xFF800000> : vector<8xf32>
    %393 = vector.multi_reduction <maximumf>, %392, %cst_179 [1] : vector<8x8xf32> to vector<8xf32>
    %394 = vector.shape_cast %393 : vector<8xf32> to vector<8x1xf32>
    %395 = vector.broadcast %394 : vector<8x1xf32> to vector<8x8xf32>
    %396 = arith.subf %392, %395 : vector<8x8xf32>
    %397 = math.exp %396 : vector<8x8xf32>
    %cst_180 = arith.constant dense<0.000000e+00> : vector<8xf32>
    %398 = vector.multi_reduction <add>, %397, %cst_180 [1] : vector<8x8xf32> to vector<8xf32>
    %399 = vector.shape_cast %398 : vector<8xf32> to vector<8x1xf32>
    %400 = tpu.reciprocal %399 {approx = true} : vector<8x1xf32> -> vector<8x1xf32>
    %401 = vector.broadcast %400 : vector<8x1xf32> to vector<8x8xf32>
    %402 = arith.mulf %397, %401 : vector<8x8xf32>
    %cst_181 = arith.constant dense<0.000000e+00> : vector<8x8xf32>
    %403 = tpu.matmul %402, %389, %cst_181 {dimension_numbers = #tpu.dot_dimension_numbers<[1], [0], [0], [1], [0, 0, 1, 1], [], []>} : vector<8x8xf32>, vector<8x8xf32>, vector<8x8xf32> -> vector<8x8xf32>
    %404 = vector.extract_strided_slice %350 {offsets = [0, 24], sizes = [8, 8], strides = [1, 1]} : vector<8x32xf32> to vector<8x8xf32>
    %405 = vector.extract_strided_slice %351 {offsets = [0, 24], sizes = [8, 8], strides = [1, 1]} : vector<8x32xf32> to vector<8x8xf32>
    %406 = vector.extract_strided_slice %352 {offsets = [0, 24], sizes = [8, 8], strides = [1, 1]} : vector<8x32xf32> to vector<8x8xf32>
    %cst_182 = arith.constant dense<0.000000e+00> : vector<8x8xf32>
    %407 = tpu.matmul %404, %405, %cst_182 {dimension_numbers = #tpu.dot_dimension_numbers<[1], [1], [0], [0], [0, 0, 1, 0], [], []>} : vector<8x8xf32>, vector<8x8xf32>, vector<8x8xf32> -> vector<8x8xf32>
    %cst_183 = arith.constant 0.353553385 : f32
    %408 = vector.broadcast %cst_183 : f32 to vector<8x8xf32>
    %409 = arith.mulf %407, %408 : vector<8x8xf32>
    %cst_184 = arith.constant dense<0xFF800000> : vector<8xf32>
    %410 = vector.multi_reduction <maximumf>, %409, %cst_184 [1] : vector<8x8xf32> to vector<8xf32>
    %411 = vector.shape_cast %410 : vector<8xf32> to vector<8x1xf32>
    %412 = vector.broadcast %411 : vector<8x1xf32> to vector<8x8xf32>
    %413 = arith.subf %409, %412 : vector<8x8xf32>
    %414 = math.exp %413 : vector<8x8xf32>
    %cst_185 = arith.constant dense<0.000000e+00> : vector<8xf32>
    %415 = vector.multi_reduction <add>, %414, %cst_185 [1] : vector<8x8xf32> to vector<8xf32>
    %416 = vector.shape_cast %415 : vector<8xf32> to vector<8x1xf32>
    %417 = tpu.reciprocal %416 {approx = true} : vector<8x1xf32> -> vector<8x1xf32>
    %418 = vector.broadcast %417 : vector<8x1xf32> to vector<8x8xf32>
    %419 = arith.mulf %414, %418 : vector<8x8xf32>
    %cst_186 = arith.constant dense<0.000000e+00> : vector<8x8xf32>
    %420 = tpu.matmul %419, %406, %cst_186 {dimension_numbers = #tpu.dot_dimension_numbers<[1], [0], [0], [1], [0, 0, 1, 1], [], []>} : vector<8x8xf32>, vector<8x8xf32>, vector<8x8xf32> -> vector<8x8xf32>
    %421 = tpu.concatenate %369, %386, %403, %420 in 1 : vector<8x8xf32>, vector<8x8xf32>, vector<8x8xf32>, vector<8x8xf32> -> vector<8x32xf32>
    %422 = arith.truncf %421 : vector<8x32xf32> to vector<8x32xbf16>
    %cst_187 = arith.constant dense<0.000000e+00> : vector<8x32xf32>
    %423 = tpu.matmul %422, %343, %cst_187 {dimension_numbers = #tpu.dot_dimension_numbers<[1], [0], [0], [1], [0, 0, 1, 1], [], []>} : vector<8x32xbf16>, vector<32x32xbf16>, vector<8x32xf32> -> vector<8x32xf32>
    %424 = vector.broadcast %345 : vector<1x32xf32> to vector<8x32xf32>
    %425 = arith.addf %423, %424 : vector<8x32xf32>
    %426 = arith.addf %337, %425 : vector<8x32xf32>
    %c0_188 = arith.constant 0 : index
    %c0_189 = arith.constant 0 : index
    %c0_190 = arith.constant 0 : index
    %427 = vector.load %arg25[%c0_188, %c0_189, %c0_190] : memref<2x1x32xf32, #tpu.memory_space<vmem>>, vector<1x1x32xf32>
    %428 = vector.shape_cast %427 : vector<1x1x32xf32> to vector<1x32xf32>
    %c0_191 = arith.constant 0 : index
    %c0_192 = arith.constant 0 : index
    %c0_193 = arith.constant 0 : index
    %429 = vector.load %arg26[%c0_191, %c0_192, %c0_193] : memref<2x1x32xf32, #tpu.memory_space<vmem>>, vector<1x1x32xf32>
    %430 = vector.shape_cast %429 : vector<1x1x32xf32> to vector<1x32xf32>
    %cst_194 = arith.constant dense<0.000000e+00> : vector<8xf32>
    %431 = vector.multi_reduction <add>, %426, %cst_194 [1] : vector<8x32xf32> to vector<8xf32>
    %432 = vector.shape_cast %431 : vector<8xf32> to vector<8x1xf32>
    %cst_195 = arith.constant 3.200000e+01 : f32
    %433 = vector.broadcast %cst_195 : f32 to vector<8x1xf32>
    %434 = arith.divf %432, %433 : vector<8x1xf32>
    %435 = vector.broadcast %434 : vector<8x1xf32> to vector<8x32xf32>
    %436 = arith.subf %426, %435 : vector<8x32xf32>
    %437 = arith.mulf %436, %436 : vector<8x32xf32>
    %cst_196 = arith.constant dense<0.000000e+00> : vector<8xf32>
    %438 = vector.multi_reduction <add>, %437, %cst_196 [1] : vector<8x32xf32> to vector<8xf32>
    %439 = vector.shape_cast %438 : vector<8xf32> to vector<8x1xf32>
    %cst_197 = arith.constant 3.200000e+01 : f32
    %440 = vector.broadcast %cst_197 : f32 to vector<8x1xf32>
    %441 = arith.divf %439, %440 : vector<8x1xf32>
    %cst_198 = arith.constant 9.99999974E-6 : f32
    %442 = vector.broadcast %cst_198 : f32 to vector<8x1xf32>
    %443 = arith.addf %441, %442 : vector<8x1xf32>
    %444 = math.rsqrt %443 : vector<8x1xf32>
    %445 = vector.broadcast %444 : vector<8x1xf32> to vector<8x32xf32>
    %446 = arith.mulf %436, %445 : vector<8x32xf32>
    %447 = vector.broadcast %428 : vector<1x32xf32> to vector<8x32xf32>
    %448 = arith.mulf %446, %447 : vector<8x32xf32>
    %449 = vector.broadcast %430 : vector<1x32xf32> to vector<8x32xf32>
    %450 = arith.addf %448, %449 : vector<8x32xf32>
    %c0_199 = arith.constant 0 : index
    %c0_200 = arith.constant 0 : index
    %c0_201 = arith.constant 0 : index
    %451 = vector.load %arg21[%c0_199, %c0_200, %c0_201] : memref<2x32x96xbf16, #tpu.memory_space<vmem>>, vector<1x32x96xbf16>
    %452 = vector.shape_cast %451 : vector<1x32x96xbf16> to vector<32x96xbf16>
    %c0_202 = arith.constant 0 : index
    %c0_203 = arith.constant 0 : index
    %c0_204 = arith.constant 0 : index
    %453 = vector.load %arg22[%c0_202, %c0_203, %c0_204] : memref<2x1x96xf32, #tpu.memory_space<vmem>>, vector<1x1x96xf32>
    %454 = vector.shape_cast %453 : vector<1x1x96xf32> to vector<1x96xf32>
    %c0_205 = arith.constant 0 : index
    %c0_206 = arith.constant 0 : index
    %c0_207 = arith.constant 0 : index
    %455 = vector.load %arg23[%c0_205, %c0_206, %c0_207] : memref<2x32x32xbf16, #tpu.memory_space<vmem>>, vector<1x32x32xbf16>
    %456 = vector.shape_cast %455 : vector<1x32x32xbf16> to vector<32x32xbf16>
    %c0_208 = arith.constant 0 : index
    %c0_209 = arith.constant 0 : index
    %c0_210 = arith.constant 0 : index
    %457 = vector.load %arg24[%c0_208, %c0_209, %c0_210] : memref<2x1x32xf32, #tpu.memory_space<vmem>>, vector<1x1x32xf32>
    %458 = vector.shape_cast %457 : vector<1x1x32xf32> to vector<1x32xf32>
    %459 = arith.truncf %450 : vector<8x32xf32> to vector<8x32xbf16>
    %460 = vector.extract_strided_slice %452 {offsets = [0, 0], sizes = [32, 32], strides = [1, 1]} : vector<32x96xbf16> to vector<32x32xbf16>
    %cst_211 = arith.constant dense<0.000000e+00> : vector<8x32xf32>
    %461 = tpu.matmul %459, %460, %cst_211 {dimension_numbers = #tpu.dot_dimension_numbers<[1], [0], [0], [1], [0, 0, 1, 1], [], []>} : vector<8x32xbf16>, vector<32x32xbf16>, vector<8x32xf32> -> vector<8x32xf32>
    %462 = vector.extract_strided_slice %454 {offsets = [0, 0], sizes = [1, 32], strides = [1, 1]} : vector<1x96xf32> to vector<1x32xf32>
    %463 = vector.broadcast %462 : vector<1x32xf32> to vector<8x32xf32>
    %464 = arith.addf %461, %463 : vector<8x32xf32>
    %465 = arith.truncf %335 : vector<10x32xf32> to vector<10x32xbf16>
    %466 = vector.extract_strided_slice %452 {offsets = [0, 32], sizes = [32, 64], strides = [1, 1]} : vector<32x96xbf16> to vector<32x64xbf16>
    %cst_212 = arith.constant dense<0.000000e+00> : vector<10x64xf32>
    %467 = tpu.matmul %465, %466, %cst_212 {dimension_numbers = #tpu.dot_dimension_numbers<[1], [0], [0], [1], [0, 0, 1, 1], [], []>} : vector<10x32xbf16>, vector<32x64xbf16>, vector<10x64xf32> -> vector<10x64xf32>
    %468 = vector.extract_strided_slice %454 {offsets = [0, 32], sizes = [1, 64], strides = [1, 1]} : vector<1x96xf32> to vector<1x64xf32>
    %469 = vector.broadcast %468 : vector<1x64xf32> to vector<10x64xf32>
    %470 = arith.addf %467, %469 : vector<10x64xf32>
    %471 = vector.extract_strided_slice %470 {offsets = [0, 0], sizes = [10, 32], strides = [1, 1]} : vector<10x64xf32> to vector<10x32xf32>
    %472 = vector.extract_strided_slice %470 {offsets = [0, 32], sizes = [10, 32], strides = [1, 1]} : vector<10x64xf32> to vector<10x32xf32>
    %473 = vector.extract_strided_slice %464 {offsets = [0, 0], sizes = [8, 8], strides = [1, 1]} : vector<8x32xf32> to vector<8x8xf32>
    %474 = vector.extract_strided_slice %471 {offsets = [0, 0], sizes = [10, 8], strides = [1, 1]} : vector<10x32xf32> to vector<10x8xf32>
    %475 = vector.extract_strided_slice %472 {offsets = [0, 0], sizes = [10, 8], strides = [1, 1]} : vector<10x32xf32> to vector<10x8xf32>
    %cst_213 = arith.constant dense<0.000000e+00> : vector<8x10xf32>
    %476 = tpu.matmul %473, %474, %cst_213 {dimension_numbers = #tpu.dot_dimension_numbers<[1], [1], [0], [0], [0, 0, 1, 0], [], []>} : vector<8x8xf32>, vector<10x8xf32>, vector<8x10xf32> -> vector<8x10xf32>
    %cst_214 = arith.constant 0.353553385 : f32
    %477 = vector.broadcast %cst_214 : f32 to vector<8x10xf32>
    %478 = arith.mulf %476, %477 : vector<8x10xf32>
    %cst_215 = arith.constant dense<0xFF800000> : vector<8xf32>
    %479 = vector.multi_reduction <maximumf>, %478, %cst_215 [1] : vector<8x10xf32> to vector<8xf32>
    %480 = vector.shape_cast %479 : vector<8xf32> to vector<8x1xf32>
    %481 = vector.broadcast %480 : vector<8x1xf32> to vector<8x10xf32>
    %482 = arith.subf %478, %481 : vector<8x10xf32>
    %483 = math.exp %482 : vector<8x10xf32>
    %cst_216 = arith.constant dense<0.000000e+00> : vector<8xf32>
    %484 = vector.multi_reduction <add>, %483, %cst_216 [1] : vector<8x10xf32> to vector<8xf32>
    %485 = vector.shape_cast %484 : vector<8xf32> to vector<8x1xf32>
    %486 = tpu.reciprocal %485 {approx = true} : vector<8x1xf32> -> vector<8x1xf32>
    %487 = vector.broadcast %486 : vector<8x1xf32> to vector<8x10xf32>
    %488 = arith.mulf %483, %487 : vector<8x10xf32>
    %cst_217 = arith.constant dense<0.000000e+00> : vector<8x8xf32>
    %489 = tpu.matmul %488, %475, %cst_217 {dimension_numbers = #tpu.dot_dimension_numbers<[1], [0], [0], [1], [0, 0, 1, 1], [], []>} : vector<8x10xf32>, vector<10x8xf32>, vector<8x8xf32> -> vector<8x8xf32>
    %490 = vector.extract_strided_slice %464 {offsets = [0, 8], sizes = [8, 8], strides = [1, 1]} : vector<8x32xf32> to vector<8x8xf32>
    %491 = vector.extract_strided_slice %471 {offsets = [0, 8], sizes = [10, 8], strides = [1, 1]} : vector<10x32xf32> to vector<10x8xf32>
    %492 = vector.extract_strided_slice %472 {offsets = [0, 8], sizes = [10, 8], strides = [1, 1]} : vector<10x32xf32> to vector<10x8xf32>
    %cst_218 = arith.constant dense<0.000000e+00> : vector<8x10xf32>
    %493 = tpu.matmul %490, %491, %cst_218 {dimension_numbers = #tpu.dot_dimension_numbers<[1], [1], [0], [0], [0, 0, 1, 0], [], []>} : vector<8x8xf32>, vector<10x8xf32>, vector<8x10xf32> -> vector<8x10xf32>
    %cst_219 = arith.constant 0.353553385 : f32
    %494 = vector.broadcast %cst_219 : f32 to vector<8x10xf32>
    %495 = arith.mulf %493, %494 : vector<8x10xf32>
    %cst_220 = arith.constant dense<0xFF800000> : vector<8xf32>
    %496 = vector.multi_reduction <maximumf>, %495, %cst_220 [1] : vector<8x10xf32> to vector<8xf32>
    %497 = vector.shape_cast %496 : vector<8xf32> to vector<8x1xf32>
    %498 = vector.broadcast %497 : vector<8x1xf32> to vector<8x10xf32>
    %499 = arith.subf %495, %498 : vector<8x10xf32>
    %500 = math.exp %499 : vector<8x10xf32>
    %cst_221 = arith.constant dense<0.000000e+00> : vector<8xf32>
    %501 = vector.multi_reduction <add>, %500, %cst_221 [1] : vector<8x10xf32> to vector<8xf32>
    %502 = vector.shape_cast %501 : vector<8xf32> to vector<8x1xf32>
    %503 = tpu.reciprocal %502 {approx = true} : vector<8x1xf32> -> vector<8x1xf32>
    %504 = vector.broadcast %503 : vector<8x1xf32> to vector<8x10xf32>
    %505 = arith.mulf %500, %504 : vector<8x10xf32>
    %cst_222 = arith.constant dense<0.000000e+00> : vector<8x8xf32>
    %506 = tpu.matmul %505, %492, %cst_222 {dimension_numbers = #tpu.dot_dimension_numbers<[1], [0], [0], [1], [0, 0, 1, 1], [], []>} : vector<8x10xf32>, vector<10x8xf32>, vector<8x8xf32> -> vector<8x8xf32>
    %507 = vector.extract_strided_slice %464 {offsets = [0, 16], sizes = [8, 8], strides = [1, 1]} : vector<8x32xf32> to vector<8x8xf32>
    %508 = vector.extract_strided_slice %471 {offsets = [0, 16], sizes = [10, 8], strides = [1, 1]} : vector<10x32xf32> to vector<10x8xf32>
    %509 = vector.extract_strided_slice %472 {offsets = [0, 16], sizes = [10, 8], strides = [1, 1]} : vector<10x32xf32> to vector<10x8xf32>
    %cst_223 = arith.constant dense<0.000000e+00> : vector<8x10xf32>
    %510 = tpu.matmul %507, %508, %cst_223 {dimension_numbers = #tpu.dot_dimension_numbers<[1], [1], [0], [0], [0, 0, 1, 0], [], []>} : vector<8x8xf32>, vector<10x8xf32>, vector<8x10xf32> -> vector<8x10xf32>
    %cst_224 = arith.constant 0.353553385 : f32
    %511 = vector.broadcast %cst_224 : f32 to vector<8x10xf32>
    %512 = arith.mulf %510, %511 : vector<8x10xf32>
    %cst_225 = arith.constant dense<0xFF800000> : vector<8xf32>
    %513 = vector.multi_reduction <maximumf>, %512, %cst_225 [1] : vector<8x10xf32> to vector<8xf32>
    %514 = vector.shape_cast %513 : vector<8xf32> to vector<8x1xf32>
    %515 = vector.broadcast %514 : vector<8x1xf32> to vector<8x10xf32>
    %516 = arith.subf %512, %515 : vector<8x10xf32>
    %517 = math.exp %516 : vector<8x10xf32>
    %cst_226 = arith.constant dense<0.000000e+00> : vector<8xf32>
    %518 = vector.multi_reduction <add>, %517, %cst_226 [1] : vector<8x10xf32> to vector<8xf32>
    %519 = vector.shape_cast %518 : vector<8xf32> to vector<8x1xf32>
    %520 = tpu.reciprocal %519 {approx = true} : vector<8x1xf32> -> vector<8x1xf32>
    %521 = vector.broadcast %520 : vector<8x1xf32> to vector<8x10xf32>
    %522 = arith.mulf %517, %521 : vector<8x10xf32>
    %cst_227 = arith.constant dense<0.000000e+00> : vector<8x8xf32>
    %523 = tpu.matmul %522, %509, %cst_227 {dimension_numbers = #tpu.dot_dimension_numbers<[1], [0], [0], [1], [0, 0, 1, 1], [], []>} : vector<8x10xf32>, vector<10x8xf32>, vector<8x8xf32> -> vector<8x8xf32>
    %524 = vector.extract_strided_slice %464 {offsets = [0, 24], sizes = [8, 8], strides = [1, 1]} : vector<8x32xf32> to vector<8x8xf32>
    %525 = vector.extract_strided_slice %471 {offsets = [0, 24], sizes = [10, 8], strides = [1, 1]} : vector<10x32xf32> to vector<10x8xf32>
    %526 = vector.extract_strided_slice %472 {offsets = [0, 24], sizes = [10, 8], strides = [1, 1]} : vector<10x32xf32> to vector<10x8xf32>
    %cst_228 = arith.constant dense<0.000000e+00> : vector<8x10xf32>
    %527 = tpu.matmul %524, %525, %cst_228 {dimension_numbers = #tpu.dot_dimension_numbers<[1], [1], [0], [0], [0, 0, 1, 0], [], []>} : vector<8x8xf32>, vector<10x8xf32>, vector<8x10xf32> -> vector<8x10xf32>
    %cst_229 = arith.constant 0.353553385 : f32
    %528 = vector.broadcast %cst_229 : f32 to vector<8x10xf32>
    %529 = arith.mulf %527, %528 : vector<8x10xf32>
    %cst_230 = arith.constant dense<0xFF800000> : vector<8xf32>
    %530 = vector.multi_reduction <maximumf>, %529, %cst_230 [1] : vector<8x10xf32> to vector<8xf32>
    %531 = vector.shape_cast %530 : vector<8xf32> to vector<8x1xf32>
    %532 = vector.broadcast %531 : vector<8x1xf32> to vector<8x10xf32>
    %533 = arith.subf %529, %532 : vector<8x10xf32>
    %534 = math.exp %533 : vector<8x10xf32>
    %cst_231 = arith.constant dense<0.000000e+00> : vector<8xf32>
    %535 = vector.multi_reduction <add>, %534, %cst_231 [1] : vector<8x10xf32> to vector<8xf32>
    %536 = vector.shape_cast %535 : vector<8xf32> to vector<8x1xf32>
    %537 = tpu.reciprocal %536 {approx = true} : vector<8x1xf32> -> vector<8x1xf32>
    %538 = vector.broadcast %537 : vector<8x1xf32> to vector<8x10xf32>
    %539 = arith.mulf %534, %538 : vector<8x10xf32>
    %cst_232 = arith.constant dense<0.000000e+00> : vector<8x8xf32>
    %540 = tpu.matmul %539, %526, %cst_232 {dimension_numbers = #tpu.dot_dimension_numbers<[1], [0], [0], [1], [0, 0, 1, 1], [], []>} : vector<8x10xf32>, vector<10x8xf32>, vector<8x8xf32> -> vector<8x8xf32>
    %541 = tpu.concatenate %489, %506, %523, %540 in 1 : vector<8x8xf32>, vector<8x8xf32>, vector<8x8xf32>, vector<8x8xf32> -> vector<8x32xf32>
    %542 = arith.truncf %541 : vector<8x32xf32> to vector<8x32xbf16>
    %cst_233 = arith.constant dense<0.000000e+00> : vector<8x32xf32>
    %543 = tpu.matmul %542, %456, %cst_233 {dimension_numbers = #tpu.dot_dimension_numbers<[1], [0], [0], [1], [0, 0, 1, 1], [], []>} : vector<8x32xbf16>, vector<32x32xbf16>, vector<8x32xf32> -> vector<8x32xf32>
    %544 = vector.broadcast %458 : vector<1x32xf32> to vector<8x32xf32>
    %545 = arith.addf %543, %544 : vector<8x32xf32>
    %546 = arith.addf %450, %545 : vector<8x32xf32>
    %c0_234 = arith.constant 0 : index
    %c0_235 = arith.constant 0 : index
    %c0_236 = arith.constant 0 : index
    %547 = vector.load %arg27[%c0_234, %c0_235, %c0_236] : memref<2x1x32xf32, #tpu.memory_space<vmem>>, vector<1x1x32xf32>
    %548 = vector.shape_cast %547 : vector<1x1x32xf32> to vector<1x32xf32>
    %c0_237 = arith.constant 0 : index
    %c0_238 = arith.constant 0 : index
    %c0_239 = arith.constant 0 : index
    %549 = vector.load %arg28[%c0_237, %c0_238, %c0_239] : memref<2x1x32xf32, #tpu.memory_space<vmem>>, vector<1x1x32xf32>
    %550 = vector.shape_cast %549 : vector<1x1x32xf32> to vector<1x32xf32>
    %cst_240 = arith.constant dense<0.000000e+00> : vector<8xf32>
    %551 = vector.multi_reduction <add>, %546, %cst_240 [1] : vector<8x32xf32> to vector<8xf32>
    %552 = vector.shape_cast %551 : vector<8xf32> to vector<8x1xf32>
    %cst_241 = arith.constant 3.200000e+01 : f32
    %553 = vector.broadcast %cst_241 : f32 to vector<8x1xf32>
    %554 = arith.divf %552, %553 : vector<8x1xf32>
    %555 = vector.broadcast %554 : vector<8x1xf32> to vector<8x32xf32>
    %556 = arith.subf %546, %555 : vector<8x32xf32>
    %557 = arith.mulf %556, %556 : vector<8x32xf32>
    %cst_242 = arith.constant dense<0.000000e+00> : vector<8xf32>
    %558 = vector.multi_reduction <add>, %557, %cst_242 [1] : vector<8x32xf32> to vector<8xf32>
    %559 = vector.shape_cast %558 : vector<8xf32> to vector<8x1xf32>
    %cst_243 = arith.constant 3.200000e+01 : f32
    %560 = vector.broadcast %cst_243 : f32 to vector<8x1xf32>
    %561 = arith.divf %559, %560 : vector<8x1xf32>
    %cst_244 = arith.constant 9.99999974E-6 : f32
    %562 = vector.broadcast %cst_244 : f32 to vector<8x1xf32>
    %563 = arith.addf %561, %562 : vector<8x1xf32>
    %564 = math.rsqrt %563 : vector<8x1xf32>
    %565 = vector.broadcast %564 : vector<8x1xf32> to vector<8x32xf32>
    %566 = arith.mulf %556, %565 : vector<8x32xf32>
    %567 = vector.broadcast %548 : vector<1x32xf32> to vector<8x32xf32>
    %568 = arith.mulf %566, %567 : vector<8x32xf32>
    %569 = vector.broadcast %550 : vector<1x32xf32> to vector<8x32xf32>
    %570 = arith.addf %568, %569 : vector<8x32xf32>
    %c0_245 = arith.constant 0 : index
    %c0_246 = arith.constant 0 : index
    %c0_247 = arith.constant 0 : index
    %571 = vector.load %arg31[%c0_245, %c0_246, %c0_247] : memref<2x32x2048xbf16, #tpu.memory_space<vmem>>, vector<1x32x2048xbf16>
    %572 = vector.shape_cast %571 : vector<1x32x2048xbf16> to vector<32x2048xbf16>
    %c0_248 = arith.constant 0 : index
    %c0_249 = arith.constant 0 : index
    %c0_250 = arith.constant 0 : index
    %573 = vector.load %arg32[%c0_248, %c0_249, %c0_250] : memref<2x1x2048xf32, #tpu.memory_space<vmem>>, vector<1x1x2048xf32>
    %574 = vector.shape_cast %573 : vector<1x1x2048xf32> to vector<1x2048xf32>
    %c0_251 = arith.constant 0 : index
    %c0_252 = arith.constant 0 : index
    %c0_253 = arith.constant 0 : index
    %575 = vector.load %arg33[%c0_251, %c0_252, %c0_253] : memref<2x2048x32xbf16, #tpu.memory_space<vmem>>, vector<1x2048x32xbf16>
    %576 = vector.shape_cast %575 : vector<1x2048x32xbf16> to vector<2048x32xbf16>
    %c0_254 = arith.constant 0 : index
    %c0_255 = arith.constant 0 : index
    %c0_256 = arith.constant 0 : index
    %577 = vector.load %arg34[%c0_254, %c0_255, %c0_256] : memref<2x1x32xf32, #tpu.memory_space<vmem>>, vector<1x1x32xf32>
    %578 = vector.shape_cast %577 : vector<1x1x32xf32> to vector<1x32xf32>
    %579 = arith.truncf %570 : vector<8x32xf32> to vector<8x32xbf16>
    %cst_257 = arith.constant dense<0.000000e+00> : vector<8x2048xf32>
    %580 = tpu.matmul %579, %572, %cst_257 {dimension_numbers = #tpu.dot_dimension_numbers<[1], [0], [0], [1], [0, 0, 1, 1], [], []>} : vector<8x32xbf16>, vector<32x2048xbf16>, vector<8x2048xf32> -> vector<8x2048xf32>
    %581 = vector.broadcast %574 : vector<1x2048xf32> to vector<8x2048xf32>
    %582 = arith.addf %580, %581 : vector<8x2048xf32>
    %cst_258 = arith.constant 0.000000e+00 : f32
    %583 = vector.broadcast %cst_258 : f32 to vector<8x2048xf32>
    %584 = arith.maximumf %582, %583 : vector<8x2048xf32>
    %585 = arith.truncf %584 : vector<8x2048xf32> to vector<8x2048xbf16>
    %cst_259 = arith.constant dense<0.000000e+00> : vector<8x32xf32>
    %586 = tpu.matmul %585, %576, %cst_259 {dimension_numbers = #tpu.dot_dimension_numbers<[1], [0], [0], [1], [0, 0, 1, 1], [], []>} : vector<8x2048xbf16>, vector<2048x32xbf16>, vector<8x32xf32> -> vector<8x32xf32>
    %587 = vector.broadcast %578 : vector<1x32xf32> to vector<8x32xf32>
    %588 = arith.addf %586, %587 : vector<8x32xf32>
    %589 = arith.addf %570, %588 : vector<8x32xf32>
    %c0_260 = arith.constant 0 : index
    %c0_261 = arith.constant 0 : index
    %c0_262 = arith.constant 0 : index
    %590 = vector.load %arg29[%c0_260, %c0_261, %c0_262] : memref<2x1x32xf32, #tpu.memory_space<vmem>>, vector<1x1x32xf32>
    %591 = vector.shape_cast %590 : vector<1x1x32xf32> to vector<1x32xf32>
    %c0_263 = arith.constant 0 : index
    %c0_264 = arith.constant 0 : index
    %c0_265 = arith.constant 0 : index
    %592 = vector.load %arg30[%c0_263, %c0_264, %c0_265] : memref<2x1x32xf32, #tpu.memory_space<vmem>>, vector<1x1x32xf32>
    %593 = vector.shape_cast %592 : vector<1x1x32xf32> to vector<1x32xf32>
    %cst_266 = arith.constant dense<0.000000e+00> : vector<8xf32>
    %594 = vector.multi_reduction <add>, %589, %cst_266 [1] : vector<8x32xf32> to vector<8xf32>
    %595 = vector.shape_cast %594 : vector<8xf32> to vector<8x1xf32>
    %cst_267 = arith.constant 3.200000e+01 : f32
    %596 = vector.broadcast %cst_267 : f32 to vector<8x1xf32>
    %597 = arith.divf %595, %596 : vector<8x1xf32>
    %598 = vector.broadcast %597 : vector<8x1xf32> to vector<8x32xf32>
    %599 = arith.subf %589, %598 : vector<8x32xf32>
    %600 = arith.mulf %599, %599 : vector<8x32xf32>
    %cst_268 = arith.constant dense<0.000000e+00> : vector<8xf32>
    %601 = vector.multi_reduction <add>, %600, %cst_268 [1] : vector<8x32xf32> to vector<8xf32>
    %602 = vector.shape_cast %601 : vector<8xf32> to vector<8x1xf32>
    %cst_269 = arith.constant 3.200000e+01 : f32
    %603 = vector.broadcast %cst_269 : f32 to vector<8x1xf32>
    %604 = arith.divf %602, %603 : vector<8x1xf32>
    %cst_270 = arith.constant 9.99999974E-6 : f32
    %605 = vector.broadcast %cst_270 : f32 to vector<8x1xf32>
    %606 = arith.addf %604, %605 : vector<8x1xf32>
    %607 = math.rsqrt %606 : vector<8x1xf32>
    %608 = vector.broadcast %607 : vector<8x1xf32> to vector<8x32xf32>
    %609 = arith.mulf %599, %608 : vector<8x32xf32>
    %610 = vector.broadcast %591 : vector<1x32xf32> to vector<8x32xf32>
    %611 = arith.mulf %609, %610 : vector<8x32xf32>
    %612 = vector.broadcast %593 : vector<1x32xf32> to vector<8x32xf32>
    %613 = arith.addf %611, %612 : vector<8x32xf32>
    %c1_271 = arith.constant 1 : index
    %c0_272 = arith.constant 0 : index
    %c0_273 = arith.constant 0 : index
    %614 = vector.load %arg17[%c1_271, %c0_272, %c0_273] : memref<2x32x96xbf16, #tpu.memory_space<vmem>>, vector<1x32x96xbf16>
    %615 = vector.shape_cast %614 : vector<1x32x96xbf16> to vector<32x96xbf16>
    %c1_274 = arith.constant 1 : index
    %c0_275 = arith.constant 0 : index
    %c0_276 = arith.constant 0 : index
    %616 = vector.load %arg18[%c1_274, %c0_275, %c0_276] : memref<2x1x96xf32, #tpu.memory_space<vmem>>, vector<1x1x96xf32>
    %617 = vector.shape_cast %616 : vector<1x1x96xf32> to vector<1x96xf32>
    %c1_277 = arith.constant 1 : index
    %c0_278 = arith.constant 0 : index
    %c0_279 = arith.constant 0 : index
    %618 = vector.load %arg19[%c1_277, %c0_278, %c0_279] : memref<2x32x32xbf16, #tpu.memory_space<vmem>>, vector<1x32x32xbf16>
    %619 = vector.shape_cast %618 : vector<1x32x32xbf16> to vector<32x32xbf16>
    %c1_280 = arith.constant 1 : index
    %c0_281 = arith.constant 0 : index
    %c0_282 = arith.constant 0 : index
    %620 = vector.load %arg20[%c1_280, %c0_281, %c0_282] : memref<2x1x32xf32, #tpu.memory_space<vmem>>, vector<1x1x32xf32>
    %621 = vector.shape_cast %620 : vector<1x1x32xf32> to vector<1x32xf32>
    %622 = arith.truncf %613 : vector<8x32xf32> to vector<8x32xbf16>
    %cst_283 = arith.constant dense<0.000000e+00> : vector<8x96xf32>
    %623 = tpu.matmul %622, %615, %cst_283 {dimension_numbers = #tpu.dot_dimension_numbers<[1], [0], [0], [1], [0, 0, 1, 1], [], []>} : vector<8x32xbf16>, vector<32x96xbf16>, vector<8x96xf32> -> vector<8x96xf32>
    %624 = vector.broadcast %617 : vector<1x96xf32> to vector<8x96xf32>
    %625 = arith.addf %623, %624 : vector<8x96xf32>
    %626 = vector.extract_strided_slice %625 {offsets = [0, 0], sizes = [8, 32], strides = [1, 1]} : vector<8x96xf32> to vector<8x32xf32>
    %627 = vector.extract_strided_slice %625 {offsets = [0, 32], sizes = [8, 32], strides = [1, 1]} : vector<8x96xf32> to vector<8x32xf32>
    %628 = vector.extract_strided_slice %625 {offsets = [0, 64], sizes = [8, 32], strides = [1, 1]} : vector<8x96xf32> to vector<8x32xf32>
    %629 = vector.extract_strided_slice %626 {offsets = [0, 0], sizes = [8, 8], strides = [1, 1]} : vector<8x32xf32> to vector<8x8xf32>
    %630 = vector.extract_strided_slice %627 {offsets = [0, 0], sizes = [8, 8], strides = [1, 1]} : vector<8x32xf32> to vector<8x8xf32>
    %631 = vector.extract_strided_slice %628 {offsets = [0, 0], sizes = [8, 8], strides = [1, 1]} : vector<8x32xf32> to vector<8x8xf32>
    %cst_284 = arith.constant dense<0.000000e+00> : vector<8x8xf32>
    %632 = tpu.matmul %629, %630, %cst_284 {dimension_numbers = #tpu.dot_dimension_numbers<[1], [1], [0], [0], [0, 0, 1, 0], [], []>} : vector<8x8xf32>, vector<8x8xf32>, vector<8x8xf32> -> vector<8x8xf32>
    %cst_285 = arith.constant 0.353553385 : f32
    %633 = vector.broadcast %cst_285 : f32 to vector<8x8xf32>
    %634 = arith.mulf %632, %633 : vector<8x8xf32>
    %cst_286 = arith.constant dense<0xFF800000> : vector<8xf32>
    %635 = vector.multi_reduction <maximumf>, %634, %cst_286 [1] : vector<8x8xf32> to vector<8xf32>
    %636 = vector.shape_cast %635 : vector<8xf32> to vector<8x1xf32>
    %637 = vector.broadcast %636 : vector<8x1xf32> to vector<8x8xf32>
    %638 = arith.subf %634, %637 : vector<8x8xf32>
    %639 = math.exp %638 : vector<8x8xf32>
    %cst_287 = arith.constant dense<0.000000e+00> : vector<8xf32>
    %640 = vector.multi_reduction <add>, %639, %cst_287 [1] : vector<8x8xf32> to vector<8xf32>
    %641 = vector.shape_cast %640 : vector<8xf32> to vector<8x1xf32>
    %642 = tpu.reciprocal %641 {approx = true} : vector<8x1xf32> -> vector<8x1xf32>
    %643 = vector.broadcast %642 : vector<8x1xf32> to vector<8x8xf32>
    %644 = arith.mulf %639, %643 : vector<8x8xf32>
    %cst_288 = arith.constant dense<0.000000e+00> : vector<8x8xf32>
    %645 = tpu.matmul %644, %631, %cst_288 {dimension_numbers = #tpu.dot_dimension_numbers<[1], [0], [0], [1], [0, 0, 1, 1], [], []>} : vector<8x8xf32>, vector<8x8xf32>, vector<8x8xf32> -> vector<8x8xf32>
    %646 = vector.extract_strided_slice %626 {offsets = [0, 8], sizes = [8, 8], strides = [1, 1]} : vector<8x32xf32> to vector<8x8xf32>
    %647 = vector.extract_strided_slice %627 {offsets = [0, 8], sizes = [8, 8], strides = [1, 1]} : vector<8x32xf32> to vector<8x8xf32>
    %648 = vector.extract_strided_slice %628 {offsets = [0, 8], sizes = [8, 8], strides = [1, 1]} : vector<8x32xf32> to vector<8x8xf32>
    %cst_289 = arith.constant dense<0.000000e+00> : vector<8x8xf32>
    %649 = tpu.matmul %646, %647, %cst_289 {dimension_numbers = #tpu.dot_dimension_numbers<[1], [1], [0], [0], [0, 0, 1, 0], [], []>} : vector<8x8xf32>, vector<8x8xf32>, vector<8x8xf32> -> vector<8x8xf32>
    %cst_290 = arith.constant 0.353553385 : f32
    %650 = vector.broadcast %cst_290 : f32 to vector<8x8xf32>
    %651 = arith.mulf %649, %650 : vector<8x8xf32>
    %cst_291 = arith.constant dense<0xFF800000> : vector<8xf32>
    %652 = vector.multi_reduction <maximumf>, %651, %cst_291 [1] : vector<8x8xf32> to vector<8xf32>
    %653 = vector.shape_cast %652 : vector<8xf32> to vector<8x1xf32>
    %654 = vector.broadcast %653 : vector<8x1xf32> to vector<8x8xf32>
    %655 = arith.subf %651, %654 : vector<8x8xf32>
    %656 = math.exp %655 : vector<8x8xf32>
    %cst_292 = arith.constant dense<0.000000e+00> : vector<8xf32>
    %657 = vector.multi_reduction <add>, %656, %cst_292 [1] : vector<8x8xf32> to vector<8xf32>
    %658 = vector.shape_cast %657 : vector<8xf32> to vector<8x1xf32>
    %659 = tpu.reciprocal %658 {approx = true} : vector<8x1xf32> -> vector<8x1xf32>
    %660 = vector.broadcast %659 : vector<8x1xf32> to vector<8x8xf32>
    %661 = arith.mulf %656, %660 : vector<8x8xf32>
    %cst_293 = arith.constant dense<0.000000e+00> : vector<8x8xf32>
    %662 = tpu.matmul %661, %648, %cst_293 {dimension_numbers = #tpu.dot_dimension_numbers<[1], [0], [0], [1], [0, 0, 1, 1], [], []>} : vector<8x8xf32>, vector<8x8xf32>, vector<8x8xf32> -> vector<8x8xf32>
    %663 = vector.extract_strided_slice %626 {offsets = [0, 16], sizes = [8, 8], strides = [1, 1]} : vector<8x32xf32> to vector<8x8xf32>
    %664 = vector.extract_strided_slice %627 {offsets = [0, 16], sizes = [8, 8], strides = [1, 1]} : vector<8x32xf32> to vector<8x8xf32>
    %665 = vector.extract_strided_slice %628 {offsets = [0, 16], sizes = [8, 8], strides = [1, 1]} : vector<8x32xf32> to vector<8x8xf32>
    %cst_294 = arith.constant dense<0.000000e+00> : vector<8x8xf32>
    %666 = tpu.matmul %663, %664, %cst_294 {dimension_numbers = #tpu.dot_dimension_numbers<[1], [1], [0], [0], [0, 0, 1, 0], [], []>} : vector<8x8xf32>, vector<8x8xf32>, vector<8x8xf32> -> vector<8x8xf32>
    %cst_295 = arith.constant 0.353553385 : f32
    %667 = vector.broadcast %cst_295 : f32 to vector<8x8xf32>
    %668 = arith.mulf %666, %667 : vector<8x8xf32>
    %cst_296 = arith.constant dense<0xFF800000> : vector<8xf32>
    %669 = vector.multi_reduction <maximumf>, %668, %cst_296 [1] : vector<8x8xf32> to vector<8xf32>
    %670 = vector.shape_cast %669 : vector<8xf32> to vector<8x1xf32>
    %671 = vector.broadcast %670 : vector<8x1xf32> to vector<8x8xf32>
    %672 = arith.subf %668, %671 : vector<8x8xf32>
    %673 = math.exp %672 : vector<8x8xf32>
    %cst_297 = arith.constant dense<0.000000e+00> : vector<8xf32>
    %674 = vector.multi_reduction <add>, %673, %cst_297 [1] : vector<8x8xf32> to vector<8xf32>
    %675 = vector.shape_cast %674 : vector<8xf32> to vector<8x1xf32>
    %676 = tpu.reciprocal %675 {approx = true} : vector<8x1xf32> -> vector<8x1xf32>
    %677 = vector.broadcast %676 : vector<8x1xf32> to vector<8x8xf32>
    %678 = arith.mulf %673, %677 : vector<8x8xf32>
    %cst_298 = arith.constant dense<0.000000e+00> : vector<8x8xf32>
    %679 = tpu.matmul %678, %665, %cst_298 {dimension_numbers = #tpu.dot_dimension_numbers<[1], [0], [0], [1], [0, 0, 1, 1], [], []>} : vector<8x8xf32>, vector<8x8xf32>, vector<8x8xf32> -> vector<8x8xf32>
    %680 = vector.extract_strided_slice %626 {offsets = [0, 24], sizes = [8, 8], strides = [1, 1]} : vector<8x32xf32> to vector<8x8xf32>
    %681 = vector.extract_strided_slice %627 {offsets = [0, 24], sizes = [8, 8], strides = [1, 1]} : vector<8x32xf32> to vector<8x8xf32>
    %682 = vector.extract_strided_slice %628 {offsets = [0, 24], sizes = [8, 8], strides = [1, 1]} : vector<8x32xf32> to vector<8x8xf32>
    %cst_299 = arith.constant dense<0.000000e+00> : vector<8x8xf32>
    %683 = tpu.matmul %680, %681, %cst_299 {dimension_numbers = #tpu.dot_dimension_numbers<[1], [1], [0], [0], [0, 0, 1, 0], [], []>} : vector<8x8xf32>, vector<8x8xf32>, vector<8x8xf32> -> vector<8x8xf32>
    %cst_300 = arith.constant 0.353553385 : f32
    %684 = vector.broadcast %cst_300 : f32 to vector<8x8xf32>
    %685 = arith.mulf %683, %684 : vector<8x8xf32>
    %cst_301 = arith.constant dense<0xFF800000> : vector<8xf32>
    %686 = vector.multi_reduction <maximumf>, %685, %cst_301 [1] : vector<8x8xf32> to vector<8xf32>
    %687 = vector.shape_cast %686 : vector<8xf32> to vector<8x1xf32>
    %688 = vector.broadcast %687 : vector<8x1xf32> to vector<8x8xf32>
    %689 = arith.subf %685, %688 : vector<8x8xf32>
    %690 = math.exp %689 : vector<8x8xf32>
    %cst_302 = arith.constant dense<0.000000e+00> : vector<8xf32>
    %691 = vector.multi_reduction <add>, %690, %cst_302 [1] : vector<8x8xf32> to vector<8xf32>
    %692 = vector.shape_cast %691 : vector<8xf32> to vector<8x1xf32>
    %693 = tpu.reciprocal %692 {approx = true} : vector<8x1xf32> -> vector<8x1xf32>
    %694 = vector.broadcast %693 : vector<8x1xf32> to vector<8x8xf32>
    %695 = arith.mulf %690, %694 : vector<8x8xf32>
    %cst_303 = arith.constant dense<0.000000e+00> : vector<8x8xf32>
    %696 = tpu.matmul %695, %682, %cst_303 {dimension_numbers = #tpu.dot_dimension_numbers<[1], [0], [0], [1], [0, 0, 1, 1], [], []>} : vector<8x8xf32>, vector<8x8xf32>, vector<8x8xf32> -> vector<8x8xf32>
    %697 = tpu.concatenate %645, %662, %679, %696 in 1 : vector<8x8xf32>, vector<8x8xf32>, vector<8x8xf32>, vector<8x8xf32> -> vector<8x32xf32>
    %698 = arith.truncf %697 : vector<8x32xf32> to vector<8x32xbf16>
    %cst_304 = arith.constant dense<0.000000e+00> : vector<8x32xf32>
    %699 = tpu.matmul %698, %619, %cst_304 {dimension_numbers = #tpu.dot_dimension_numbers<[1], [0], [0], [1], [0, 0, 1, 1], [], []>} : vector<8x32xbf16>, vector<32x32xbf16>, vector<8x32xf32> -> vector<8x32xf32>
    %700 = vector.broadcast %621 : vector<1x32xf32> to vector<8x32xf32>
    %701 = arith.addf %699, %700 : vector<8x32xf32>
    %702 = arith.addf %613, %701 : vector<8x32xf32>
    %c1_305 = arith.constant 1 : index
    %c0_306 = arith.constant 0 : index
    %c0_307 = arith.constant 0 : index
    %703 = vector.load %arg25[%c1_305, %c0_306, %c0_307] : memref<2x1x32xf32, #tpu.memory_space<vmem>>, vector<1x1x32xf32>
    %704 = vector.shape_cast %703 : vector<1x1x32xf32> to vector<1x32xf32>
    %c1_308 = arith.constant 1 : index
    %c0_309 = arith.constant 0 : index
    %c0_310 = arith.constant 0 : index
    %705 = vector.load %arg26[%c1_308, %c0_309, %c0_310] : memref<2x1x32xf32, #tpu.memory_space<vmem>>, vector<1x1x32xf32>
    %706 = vector.shape_cast %705 : vector<1x1x32xf32> to vector<1x32xf32>
    %cst_311 = arith.constant dense<0.000000e+00> : vector<8xf32>
    %707 = vector.multi_reduction <add>, %702, %cst_311 [1] : vector<8x32xf32> to vector<8xf32>
    %708 = vector.shape_cast %707 : vector<8xf32> to vector<8x1xf32>
    %cst_312 = arith.constant 3.200000e+01 : f32
    %709 = vector.broadcast %cst_312 : f32 to vector<8x1xf32>
    %710 = arith.divf %708, %709 : vector<8x1xf32>
    %711 = vector.broadcast %710 : vector<8x1xf32> to vector<8x32xf32>
    %712 = arith.subf %702, %711 : vector<8x32xf32>
    %713 = arith.mulf %712, %712 : vector<8x32xf32>
    %cst_313 = arith.constant dense<0.000000e+00> : vector<8xf32>
    %714 = vector.multi_reduction <add>, %713, %cst_313 [1] : vector<8x32xf32> to vector<8xf32>
    %715 = vector.shape_cast %714 : vector<8xf32> to vector<8x1xf32>
    %cst_314 = arith.constant 3.200000e+01 : f32
    %716 = vector.broadcast %cst_314 : f32 to vector<8x1xf32>
    %717 = arith.divf %715, %716 : vector<8x1xf32>
    %cst_315 = arith.constant 9.99999974E-6 : f32
    %718 = vector.broadcast %cst_315 : f32 to vector<8x1xf32>
    %719 = arith.addf %717, %718 : vector<8x1xf32>
    %720 = math.rsqrt %719 : vector<8x1xf32>
    %721 = vector.broadcast %720 : vector<8x1xf32> to vector<8x32xf32>
    %722 = arith.mulf %712, %721 : vector<8x32xf32>
    %723 = vector.broadcast %704 : vector<1x32xf32> to vector<8x32xf32>
    %724 = arith.mulf %722, %723 : vector<8x32xf32>
    %725 = vector.broadcast %706 : vector<1x32xf32> to vector<8x32xf32>
    %726 = arith.addf %724, %725 : vector<8x32xf32>
    %c1_316 = arith.constant 1 : index
    %c0_317 = arith.constant 0 : index
    %c0_318 = arith.constant 0 : index
    %727 = vector.load %arg21[%c1_316, %c0_317, %c0_318] : memref<2x32x96xbf16, #tpu.memory_space<vmem>>, vector<1x32x96xbf16>
    %728 = vector.shape_cast %727 : vector<1x32x96xbf16> to vector<32x96xbf16>
    %c1_319 = arith.constant 1 : index
    %c0_320 = arith.constant 0 : index
    %c0_321 = arith.constant 0 : index
    %729 = vector.load %arg22[%c1_319, %c0_320, %c0_321] : memref<2x1x96xf32, #tpu.memory_space<vmem>>, vector<1x1x96xf32>
    %730 = vector.shape_cast %729 : vector<1x1x96xf32> to vector<1x96xf32>
    %c1_322 = arith.constant 1 : index
    %c0_323 = arith.constant 0 : index
    %c0_324 = arith.constant 0 : index
    %731 = vector.load %arg23[%c1_322, %c0_323, %c0_324] : memref<2x32x32xbf16, #tpu.memory_space<vmem>>, vector<1x32x32xbf16>
    %732 = vector.shape_cast %731 : vector<1x32x32xbf16> to vector<32x32xbf16>
    %c1_325 = arith.constant 1 : index
    %c0_326 = arith.constant 0 : index
    %c0_327 = arith.constant 0 : index
    %733 = vector.load %arg24[%c1_325, %c0_326, %c0_327] : memref<2x1x32xf32, #tpu.memory_space<vmem>>, vector<1x1x32xf32>
    %734 = vector.shape_cast %733 : vector<1x1x32xf32> to vector<1x32xf32>
    %735 = arith.truncf %726 : vector<8x32xf32> to vector<8x32xbf16>
    %736 = vector.extract_strided_slice %728 {offsets = [0, 0], sizes = [32, 32], strides = [1, 1]} : vector<32x96xbf16> to vector<32x32xbf16>
    %cst_328 = arith.constant dense<0.000000e+00> : vector<8x32xf32>
    %737 = tpu.matmul %735, %736, %cst_328 {dimension_numbers = #tpu.dot_dimension_numbers<[1], [0], [0], [1], [0, 0, 1, 1], [], []>} : vector<8x32xbf16>, vector<32x32xbf16>, vector<8x32xf32> -> vector<8x32xf32>
    %738 = vector.extract_strided_slice %730 {offsets = [0, 0], sizes = [1, 32], strides = [1, 1]} : vector<1x96xf32> to vector<1x32xf32>
    %739 = vector.broadcast %738 : vector<1x32xf32> to vector<8x32xf32>
    %740 = arith.addf %737, %739 : vector<8x32xf32>
    %741 = arith.truncf %335 : vector<10x32xf32> to vector<10x32xbf16>
    %742 = vector.extract_strided_slice %728 {offsets = [0, 32], sizes = [32, 64], strides = [1, 1]} : vector<32x96xbf16> to vector<32x64xbf16>
    %cst_329 = arith.constant dense<0.000000e+00> : vector<10x64xf32>
    %743 = tpu.matmul %741, %742, %cst_329 {dimension_numbers = #tpu.dot_dimension_numbers<[1], [0], [0], [1], [0, 0, 1, 1], [], []>} : vector<10x32xbf16>, vector<32x64xbf16>, vector<10x64xf32> -> vector<10x64xf32>
    %744 = vector.extract_strided_slice %730 {offsets = [0, 32], sizes = [1, 64], strides = [1, 1]} : vector<1x96xf32> to vector<1x64xf32>
    %745 = vector.broadcast %744 : vector<1x64xf32> to vector<10x64xf32>
    %746 = arith.addf %743, %745 : vector<10x64xf32>
    %747 = vector.extract_strided_slice %746 {offsets = [0, 0], sizes = [10, 32], strides = [1, 1]} : vector<10x64xf32> to vector<10x32xf32>
    %748 = vector.extract_strided_slice %746 {offsets = [0, 32], sizes = [10, 32], strides = [1, 1]} : vector<10x64xf32> to vector<10x32xf32>
    %749 = vector.extract_strided_slice %740 {offsets = [0, 0], sizes = [8, 8], strides = [1, 1]} : vector<8x32xf32> to vector<8x8xf32>
    %750 = vector.extract_strided_slice %747 {offsets = [0, 0], sizes = [10, 8], strides = [1, 1]} : vector<10x32xf32> to vector<10x8xf32>
    %751 = vector.extract_strided_slice %748 {offsets = [0, 0], sizes = [10, 8], strides = [1, 1]} : vector<10x32xf32> to vector<10x8xf32>
    %cst_330 = arith.constant dense<0.000000e+00> : vector<8x10xf32>
    %752 = tpu.matmul %749, %750, %cst_330 {dimension_numbers = #tpu.dot_dimension_numbers<[1], [1], [0], [0], [0, 0, 1, 0], [], []>} : vector<8x8xf32>, vector<10x8xf32>, vector<8x10xf32> -> vector<8x10xf32>
    %cst_331 = arith.constant 0.353553385 : f32
    %753 = vector.broadcast %cst_331 : f32 to vector<8x10xf32>
    %754 = arith.mulf %752, %753 : vector<8x10xf32>
    %cst_332 = arith.constant dense<0xFF800000> : vector<8xf32>
    %755 = vector.multi_reduction <maximumf>, %754, %cst_332 [1] : vector<8x10xf32> to vector<8xf32>
    %756 = vector.shape_cast %755 : vector<8xf32> to vector<8x1xf32>
    %757 = vector.broadcast %756 : vector<8x1xf32> to vector<8x10xf32>
    %758 = arith.subf %754, %757 : vector<8x10xf32>
    %759 = math.exp %758 : vector<8x10xf32>
    %cst_333 = arith.constant dense<0.000000e+00> : vector<8xf32>
    %760 = vector.multi_reduction <add>, %759, %cst_333 [1] : vector<8x10xf32> to vector<8xf32>
    %761 = vector.shape_cast %760 : vector<8xf32> to vector<8x1xf32>
    %762 = tpu.reciprocal %761 {approx = true} : vector<8x1xf32> -> vector<8x1xf32>
    %763 = vector.broadcast %762 : vector<8x1xf32> to vector<8x10xf32>
    %764 = arith.mulf %759, %763 : vector<8x10xf32>
    %cst_334 = arith.constant dense<0.000000e+00> : vector<8x8xf32>
    %765 = tpu.matmul %764, %751, %cst_334 {dimension_numbers = #tpu.dot_dimension_numbers<[1], [0], [0], [1], [0, 0, 1, 1], [], []>} : vector<8x10xf32>, vector<10x8xf32>, vector<8x8xf32> -> vector<8x8xf32>
    %766 = vector.extract_strided_slice %740 {offsets = [0, 8], sizes = [8, 8], strides = [1, 1]} : vector<8x32xf32> to vector<8x8xf32>
    %767 = vector.extract_strided_slice %747 {offsets = [0, 8], sizes = [10, 8], strides = [1, 1]} : vector<10x32xf32> to vector<10x8xf32>
    %768 = vector.extract_strided_slice %748 {offsets = [0, 8], sizes = [10, 8], strides = [1, 1]} : vector<10x32xf32> to vector<10x8xf32>
    %cst_335 = arith.constant dense<0.000000e+00> : vector<8x10xf32>
    %769 = tpu.matmul %766, %767, %cst_335 {dimension_numbers = #tpu.dot_dimension_numbers<[1], [1], [0], [0], [0, 0, 1, 0], [], []>} : vector<8x8xf32>, vector<10x8xf32>, vector<8x10xf32> -> vector<8x10xf32>
    %cst_336 = arith.constant 0.353553385 : f32
    %770 = vector.broadcast %cst_336 : f32 to vector<8x10xf32>
    %771 = arith.mulf %769, %770 : vector<8x10xf32>
    %cst_337 = arith.constant dense<0xFF800000> : vector<8xf32>
    %772 = vector.multi_reduction <maximumf>, %771, %cst_337 [1] : vector<8x10xf32> to vector<8xf32>
    %773 = vector.shape_cast %772 : vector<8xf32> to vector<8x1xf32>
    %774 = vector.broadcast %773 : vector<8x1xf32> to vector<8x10xf32>
    %775 = arith.subf %771, %774 : vector<8x10xf32>
    %776 = math.exp %775 : vector<8x10xf32>
    %cst_338 = arith.constant dense<0.000000e+00> : vector<8xf32>
    %777 = vector.multi_reduction <add>, %776, %cst_338 [1] : vector<8x10xf32> to vector<8xf32>
    %778 = vector.shape_cast %777 : vector<8xf32> to vector<8x1xf32>
    %779 = tpu.reciprocal %778 {approx = true} : vector<8x1xf32> -> vector<8x1xf32>
    %780 = vector.broadcast %779 : vector<8x1xf32> to vector<8x10xf32>
    %781 = arith.mulf %776, %780 : vector<8x10xf32>
    %cst_339 = arith.constant dense<0.000000e+00> : vector<8x8xf32>
    %782 = tpu.matmul %781, %768, %cst_339 {dimension_numbers = #tpu.dot_dimension_numbers<[1], [0], [0], [1], [0, 0, 1, 1], [], []>} : vector<8x10xf32>, vector<10x8xf32>, vector<8x8xf32> -> vector<8x8xf32>
    %783 = vector.extract_strided_slice %740 {offsets = [0, 16], sizes = [8, 8], strides = [1, 1]} : vector<8x32xf32> to vector<8x8xf32>
    %784 = vector.extract_strided_slice %747 {offsets = [0, 16], sizes = [10, 8], strides = [1, 1]} : vector<10x32xf32> to vector<10x8xf32>
    %785 = vector.extract_strided_slice %748 {offsets = [0, 16], sizes = [10, 8], strides = [1, 1]} : vector<10x32xf32> to vector<10x8xf32>
    %cst_340 = arith.constant dense<0.000000e+00> : vector<8x10xf32>
    %786 = tpu.matmul %783, %784, %cst_340 {dimension_numbers = #tpu.dot_dimension_numbers<[1], [1], [0], [0], [0, 0, 1, 0], [], []>} : vector<8x8xf32>, vector<10x8xf32>, vector<8x10xf32> -> vector<8x10xf32>
    %cst_341 = arith.constant 0.353553385 : f32
    %787 = vector.broadcast %cst_341 : f32 to vector<8x10xf32>
    %788 = arith.mulf %786, %787 : vector<8x10xf32>
    %cst_342 = arith.constant dense<0xFF800000> : vector<8xf32>
    %789 = vector.multi_reduction <maximumf>, %788, %cst_342 [1] : vector<8x10xf32> to vector<8xf32>
    %790 = vector.shape_cast %789 : vector<8xf32> to vector<8x1xf32>
    %791 = vector.broadcast %790 : vector<8x1xf32> to vector<8x10xf32>
    %792 = arith.subf %788, %791 : vector<8x10xf32>
    %793 = math.exp %792 : vector<8x10xf32>
    %cst_343 = arith.constant dense<0.000000e+00> : vector<8xf32>
    %794 = vector.multi_reduction <add>, %793, %cst_343 [1] : vector<8x10xf32> to vector<8xf32>
    %795 = vector.shape_cast %794 : vector<8xf32> to vector<8x1xf32>
    %796 = tpu.reciprocal %795 {approx = true} : vector<8x1xf32> -> vector<8x1xf32>
    %797 = vector.broadcast %796 : vector<8x1xf32> to vector<8x10xf32>
    %798 = arith.mulf %793, %797 : vector<8x10xf32>
    %cst_344 = arith.constant dense<0.000000e+00> : vector<8x8xf32>
    %799 = tpu.matmul %798, %785, %cst_344 {dimension_numbers = #tpu.dot_dimension_numbers<[1], [0], [0], [1], [0, 0, 1, 1], [], []>} : vector<8x10xf32>, vector<10x8xf32>, vector<8x8xf32> -> vector<8x8xf32>
    %800 = vector.extract_strided_slice %740 {offsets = [0, 24], sizes = [8, 8], strides = [1, 1]} : vector<8x32xf32> to vector<8x8xf32>
    %801 = vector.extract_strided_slice %747 {offsets = [0, 24], sizes = [10, 8], strides = [1, 1]} : vector<10x32xf32> to vector<10x8xf32>
    %802 = vector.extract_strided_slice %748 {offsets = [0, 24], sizes = [10, 8], strides = [1, 1]} : vector<10x32xf32> to vector<10x8xf32>
    %cst_345 = arith.constant dense<0.000000e+00> : vector<8x10xf32>
    %803 = tpu.matmul %800, %801, %cst_345 {dimension_numbers = #tpu.dot_dimension_numbers<[1], [1], [0], [0], [0, 0, 1, 0], [], []>} : vector<8x8xf32>, vector<10x8xf32>, vector<8x10xf32> -> vector<8x10xf32>
    %cst_346 = arith.constant 0.353553385 : f32
    %804 = vector.broadcast %cst_346 : f32 to vector<8x10xf32>
    %805 = arith.mulf %803, %804 : vector<8x10xf32>
    %cst_347 = arith.constant dense<0xFF800000> : vector<8xf32>
    %806 = vector.multi_reduction <maximumf>, %805, %cst_347 [1] : vector<8x10xf32> to vector<8xf32>
    %807 = vector.shape_cast %806 : vector<8xf32> to vector<8x1xf32>
    %808 = vector.broadcast %807 : vector<8x1xf32> to vector<8x10xf32>
    %809 = arith.subf %805, %808 : vector<8x10xf32>
    %810 = math.exp %809 : vector<8x10xf32>
    %cst_348 = arith.constant dense<0.000000e+00> : vector<8xf32>
    %811 = vector.multi_reduction <add>, %810, %cst_348 [1] : vector<8x10xf32> to vector<8xf32>
    %812 = vector.shape_cast %811 : vector<8xf32> to vector<8x1xf32>
    %813 = tpu.reciprocal %812 {approx = true} : vector<8x1xf32> -> vector<8x1xf32>
    %814 = vector.broadcast %813 : vector<8x1xf32> to vector<8x10xf32>
    %815 = arith.mulf %810, %814 : vector<8x10xf32>
    %cst_349 = arith.constant dense<0.000000e+00> : vector<8x8xf32>
    %816 = tpu.matmul %815, %802, %cst_349 {dimension_numbers = #tpu.dot_dimension_numbers<[1], [0], [0], [1], [0, 0, 1, 1], [], []>} : vector<8x10xf32>, vector<10x8xf32>, vector<8x8xf32> -> vector<8x8xf32>
    %817 = tpu.concatenate %765, %782, %799, %816 in 1 : vector<8x8xf32>, vector<8x8xf32>, vector<8x8xf32>, vector<8x8xf32> -> vector<8x32xf32>
    %818 = arith.truncf %817 : vector<8x32xf32> to vector<8x32xbf16>
    %cst_350 = arith.constant dense<0.000000e+00> : vector<8x32xf32>
    %819 = tpu.matmul %818, %732, %cst_350 {dimension_numbers = #tpu.dot_dimension_numbers<[1], [0], [0], [1], [0, 0, 1, 1], [], []>} : vector<8x32xbf16>, vector<32x32xbf16>, vector<8x32xf32> -> vector<8x32xf32>
    %820 = vector.broadcast %734 : vector<1x32xf32> to vector<8x32xf32>
    %821 = arith.addf %819, %820 : vector<8x32xf32>
    %822 = arith.addf %726, %821 : vector<8x32xf32>
    %c1_351 = arith.constant 1 : index
    %c0_352 = arith.constant 0 : index
    %c0_353 = arith.constant 0 : index
    %823 = vector.load %arg27[%c1_351, %c0_352, %c0_353] : memref<2x1x32xf32, #tpu.memory_space<vmem>>, vector<1x1x32xf32>
    %824 = vector.shape_cast %823 : vector<1x1x32xf32> to vector<1x32xf32>
    %c1_354 = arith.constant 1 : index
    %c0_355 = arith.constant 0 : index
    %c0_356 = arith.constant 0 : index
    %825 = vector.load %arg28[%c1_354, %c0_355, %c0_356] : memref<2x1x32xf32, #tpu.memory_space<vmem>>, vector<1x1x32xf32>
    %826 = vector.shape_cast %825 : vector<1x1x32xf32> to vector<1x32xf32>
    %cst_357 = arith.constant dense<0.000000e+00> : vector<8xf32>
    %827 = vector.multi_reduction <add>, %822, %cst_357 [1] : vector<8x32xf32> to vector<8xf32>
    %828 = vector.shape_cast %827 : vector<8xf32> to vector<8x1xf32>
    %cst_358 = arith.constant 3.200000e+01 : f32
    %829 = vector.broadcast %cst_358 : f32 to vector<8x1xf32>
    %830 = arith.divf %828, %829 : vector<8x1xf32>
    %831 = vector.broadcast %830 : vector<8x1xf32> to vector<8x32xf32>
    %832 = arith.subf %822, %831 : vector<8x32xf32>
    %833 = arith.mulf %832, %832 : vector<8x32xf32>
    %cst_359 = arith.constant dense<0.000000e+00> : vector<8xf32>
    %834 = vector.multi_reduction <add>, %833, %cst_359 [1] : vector<8x32xf32> to vector<8xf32>
    %835 = vector.shape_cast %834 : vector<8xf32> to vector<8x1xf32>
    %cst_360 = arith.constant 3.200000e+01 : f32
    %836 = vector.broadcast %cst_360 : f32 to vector<8x1xf32>
    %837 = arith.divf %835, %836 : vector<8x1xf32>
    %cst_361 = arith.constant 9.99999974E-6 : f32
    %838 = vector.broadcast %cst_361 : f32 to vector<8x1xf32>
    %839 = arith.addf %837, %838 : vector<8x1xf32>
    %840 = math.rsqrt %839 : vector<8x1xf32>
    %841 = vector.broadcast %840 : vector<8x1xf32> to vector<8x32xf32>
    %842 = arith.mulf %832, %841 : vector<8x32xf32>
    %843 = vector.broadcast %824 : vector<1x32xf32> to vector<8x32xf32>
    %844 = arith.mulf %842, %843 : vector<8x32xf32>
    %845 = vector.broadcast %826 : vector<1x32xf32> to vector<8x32xf32>
    %846 = arith.addf %844, %845 : vector<8x32xf32>
    %c1_362 = arith.constant 1 : index
    %c0_363 = arith.constant 0 : index
    %c0_364 = arith.constant 0 : index
    %847 = vector.load %arg31[%c1_362, %c0_363, %c0_364] : memref<2x32x2048xbf16, #tpu.memory_space<vmem>>, vector<1x32x2048xbf16>
    %848 = vector.shape_cast %847 : vector<1x32x2048xbf16> to vector<32x2048xbf16>
    %c1_365 = arith.constant 1 : index
    %c0_366 = arith.constant 0 : index
    %c0_367 = arith.constant 0 : index
    %849 = vector.load %arg32[%c1_365, %c0_366, %c0_367] : memref<2x1x2048xf32, #tpu.memory_space<vmem>>, vector<1x1x2048xf32>
    %850 = vector.shape_cast %849 : vector<1x1x2048xf32> to vector<1x2048xf32>
    %c1_368 = arith.constant 1 : index
    %c0_369 = arith.constant 0 : index
    %c0_370 = arith.constant 0 : index
    %851 = vector.load %arg33[%c1_368, %c0_369, %c0_370] : memref<2x2048x32xbf16, #tpu.memory_space<vmem>>, vector<1x2048x32xbf16>
    %852 = vector.shape_cast %851 : vector<1x2048x32xbf16> to vector<2048x32xbf16>
    %c1_371 = arith.constant 1 : index
    %c0_372 = arith.constant 0 : index
    %c0_373 = arith.constant 0 : index
    %853 = vector.load %arg34[%c1_371, %c0_372, %c0_373] : memref<2x1x32xf32, #tpu.memory_space<vmem>>, vector<1x1x32xf32>
    %854 = vector.shape_cast %853 : vector<1x1x32xf32> to vector<1x32xf32>
    %855 = arith.truncf %846 : vector<8x32xf32> to vector<8x32xbf16>
    %cst_374 = arith.constant dense<0.000000e+00> : vector<8x2048xf32>
    %856 = tpu.matmul %855, %848, %cst_374 {dimension_numbers = #tpu.dot_dimension_numbers<[1], [0], [0], [1], [0, 0, 1, 1], [], []>} : vector<8x32xbf16>, vector<32x2048xbf16>, vector<8x2048xf32> -> vector<8x2048xf32>
    %857 = vector.broadcast %850 : vector<1x2048xf32> to vector<8x2048xf32>
    %858 = arith.addf %856, %857 : vector<8x2048xf32>
    %cst_375 = arith.constant 0.000000e+00 : f32
    %859 = vector.broadcast %cst_375 : f32 to vector<8x2048xf32>
    %860 = arith.maximumf %858, %859 : vector<8x2048xf32>
    %861 = arith.truncf %860 : vector<8x2048xf32> to vector<8x2048xbf16>
    %cst_376 = arith.constant dense<0.000000e+00> : vector<8x32xf32>
    %862 = tpu.matmul %861, %852, %cst_376 {dimension_numbers = #tpu.dot_dimension_numbers<[1], [0], [0], [1], [0, 0, 1, 1], [], []>} : vector<8x2048xbf16>, vector<2048x32xbf16>, vector<8x32xf32> -> vector<8x32xf32>
    %863 = vector.broadcast %854 : vector<1x32xf32> to vector<8x32xf32>
    %864 = arith.addf %862, %863 : vector<8x32xf32>
    %865 = arith.addf %846, %864 : vector<8x32xf32>
    %c1_377 = arith.constant 1 : index
    %c0_378 = arith.constant 0 : index
    %c0_379 = arith.constant 0 : index
    %866 = vector.load %arg29[%c1_377, %c0_378, %c0_379] : memref<2x1x32xf32, #tpu.memory_space<vmem>>, vector<1x1x32xf32>
    %867 = vector.shape_cast %866 : vector<1x1x32xf32> to vector<1x32xf32>
    %c1_380 = arith.constant 1 : index
    %c0_381 = arith.constant 0 : index
    %c0_382 = arith.constant 0 : index
    %868 = vector.load %arg30[%c1_380, %c0_381, %c0_382] : memref<2x1x32xf32, #tpu.memory_space<vmem>>, vector<1x1x32xf32>
    %869 = vector.shape_cast %868 : vector<1x1x32xf32> to vector<1x32xf32>
    %cst_383 = arith.constant dense<0.000000e+00> : vector<8xf32>
    %870 = vector.multi_reduction <add>, %865, %cst_383 [1] : vector<8x32xf32> to vector<8xf32>
    %871 = vector.shape_cast %870 : vector<8xf32> to vector<8x1xf32>
    %cst_384 = arith.constant 3.200000e+01 : f32
    %872 = vector.broadcast %cst_384 : f32 to vector<8x1xf32>
    %873 = arith.divf %871, %872 : vector<8x1xf32>
    %874 = vector.broadcast %873 : vector<8x1xf32> to vector<8x32xf32>
    %875 = arith.subf %865, %874 : vector<8x32xf32>
    %876 = arith.mulf %875, %875 : vector<8x32xf32>
    %cst_385 = arith.constant dense<0.000000e+00> : vector<8xf32>
    %877 = vector.multi_reduction <add>, %876, %cst_385 [1] : vector<8x32xf32> to vector<8xf32>
    %878 = vector.shape_cast %877 : vector<8xf32> to vector<8x1xf32>
    %cst_386 = arith.constant 3.200000e+01 : f32
    %879 = vector.broadcast %cst_386 : f32 to vector<8x1xf32>
    %880 = arith.divf %878, %879 : vector<8x1xf32>
    %cst_387 = arith.constant 9.99999974E-6 : f32
    %881 = vector.broadcast %cst_387 : f32 to vector<8x1xf32>
    %882 = arith.addf %880, %881 : vector<8x1xf32>
    %883 = math.rsqrt %882 : vector<8x1xf32>
    %884 = vector.broadcast %883 : vector<8x1xf32> to vector<8x32xf32>
    %885 = arith.mulf %875, %884 : vector<8x32xf32>
    %886 = vector.broadcast %867 : vector<1x32xf32> to vector<8x32xf32>
    %887 = arith.mulf %885, %886 : vector<8x32xf32>
    %888 = vector.broadcast %869 : vector<1x32xf32> to vector<8x32xf32>
    %889 = arith.addf %887, %888 : vector<8x32xf32>
    %c0_388 = arith.constant 0 : index
    %c0_389 = arith.constant 0 : index
    %890 = vector.load %arg35[%c0_388, %c0_389] : memref<1x32xf32, #tpu.memory_space<vmem>>, vector<1x32xf32>
    %c0_390 = arith.constant 0 : index
    %c0_391 = arith.constant 0 : index
    %891 = vector.load %arg36[%c0_390, %c0_391] : memref<1x32xf32, #tpu.memory_space<vmem>>, vector<1x32xf32>
    %cst_392 = arith.constant dense<0.000000e+00> : vector<8xf32>
    %892 = vector.multi_reduction <add>, %889, %cst_392 [1] : vector<8x32xf32> to vector<8xf32>
    %893 = vector.shape_cast %892 : vector<8xf32> to vector<8x1xf32>
    %cst_393 = arith.constant 3.200000e+01 : f32
    %894 = vector.broadcast %cst_393 : f32 to vector<8x1xf32>
    %895 = arith.divf %893, %894 : vector<8x1xf32>
    %896 = vector.broadcast %895 : vector<8x1xf32> to vector<8x32xf32>
    %897 = arith.subf %889, %896 : vector<8x32xf32>
    %898 = arith.mulf %897, %897 : vector<8x32xf32>
    %cst_394 = arith.constant dense<0.000000e+00> : vector<8xf32>
    %899 = vector.multi_reduction <add>, %898, %cst_394 [1] : vector<8x32xf32> to vector<8xf32>
    %900 = vector.shape_cast %899 : vector<8xf32> to vector<8x1xf32>
    %cst_395 = arith.constant 3.200000e+01 : f32
    %901 = vector.broadcast %cst_395 : f32 to vector<8x1xf32>
    %902 = arith.divf %900, %901 : vector<8x1xf32>
    %cst_396 = arith.constant 9.99999974E-6 : f32
    %903 = vector.broadcast %cst_396 : f32 to vector<8x1xf32>
    %904 = arith.addf %902, %903 : vector<8x1xf32>
    %905 = math.rsqrt %904 : vector<8x1xf32>
    %906 = vector.broadcast %905 : vector<8x1xf32> to vector<8x32xf32>
    %907 = arith.mulf %897, %906 : vector<8x32xf32>
    %908 = vector.broadcast %890 : vector<1x32xf32> to vector<8x32xf32>
    %909 = arith.mulf %907, %908 : vector<8x32xf32>
    %910 = vector.broadcast %891 : vector<1x32xf32> to vector<8x32xf32>
    %911 = arith.addf %909, %910 : vector<8x32xf32>
    %c0_397 = arith.constant 0 : index
    %c0_398 = arith.constant 0 : index
    %912 = vector.load %arg37[%c0_397, %c0_398] : memref<32x128xbf16, #tpu.memory_space<vmem>>, vector<32x128xbf16>
    %913 = arith.truncf %911 : vector<8x32xf32> to vector<8x32xbf16>
    %cst_399 = arith.constant dense<0.000000e+00> : vector<8x128xf32>
    %914 = tpu.matmul %913, %912, %cst_399 {dimension_numbers = #tpu.dot_dimension_numbers<[1], [0], [0], [1], [0, 0, 1, 1], [], []>} : vector<8x32xbf16>, vector<32x128xbf16>, vector<8x128xf32> -> vector<8x128xf32>
    %c0_400 = arith.constant 0 : index
    %c0_401 = arith.constant 0 : index
    %915 = vector.load %arg38[%c0_400, %c0_401] : memref<1x128xf32, #tpu.memory_space<vmem>>, vector<1x128xf32>
    %916 = vector.broadcast %915 : vector<1x128xf32> to vector<8x128xf32>
    %917 = arith.addf %914, %916 : vector<8x128xf32>
    %c0_402 = arith.constant 0 : index
    %c0_403 = arith.constant 0 : index
    %c0_404 = arith.constant 0 : index
    %918 = vector.load %arg39[%c0_402, %c0_403, %c0_404] : memref<1x8x128xf32, #tpu.memory_space<vmem>>, vector<1x8x128xf32>
    %919 = vector.shape_cast %918 : vector<1x8x128xf32> to vector<8x128xf32>
    %920 = vector.shape_cast %917 : vector<8x128xf32> to vector<1x8x128xf32>
    tpu.vector_store %arg39[%c0_402, %c0_403, %c0_404], %920 {strides = array<i32>} : memref<1x8x128xf32, #tpu.memory_space<vmem>>, vector<1x8x128xf32>,
    return
  }
  func.func @transform_0(%arg0: i32) -> (i32, i32, i32) {
    %c0_i32 = arith.constant 0 : i32
    %c0_i32_0 = arith.constant 0 : i32
    %c0_i32_1 = arith.constant 0 : i32
    return %arg0, %c0_i32, %c0_i32_0 : i32, i32, i32
  }
  func.func @transform_1(%arg0: i32) -> (i32, i32, i32) {
    %c0_i32 = arith.constant 0 : i32
    %c0_i32_0 = arith.constant 0 : i32
    %c0_i32_1 = arith.constant 0 : i32
    return %arg0, %c0_i32, %c0_i32_0 : i32, i32, i32
  }
  func.func @transform_2(%arg0: i32) -> (i32, i32, i32) {
    %c0_i32 = arith.constant 0 : i32
    %c0_i32_0 = arith.constant 0 : i32
    %c0_i32_1 = arith.constant 0 : i32
    %c0_i32_2 = arith.constant 0 : i32
    return %c0_i32, %c0_i32_0, %c0_i32_1 : i32, i32, i32
  }
  func.func @transform_3(%arg0: i32) -> (i32, i32, i32) {
    %c0_i32 = arith.constant 0 : i32
    %c0_i32_0 = arith.constant 0 : i32
    %c0_i32_1 = arith.constant 0 : i32
    %c0_i32_2 = arith.constant 0 : i32
    return %c0_i32, %c0_i32_0, %c0_i32_1 : i32, i32, i32
  }
  func.func @transform_4(%arg0: i32) -> (i32, i32, i32) {
    %c0_i32 = arith.constant 0 : i32
    %c0_i32_0 = arith.constant 0 : i32
    %c0_i32_1 = arith.constant 0 : i32
    %c0_i32_2 = arith.constant 0 : i32
    return %c0_i32, %c0_i32_0, %c0_i32_1 : i32, i32, i32
  }
  func.func @transform_5(%arg0: i32) -> (i32, i32, i32) {
    %c0_i32 = arith.constant 0 : i32
    %c0_i32_0 = arith.constant 0 : i32
    %c0_i32_1 = arith.constant 0 : i32
    %c0_i32_2 = arith.constant 0 : i32
    return %c0_i32, %c0_i32_0, %c0_i32_1 : i32, i32, i32
  }
  func.func @transform_6(%arg0: i32) -> (i32, i32, i32) {
    %c0_i32 = arith.constant 0 : i32
    %c0_i32_0 = arith.constant 0 : i32
    %c0_i32_1 = arith.constant 0 : i32
    %c0_i32_2 = arith.constant 0 : i32
    return %c0_i32, %c0_i32_0, %c0_i32_1 : i32, i32, i32
  }
  func.func @transform_7(%arg0: i32) -> (i32, i32, i32) {
    %c0_i32 = arith.constant 0 : i32
    %c0_i32_0 = arith.constant 0 : i32
    %c0_i32_1 = arith.constant 0 : i32
    %c0_i32_2 = arith.constant 0 : i32
    return %c0_i32, %c0_i32_0, %c0_i32_1 : i32, i32, i32
  }
  func.func @transform_8(%arg0: i32) -> (i32, i32, i32) {
    %c0_i32 = arith.constant 0 : i32
    %c0_i32_0 = arith.constant 0 : i32
    %c0_i32_1 = arith.constant 0 : i32
    %c0_i32_2 = arith.constant 0 : i32
    return %c0_i32, %c0_i32_0, %c0_i32_1 : i32, i32, i32
  }
  func.func @transform_9(%arg0: i32) -> (i32, i32, i32) {
    %c0_i32 = arith.constant 0 : i32
    %c0_i32_0 = arith.constant 0 : i32
    %c0_i32_1 = arith.constant 0 : i32
    %c0_i32_2 = arith.constant 0 : i32
    return %c0_i32, %c0_i32_0, %c0_i32_1 : i32, i32, i32
  }
  func.func @transform_10(%arg0: i32) -> (i32, i32, i32) {
    %c0_i32 = arith.constant 0 : i32
    %c0_i32_0 = arith.constant 0 : i32
    %c0_i32_1 = arith.constant 0 : i32
    %c0_i32_2 = arith.constant 0 : i32
    return %c0_i32, %c0_i32_0, %c0_i32_1 : i32, i32, i32
  }
  func.func @transform_11(%arg0: i32) -> (i32, i32, i32) {
    %c0_i32 = arith.constant 0 : i32
    %c0_i32_0 = arith.constant 0 : i32
    %c0_i32_1 = arith.constant 0 : i32
    %c0_i32_2 = arith.constant 0 : i32
    return %c0_i32, %c0_i32_0, %c0_i32_1 : i32, i32, i32
  }
  func.func @transform_12(%arg0: i32) -> (i32, i32, i32) {
    %c0_i32 = arith.constant 0 : i32
    %c0_i32_0 = arith.constant 0 : i32
    %c0_i32_1 = arith.constant 0 : i32
    %c0_i32_2 = arith.constant 0 : i32
    return %c0_i32, %c0_i32_0, %c0_i32_1 : i32, i32, i32
  }
  func.func @transform_13(%arg0: i32) -> (i32, i32, i32) {
    %c0_i32 = arith.constant 0 : i32
    %c0_i32_0 = arith.constant 0 : i32
    %c0_i32_1 = arith.constant 0 : i32
    %c0_i32_2 = arith.constant 0 : i32
    return %c0_i32, %c0_i32_0, %c0_i32_1 : i32, i32, i32
  }
  func.func @transform_14(%arg0: i32) -> (i32, i32) {
    %c0_i32 = arith.constant 0 : i32
    %c0_i32_0 = arith.constant 0 : i32
    %c0_i32_1 = arith.constant 0 : i32
    return %c0_i32, %c0_i32_0 : i32, i32
  }
  func.func @transform_15(%arg0: i32) -> (i32, i32) {
    %c0_i32 = arith.constant 0 : i32
    %c0_i32_0 = arith.constant 0 : i32
    %c0_i32_1 = arith.constant 0 : i32
    return %c0_i32, %c0_i32_0 : i32, i32
  }
  func.func @transform_16(%arg0: i32) -> (i32, i32, i32) {
    %c0_i32 = arith.constant 0 : i32
    %c0_i32_0 = arith.constant 0 : i32
    %c0_i32_1 = arith.constant 0 : i32
    %c0_i32_2 = arith.constant 0 : i32
    return %c0_i32, %c0_i32_0, %c0_i32_1 : i32, i32, i32
  }
  func.func @transform_17(%arg0: i32) -> (i32, i32, i32) {
    %c0_i32 = arith.constant 0 : i32
    %c0_i32_0 = arith.constant 0 : i32
    %c0_i32_1 = arith.constant 0 : i32
    %c0_i32_2 = arith.constant 0 : i32
    return %c0_i32, %c0_i32_0, %c0_i32_1 : i32, i32, i32
  }
  func.func @transform_18(%arg0: i32) -> (i32, i32, i32) {
    %c0_i32 = arith.constant 0 : i32
    %c0_i32_0 = arith.constant 0 : i32
    %c0_i32_1 = arith.constant 0 : i32
    %c0_i32_2 = arith.constant 0 : i32
    return %c0_i32, %c0_i32_0, %c0_i32_1 : i32, i32, i32
  }
  func.func @transform_19(%arg0: i32) -> (i32, i32, i32) {
    %c0_i32 = arith.constant 0 : i32
    %c0_i32_0 = arith.constant 0 : i32
    %c0_i32_1 = arith.constant 0 : i32
    %c0_i32_2 = arith.constant 0 : i32
    return %c0_i32, %c0_i32_0, %c0_i32_1 : i32, i32, i32
  }
  func.func @transform_20(%arg0: i32) -> (i32, i32, i32) {
    %c0_i32 = arith.constant 0 : i32
    %c0_i32_0 = arith.constant 0 : i32
    %c0_i32_1 = arith.constant 0 : i32
    %c0_i32_2 = arith.constant 0 : i32
    return %c0_i32, %c0_i32_0, %c0_i32_1 : i32, i32, i32
  }
  func.func @transform_21(%arg0: i32) -> (i32, i32, i32) {
    %c0_i32 = arith.constant 0 : i32
    %c0_i32_0 = arith.constant 0 : i32
    %c0_i32_1 = arith.constant 0 : i32
    %c0_i32_2 = arith.constant 0 : i32
    return %c0_i32, %c0_i32_0, %c0_i32_1 : i32, i32, i32
  }
  func.func @transform_22(%arg0: i32) -> (i32, i32, i32) {
    %c0_i32 = arith.constant 0 : i32
    %c0_i32_0 = arith.constant 0 : i32
    %c0_i32_1 = arith.constant 0 : i32
    %c0_i32_2 = arith.constant 0 : i32
    return %c0_i32, %c0_i32_0, %c0_i32_1 : i32, i32, i32
  }
  func.func @transform_23(%arg0: i32) -> (i32, i32, i32) {
    %c0_i32 = arith.constant 0 : i32
    %c0_i32_0 = arith.constant 0 : i32
    %c0_i32_1 = arith.constant 0 : i32
    %c0_i32_2 = arith.constant 0 : i32
    return %c0_i32, %c0_i32_0, %c0_i32_1 : i32, i32, i32
  }
  func.func @transform_24(%arg0: i32) -> (i32, i32, i32) {
    %c0_i32 = arith.constant 0 : i32
    %c0_i32_0 = arith.constant 0 : i32
    %c0_i32_1 = arith.constant 0 : i32
    %c0_i32_2 = arith.constant 0 : i32
    return %c0_i32, %c0_i32_0, %c0_i32_1 : i32, i32, i32
  }
  func.func @transform_25(%arg0: i32) -> (i32, i32, i32) {
    %c0_i32 = arith.constant 0 : i32
    %c0_i32_0 = arith.constant 0 : i32
    %c0_i32_1 = arith.constant 0 : i32
    %c0_i32_2 = arith.constant 0 : i32
    return %c0_i32, %c0_i32_0, %c0_i32_1 : i32, i32, i32
  }
  func.func @transform_26(%arg0: i32) -> (i32, i32, i32) {
    %c0_i32 = arith.constant 0 : i32
    %c0_i32_0 = arith.constant 0 : i32
    %c0_i32_1 = arith.constant 0 : i32
    %c0_i32_2 = arith.constant 0 : i32
    return %c0_i32, %c0_i32_0, %c0_i32_1 : i32, i32, i32
  }
  func.func @transform_27(%arg0: i32) -> (i32, i32, i32) {
    %c0_i32 = arith.constant 0 : i32
    %c0_i32_0 = arith.constant 0 : i32
    %c0_i32_1 = arith.constant 0 : i32
    %c0_i32_2 = arith.constant 0 : i32
    return %c0_i32, %c0_i32_0, %c0_i32_1 : i32, i32, i32
  }
  func.func @transform_28(%arg0: i32) -> (i32, i32, i32) {
    %c0_i32 = arith.constant 0 : i32
    %c0_i32_0 = arith.constant 0 : i32
    %c0_i32_1 = arith.constant 0 : i32
    %c0_i32_2 = arith.constant 0 : i32
    return %c0_i32, %c0_i32_0, %c0_i32_1 : i32, i32, i32
  }
  func.func @transform_29(%arg0: i32) -> (i32, i32, i32) {
    %c0_i32 = arith.constant 0 : i32
    %c0_i32_0 = arith.constant 0 : i32
    %c0_i32_1 = arith.constant 0 : i32
    %c0_i32_2 = arith.constant 0 : i32
    return %c0_i32, %c0_i32_0, %c0_i32_1 : i32, i32, i32
  }
  func.func @transform_30(%arg0: i32) -> (i32, i32, i32) {
    %c0_i32 = arith.constant 0 : i32
    %c0_i32_0 = arith.constant 0 : i32
    %c0_i32_1 = arith.constant 0 : i32
    %c0_i32_2 = arith.constant 0 : i32
    return %c0_i32, %c0_i32_0, %c0_i32_1 : i32, i32, i32
  }
  func.func @transform_31(%arg0: i32) -> (i32, i32, i32) {
    %c0_i32 = arith.constant 0 : i32
    %c0_i32_0 = arith.constant 0 : i32
    %c0_i32_1 = arith.constant 0 : i32
    %c0_i32_2 = arith.constant 0 : i32
    return %c0_i32, %c0_i32_0, %c0_i32_1 : i32, i32, i32
  }
  func.func @transform_32(%arg0: i32) -> (i32, i32, i32) {
    %c0_i32 = arith.constant 0 : i32
    %c0_i32_0 = arith.constant 0 : i32
    %c0_i32_1 = arith.constant 0 : i32
    %c0_i32_2 = arith.constant 0 : i32
    return %c0_i32, %c0_i32_0, %c0_i32_1 : i32, i32, i32
  }
  func.func @transform_33(%arg0: i32) -> (i32, i32, i32) {
    %c0_i32 = arith.constant 0 : i32
    %c0_i32_0 = arith.constant 0 : i32
    %c0_i32_1 = arith.constant 0 : i32
    %c0_i32_2 = arith.constant 0 : i32
    return %c0_i32, %c0_i32_0, %c0_i32_1 : i32, i32, i32
  }
  func.func @transform_34(%arg0: i32) -> (i32, i32) {
    %c0_i32 = arith.constant 0 : i32
    %c0_i32_0 = arith.constant 0 : i32
    %c0_i32_1 = arith.constant 0 : i32
    return %c0_i32, %c0_i32_0 : i32, i32
  }
  func.func @transform_35(%arg0: i32) -> (i32, i32) {
    %c0_i32 = arith.constant 0 : i32
    %c0_i32_0 = arith.constant 0 : i32
    %c0_i32_1 = arith.constant 0 : i32
    return %c0_i32, %c0_i32_0 : i32, i32
  }
  func.func @transform_36(%arg0: i32) -> (i32, i32) {
    %c0_i32 = arith.constant 0 : i32
    %c0_i32_0 = arith.constant 0 : i32
    %c0_i32_1 = arith.constant 0 : i32
    return %c0_i32, %c0_i32_0 : i32, i32
  }
  func.func @transform_37(%arg0: i32) -> (i32, i32) {
    %c0_i32 = arith.constant 0 : i32
    %c0_i32_0 = arith.constant 0 : i32
    %c0_i32_1 = arith.constant 0 : i32
    return %c0_i32, %c0_i32_0 : i32, i32
  }
  func.func @transform_38(%arg0: i32) -> (i32, i32, i32) {
    %c0_i32 = arith.constant 0 : i32
    %c0_i32_0 = arith.constant 0 : i32
    %c0_i32_1 = arith.constant 0 : i32
    return %arg0, %c0_i32, %c0_i32_0 : i32, i32, i32
  }
}

</mosaic_0001>

<bundles_post_ra>
// kernel: esoteric_multi_encoder_decoder_forward.1
= control target key start
LH: loop header
LB: loop body
LE: loop exit
PB: predicated region body
PF: predicated region fallthrough
CT: control target
= control target key end

     0   :  { %s19169_s6 = smov 1   ;;  %s19170_s10 = smov 2   ;;  %s21281_s0 = inlined_call_operand.smem [shape: u32[39], index: -1, kind: input, shape index: {}] }
   0x1   :  { %s19234_s5 = sld [smem:[%s21281_s0]]   ;;  %s19171_s14 = smov 3  }
   0x2   :  { %s19239_s9 = sld [smem:[%s21281_s0 + %s19169_s6]]   ;;  %s19172_s18 = smov 4  }
   0x3   :  { %s19244_s13 = sld [smem:[%s21281_s0 + %s19170_s10]]   ;;  %s19173_s22 = smov 5  }
   0x4   :  { %s19249_s17 = sld [smem:[%s21281_s0 + %s19171_s14]]   ;;  %s19174_s26 = smov 6  }
   0x5   :  { %s19254_s21 = sld [smem:[%s21281_s0 + %s19172_s18]]   ;;  %s19175_s30 = smov 7  }
   0x6   :  { %s19259_s25 = sld [smem:[%s21281_s0 + %s19173_s22]]   ;;  %s19176_s4 = smov 8  }
   0x7   :  { %21344 = sst [smem:[#allocation2_spill]] %s19234_s5  ;;  %s19177_s10 = smov 9  }
   0x8   :  { %21345 = sst [smem:[#allocation3_spill]] %s19239_s9  ;;  %s19178_s15 = smov 10  }
   0x9   :  { %21346 = sst [smem:[#allocation4_spill]] %s19244_s13  ;;  %s19179_s20 = smov 11  }
   0xa   :  { %21347 = sst [smem:[#allocation5_spill]] %s19249_s17  ;;  %s19181_s1 = smov 13  }
   0xb   :  { %21348 = sst [smem:[#allocation6_spill]] %s19254_s21  ;;  %s19182_s7 = smov 14  }
   0xc   :  { %21349 = sst [smem:[#allocation7_spill]] %s19259_s25  ;;  %s19184_s22 = smov 16  }
   0xd   :  { %s19264_s29 = sld [smem:[%s21281_s0 + %s19174_s26]]   ;;  %s19180_s26 = smov 12  }
   0xe   :  { %s19269_s3 = sld [smem:[%s21281_s0 + %s19175_s30]]   ;;  %s19185_s28 = smov 17  }
   0xf   :  { %s19274_s8 = sld [smem:[%s21281_s0 + %s19176_s4]]  }
  0x10   :  { %s19279_s14 = sld [smem:[%s21281_s0 + %s19177_s10]]  }
  0x11   :  { %s19284_s19 = sld [smem:[%s21281_s0 + %s19178_s15]]   ;;  %s19183_s15 = smov 15  }
  0x12   :  { %s19289_s24 = sld [smem:[%s21281_s0 + %s19179_s20]]  }
  0x13   :  { %21350 = sst [smem:[#allocation8_spill]] %s19264_s29 }
  0x14   :  { %21351 = sst [smem:[#allocation9_spill]] %s19269_s3 }
  0x15   :  { %21352 = sst [smem:[#allocation10_spill]] %s19274_s8 }
  0x16   :  { %21353 = sst [smem:[#allocation11_spill]] %s19279_s14 }
  0x17   :  { %21354 = sst [smem:[#allocation12_spill]] %s19284_s19 }
  0x18   :  { %21355 = sst [smem:[#allocation13_spill]] %s19289_s24 }
  0x19   :  { %s19294_s30 = sld [smem:[%s21281_s0 + %s19180_s26]]  }
  0x1a   :  { %s19299_s6 = sld [smem:[%s21281_s0 + %s19181_s1]]  }
  0x1b   :  { %s19304_s12 = sld [smem:[%s21281_s0 + %s19182_s7]]   ;;  %s19186_s7 = smov 18  }
  0x1c   :  { %s19309_s20 = sld [smem:[%s21281_s0 + %s19183_s15]]   ;;  %s19187_s15 = smov 19  }
  0x1d   :  { %s19314_s27 = sld [smem:[%s21281_s0 + %s19184_s22]]   ;;  %s19188_s22 = smov 20  }
  0x1e   :  { %s19319_s4 = sld [smem:[%s21281_s0 + %s19185_s28]]   ;;  %s19189_s28 = smov 21  }
  0x1f   :  { %21356 = sst [smem:[#allocation14_spill]] %s19294_s30 }
  0x20   :  { %21357 = sst [smem:[#allocation15_spill]] %s19299_s6 }
  0x21   :  { %21358 = sst [smem:[#allocation16_spill]] %s19304_s12 }
  0x22   :  { %21359 = sst [smem:[#allocation17_spill]] %s19309_s20 }
  0x23   :  { %s19324_s12 = sld [smem:[%s21281_s0 + %s19186_s7]]   ;;  %s19190_s7 = smov 22  }
  0x24   :  { %21360 = sst [smem:[#allocation18_spill]] %s19319_s4 }
  0x25   :  { %s19329_s20 = sld [smem:[%s21281_s0 + %s19187_s15]]   ;;  %s19191_s15 = smov 23  }
  0x26   :  { %s19334_s9 = sld [smem:[%s21281_s0 + %s19188_s22]]   ;;  %s19192_s22 = smov 24  }
  0x27   :  { %s19339_s4 = sld [smem:[%s21281_s0 + %s19189_s28]]   ;;  %s19193_s28 = smov 25  }
  0x29   :  { %21361 = sst [smem:[#allocation19_spill]] %s19324_s12 }
  0x2a   :  { %s19344_s12 = sld [smem:[%s21281_s0 + %s19190_s7]]   ;;  %s19194_s7 = smov 26  }
  0x2b   :  { %21362 = sst [smem:[#allocation20_spill]] %s19329_s20 }
  0x2c   :  { %21363 = sst [smem:[#allocation21_spill]] %s19334_s9 }
  0x2d   :  { %21364 = sst [smem:[#allocation22_spill]] %s19339_s4 }
  0x2e   :  { %s19349_s20 = sld [smem:[%s21281_s0 + %s19191_s15]]   ;;  %s19195_s15 = smov 27  }
  0x2f   :  { %s19354_s9 = sld [smem:[%s21281_s0 + %s19192_s22]]   ;;  %s19196_s22 = smov 28  }
  0x30   :  { %21365 = sst [smem:[#allocation23_spill]] %s19344_s12 }
  0x31   :  { %s19359_s4 = sld [smem:[%s21281_s0 + %s19193_s28]]   ;;  %s19197_s28 = smov 29  }
  0x32   :  { %s19364_s12 = sld [smem:[%s21281_s0 + %s19194_s7]]   ;;  %s19198_s7 = smov 30  }
  0x34   :  { %21366 = sst [smem:[#allocation24_spill]] %s19349_s20 }
  0x35   :  { %21367 = sst [smem:[#allocation25_spill]] %s19354_s9 }
  0x36   :  { %s19369_s20 = sld [smem:[%s21281_s0 + %s19195_s15]]   ;;  %s19199_s15 = smov 31  }
  0x37   :  { %21368 = sst [smem:[#allocation26_spill]] %s19359_s4 }
  0x38   :  { %21369 = sst [smem:[#allocation27_spill]] %s19364_s12 }
  0x39   :  { %s19374_s9 = sld [smem:[%s21281_s0 + %s19196_s22]]   ;;  %s19200_s22 = smov 32  }
  0x3a   :  { %s19379_s4 = sld [smem:[%s21281_s0 + %s19197_s28]]   ;;  %s19201_s28 = smov 33  }
  0x3b   :  { %s19384_s12 = sld [smem:[%s21281_s0 + %s19198_s7]]   ;;  %s19202_s7 = smov 34  }
  0x3c   :  { %21370 = sst [smem:[#allocation28_spill]] %s19369_s20 }
  0x3d   :  { %s19389_s20 = sld [smem:[%s21281_s0 + %s19199_s15]]   ;;  %s19203_s15 = smov 35  }
  0x3f   :  { %21371 = sst [smem:[#allocation29_spill]] %s19374_s9 }
  0x40   :  { %21372 = sst [smem:[#allocation30_spill]] %s19379_s4 }
  0x41   :  { %21373 = sst [smem:[#allocation31_spill]] %s19384_s12 }
  0x42   :  { %s19394_s9 = sld [smem:[%s21281_s0 + %s19200_s22]]   ;;  %s19204_s22 = smov 36  }
  0x43   :  { %21374 = sst [smem:[#allocation32_spill]] %s19389_s20 }
  0x44   :  { %s19399_s4 = sld [smem:[%s21281_s0 + %s19201_s28]]   ;;  %s19205_s28 = smov 37  }
  0x45   :  { %s19404_s12 = sld [smem:[%s21281_s0 + %s19202_s7]]   ;;  %s19206_s7 = smov 38  }
  0x46   :  { %s19409_s20 = sld [smem:[%s21281_s0 + %s19203_s15]]   ;;  %s19426_s15 = smov 0  }
  0x48   :  { %21375 = sst [smem:[#allocation33_spill]] %s19394_s9 }
  0x49   :  { %s19414_s9 = sld [smem:[%s21281_s0 + %s19204_s22]]  }
  0x4a   :  { %21376 = sst [smem:[#allocation34_spill]] %s19399_s4 }
  0x4b   :  { %21377 = sst [smem:[#allocation35_spill]] %s19404_s12 }
  0x4c   :  { %21378 = sst [smem:[#allocation36_spill]] %s19409_s20 }
  0x4d   :  { %s19419_s4 = sld [smem:[%s21281_s0 + %s19205_s28]]  }
  0x4e   :  { %s19424_s12 = sld [smem:[%s21281_s0 + %s19206_s7]]  }
  0x4f   :  { %21379 = sst [smem:[#allocation37_spill]] %s19414_s9 }
  0x53   :  { %21380 = sst [smem:[#allocation38_spill]] %s19419_s4 }
  0x54   :  { %21381 = sst [smem:[#allocation39_spill]] %s19424_s12 }
  0x55 LB: > { %s21382_s30 = sld [smem:[#allocation14_spill]]  ;;  %s21383_s29 = sld [smem:[#allocation8_spill]]  ;;  %s19167_s15 = sphi %s19426_s15, %s87_s15  }
  0x56   : > { %s21384_s25 = sld [smem:[#allocation7_spill]]  ;;  %s21385_s24 = sld [smem:[#allocation13_spill]] }
  0x57   : > { %s21386_s21 = sld [smem:[#allocation6_spill]]  ;;  %s21387_s19 = sld [smem:[#allocation12_spill]] }
  0x58   : > { %s21388_s17 = sld [smem:[#allocation5_spill]]  ;;  %s21389_s14 = sld [smem:[#allocation11_spill]] }
  0x59   : > { %s21390_s13 = sld [smem:[#allocation4_spill]]  ;;  %s21391_s6 = sld [smem:[#allocation15_spill]] }
  0x5a   : > { %s21392_s8 = sld [smem:[#allocation10_spill]]  ;;  %s21393_s3 = sld [smem:[#allocation9_spill]] }
  0x5b   : > { %21394 = sst [smem:[#allocation40_spill]] %s19167_s15  ;;  %s15229_s16 = sadd.s32 4294967295, %s19167_s15  }
  0x5c   : > { %p15233_p0 = scmp.ge.s32.totalorder %s19167_s15, 1  ;;  %p1060_p1 = scmp.lt.s32.totalorder %s19167_s15, 3 }
  0x5e   : > { %p1061_p2 = pnand %p15233_p0, %p1060_p1 }
  0x60   : > { %1064 = sbr.rel (%p1061_p2) target bundleno = 16821 (0x41b5), region = 172 }
  0x67   : > { %s21395_s5 = sld [smem:[#allocation2_spill]]  ;;  %v18459_v0 = vld [vmem:[%s21390_s13] sm:$0xff]   ;;  %v19207_v1 = vmov 0.0   ;;  %v18460_v2 = vld [vmem:[%s21390_s13 + $0x8] sm:$0xff]   ;;  %vm19208_vm0 = vmmov 0   ;;  %p1157_p3 = scmp.lt.s32.totalorder %s15229_s16, 1 }
  0x68   : > { %17630 = vmatprep.subr.bf16.mxu0 %v19207_v1  ;;  %17634 = vmatprep.mubr.msk.bf16.mxu0 %vm19208_vm0, %v19207_v1  ;;  %vm1202_vm1 = vcmask 261120   ;;  %v15238_v6 = vld [vmem:[%s21388_s17] ss:$0 sm:$0xff]  ;;  %vm1253_vm2 = vcmask 64512   ;;  %s21324_s22 = smov 120   ;;  %s21317_s23 = smov 80  }
  0x69   : > { %17631 = vmatpush3.bf16.msra.mxu0 %v18459_v0  ;;  %s21450_s16 = smov (!%p1157_p3, %s15229_s16), 1  ;;  %s21326_s26 = smov 96   ;;  %vm19476_vm3 = vmpackc.low %vm1253_vm2, %vm1253_vm2  ;;  %vm1343_vm4 = vcmask 74752   ;;  %vm1339_vm5 = vcmask 80896   ;;  %vm1374_vm6 = vcmask 1041408   ;;  %vm19216_vm7 = vmmov 1  }
  0x6a   : > { %17632 = vmatprep.subr.bf16.mxu0 %v19207_v1  ;;  %21396 = sst [smem:[#allocation41_spill]] %s21450_s16  ;;  %s16736_s0 = sshll.u32 %s21450_s16, 4  ;;  %vm19513_vm8 = vmpackc.low %vm1374_vm6, %vm19216_vm7  ;;  %vm2087_vm9 = vcmask 130048   ;;  %vm2090_vm10 = vcmask 195584   ;;  %vm2163_vm11 = vcmask 254976  }
  0x6b   : > { %s21322_s28 = smov 112   ;;  %s21320_s1 = smov 88  }
  0x6c   : > { %s21309_s2 = smov 56   ;;  %s21307_s7 = smov 64  }
  0x6d   : > { %17633 = vmatpush3.bf16.msra.mxu0 %v18460_v2  ;;  %s19444_s18 = scalar_lea.vmem %s21395_s5, %s16736_s0  ;;  %s21303_s10 = smov 48  }
  0x6e   : > { %v1171_v3 = vld [vmem:[%s19444_s18] sm:$0xff]  ;;  %v1172_v4 = vld [vmem:[%s19444_s18 + $0x8] sm:$0x3]  ;;  %s21299_s11 = smov 72   ;;  %s21301_s0 = smov 104  }
  0x6f   : > { %v1183_v5 = vpack.c.bf16 %v1172_v4, %v1171_v3  ;;  %s21414_s5 = sld [smem:[#allocation20_spill]]  ;;  %s21428_s15 = sld [smem:[#allocation27_spill]] }
  0x71   : > { %17635 = vmatmul.mubr.msk.bf16.vlgmr.msra.gmra.mrb[0].mxu0 %vm1202_vm1, %v1183_v5 }
  0x75   : > { %s21429_s12 = smov %s21428_s15 }
 0x144   : > { %v1240_v7 = vpop.f32.mrb[0].mxu0 }
 0x145   : > { %v19450_v8 = vadd.f32 %v15238_v6, %v1240_v7  ;;  %v17636_v9 = vpop.f32.mrb[1].mxu0 }
 0x146   : > { %v1243_v10 = vpop.f32.mrb[2].mxu0 }
 0x147   : > { %v19452_v11 = vadd.f32 %v15238_v6, %v1243_v10  ;;  %1452 = vrot.lane.b32.xlu1 %v19450_v8, %s21324_s22  ;;  %v17637_v12 = vpop.f32.mrb[3].mxu0  ;;  %17642 = vmatprep.mubr.msk.f32.mxu1 %vm1253_vm2, %v19450_v8 }
 0x149   : > { %v19460_v13 = vpack.i.bf16 %v19452_v11, %v19450_v8 }
 0x14b   : > { %18290 = vrot.lane.b32.xlu1 %v19460_v13, %s21317_s23  ;;  %18280 = vrot.lane.b32.xlu0 %v19460_v13, %s21326_s26 }
 0x14f   : > { %1655 = vrot.lane.b32.xlu1 %v19450_v8, %s21322_s28  ;;  %18285 = vrot.lane.b32.xlu0 %v19460_v13, %s21320_s1 }
 0x153   : > { %1454 = vrot.lane.b32.xlu0 %v19452_v11, %s21324_s22 }
 0x157   : > { %1657 = vrot.lane.b32.xlu0 %v19452_v11, %s21322_s28 }
 0x1b9   : > { %v1453_v15 = vpop.permute.xlu1 %1452 }
 0x1ba   : > { %17656 = vmatprep.mubr.msk.f32.mxu0 %vm1253_vm2, %v1453_v15 }
 0x1bd   : > { %v18281_v16 = vpop.permute.xlu0 %18280  ;;  %v18291_v19 = vpop.permute.xlu1 %18290 }
 0x1be   : > { %v18283_v17 = vunpack.i.h.bf16 %v18281_v16  ;;  %v18282_v18 = vunpack.i.l.bf16 %v18281_v16  ;;  %v18293_v22 = vunpack.i.h.bf16 %v18291_v19  ;;  %v18292_v23 = vunpack.i.l.bf16 %v18291_v19 }
 0x1c0   : > { %v18054_v20 = vpack.c.bf16 %v18283_v17, %v18282_v18  ;;  %v18078_v27 = vpack.c.bf16 %v18293_v22, %v18292_v23 }
 0x1c1   : > { %v18286_v21 = vpop.permute.xlu0 %18285  ;;  %v1656_v29 = vpop.permute.xlu1 %1655 }
 0x1c2   : > { %v18288_v24 = vunpack.i.h.bf16 %v18286_v21  ;;  %v18287_v25 = vunpack.i.l.bf16 %v18286_v21  ;;  %18056 = vmatprep.subr.msk.bf16.mxu1 %vm19476_vm3, %v18054_v20 }
 0x1c3   : > { %18059 = vmatpush3.bf16.xpose.msk.msra.mxu1 %vm19476_vm3, %v18054_v20 }
 0x1c4   : > { %v18066_v26 = vpack.c.bf16 %v18288_v24, %v18287_v25 }
 0x1c5   : > { %v1455_v28 = vpop.permute.xlu0 %1454 }
 0x1c6   : > { %18068 = vmatprep.subr.msk.bf16.mxu0 %vm19476_vm3, %v18066_v26 }
 0x1c7   : > { %18071 = vmatpush3.bf16.xpose.msk.msra.mxu0 %vm19476_vm3, %v18066_v26 }
 0x1c8   : > { %18080 = vmatprep.subr.msk.bf16.mxu0 %vm19476_vm3, %v18078_v27 }
 0x1c9   : > { %v1658_v30 = vpop.permute.xlu0 %1657 }
 0x1ca   : > { %17643 = vmatmul.mubr.msk.f32.vlgmr.msra.gmra.mrb[0].mxu1 %vm1253_vm2, %v19452_v11 }
 0x1ce   : > { %17657 = vmatmul.mubr.msk.f32.vlgmr.msra.gmra.mrb[4].mxu0 %vm1253_vm2, %v1455_v28 }
 0x1cf   : > { %18083 = vmatpush3.bf16.xpose.msk.msra.mxu0 %vm19476_vm3, %v18078_v27  ;;  %17670 = vmatprep.mubr.msk.f32.mxu0 %vm1253_vm2, %v1656_v29 }
 0x1d6   : > { %17671 = vmatmul.mubr.msk.f32.vlgmr.msra.gmra.mrb[6].mxu0 %vm1253_vm2, %v1658_v30 }
 0x29d   : > { %v17644_v31 = vpop.f32.mrb[0].mxu1 }
 0x29e   : > { %v1338_v32 = vmul.f32 0.35355338, %v17644_v31  ;;  %v1328_v33 = vpop.f32.mrb[1].mxu1 }
 0x29f   : > { %v1337_v34 = vmul.f32 0.35355338, %v1328_v33 }
 0x2a0   : > { %v1344_v35 = vsel %vm1343_vm4, %v1338_v32, -inf }
 0x2a1   : > { %1345 = vmax.xlane.f32.xlu0 %v1344_v35  ;;  %v17658_v36 = vpop.f32.mrb[4].mxu0  ;;  %v1340_v37 = vsel %vm1339_vm5, %v1337_v34, -inf }
 0x2a2   : > { %v1544_v38 = vmul.f32 0.35355338, %v17658_v36  ;;  %1341 = vmax.xlane.f32.xlu1 %v1340_v37  ;;  %v1534_v39 = vpop.f32.mrb[5].mxu0 }
 0x2a3   : > { %v1543_v40 = vmul.f32 0.35355338, %v1534_v39 }
 0x2a4   : > { %v1548_v41 = vsel %vm1343_vm4, %v1544_v38, -inf }
 0x2a5   : > { %v1545_v42 = vsel %vm1339_vm5, %v1543_v40, -inf }
 0x2a6   : > { %1549 = vmax.xlane.f32.xlu1 %v1548_v41  ;;  %1546 = vmax.xlane.f32.xlu0 %v1545_v42 }
 0x2a9   : > { %v17672_v43 = vpop.f32.mrb[6].mxu0 }
 0x2aa   : > { %v19502_v44 = vmul.f32 0.35355338, %v17672_v43  ;;  %v1737_v45 = vpop.f32.mrb[7].mxu0 }
 0x2ab   : > { %v1746_v46 = vmul.f32 0.35355338, %v1737_v45 }
 0x2ac   : > { %v1751_v47 = vsel %vm1343_vm4, %v19502_v44, -inf }
 0x2ad   : > { %1752 = vmax.xlane.f32.xlu1 %v1751_v47  ;;  %v1748_v48 = vsel %vm1339_vm5, %v1746_v46, -inf }
 0x2ae   : > { %1749 = vmax.xlane.f32.xlu0 %v1748_v48 }
 0x2be   : > { %18300 = vrot.lane.b32.xlu1 %v19460_v13, %s21309_s2 }
 0x2c4   : > { %18295 = vrot.lane.b32.xlu0 %v19460_v13, %s21307_s7 }
 0x32e   : > { %v1346_v49 = vpop.xlane.xlu0 %1345 }
 0x32f   : > { %v1348_v50 = vsub.f32 %v1338_v32, %v1346_v49  ;;  %v1342_v51 = vpop.xlane.xlu1 %1341 }
 0x330   : > { %v1347_v52 = vsub.f32 %v1337_v34, %v1342_v51 }
 0x331   : > { %v1351_v53 = vmul.f32 1.442695, %v1348_v50 }
 0x332   : > { %v1349_v54 = vmul.f32 1.442695, %v1347_v52 }
 0x333   : > { %18997 = vpow2.f32 %v1351_v53  ;;  %v1550_v55 = vpop.xlane.xlu1 %1549  ;;  %v1547_v56 = vpop.xlane.xlu0 %1546 }
 0x334   : > { %18999 = vpow2.f32 %v1349_v54  ;;  %v1552_v57 = vsub.f32 %v1544_v38, %v1550_v55  ;;  %v1551_v58 = vsub.f32 %v1543_v40, %v1547_v56 }
 0x336   : > { %v1555_v59 = vmul.f32 1.442695, %v1552_v57  ;;  %v1553_v60 = vmul.f32 1.442695, %v1551_v58 }
 0x338   : > { %19001 = vpow2.f32 %v1555_v59 }
 0x339   : > { %19003 = vpow2.f32 %v1553_v60 }
 0x33a   : > { %v1753_v61 = vpop.xlane.xlu1 %1752 }
 0x33b   : > { %v1750_v62 = vpop.xlane.xlu0 %1749  ;;  %v1755_v25 = vsub.f32 %v19502_v44, %v1753_v61 }
 0x33c   : > { %v1754_v63 = vsub.f32 %v1746_v46, %v1750_v62 }
 0x33d   : > { %v18998_v0 = vpop.eup %18997  ;;  %v1758_v26 = vmul.f32 1.442695, %v1755_v25 }
 0x33e   : > { %v19000_v2 = vpop.eup %18999  ;;  %v1756_v3 = vmul.f32 1.442695, %v1754_v63  ;;  %v18301_v4 = vpop.permute.xlu1 %18300  ;;  %v1356_v5 = vsel %vm1343_vm4, %v18998_v0, 0.0 }
 0x33f   : > { %v18303_v6 = vunpack.i.h.bf16 %v18301_v4  ;;  %1357 = vadd.xlane.f32.xlu1 %v1356_v5  ;;  %v18296_v7 = vpop.permute.xlu0 %18295  ;;  %v1353_v9 = vsel %vm1339_vm5, %v19000_v2, 0.0  ;;  %v18302_v10 = vunpack.i.l.bf16 %v18301_v4 }
 0x340   : > { %19005 = vpow2.f32 %v1756_v3  ;;  %v18298_v12 = vunpack.i.h.bf16 %v18296_v7  ;;  %v18297_v15 = vunpack.i.l.bf16 %v18296_v7  ;;  %1354 = vadd.xlane.f32.xlu0 %v1353_v9 }
 0x341   : > { %v18072_v21 = vpack.c.bf16 %v18303_v6, %v18302_v10  ;;  %19007 = vpow2.f32 %v1758_v26 }
 0x342   : > { %v19002_v17 = vpop.eup %19001  ;;  %v18060_v18 = vpack.c.bf16 %v18298_v12, %v18297_v15 }
 0x343   : > { %v19004_v19 = vpop.eup %19003  ;;  %v1560_v20 = vsel %vm1343_vm4, %v19002_v17, 0.0 }
 0x344   : > { %1561 = vadd.xlane.f32.xlu1 %v1560_v20  ;;  %v1557_v22 = vsel %vm1339_vm5, %v19004_v19, 0.0  ;;  %18062 = vmatprep.subr.msk.bf16.mxu1 %vm19513_vm8, %v18060_v18 }
 0x345   : > { %1558 = vadd.xlane.f32.xlu0 %v1557_v22  ;;  %18065 = vmatpush3.bf16.msk.msra.mxu1 %vm19513_vm8, %v18060_v18 }
 0x346   : > { %18074 = vmatprep.subr.msk.bf16.mxu1 %vm19513_vm8, %v18072_v21 }
 0x34a   : > { %v19006_v23 = vpop.eup %19005 }
 0x34b   : > { %v1760_v24 = vsel %vm1339_vm5, %v19006_v23, 0.0  ;;  %v19008_v27 = vpop.eup %19007 }
 0x34c   : > { %1761 = vadd.xlane.f32.xlu0 %v1760_v24  ;;  %v1763_v28 = vsel %vm1343_vm4, %v19008_v27, 0.0 }
 0x355   : > { %18305 = vrot.lane.b32.xlu1 %v19460_v13, %s21303_s10  ;;  %s21315_s10 = smov 40  }
 0x362   : > { %18310 = vrot.lane.b32.xlu0 %v19460_v13, %s21299_s11  ;;  %s21305_s11 = smov 8  }
 0x366   : > { %1860 = vrot.lane.b32.xlu0 %v19452_v11, %s21301_s0 }
 0x379   : > { %1764 = vadd.xlane.f32.xlu1 %v1763_v28 }
 0x38a   : > { %1858 = vrot.lane.b32.xlu1 %v19450_v8, %s21301_s0  ;;  %s21311_s0 = smov 16  }
 0x3cc   : > { %v1358_v29 = vpop.xlane.xlu1 %1357 }
 0x3cd   : > { %19009 = vrcp.f32 %v1358_v29  ;;  %v1355_v30 = vpop.xlane.xlu0 %1354 }
 0x3ce   : > { %19011 = vrcp.f32 %v1355_v30  ;;  %v18461_v30 = vld [vmem:[%s21386_s21] sm:$0xff]  }
 0x3d1   : > { %v1562_v31 = vpop.xlane.xlu1 %1561 }
 0x3d2   : > { %19013 = vrcp.f32 %v1562_v31  ;;  %v1559_v32 = vpop.xlane.xlu0 %1558  ;;  %v18462_v31 = vld [vmem:[%s21386_s21 + $0x8] sm:$0xff]  }
 0x3d3   : > { %19015 = vrcp.f32 %v1559_v32 }
 0x3d5   : > { %v18306_v33 = vpop.permute.xlu1 %18305 }
 0x3d6   : > { %v18308_v35 = vunpack.i.h.bf16 %v18306_v33  ;;  %v18307_v36 = vunpack.i.l.bf16 %v18306_v33 }
 0x3d7   : > { %v19010_v34 = vpop.eup %19009 }
 0x3d8   : > { %v19012_v11 = vpop.eup %19011  ;;  %v1362_v39 = vmul.f32 %v19010_v34, %v18998_v0  ;;  %v18084_v40 = vpack.c.bf16 %v18308_v35, %v18307_v36 }
 0x3d9   : > { %v1762_v37 = vpop.xlane.xlu0 %1761  ;;  %v1361_v38 = vmul.f32 %v19012_v11, %v19000_v2 }
 0x3da   : > { %19017 = vrcp.f32 %v1762_v37 }
 0x3db   : > { %17649 = vmatprep.mubr.msk.f32.mxu1 %vm1339_vm5, %v1361_v38 }
 0x3dc   : > { %v19014_v8 = vpop.eup %19013  ;;  %17650 = vmatmul.mubr.msk.f32.vlgmr.msra.gmra.mrb[2].mxu1 %vm1339_vm5, %v1362_v39 }
 0x3dd   : > { %v19016_v41 = vpop.eup %19015  ;;  %18077 = vmatpush3.bf16.msk.msra.mxu1 %vm19513_vm8, %v18072_v21  ;;  %v18311_v42 = vpop.permute.xlu0 %18310  ;;  %v1566_v43 = vmul.f32 %v19014_v8, %v19002_v17 }
 0x3de   : > { %v18313_v44 = vunpack.i.h.bf16 %v18311_v42  ;;  %v18312_v45 = vunpack.i.l.bf16 %v18311_v42  ;;  %18086 = vmatprep.subr.msk.bf16.mxu1 %vm19513_vm8, %v18084_v40  ;;  %v1565_v46 = vmul.f32 %v19016_v41, %v19004_v19 }
 0x3e0   : > { %v18090_v47 = vpack.c.bf16 %v18313_v44, %v18312_v45  ;;  %17663 = vmatprep.mubr.msk.f32.mxu1 %vm1339_vm5, %v1565_v46 }
 0x3e1   : > { %17664 = vmatmul.mubr.msk.f32.vlgmr.msra.gmra.mrb[4].mxu1 %vm1339_vm5, %v1566_v43  ;;  %v1861_v54 = vpop.permute.xlu0 %1860 }
 0x3e2   : > { %18089 = vmatpush3.bf16.msk.msra.mxu1 %vm19513_vm8, %v18084_v40 }
 0x3e3   : > { %18092 = vmatprep.subr.msk.bf16.mxu1 %vm19476_vm3, %v18090_v47 }
 0x3e4   : > { %v19018_v48 = vpop.eup %19017 }
 0x3e5   : > { %v1768_v49 = vmul.f32 %v19018_v48, %v19006_v23 }
 0x3e7   : > { %17677 = vmatprep.mubr.msk.f32.mxu1 %vm1339_vm5, %v1768_v49  ;;  %v15270_v49 = vld [vmem:[%s21384_s25] ss:$0 sm:$0xff] }
 0x406   : > { %v1765_v50 = vpop.xlane.xlu1 %1764 }
 0x407   : > { %19019 = vrcp.f32 %v1765_v50 }
 0x40a   : > { %v1859_v53 = vpop.permute.xlu1 %1858 }
 0x411   : > { %v19020_v51 = vpop.eup %19019 }
 0x412   : > { %v1769_v52 = vmul.f32 %v19020_v51, %v19008_v27 }
 0x414   : > { %17678 = vmatmul.mubr.msk.f32.vlgmr.msra.gmra.mrb[6].mxu1 %vm1339_vm5, %v1769_v52 }
 0x415   : > { %18095 = vmatpush3.bf16.xpose.msk.msra.mxu1 %vm19476_vm3, %v18090_v47  ;;  %17684 = vmatprep.mubr.msk.f32.mxu1 %vm1253_vm2, %v1859_v53 }
 0x41c   : > { %17685 = vmatmul.mubr.msk.f32.vlgmr.msra.gmra.mrb[8].mxu1 %vm1253_vm2, %v1861_v54 }
 0x4af   : > { %v19554_v55 = vpop.f32.mrb[2].mxu1 }
 0x4b0   : > { %v19556_v56 = vpop.f32.mrb[3].mxu1 }
 0x4b4   : > { %v17665_v57 = vpop.f32.mrb[4].mxu1 }
 0x4b5   : > { %v1646_v58 = vpop.f32.mrb[5].mxu1 }
 0x4b6   : > { %v18319_v59 = vpack.i.bf16 %v17665_v57, %v1646_v58 }
 0x4e7   : > { %v17679_v60 = vpop.f32.mrb[6].mxu1 }
 0x4e8   : > { %v1849_v61 = vpop.f32.mrb[7].mxu1 }
 0x4e9   : > { %v18324_v62 = vpack.i.bf16 %v17679_v60, %v1849_v61 }
 0x4ef   : > { %v17686_v63 = vpop.f32.mrb[8].mxu1 }
 0x4f0   : > { %v1950_v0 = vmul.f32 0.35355338, %v17686_v63  ;;  %v1940_v2 = vpop.f32.mrb[9].mxu1 }
 0x4f1   : > { %v1949_v3 = vmul.f32 0.35355338, %v1940_v2 }
 0x4f2   : > { %v1954_v4 = vsel %vm1343_vm4, %v1950_v0, -inf }
 0x4f3   : > { %1955 = vmax.xlane.f32.xlu0 %v1954_v4  ;;  %v1951_v5 = vsel %vm1339_vm5, %v1949_v3, -inf }
 0x4f4   : > { %1952 = vmax.xlane.f32.xlu1 %v1951_v5 }
 0x580   : > { %v1956_v6 = vpop.xlane.xlu0 %1955 }
 0x581   : > { %v1958_v7 = vsub.f32 %v1950_v0, %v1956_v6  ;;  %v1953_v9 = vpop.xlane.xlu1 %1952 }
 0x582   : > { %v1957_v10 = vsub.f32 %v1949_v3, %v1953_v9 }
 0x583   : > { %v1961_v12 = vmul.f32 1.442695, %v1958_v7 }
 0x584   : > { %v1959_v15 = vmul.f32 1.442695, %v1957_v10  ;;  %v2204_v10 = vld [vmem:[%s21392_s8] sm:$0xff] }
 0x585   : > { %19021 = vpow2.f32 %v1961_v12  ;;  %v2212_v12 = vld [vmem:[%s21392_s8 + $0x40] sm:$0xff] }
 0x586   : > { %19023 = vpow2.f32 %v1959_v15  ;;  %v2205_v15 = vld [vmem:[%s21392_s8 + $0x8] sm:$0xff] }
 0x58f   : > { %v19022_v17 = vpop.eup %19021 }
 0x590   : > { %v19024_v18 = vpop.eup %19023  ;;  %v1966_v19 = vsel %vm1343_vm4, %v19022_v17, 0.0 }
 0x591   : > { %1967 = vadd.xlane.f32.xlu1 %v1966_v19  ;;  %v1963_v20 = vsel %vm1339_vm5, %v19024_v18, 0.0  ;;  %v15276_v19 = vcombine.low %v2204_v10, %v2212_v12 }
 0x592   : > { %1964 = vadd.xlane.f32.xlu0 %v1963_v20 }
 0x5a2   : > { %18320 = vrot.lane.b32.xlu1 %v18319_v59, %s21305_s11  ;;  %s21313_s11 = smov 24   ;;  %v19160_v59 = vld [vmem:[%s19444_s18 + $0x8] sm:$0x3] }
 0x5a6   : > { %18325 = vrot.lane.b32.xlu1 %v18324_v62, %s21311_s0 }
 0x5a8   : > { %18315 = vrot.lane.b32.xlu0 %v19460_v13, %s21315_s10 }
 0x61e   : > { %v1968_v21 = vpop.xlane.xlu1 %1967 }
 0x61f   : > { %19025 = vrcp.f32 %v1968_v21  ;;  %v1965_v22 = vpop.xlane.xlu0 %1964 }
 0x620   : > { %19027 = vrcp.f32 %v1965_v22  ;;  %v2220_v22 = vld [vmem:[%s21392_s8 + $0x80] sm:$0xff] }
 0x622   : > { %v18321_v11 = vpop.permute.xlu1 %18320 }
 0x623   : > { %v18316_v23 = vpop.permute.xlu0 %18315  ;;  %v18323_v36 = vunpack.i.h.bf16 %v18321_v11  ;;  %v18322_v37 = vunpack.i.l.bf16 %v18321_v11 }
 0x624   : > { %v18318_v24 = vunpack.i.h.bf16 %v18316_v23  ;;  %v18317_v25 = vunpack.i.l.bf16 %v18316_v23  ;;  %v2228_v23 = vld [vmem:[%s21392_s8 + $0xc0] sm:$0xff] }
 0x625   : > { %v2086_v40 = vsel %vm1253_vm2, %v19554_v55, %v18323_v36  ;;  %v2085_v41 = vsel %vm1253_vm2, %v19556_v56, %v18322_v37  ;;  %v19159_v56 = vld [vmem:[%s19444_s18] sm:$0xff]  ;;  %s21401_s18 = smov 48  }
 0x626   : > { %v18096_v26 = vpack.c.bf16 %v18318_v24, %v18317_v25  ;;  %v18326_v35 = vpop.permute.xlu1 %18325  ;;  %v2221_v24 = vld [vmem:[%s21392_s8 + $0x88] sm:$0xff]  ;;  %v15293_v25 = vcombine.high %v2220_v22, %v2228_v23 }
 0x627   : > { %v18328_v38 = vunpack.i.h.bf16 %v18326_v35  ;;  %v18327_v39 = vunpack.i.l.bf16 %v18326_v35 }
 0x628   : > { %18098 = vmatprep.subr.msk.bf16.mxu0 %vm19513_vm8, %v18096_v26 }
 0x629   : > { %v19026_v27 = vpop.eup %19025  ;;  %18101 = vmatpush3.bf16.msk.msra.mxu0 %vm19513_vm8, %v18096_v26  ;;  %v2088_v44 = vsel %vm2087_vm9, %v2085_v41, %v18327_v39  ;;  %v2089_v45 = vsel %vm2087_vm9, %v2086_v40, %v18328_v38  ;;  %v2229_v26 = vld [vmem:[%s21392_s8 + $0xc8] sm:$0xff] }
 0x62a   : > { %v19028_v28 = vpop.eup %19027  ;;  %17694 = vmatprep.subr.bf16.mxu0 %v19207_v1  ;;  %v1972_v29 = vmul.f32 %v19026_v27, %v19022_v17  ;;  %v15277_v17 = vcombine.high %v2204_v10, %v2212_v12  ;;  %v15292_v27 = vcombine.low %v2220_v22, %v2228_v23 }
 0x62b   : > { %v1971_v13 = vmul.f32 %v19028_v28, %v19024_v18  ;;  %v2213_v18 = vld [vmem:[%s21392_s8 + $0x48] sm:$0xff]  ;;  %v15294_v28 = vcombine.low %v2221_v24, %v2229_v26 }
 0x62c   : > { %v15278_v20 = vcombine.low %v2205_v15, %v2213_v18  ;;  %v15279_v21 = vcombine.high %v2205_v15, %v2213_v18  ;;  %2741 = vmatprep.subr.bf16.mxu1 %v15277_v17  ;;  %v2210_v17 = vld [vmem:[%s21392_s8 + $0x30] sm:$0xff] }
 0x62d   : > { %17691 = vmatprep.mubr.msk.f32.mxu0 %vm1339_vm5, %v1971_v13  ;;  %2742 = vmatpush1.bf16.msra.mxu1 %v15276_v19  ;;  %v15295_v13 = vcombine.high %v2221_v24, %v2229_v26  ;;  %v2218_v18 = vld [vmem:[%s21392_s8 + $0x70] sm:$0xff]  ;;  %v2211_v19 = vld [vmem:[%s21392_s8 + $0x38] sm:$0xff] }
 0x62e   : > { %17692 = vmatmul.mubr.msk.f32.vlgmr.msra.gmra.mrb[8].mxu0 %vm1339_vm5, %v1972_v29  ;;  %2743 = vmatprep.subr.bf16.mxu1 %v15293_v25  ;;  %v2206_v29 = vld [vmem:[%s21392_s8 + $0x10] sm:$0xff]  ;;  %v15289_v23 = vcombine.high %v2210_v17, %v2218_v18 }
 0x62f   : > { %17698 = vmatprep.mubr.msk.bf16.mxu0 %vm19208_vm0, %v19207_v1  ;;  %17695 = vmatpush3.bf16.msra.mxu0 %v18461_v30  ;;  %v2214_v30 = vld [vmem:[%s21392_s8 + $0x50] sm:$0xff] }
 0x630   : > { %17696 = vmatprep.subr.bf16.mxu0 %v19207_v1  ;;  %v15280_v11 = vcombine.low %v2206_v29, %v2214_v30  ;;  %v2226_v25 = vld [vmem:[%s21392_s8 + $0xb0] sm:$0xff] }
 0x631   : > { %2744 = vmatpush1.bf16.msra.mxu1 %v15292_v27  ;;  %v2234_v26 = vld [vmem:[%s21392_s8 + $0xf0] sm:$0xff]  ;;  %v2227_v27 = vld [vmem:[%s21392_s8 + $0xb8] sm:$0xff] }
 0x633   : > { %17697 = vmatpush3.bf16.msra.mxu0 %v18462_v31  ;;  %v2207_v31 = vld [vmem:[%s21392_s8 + $0x18] sm:$0xff] }
 0x634   : > { %2784 = vmatprep.subr.bf16.mxu0 %v15279_v21 }
 0x701   : > { %v17693_v32 = vpop.f32.mrb[8].mxu0 }
 0x702   : > { %v2052_v33 = vpop.f32.mrb[9].mxu0 }
 0x703   : > { %v18329_v34 = vpack.i.bf16 %v17693_v32, %v2052_v33  ;;  %v19224_v32 = vmov 0   ;;  %v15281_v33 = vcombine.high %v2206_v29, %v2214_v30  ;;  %v15305_v30 = vcombine.high %v2226_v25, %v2234_v26 }
 0x704   : > { %2773 = vmatprep.mubr.bf16.mxu1 %v19224_v32 }
 0x705   : > { %18330 = vrot.lane.b32.xlu0 %v18329_v34, %s21313_s11  ;;  %v2215_v34 = vld [vmem:[%s21392_s8 + $0x58] sm:$0xff]  ;;  %2827 = vmatprep.subr.bf16.mxu1 %v15281_v33  ;;  %v15304_v33 = vcombine.low %v2226_v25, %v2234_v26 }
 0x706   : > { %v15282_v35 = vcombine.low %v2207_v31, %v2215_v34  ;;  %v15283_v36 = vcombine.high %v2207_v31, %v2215_v34 }
 0x777   : > { %v18331_v8 = vpop.permute.xlu0 %18330 }
 0x778   : > { %v18333_v42 = vunpack.i.h.bf16 %v18331_v8  ;;  %v18332_v43 = vunpack.i.l.bf16 %v18331_v8 }
 0x77a   : > { %v2091_v46 = vsel %vm2090_vm10, %v2088_v44, %v18332_v43  ;;  %v2092_v47 = vsel %vm2090_vm10, %v2089_v45, %v18333_v42  ;;  %v15274_v43 = vld [vmem:[%s21383_s29] ss:$0 sm:$0xff] }
 0x77b   : > { %v2093_v48 = vpack.c.bf16 %v2092_v47, %v2091_v46 }
 0x77d   : > { %17699 = vmatmul.mubr.msk.bf16.vlgmr.msra.gmra.mrb[12].mxu0 %vm1202_vm1, %v2093_v48  ;;  %v15275_v48 = vld [vmem:[%s21393_s3] ss:$0 sm:$0xff] }
 0x77e   : > { %2785 = vmatpush1.bf16.msra.mxu0 %v15278_v20  ;;  %2816 = vmatprep.mubr.bf16.mxu0 %v19224_v32  ;;  %v2219_v20 = vld [vmem:[%s21392_s8 + $0x78] sm:$0xff] }
 0x77f   : > { %2786 = vmatprep.subr.bf16.mxu0 %v15295_v13  ;;  %v15291_v24 = vcombine.high %v2211_v19, %v2219_v20  ;;  %v15288_v13 = vcombine.low %v2210_v17, %v2218_v18  ;;  %v15290_v29 = vcombine.low %v2211_v19, %v2219_v20 }
 0x782   : > { %2787 = vmatpush1.bf16.msra.mxu0 %v15294_v28  ;;  %v2235_v28 = vld [vmem:[%s21392_s8 + $0xf8] sm:$0xff] }
 0x783   : > { %2870 = vmatprep.subr.bf16.mxu0 %v15283_v36  ;;  %v15307_v31 = vcombine.high %v2227_v27, %v2235_v28  ;;  %v15306_v34 = vcombine.low %v2227_v27, %v2235_v28  ;;  %v18465_v36 = vld [vmem:[%s21387_s19] sm:$0xff]  }
 0x850   : > { %v2149_v50 = vpop.f32.mrb[12].mxu0 }
 0x851   : > { %v2150_v51 = vadd.f32 %v15270_v49, %v2149_v50  ;;  %v17700_v52 = vpop.f32.mrb[13].mxu0  ;;  %v2222_v50 = vld [vmem:[%s21392_s8 + $0x90] sm:$0xff] }
 0x852   : > { %v2152_v53 = vpop.f32.mrb[14].mxu0  ;;  %v2223_v52 = vld [vmem:[%s21392_s8 + $0x98] sm:$0xff] }
 0x853   : > { %v2153_v54 = vadd.f32 %v15270_v49, %v2152_v53  ;;  %v17701_v55 = vpop.f32.mrb[15].mxu0  ;;  %v2156_v57 = vadd.f32 %v19159_v56, %v2150_v51  ;;  %v2230_v51 = vld [vmem:[%s21392_s8 + $0xd0] sm:$0xff]  ;;  %v2231_v53 = vld [vmem:[%s21392_s8 + $0xd8] sm:$0xff] }
 0x855   : > { %v2160_v58 = vsel %vm1202_vm1, %v2156_v57, 0.0  ;;  %v2157_v60 = vadd.f32 %v19160_v59, %v2153_v54  ;;  %v2208_v59 = vld [vmem:[%s21392_s8 + $0x20] sm:$0xff] }
 0x856   : > { %2161 = vadd.xlane.f32.xlu1 %v2160_v58  ;;  %v15299_v58 = vcombine.high %v2223_v52, %v2231_v53 }
 0x857   : > { %v2164_v61 = vsel %vm2163_vm11, %v2157_v60, 0.0 }
 0x858   : > { %2165 = vadd.xlane.f32.xlu0 %v2164_v61  ;;  %v2209_v61 = vld [vmem:[%s21392_s8 + $0x28] sm:$0xff] }
 0x8e3   : > { %v2162_v62 = vpop.xlane.xlu1 %2161 }
 0x8e4   : > { %v2168_v63 = vmul.f32 0.03125, %v2162_v62  ;;  %v2217_v62 = vld [vmem:[%s21392_s8 + $0x68] sm:$0xff] }
 0x8e5   : > { %v2166_v0 = vpop.xlane.xlu0 %2165  ;;  %v15286_v10 = vcombine.low %v2209_v61, %v2217_v62 }
 0x8e6   : > { %v2170_v2 = vsub.f32 %v2156_v57, %v2168_v63  ;;  %v2169_v3 = vmul.f32 0.03125, %v2166_v0  ;;  %v15297_v57 = vcombine.high %v2222_v50, %v2230_v51  ;;  %v15296_v63 = vcombine.low %v2222_v50, %v2230_v51  ;;  %v18480_v50 = vld [vmem:[%s21387_s19 + $0xe0] sm:$0xff]  }
 0x8e7   : > { %v15298_v0 = vcombine.low %v2223_v52, %v2231_v53  ;;  %v18481_v51 = vld [vmem:[%s21387_s19 + $0x20] sm:$0xff]   ;;  %v18483_v53 = vld [vmem:[%s21387_s19 + $0x68] sm:$0xff]  }
 0x8e8   : > { %v2171_v4 = vsub.f32 %v2157_v60, %v2169_v3  ;;  %v2172_v5 = vmul.f32 %v2170_v2, %v2170_v2  ;;  %v2216_v60 = vld [vmem:[%s21392_s8 + $0x60] sm:$0xff]  ;;  %v15287_v3 = vcombine.high %v2209_v61, %v2217_v62  ;;  %v18489_v61 = vld [vmem:[%s21387_s19 + $0x30] sm:$0xff]  }
 0x8e9   : > { %v18482_v52 = vld [vmem:[%s21387_s19 + $0xa0] sm:$0xff]   ;;  %v18490_v62 = vld [vmem:[%s21387_s19 + $0xb0] sm:$0xff]  }
 0x8ea   : > { %v2174_v6 = vsel %vm1202_vm1, %v2172_v5, 0.0  ;;  %v2173_v7 = vmul.f32 %v2171_v4, %v2171_v4  ;;  %v2232_v5 = vld [vmem:[%s21392_s8 + $0xe0] sm:$0xff] }
 0x8eb   : > { %2175 = vadd.xlane.f32.xlu0 %v2174_v6  ;;  %v2225_v6 = vld [vmem:[%s21392_s8 + $0xa8] sm:$0xff] }
 0x8ec   : > { %v2177_v9 = vsel %vm2163_vm11, %v2173_v7, 0.0  ;;  %v2233_v7 = vld [vmem:[%s21392_s8 + $0xe8] sm:$0xff] }
 0x8ed   : > { %2178 = vadd.xlane.f32.xlu1 %v2177_v9  ;;  %v15284_v9 = vcombine.low %v2208_v59, %v2216_v60  ;;  %v15303_v15 = vcombine.high %v2225_v6, %v2233_v7  ;;  %v15302_v22 = vcombine.low %v2225_v6, %v2233_v7  ;;  %v2498_v6 = vlaneseq }
 0x8ef   : > { %v2499_v7 = vshrl.u32 %v2498_v6, 7 }
 0x8f1   : > { %v19702_v17 = vsub.s32 3, %v2499_v7  ;;  %v19712_v26 = vsub.s32 5, %v2499_v7  ;;  %v19714_v27 = vsub.s32 7, %v2499_v7 }
 0x978   : > { %v2176_v37 = vpop.xlane.xlu0 %2175 }
 0x979   : > { %v2180_v38 = vmul.f32 0.03125, %v2176_v37  ;;  %v18466_v37 = vld [vmem:[%s21387_s19 + $0x80] sm:$0xff]  }
 0x97a   : > { %v2179_v39 = vpop.xlane.xlu1 %2178 }
 0x97b   : > { %v2182_v8 = vadd.f32 1e-05, %v2180_v38  ;;  %v2181_v40 = vmul.f32 0.03125, %v2179_v39  ;;  %v18467_v38 = vld [vmem:[%s21387_s19 + $0x48] sm:$0xff]  }
 0x97c   : > { %v18468_v39 = vld [vmem:[%s21387_s19 + $0xc8] sm:$0xff]  }
 0x97d   : > { %19029 = vrsqrt.f32 %v2182_v8  ;;  %v2183_v41 = vadd.f32 1e-05, %v2181_v40  ;;  %v18469_v8 = vld [vmem:[%s21387_s19 + $0x8] sm:$0xff]  }
 0x97e   : > { %v18470_v40 = vld [vmem:[%s21387_s19 + $0x88] sm:$0xff]  }
 0x97f   : > { %19031 = vrsqrt.f32 %v2183_v41  ;;  %v18471_v41 = vld [vmem:[%s21387_s19 + $0x50] sm:$0xff]  }
 0x987   : > { %v19030_v42 = vpop.eup %19029 }
 0x988   : > { %v2186_v44 = vmul.f32 %v19030_v42, %v2170_v2  ;;  %v15285_v2 = vcombine.high %v2208_v59, %v2216_v60  ;;  %v18472_v42 = vld [vmem:[%s21387_s19 + $0xd0] sm:$0xff]  }
 0x989   : > { %v19032_v45 = vpop.eup %19031  ;;  %v18487_v59 = vld [vmem:[%s21387_s19 + $0x70] sm:$0xff]  }
 0x98a   : > { %v2194_v46 = vmul.f32 %v15274_v43, %v2186_v44  ;;  %v2187_v47 = vmul.f32 %v19032_v45, %v2171_v4  ;;  %v2224_v4 = vld [vmem:[%s21392_s8 + $0xa0] sm:$0xff]  ;;  %v18474_v44 = vld [vmem:[%s21387_s19 + $0x90] sm:$0xff]   ;;  %v18475_v45 = vld [vmem:[%s21387_s19 + $0x58] sm:$0xff]  }
 0x98b   : > { %v15301_v12 = vcombine.high %v2224_v4, %v2232_v5  ;;  %v15300_v21 = vcombine.low %v2224_v4, %v2232_v5  ;;  %v18488_v60 = vld [vmem:[%s21387_s19 + $0xf0] sm:$0xff]   ;;  %v18495_v4 = vld [vmem:[%s21387_s19 + $0x140] sm:$0xff]  }
 0x98c   : > { %v2195_v49 = vmul.f32 %v15274_v43, %v2187_v47  ;;  %v19615_v54 = vadd.f32 %v15275_v48, %v2194_v46  ;;  %v18473_v43 = vld [vmem:[%s21387_s19 + $0x10] sm:$0xff]   ;;  %v18476_v46 = vld [vmem:[%s21387_s19 + $0xd8] sm:$0xff]   ;;  %v18496_v5 = vld [vmem:[%s21387_s19 + $0x1c0] sm:$0xff]  }
 0x98d   : > { %v18477_v47 = vld [vmem:[%s21387_s19 + $0x18] sm:$0xff]  }
 0x98e   : > { %v19617_v55 = vadd.f32 %v15275_v48, %v2195_v49  ;;  %v18478_v48 = vld [vmem:[%s21387_s19 + $0x98] sm:$0xff]   ;;  %v18479_v49 = vld [vmem:[%s21387_s19 + $0x60] sm:$0xff]  }
 0x990   : > { %v19621_v56 = vpack.c.bf16 %v19617_v55, %v19615_v54 }
 0x992   : > { %15308 = vmatmul.mubr.msk.bf16.vlgmr.msra.gmra.mrb[12].mxu1 %vm1202_vm1, %v19621_v56  ;;  %15309 = vmatmul.mubr.msk.bf16.vlgmr.msra.gmra.mrb[16].mxu0 %vm1202_vm1, %v19621_v56 }
 0x993   : > { %2828 = vmatpush1.bf16.msra.mxu1 %v15280_v11  ;;  %2871 = vmatpush1.bf16.msra.mxu0 %v15282_v35  ;;  %v18463_v11 = vld [vmem:[%s21387_s19 + $0x40] sm:$0xff]  }
 0x994   : > { %2829 = vmatprep.subr.bf16.mxu1 %v15297_v57  ;;  %2872 = vmatprep.subr.bf16.mxu0 %v15299_v58  ;;  %v18464_v35 = vld [vmem:[%s21387_s19 + $0xc0] sm:$0xff]   ;;  %v18485_v57 = vld [vmem:[%s21387_s19 + $0x28] sm:$0xff]  }
 0x995   : > { %2859 = vmatprep.mubr.bf16.mxu1 %v19224_v32  ;;  %2902 = vmatprep.mubr.bf16.mxu0 %v19224_v32  ;;  %v18486_v58 = vld [vmem:[%s21387_s19 + $0xa8] sm:$0xff]  }
 0x997   : > { %2830 = vmatpush1.bf16.msra.mxu1 %v15296_v63  ;;  %2873 = vmatpush1.bf16.msra.mxu0 %v15298_v0  ;;  %v18491_v63 = vld [vmem:[%s21387_s19 + $0x78] sm:$0xff]  }
 0x998   : > { %2913 = vmatprep.subr.bf16.mxu1 %v15285_v2  ;;  %2956 = vmatprep.subr.bf16.mxu0 %v15287_v3  ;;  %v18492_v0 = vld [vmem:[%s21387_s19 + $0xf8] sm:$0xff]  }
 0x999   : > { %v18493_v2 = vld [vmem:[%s21387_s19 + $0x38] sm:$0xff]  }
 0x99a   : > { %15310 = vmatmul.mubr.msk.bf16.vlgmr.msra.gmra.mrb[16].mxu1 %vm1202_vm1, %v19621_v56  ;;  %15311 = vmatmul.mubr.msk.bf16.vlgmr.msra.gmra.mrb[20].mxu0 %vm1202_vm1, %v19621_v56  ;;  %v18494_v3 = vld [vmem:[%s21387_s19 + $0xb8] sm:$0xff]  }
 0x99b   : > { %2914 = vmatpush1.bf16.msra.mxu1 %v15284_v9  ;;  %2957 = vmatpush1.bf16.msra.mxu0 %v15286_v10  ;;  %v19695_v9 = vsub.s32 0, %v2499_v7  ;;  %v19697_v10 = vsub.s32 2, %v2499_v7 }
 0x99c   : > { %2915 = vmatprep.subr.bf16.mxu1 %v15301_v12  ;;  %2958 = vmatprep.subr.bf16.mxu0 %v15303_v15  ;;  %v2236_v12 = vld [vmem:[%s21389_s14] sm:$0xff]  ;;  %v19700_v15 = vsub.s32 1, %v2499_v7 }
 0x99d   : > { %2945 = vmatprep.mubr.bf16.mxu1 %v19224_v32  ;;  %2988 = vmatprep.mubr.bf16.mxu0 %v19224_v32  ;;  %v2501_v18 = vrot.slane %v2236_v12, %v19695_v9  ;;  %v2509_v19 = vrot.slane %v2236_v12, %v19697_v10 }
 0x99e   : > { %v2505_v20 = vrot.slane %v2236_v12, %v19700_v15 }
 0x99f   : > { %2916 = vmatpush1.bf16.msra.mxu1 %v15300_v21  ;;  %2959 = vmatpush1.bf16.msra.mxu0 %v15302_v22  ;;  %v2513_v21 = vrot.slane %v2236_v12, %v19702_v17  ;;  %v19708_v22 = vsub.s32 4, %v2499_v7 }
 0x9a0   : > { %2999 = vmatprep.subr.bf16.mxu1 %v15289_v23  ;;  %3042 = vmatprep.subr.bf16.mxu0 %v15291_v24  ;;  %v19710_v23 = vsub.s32 6, %v2499_v7 }
 0x9a2   : > { %15312 = vmatmul.mubr.msk.bf16.vlgmr.msra.gmra.mrb[20].mxu1 %vm1202_vm1, %v19621_v56  ;;  %15313 = vmatmul.mubr.msk.bf16.vlgmr.msra.gmra.mrb[24].mxu0 %vm1202_vm1, %v19621_v56 }
 0x9a3   : > { %3000 = vmatpush1.bf16.msra.mxu1 %v15288_v13  ;;  %3043 = vmatpush1.bf16.msra.mxu0 %v15290_v29 }
 0x9a4   : > { %3001 = vmatprep.subr.bf16.mxu1 %v15305_v30  ;;  %3044 = vmatprep.subr.bf16.mxu0 %v15307_v31 }
 0x9a5   : > { %3031 = vmatprep.mubr.bf16.mxu1 %v19224_v32  ;;  %3074 = vmatprep.mubr.bf16.mxu0 %v19224_v32 }
 0x9a7   : > { %3002 = vmatpush1.bf16.msra.mxu1 %v15304_v33  ;;  %3045 = vmatpush1.bf16.msra.mxu0 %v15306_v34 }
 0x9a8   : > { %16775 = vmatprep.subr.bf16.mxu1 %v18463_v11  ;;  %16797 = vmatprep.subr.bf16.mxu0 %v18464_v35 }
 0x9aa   : > { %15314 = vmatmul.mubr.msk.bf16.vlgmr.msra.gmra.mrb[24].mxu1 %vm1202_vm1, %v19621_v56  ;;  %15315 = vmatmul.mubr.msk.bf16.vlgmr.msra.gmra.mrb[28].mxu0 %vm1202_vm1, %v19621_v56  ;;  %v18484_v56 = vld [vmem:[%s21387_s19 + $0xe8] sm:$0xff]  }
 0x9ab   : > { %16776 = vmatpush3.bf16.msra.mxu1 %v18465_v36  ;;  %16798 = vmatpush3.bf16.msra.mxu0 %v18466_v37 }
 0x9ac   : > { %16777 = vmatprep.subr.bf16.mxu1 %v18467_v38  ;;  %16799 = vmatprep.subr.bf16.mxu0 %v18468_v39  ;;  %v2517_v39 = vrot.slane %v2236_v12, %v19708_v22 }
 0x9af   : > { %16778 = vmatpush3.bf16.msra.mxu1 %v18469_v8  ;;  %16800 = vmatpush3.bf16.msra.mxu0 %v18470_v40  ;;  %v2525_v8 = vrot.slane %v2236_v12, %v19710_v23 }
 0x9b0   : > { %16779 = vmatprep.subr.bf16.mxu1 %v18471_v41  ;;  %16801 = vmatprep.subr.bf16.mxu0 %v18472_v42  ;;  %v2521_v42 = vrot.slane %v2236_v12, %v19712_v26 }
 0x9b3   : > { %16780 = vmatpush3.bf16.msra.mxu1 %v18473_v43  ;;  %16802 = vmatpush3.bf16.msra.mxu0 %v18474_v44  ;;  %v2529_v43 = vrot.slane %v2236_v12, %v19714_v27 }
 0x9b4   : > { %16781 = vmatprep.subr.bf16.mxu1 %v18475_v45  ;;  %16803 = vmatprep.subr.bf16.mxu0 %v18476_v46 }
 0x9b7   : > { %16782 = vmatpush3.bf16.msra.mxu1 %v18477_v47  ;;  %16804 = vmatpush3.bf16.msra.mxu0 %v18478_v48 }
 0x9b8   : > { %16783 = vmatprep.subr.bf16.mxu1 %v18479_v49  ;;  %16805 = vmatprep.subr.bf16.mxu0 %v18480_v50 }
 0x9bb   : > { %16784 = vmatpush3.bf16.msra.mxu1 %v18481_v51  ;;  %16806 = vmatpush3.bf16.msra.mxu0 %v18482_v52  ;;  %v19721_v52 = vld [vmem:[%s21389_s14 + $0x8] sm:$0xff] }
 0x9bc   : > { %16785 = vmatprep.subr.bf16.mxu1 %v18483_v53  ;;  %16807 = vmatprep.subr.bf16.mxu0 %v18484_v56  ;;  %v2533_v6 = vrot.slane %v19721_v52, %v19695_v9 }
 0x9bf   : > { %16786 = vmatpush3.bf16.msra.mxu1 %v18485_v57  ;;  %16808 = vmatpush3.bf16.msra.mxu0 %v18486_v58 }
 0x9c0   : > { %16787 = vmatprep.subr.bf16.mxu1 %v18487_v59  ;;  %16809 = vmatprep.subr.bf16.mxu0 %v18488_v60 }
 0x9c3   : > { %16788 = vmatpush3.bf16.msra.mxu1 %v18489_v61  ;;  %16810 = vmatpush3.bf16.msra.mxu0 %v18490_v62  ;;  %v18497_v61 = vld [vmem:[%s21387_s19 + $0x100] sm:$0xff]  }
 0x9c4   : > { %16789 = vmatprep.subr.bf16.mxu1 %v18491_v63  ;;  %16811 = vmatprep.subr.bf16.mxu0 %v18492_v0  ;;  %v18498_v62 = vld [vmem:[%s21387_s19 + $0x180] sm:$0xff]  }
 0x9c7   : > { %16790 = vmatpush3.bf16.msra.mxu1 %v18493_v2  ;;  %16812 = vmatpush3.bf16.msra.mxu0 %v18494_v3 }
 0x9c8   : > { %16819 = vmatprep.subr.bf16.mxu1 %v18495_v4  ;;  %16841 = vmatprep.subr.bf16.mxu0 %v18496_v5  ;;  %v18499_v4 = vld [vmem:[%s21387_s19 + $0x148] sm:$0xff]  }
 0x9c9   : > { %v18500_v5 = vld [vmem:[%s21387_s19 + $0x1c8] sm:$0xff]  }
 0xa65   : > { %v2775_v24 = vpop.f32.mrb[12].mxu1  ;;  %v2818_v25 = vpop.f32.mrb[16].mxu0 }
 0xa66   : > { %v2776_v28 = vadd.f32 %v2775_v24, %v2501_v18  ;;  %v2819_v13 = vadd.f32 %v2818_v25, %v2509_v19  ;;  %v2777_v29 = vpop.f32.mrb[13].mxu1  ;;  %v2820_v30 = vpop.f32.mrb[17].mxu0 }
 0xa67   : > { %v2778_v31 = vadd.f32 %v2777_v29, %v2505_v20  ;;  %v2821_v33 = vadd.f32 %v2820_v30, %v2513_v21  ;;  %v2779_v34 = vpop.f32.mrb[14].mxu1  ;;  %v2822_v11 = vpop.f32.mrb[18].mxu0 }
 0xa68   : > { %v2780_v35 = vadd.f32 %v2779_v34, %v2501_v18  ;;  %v2823_v36 = vadd.f32 %v2822_v11, %v2509_v19  ;;  %v2781_v37 = vpop.f32.mrb[15].mxu1  ;;  %v2824_v38 = vpop.f32.mrb[19].mxu0  ;;  %v3085_v44 = vmax.f32 %v2776_v28, 0.0  ;;  %v3087_v45 = vmax.f32 %v2819_v13, 0.0 }
 0xa69   : > { %v2782_v40 = vadd.f32 %v2781_v37, %v2505_v20  ;;  %v2825_v41 = vadd.f32 %v2824_v38, %v2513_v21  ;;  %v3086_v48 = vmax.f32 %v2778_v31, 0.0  ;;  %v3088_v49 = vmax.f32 %v2821_v33, 0.0  ;;  %v18501_v31 = vld [vmem:[%s21387_s19 + $0x108] sm:$0xff]   ;;  %v18503_v38 = vld [vmem:[%s21387_s19 + $0x150] sm:$0xff]  }
 0xa6a   : > { %v3101_v46 = vmax.f32 %v2780_v35, 0.0  ;;  %v3103_v47 = vmax.f32 %v2823_v36, 0.0  ;;  %v2541_v20 = vrot.slane %v19721_v52, %v19697_v10  ;;  %v2537_v13 = vrot.slane %v19721_v52, %v19700_v15  ;;  %v18502_v33 = vld [vmem:[%s21387_s19 + $0x188] sm:$0xff]  }
 0xa6b   : > { %v3102_v50 = vmax.f32 %v2782_v40, 0.0  ;;  %v3104_v51 = vmax.f32 %v2825_v41, 0.0  ;;  %v2545_v34 = vrot.slane %v19721_v52, %v19702_v17 }
 0xa6c   : > { %v3117_v53 = vpack.c.bf16 %v3101_v46, %v3085_v44  ;;  %v3119_v56 = vpack.c.bf16 %v3103_v47, %v3087_v45 }
 0xa6d   : > { %v3118_v57 = vpack.c.bf16 %v3102_v50, %v3086_v48  ;;  %v3120_v58 = vpack.c.bf16 %v3104_v51, %v3088_v49  ;;  %v2861_v59 = vpop.f32.mrb[16].mxu1  ;;  %v2904_v60 = vpop.f32.mrb[20].mxu0  ;;  %v18505_v49 = vld [vmem:[%s21387_s19 + $0x110] sm:$0xff]  }
 0xa6e   : > { %v2862_v63 = vadd.f32 %v2861_v59, %v2517_v39  ;;  %v2905_v0 = vadd.f32 %v2904_v60, %v2525_v8  ;;  %v2863_v2 = vpop.f32.mrb[17].mxu1  ;;  %v2906_v3 = vpop.f32.mrb[21].mxu0  ;;  %v18506_v50 = vld [vmem:[%s21387_s19 + $0x190] sm:$0xff]   ;;  %v18508_v59 = vld [vmem:[%s21387_s19 + $0x1d8] sm:$0xff]  }
 0xa6f   : > { %v2864_v7 = vadd.f32 %v2863_v2, %v2521_v42  ;;  %v2907_v12 = vadd.f32 %v2906_v3, %v2529_v43  ;;  %v2865_v18 = vpop.f32.mrb[18].mxu1  ;;  %v2908_v19 = vpop.f32.mrb[22].mxu0  ;;  %3939 = vmatprep.mubr.bf16.mxu1 %v3118_v57  ;;  %3980 = vmatprep.mubr.bf16.mxu0 %v3120_v58  ;;  %v18507_v58 = vld [vmem:[%s21387_s19 + $0x158] sm:$0xff]  }
 0xa70   : > { %v2866_v21 = vadd.f32 %v2865_v18, %v2517_v39  ;;  %v2909_v24 = vadd.f32 %v2908_v19, %v2525_v8  ;;  %v2867_v25 = vpop.f32.mrb[19].mxu1  ;;  %v2910_v28 = vpop.f32.mrb[23].mxu0  ;;  %3940 = vmatmul.mubr.bf16.vlgmr.msra.gmra.mrb[28].mxu1 %v3117_v53  ;;  %3981 = vmatmul.mubr.bf16.vlgmr.msra.gmra.mrb[32].mxu0 %v3119_v56  ;;  %v3089_v11 = vmax.f32 %v2862_v63, 0.0  ;;  %v3091_v35 = vmax.f32 %v2905_v0, 0.0  ;;  %v18504_v39 = vld [vmem:[%s21387_s19 + $0x1d0] sm:$0xff]  }
 0xa71   : > { %v2868_v29 = vadd.f32 %v2867_v25, %v2521_v42  ;;  %v2911_v30 = vadd.f32 %v2910_v28, %v2529_v43  ;;  %16820 = vmatpush3.bf16.msra.mxu1 %v18497_v61  ;;  %16842 = vmatpush3.bf16.msra.mxu0 %v18498_v62  ;;  %v3090_v8 = vmax.f32 %v2864_v7, 0.0  ;;  %v3092_v40 = vmax.f32 %v2907_v12, 0.0 }
 0xa72   : > { %v3105_v36 = vmax.f32 %v2866_v21, 0.0  ;;  %v3107_v37 = vmax.f32 %v2909_v24, 0.0  ;;  %16821 = vmatprep.subr.bf16.mxu1 %v18499_v4  ;;  %16843 = vmatprep.subr.bf16.mxu0 %v18500_v5  ;;  %v2549_v0 = vrot.slane %v19721_v52, %v19708_v22  ;;  %v2557_v7 = vrot.slane %v19721_v52, %v19710_v23  ;;  %v18509_v21 = vld [vmem:[%s21387_s19 + $0x118] sm:$0xff]  }
 0xa73   : > { %v3106_v41 = vmax.f32 %v2868_v29, 0.0  ;;  %v3108_v42 = vmax.f32 %v2911_v30, 0.0  ;;  %v2553_v12 = vrot.slane %v19721_v52, %v19712_v26  ;;  %v18510_v24 = vld [vmem:[%s21387_s19 + $0x198] sm:$0xff]   ;;  %v18511_v30 = vld [vmem:[%s21387_s19 + $0x160] sm:$0xff]  }
 0xa74   : > { %v19739_v43 = vpack.c.bf16 %v3105_v36, %v3089_v11  ;;  %v19741_v44 = vpack.c.bf16 %v3107_v37, %v3091_v35 }
 0xa75   : > { %v3122_v45 = vpack.c.bf16 %v3106_v41, %v3090_v8  ;;  %v3124_v46 = vpack.c.bf16 %v3108_v42, %v3092_v40  ;;  %16822 = vmatpush3.bf16.msra.mxu1 %v18501_v31  ;;  %16844 = vmatpush3.bf16.msra.mxu0 %v18502_v33  ;;  %v2947_v47 = vpop.f32.mrb[20].mxu1  ;;  %v2990_v48 = vpop.f32.mrb[24].mxu0  ;;  %v18512_v31 = vld [vmem:[%s21387_s19 + $0x1e0] sm:$0xff]  }
 0xa76   : > { %v2948_v51 = vadd.f32 %v2947_v47, %v2533_v6  ;;  %v2991_v53 = vadd.f32 %v2990_v48, %v2541_v20  ;;  %v2949_v56 = vpop.f32.mrb[21].mxu1  ;;  %v2992_v57 = vpop.f32.mrb[25].mxu0  ;;  %16823 = vmatprep.subr.bf16.mxu1 %v18503_v38  ;;  %16845 = vmatprep.subr.bf16.mxu0 %v18504_v39  ;;  %v18513_v8 = vld [vmem:[%s21387_s19 + $0x120] sm:$0xff]   ;;  %v18515_v47 = vld [vmem:[%s21387_s19 + $0x168] sm:$0xff]  }
 0xa77   : > { %v2950_v60 = vadd.f32 %v2949_v56, %v2537_v13  ;;  %v2993_v61 = vadd.f32 %v2992_v57, %v2545_v34  ;;  %v2951_v62 = vpop.f32.mrb[22].mxu1  ;;  %v2994_v63 = vpop.f32.mrb[26].mxu0  ;;  %4021 = vmatprep.mubr.bf16.mxu1 %v3122_v45  ;;  %4062 = vmatprep.mubr.bf16.mxu0 %v3124_v46  ;;  %v18514_v40 = vld [vmem:[%s21387_s19 + $0x1a0] sm:$0xff]   ;;  %v18516_v48 = vld [vmem:[%s21387_s19 + $0x1e8] sm:$0xff]  }
 0xa78   : > { %v2952_v2 = vadd.f32 %v2951_v62, %v2533_v6  ;;  %v2995_v3 = vadd.f32 %v2994_v63, %v2541_v20  ;;  %v2953_v4 = vpop.f32.mrb[23].mxu1  ;;  %v2996_v5 = vpop.f32.mrb[27].mxu0  ;;  %v2561_v6 = vrot.slane %v19721_v52, %v19714_v27  ;;  %v3093_v20 = vmax.f32 %v2948_v51, 0.0  ;;  %v18517_v62 = vld [vmem:[%s21387_s19 + $0x128] sm:$0xff]  }
 0xa79   : > { %v2954_v18 = vadd.f32 %v2953_v4, %v2537_v13  ;;  %v2997_v19 = vadd.f32 %v2996_v5, %v2545_v34  ;;  %16824 = vmatpush3.bf16.msra.mxu1 %v18505_v49  ;;  %16846 = vmatpush3.bf16.msra.mxu0 %v18506_v50  ;;  %v3095_v25 = vmax.f32 %v2991_v53, 0.0  ;;  %v3094_v33 = vmax.f32 %v2950_v60, 0.0  ;;  %v18518_v63 = vld [vmem:[%s21387_s19 + $0x1a8] sm:$0xff]  }
 0xa7a   : > { %v3109_v28 = vmax.f32 %v2952_v2, 0.0  ;;  %v3111_v29 = vmax.f32 %v2995_v3, 0.0  ;;  %16825 = vmatprep.subr.bf16.mxu1 %v18507_v58  ;;  %16847 = vmatprep.subr.bf16.mxu0 %v18508_v59  ;;  %v3096_v13 = vmax.f32 %v2993_v61, 0.0 }
 0xa7b   : > { %v3110_v34 = vmax.f32 %v2954_v18, 0.0  ;;  %v3112_v11 = vmax.f32 %v2997_v19, 0.0 }
 0xa7c   : > { %v19759_v35 = vpack.c.bf16 %v3109_v28, %v3093_v20  ;;  %v19761_v36 = vpack.c.bf16 %v3111_v29, %v3095_v25  ;;  %v18521_v28 = vld [vmem:[%s21387_s19 + $0x130] sm:$0xff]  }
 0xa7d   : > { %v19763_v52 = vpack.c.bf16 %v3110_v34, %v3094_v33  ;;  %v19765_v37 = vpack.c.bf16 %v3112_v11, %v3096_v13  ;;  %16826 = vmatpush3.bf16.msra.mxu1 %v18509_v21  ;;  %16848 = vmatpush3.bf16.msra.mxu0 %v18510_v24  ;;  %v3033_v38 = vpop.f32.mrb[24].mxu1  ;;  %v3076_v39 = vpop.f32.mrb[28].mxu0  ;;  %v18522_v29 = vld [vmem:[%s21387_s19 + $0x1b0] sm:$0xff]   ;;  %v18525_v33 = vld [vmem:[%s21387_s19 + $0x138] sm:$0xff]   ;;  %v18527_v34 = vld [vmem:[%s21387_s19 + $0x240] sm:$0xff]  }
 0xa7e   : > { %v3034_v41 = vadd.f32 %v3033_v38, %v2549_v0  ;;  %v3077_v42 = vadd.f32 %v3076_v39, %v2557_v7  ;;  %v3035_v45 = vpop.f32.mrb[25].mxu1  ;;  %v3078_v46 = vpop.f32.mrb[29].mxu0  ;;  %16827 = vmatprep.subr.bf16.mxu1 %v18511_v30  ;;  %16849 = vmatprep.subr.bf16.mxu0 %v18512_v31  ;;  %v18523_v30 = vld [vmem:[%s21387_s19 + $0x178] sm:$0xff]   ;;  %v18528_v11 = vld [vmem:[%s21387_s19 + $0x2c0] sm:$0xff]  }
 0xa7f   : > { %v3036_v49 = vadd.f32 %v3035_v45, %v2553_v12  ;;  %v3079_v50 = vadd.f32 %v3078_v46, %v2561_v6  ;;  %v3037_v51 = vpop.f32.mrb[26].mxu1  ;;  %v3080_v53 = vpop.f32.mrb[30].mxu0  ;;  %v18524_v31 = vld [vmem:[%s21387_s19 + $0x1f8] sm:$0xff]   ;;  %v18529_v38 = vld [vmem:[%s21387_s19 + $0x200] sm:$0xff]   ;;  %v18535_v45 = vld [vmem:[%s21387_s19 + $0x250] sm:$0xff]  }
 0xa80   : > { %v3038_v56 = vadd.f32 %v3037_v51, %v2549_v0  ;;  %v3081_v57 = vadd.f32 %v3080_v53, %v2557_v7  ;;  %v3039_v58 = vpop.f32.mrb[27].mxu1  ;;  %v3082_v59 = vpop.f32.mrb[31].mxu0  ;;  %v3097_v2 = vmax.f32 %v3034_v41, 0.0  ;;  %v3099_v3 = vmax.f32 %v3077_v42, 0.0  ;;  %v18519_v0 = vld [vmem:[%s21387_s19 + $0x170] sm:$0xff]   ;;  %v18526_v13 = vld [vmem:[%s21387_s19 + $0x1b8] sm:$0xff]  }
 0xa81   : > { %v3040_v60 = vadd.f32 %v3039_v58, %v2553_v12  ;;  %v3083_v61 = vadd.f32 %v3082_v59, %v2561_v6  ;;  %16828 = vmatpush3.bf16.msra.mxu1 %v18513_v8  ;;  %16850 = vmatpush3.bf16.msra.mxu0 %v18514_v40  ;;  %v18520_v7 = vld [vmem:[%s21387_s19 + $0x1f0] sm:$0xff]   ;;  %v3098_v18 = vmax.f32 %v3036_v49, 0.0  ;;  %v3100_v19 = vmax.f32 %v3079_v50, 0.0  ;;  %v18530_v39 = vld [vmem:[%s21387_s19 + $0x280] sm:$0xff]   ;;  %v18531_v8 = vld [vmem:[%s21387_s19 + $0x248] sm:$0xff]  }
 0xa82   : > { %v3113_v4 = vmax.f32 %v3038_v56, 0.0  ;;  %v3115_v5 = vmax.f32 %v3081_v57, 0.0  ;;  %16829 = vmatprep.subr.bf16.mxu1 %v18515_v47  ;;  %16851 = vmatprep.subr.bf16.mxu0 %v18516_v48  ;;  %v18532_v40 = vld [vmem:[%s21387_s19 + $0x2c8] sm:$0xff]   ;;  %v18539_v46 = vld [vmem:[%s21387_s19 + $0x258] sm:$0xff]   ;;  %v18543_v49 = vld [vmem:[%s21387_s19 + $0x260] sm:$0xff]  }
 0xa83   : > { %v3114_v12 = vmax.f32 %v3040_v60, 0.0  ;;  %v3116_v21 = vmax.f32 %v3083_v61, 0.0  ;;  %v18533_v41 = vld [vmem:[%s21387_s19 + $0x208] sm:$0xff]   ;;  %v18540_v47 = vld [vmem:[%s21387_s19 + $0x2d8] sm:$0xff]   ;;  %v18544_v50 = vld [vmem:[%s21387_s19 + $0x2e0] sm:$0xff]  }
 0xa84   : > { %v19775_v24 = vpack.c.bf16 %v3113_v4, %v3097_v2  ;;  %v19777_v6 = vpack.c.bf16 %v3115_v5, %v3099_v3  ;;  %v18534_v42 = vld [vmem:[%s21387_s19 + $0x288] sm:$0xff]   ;;  %v18542_v48 = vld [vmem:[%s21387_s19 + $0x298] sm:$0xff]   ;;  %v18545_v51 = vld [vmem:[%s21387_s19 + $0x220] sm:$0xff]  }
 0xa85   : > { %v19779_v20 = vpack.c.bf16 %v3114_v12, %v3098_v18  ;;  %v19781_v25 = vpack.c.bf16 %v3116_v21, %v3100_v19  ;;  %16830 = vmatpush3.bf16.msra.mxu1 %v18517_v62  ;;  %16852 = vmatpush3.bf16.msra.mxu0 %v18518_v63  ;;  %v18546_v53 = vld [vmem:[%s21387_s19 + $0x2a0] sm:$0xff]   ;;  %v18547_v56 = vld [vmem:[%s21387_s19 + $0x268] sm:$0xff]   ;;  %v18551_v60 = vld [vmem:[%s21387_s19 + $0x270] sm:$0xff]  }
 0xa86   : > { %16831 = vmatprep.subr.bf16.mxu1 %v18519_v0  ;;  %16853 = vmatprep.subr.bf16.mxu0 %v18520_v7  ;;  %v18548_v57 = vld [vmem:[%s21387_s19 + $0x2e8] sm:$0xff]   ;;  %v18552_v61 = vld [vmem:[%s21387_s19 + $0x2f0] sm:$0xff]   ;;  %v18555_v2 = vld [vmem:[%s21387_s19 + $0x278] sm:$0xff]  }
 0xa87   : > { %v18549_v58 = vld [vmem:[%s21387_s19 + $0x228] sm:$0xff]   ;;  %v18553_v62 = vld [vmem:[%s21387_s19 + $0x230] sm:$0xff]   ;;  %v18556_v3 = vld [vmem:[%s21387_s19 + $0x2f8] sm:$0xff]  }
 0xa88   : > { %v18550_v59 = vld [vmem:[%s21387_s19 + $0x2a8] sm:$0xff]   ;;  %v18554_v63 = vld [vmem:[%s21387_s19 + $0x2b0] sm:$0xff]   ;;  %v18557_v4 = vld [vmem:[%s21387_s19 + $0x238] sm:$0xff]  }
 0xa89   : > { %16832 = vmatpush3.bf16.msra.mxu1 %v18521_v28  ;;  %16854 = vmatpush3.bf16.msra.mxu0 %v18522_v29  ;;  %v18558_v5 = vld [vmem:[%s21387_s19 + $0x2b8] sm:$0xff]   ;;  %v18559_v0 = vld [vmem:[%s21387_s19 + $0x340] sm:$0xff]   ;;  %v18563_v12 = vld [vmem:[%s21387_s19 + $0x348] sm:$0xff]  }
 0xa8a   : > { %16833 = vmatprep.subr.bf16.mxu1 %v18523_v30  ;;  %16855 = vmatprep.subr.bf16.mxu0 %v18524_v31  ;;  %v18560_v7 = vld [vmem:[%s21387_s19 + $0x3c0] sm:$0xff]   ;;  %v18564_v21 = vld [vmem:[%s21387_s19 + $0x3c8] sm:$0xff]   ;;  %v18567_v30 = vld [vmem:[%s21387_s19 + $0x350] sm:$0xff]  }
 0xa8b   : > { %v18561_v18 = vld [vmem:[%s21387_s19 + $0x300] sm:$0xff]   ;;  %v18565_v28 = vld [vmem:[%s21387_s19 + $0x308] sm:$0xff]   ;;  %v18570_v31 = vld [vmem:[%s21387_s19 + $0x390] sm:$0xff]  }
 0xa8c   : > { %v18562_v19 = vld [vmem:[%s21387_s19 + $0x380] sm:$0xff]   ;;  %v18566_v29 = vld [vmem:[%s21387_s19 + $0x388] sm:$0xff]  }
 0xa8d   : > { %16834 = vmatpush3.bf16.msra.mxu1 %v18525_v33  ;;  %16856 = vmatpush3.bf16.msra.mxu0 %v18526_v13  ;;  %v18572_v33 = vld [vmem:[%s21387_s19 + $0x3d8] sm:$0xff]  }
 0xa8e   : > { %16863 = vmatprep.subr.bf16.mxu1 %v18527_v34  ;;  %16885 = vmatprep.subr.bf16.mxu0 %v18528_v11  ;;  %v18574_v13 = vld [vmem:[%s21387_s19 + $0x398] sm:$0xff]   ;;  %v18575_v34 = vld [vmem:[%s21387_s19 + $0x360] sm:$0xff]  }
 0xa8f   : > { %v18576_v11 = vld [vmem:[%s21387_s19 + $0x3e0] sm:$0xff]  }
 0xa90   : > { %4022 = vmatmul.mubr.bf16.vlgmr.msra.gmra.mrb[32].mxu1 %v19739_v43  ;;  %4063 = vmatmul.mubr.bf16.vlgmr.msra.gmra.mrb[36].mxu0 %v19741_v44  ;;  %v18536_v43 = vld [vmem:[%s21387_s19 + $0x2d0] sm:$0xff]  }
 0xa91   : > { %16864 = vmatpush3.bf16.msra.mxu1 %v18529_v38  ;;  %4103 = vmatprep.mubr.bf16.mxu1 %v19763_v52  ;;  %v18537_v44 = vld [vmem:[%s21387_s19 + $0x210] sm:$0xff]   ;;  %v18577_v38 = vld [vmem:[%s21387_s19 + $0x320] sm:$0xff]  }
 0xa92   : > { %16886 = vmatpush3.bf16.msra.mxu0 %v18530_v39  ;;  %4144 = vmatprep.mubr.bf16.mxu0 %v19765_v37  ;;  %v18538_v52 = vld [vmem:[%s21387_s19 + $0x290] sm:$0xff]   ;;  %v18541_v37 = vld [vmem:[%s21387_s19 + $0x218] sm:$0xff]   ;;  %v18578_v39 = vld [vmem:[%s21387_s19 + $0x3a0] sm:$0xff]  }
 0xa93   : > { %16865 = vmatprep.subr.bf16.mxu1 %v18531_v8  ;;  %16887 = vmatprep.subr.bf16.mxu0 %v18532_v40  ;;  %v18579_v8 = vld [vmem:[%s21387_s19 + $0x368] sm:$0xff]  }
 0xa94   : > { %v18580_v40 = vld [vmem:[%s21387_s19 + $0x3e8] sm:$0xff]  }
 0xa95   : > { %16866 = vmatpush3.bf16.msra.mxu1 %v18533_v41  ;;  %v18581_v41 = vld [vmem:[%s21387_s19 + $0x328] sm:$0xff]  }
 0xa96   : > { %16888 = vmatpush3.bf16.msra.mxu0 %v18534_v42  ;;  %16867 = vmatprep.subr.bf16.mxu1 %v18535_v45  ;;  %v18582_v42 = vld [vmem:[%s21387_s19 + $0x3a8] sm:$0xff]   ;;  %v18583_v45 = vld [vmem:[%s21387_s19 + $0x370] sm:$0xff]  }
 0xa97   : > { %16889 = vmatprep.subr.bf16.mxu0 %v18536_v43  ;;  %v18584_v43 = vld [vmem:[%s21387_s19 + $0x3f0] sm:$0xff]  }
 0xa99   : > { %16868 = vmatpush3.bf16.msra.mxu1 %v18537_v44  ;;  %v18585_v44 = vld [vmem:[%s21387_s19 + $0x330] sm:$0xff]  }
 0xa9a   : > { %16890 = vmatpush3.bf16.msra.mxu0 %v18538_v52  ;;  %16869 = vmatprep.subr.bf16.mxu1 %v18539_v46  ;;  %v18586_v52 = vld [vmem:[%s21387_s19 + $0x3b0] sm:$0xff]   ;;  %v18587_v46 = vld [vmem:[%s21387_s19 + $0x378] sm:$0xff]  }
 0xa9b   : > { %16891 = vmatprep.subr.bf16.mxu0 %v18540_v47  ;;  %v18588_v47 = vld [vmem:[%s21387_s19 + $0x3f8] sm:$0xff]  }
 0xa9d   : > { %16870 = vmatpush3.bf16.msra.mxu1 %v18541_v37  ;;  %v18589_v37 = vld [vmem:[%s21387_s19 + $0x338] sm:$0xff]  }
 0xa9e   : > { %16892 = vmatpush3.bf16.msra.mxu0 %v18542_v48  ;;  %16871 = vmatprep.subr.bf16.mxu1 %v18543_v49  ;;  %v18590_v48 = vld [vmem:[%s21387_s19 + $0x3b8] sm:$0xff]  }
 0xa9f   : > { %16893 = vmatprep.subr.bf16.mxu0 %v18544_v50 }
 0xaa1   : > { %16872 = vmatpush3.bf16.msra.mxu1 %v18545_v51  ;;  %v15316_v51 = vld [vmem:[%s21385_s24] ss:$0 sm:$0xff] }
 0xaa2   : > { %16894 = vmatpush3.bf16.msra.mxu0 %v18546_v53  ;;  %16873 = vmatprep.subr.bf16.mxu1 %v18547_v56 }
 0xaa3   : > { %16895 = vmatprep.subr.bf16.mxu0 %v18548_v57 }
 0xaa5   : > { %16874 = vmatpush3.bf16.msra.mxu1 %v18549_v58 }
 0xaa6   : > { %16896 = vmatpush3.bf16.msra.mxu0 %v18550_v59  ;;  %16875 = vmatprep.subr.bf16.mxu1 %v18551_v60 }
 0xaa7   : > { %16897 = vmatprep.subr.bf16.mxu0 %v18552_v61 }
 0xaa9   : > { %16876 = vmatpush3.bf16.msra.mxu1 %v18553_v62 }
 0xaaa   : > { %16898 = vmatpush3.bf16.msra.mxu0 %v18554_v63  ;;  %16877 = vmatprep.subr.bf16.mxu1 %v18555_v2 }
 0xaab   : > { %16899 = vmatprep.subr.bf16.mxu0 %v18556_v3 }
 0xaad   : > { %16878 = vmatpush3.bf16.msra.mxu1 %v18557_v4 }
 0xaae   : > { %16900 = vmatpush3.bf16.msra.mxu0 %v18558_v5  ;;  %16907 = vmatprep.subr.bf16.mxu1 %v18559_v0 }
 0xaaf   : > { %16929 = vmatprep.subr.bf16.mxu0 %v18560_v7 }
 0xab0   : > { %4104 = vmatmul.mubr.bf16.vlgmr.msra.gmra.mrb[36].mxu1 %v19759_v35  ;;  %v18568_v35 = vld [vmem:[%s21387_s19 + $0x3d0] sm:$0xff]  }
 0xab1   : > { %4145 = vmatmul.mubr.bf16.vlgmr.msra.gmra.mrb[40].mxu0 %v19761_v36  ;;  %16908 = vmatpush3.bf16.msra.mxu1 %v18561_v18  ;;  %v18569_v36 = vld [vmem:[%s21387_s19 + $0x310] sm:$0xff]  }
 0xab2   : > { %4185 = vmatprep.mubr.bf16.mxu1 %v19779_v20  ;;  %16930 = vmatpush3.bf16.msra.mxu0 %v18562_v19  ;;  %v18571_v20 = vld [vmem:[%s21387_s19 + $0x358] sm:$0xff]  }
 0xab3   : > { %4226 = vmatprep.mubr.bf16.mxu0 %v19781_v25  ;;  %16909 = vmatprep.subr.bf16.mxu1 %v18563_v12  ;;  %v18573_v25 = vld [vmem:[%s21387_s19 + $0x318] sm:$0xff]  }
 0xab4   : > { %16931 = vmatprep.subr.bf16.mxu0 %v18564_v21 }
 0xab5   : > { %16910 = vmatpush3.bf16.msra.mxu1 %v18565_v28 }
 0xab6   : > { %16932 = vmatpush3.bf16.msra.mxu0 %v18566_v29  ;;  %16911 = vmatprep.subr.bf16.mxu1 %v18567_v30 }
 0xab7   : > { %16933 = vmatprep.subr.bf16.mxu0 %v18568_v35 }
 0xab9   : > { %16912 = vmatpush3.bf16.msra.mxu1 %v18569_v36 }
 0xaba   : > { %16934 = vmatpush3.bf16.msra.mxu0 %v18570_v31  ;;  %16913 = vmatprep.subr.bf16.mxu1 %v18571_v20 }
 0xabb   : > { %16935 = vmatprep.subr.bf16.mxu0 %v18572_v33 }
 0xabd   : > { %16914 = vmatpush3.bf16.msra.mxu1 %v18573_v25 }
 0xabe   : > { %16936 = vmatpush3.bf16.msra.mxu0 %v18574_v13  ;;  %16915 = vmatprep.subr.bf16.mxu1 %v18575_v34 }
 0xabf   : > { %16937 = vmatprep.subr.bf16.mxu0 %v18576_v11 }
 0xac1   : > { %16916 = vmatpush3.bf16.msra.mxu1 %v18577_v38 }
 0xac2   : > { %16938 = vmatpush3.bf16.msra.mxu0 %v18578_v39  ;;  %16917 = vmatprep.subr.bf16.mxu1 %v18579_v8 }
 0xac3   : > { %16939 = vmatprep.subr.bf16.mxu0 %v18580_v40 }
 0xac5   : > { %16918 = vmatpush3.bf16.msra.mxu1 %v18581_v41 }
 0xac6   : > { %16940 = vmatpush3.bf16.msra.mxu0 %v18582_v42  ;;  %16919 = vmatprep.subr.bf16.mxu1 %v18583_v45 }
 0xac7   : > { %16941 = vmatprep.subr.bf16.mxu0 %v18584_v43 }
 0xac9   : > { %16920 = vmatpush3.bf16.msra.mxu1 %v18585_v44 }
 0xaca   : > { %16942 = vmatpush3.bf16.msra.mxu0 %v18586_v52  ;;  %16921 = vmatprep.subr.bf16.mxu1 %v18587_v46 }
 0xacb   : > { %16943 = vmatprep.subr.bf16.mxu0 %v18588_v47 }
 0xacd   : > { %16922 = vmatpush3.bf16.msra.mxu1 %v18589_v37 }
 0xace   : > { %16944 = vmatpush3.bf16.msra.mxu0 %v18590_v48  ;;  %17702 = vmatprep.subr.bf16.mxu1 %v19207_v1 }
 0xad0   : > { %4186 = vmatmul.mubr.bf16.vlgmr.msra.gmra.mrb[40].mxu1 %v19775_v24 }
 0xad1   : > { %4227 = vmatmul.mubr.bf16.vlgmr.msra.gmra.mrb[44].mxu0 %v19777_v6  ;;  %17706 = vmatprep.mubr.msk.bf16.mxu1 %vm19208_vm0, %v19207_v1 }
 0xb43   : > { %v16791_v49 = vpop.f32.mrb[28].mxu1  ;;  %v16813_v50 = vpop.f32.mrb[32].mxu0 }
 0xb44   : > { %v16792_v53 = vpop.f32.mrb[29].mxu1  ;;  %v16814_v56 = vpop.f32.mrb[33].mxu0 }
 0xb45   : > { %v16793_v57 = vadd.f32 %v16792_v53, %v16791_v49  ;;  %v16815_v58 = vadd.f32 %v16814_v56, %v16813_v50  ;;  %v16794_v59 = vpop.f32.mrb[30].mxu1  ;;  %v16816_v60 = vpop.f32.mrb[34].mxu0 }
 0xb46   : > { %v16795_v61 = vpop.f32.mrb[31].mxu1  ;;  %v16817_v62 = vpop.f32.mrb[35].mxu0 }
 0xb47   : > { %v3942_v63 = vadd.f32 %v16793_v57, %v15316_v51  ;;  %v16796_v2 = vadd.f32 %v16795_v61, %v16794_v59  ;;  %v16818_v3 = vadd.f32 %v16817_v62, %v16816_v60 }
 0xb49   : > { %v3983_v24 = vadd.f32 %v16815_v58, %v3942_v63  ;;  %v3945_v4 = vadd.f32 %v16796_v2, %v15316_v51 }
 0xb4b   : > { %v3986_v6 = vadd.f32 %v16818_v3, %v3945_v4 }
 0xb63   : > { %v16835_v5 = vpop.f32.mrb[32].mxu1  ;;  %v16857_v0 = vpop.f32.mrb[36].mxu0 }
 0xb64   : > { %v16836_v7 = vpop.f32.mrb[33].mxu1  ;;  %v16858_v18 = vpop.f32.mrb[37].mxu0 }
 0xb65   : > { %v16837_v19 = vadd.f32 %v16836_v7, %v16835_v5  ;;  %v16859_v12 = vadd.f32 %v16858_v18, %v16857_v0  ;;  %v16838_v21 = vpop.f32.mrb[34].mxu1  ;;  %v16860_v28 = vpop.f32.mrb[38].mxu0 }
 0xb66   : > { %v16839_v29 = vpop.f32.mrb[35].mxu1  ;;  %v16861_v30 = vpop.f32.mrb[39].mxu0 }
 0xb67   : > { %v4024_v35 = vadd.f32 %v16837_v19, %v3983_v24  ;;  %v16840_v36 = vadd.f32 %v16839_v29, %v16838_v21  ;;  %v16862_v31 = vadd.f32 %v16861_v30, %v16860_v28 }
 0xb69   : > { %v4065_v20 = vadd.f32 %v16859_v12, %v4024_v35  ;;  %v4027_v33 = vadd.f32 %v16840_v36, %v3986_v6  ;;  %v18592_v36 = vld [vmem:[%s21390_s13 + $0x18] sm:$0xff]  }
 0xb6b   : > { %v4068_v25 = vadd.f32 %v16862_v31, %v4027_v33 }
 0xb83   : > { %v16879_v13 = vpop.f32.mrb[36].mxu1 }
 0xb84   : > { %v16901_v34 = vpop.f32.mrb[40].mxu0  ;;  %v16880_v11 = vpop.f32.mrb[37].mxu1 }
 0xb85   : > { %v16881_v38 = vadd.f32 %v16880_v11, %v16879_v13  ;;  %v16902_v39 = vpop.f32.mrb[41].mxu0  ;;  %v16882_v8 = vpop.f32.mrb[38].mxu1 }
 0xb86   : > { %v16903_v40 = vadd.f32 %v16902_v39, %v16901_v34  ;;  %v16904_v41 = vpop.f32.mrb[42].mxu0  ;;  %v16883_v42 = vpop.f32.mrb[39].mxu1 }
 0xb87   : > { %v4106_v45 = vadd.f32 %v16881_v38, %v4065_v20  ;;  %v16884_v43 = vadd.f32 %v16883_v42, %v16882_v8  ;;  %v16905_v44 = vpop.f32.mrb[43].mxu0  ;;  %v15445_v38 = vld [vmem:[%s21382_s30] ss:$0 sm:$0xff] }
 0xb88   : > { %v16906_v52 = vadd.f32 %v16905_v44, %v16904_v41  ;;  %v15446_v42 = vld [vmem:[%s21391_s6] ss:$0 sm:$0xff] }
 0xb89   : > { %v4147_v46 = vadd.f32 %v16903_v40, %v4106_v45  ;;  %v4109_v47 = vadd.f32 %v16884_v43, %v4068_v25 }
 0xb8b   : > { %v4150_v37 = vadd.f32 %v16906_v52, %v4109_v47 }
 0xba3   : > { %v16923_v48 = vpop.f32.mrb[40].mxu1 }
 0xba4   : > { %v16945_v49 = vpop.f32.mrb[44].mxu0  ;;  %v16924_v50 = vpop.f32.mrb[41].mxu1 }
 0xba5   : > { %v16925_v51 = vadd.f32 %v16924_v50, %v16923_v48  ;;  %v16946_v53 = vpop.f32.mrb[45].mxu0  ;;  %v16926_v56 = vpop.f32.mrb[42].mxu1 }
 0xba6   : > { %v16947_v57 = vadd.f32 %v16946_v53, %v16945_v49  ;;  %v16948_v58 = vpop.f32.mrb[46].mxu0  ;;  %v16927_v59 = vpop.f32.mrb[43].mxu1 }
 0xba7   : > { %v4188_v60 = vadd.f32 %v16925_v51, %v4147_v46  ;;  %v16928_v61 = vadd.f32 %v16927_v59, %v16926_v56  ;;  %v16949_v62 = vpop.f32.mrb[47].mxu0  ;;  %v15457_v46 = vld [vmem:[%s21388_s17 + $0x1] ss:$0 sm:$0xff]  ;;  %s21419_s17 = sld [smem:[#allocation26_spill]] }
 0xba8   : > { %v16950_v63 = vadd.f32 %v16949_v62, %v16948_v58 }
 0xba9   : > { %v4229_v2 = vadd.f32 %v16947_v57, %v4188_v60  ;;  %v4191_v3 = vadd.f32 %v16928_v61, %v4150_v37 }
 0xbab   : > { %v4232_v24 = vadd.f32 %v16950_v63, %v4191_v3  ;;  %v4235_v4 = vadd.f32 %v4229_v2, %v19615_v54 }
 0xbad   : > { %v4239_v6 = vsel %vm1202_vm1, %v4235_v4, 0.0  ;;  %v4236_v5 = vadd.f32 %v4232_v24, %v19617_v55  ;;  %v18591_v55 = vld [vmem:[%s21390_s13 + $0x10] sm:$0xff]   ;;  %s21417_s13 = smov 96  }
 0xbae   : > { %4240 = vadd.xlane.f32.xlu0 %v4239_v6  ;;  %17703 = vmatpush3.bf16.msra.mxu1 %v18591_v55 }
 0xbaf   : > { %v4242_v0 = vsel %vm2163_vm11, %v4236_v5, 0.0  ;;  %17704 = vmatprep.subr.bf16.mxu1 %v19207_v1 }
 0xbb0   : > { %4243 = vadd.xlane.f32.xlu1 %v4242_v0 }
 0xbb2   : > { %17705 = vmatpush3.bf16.msra.mxu1 %v18592_v36 }
 0xc3b   : > { %v4241_v7 = vpop.xlane.xlu0 %4240 }
 0xc3c   : > { %v4245_v18 = vmul.f32 0.03125, %v4241_v7 }
 0xc3d   : > { %v4244_v19 = vpop.xlane.xlu1 %4243 }
 0xc3e   : > { %v4247_v12 = vsub.f32 %v4235_v4, %v4245_v18  ;;  %v4246_v21 = vmul.f32 0.03125, %v4244_v19 }
 0xc40   : > { %v4248_v28 = vsub.f32 %v4236_v5, %v4246_v21  ;;  %v4249_v29 = vmul.f32 %v4247_v12, %v4247_v12 }
 0xc42   : > { %v4251_v30 = vsel %vm1202_vm1, %v4249_v29, 0.0  ;;  %v4250_v54 = vmul.f32 %v4248_v28, %v4248_v28 }
 0xc43   : > { %4252 = vadd.xlane.f32.xlu0 %v4251_v30 }
 0xc44   : > { %v4254_v35 = vsel %vm2163_vm11, %v4250_v54, 0.0 }
 0xc45   : > { %4255 = vadd.xlane.f32.xlu1 %v4254_v35 }
 0xcd0   : > { %v4253_v31 = vpop.xlane.xlu0 %4252 }
 0xcd1   : > { %v4257_v20 = vmul.f32 0.03125, %v4253_v31 }
 0xcd2   : > { %v4256_v33 = vpop.xlane.xlu1 %4255 }
 0xcd3   : > { %v4259_v25 = vadd.f32 1e-05, %v4257_v20  ;;  %v4258_v13 = vmul.f32 0.03125, %v4256_v33 }
 0xcd5   : > { %19033 = vrsqrt.f32 %v4259_v25  ;;  %v4260_v34 = vadd.f32 1e-05, %v4258_v13 }
 0xcd7   : > { %19035 = vrsqrt.f32 %v4260_v34 }
 0xcdf   : > { %v19034_v11 = vpop.eup %19033 }
 0xce0   : > { %v4263_v39 = vmul.f32 %v19034_v11, %v4247_v12 }
 0xce1   : > { %v19036_v8 = vpop.eup %19035 }
 0xce2   : > { %v4271_v40 = vmul.f32 %v15445_v38, %v4263_v39  ;;  %v4264_v41 = vmul.f32 %v19036_v8, %v4248_v28 }
 0xce4   : > { %v4272_v45 = vmul.f32 %v15445_v38, %v4264_v41  ;;  %v19878_v43 = vadd.f32 %v15446_v42, %v4271_v40 }
 0xce6   : > { %v19880_v44 = vadd.f32 %v15446_v42, %v4272_v45 }
 0xce8   : > { %v4295_v52 = vpack.c.bf16 %v19880_v44, %v19878_v43 }
 0xcea   : > { %17707 = vmatmul.mubr.msk.bf16.vlgmr.msra.gmra.mrb[44].mxu1 %vm1202_vm1, %v4295_v52 }
 0xdbd   : > { %v4351_v47 = vpop.f32.mrb[44].mxu1 }
 0xdbe   : > { %v19886_v37 = vadd.f32 %v15457_v46, %v4351_v47  ;;  %v17708_v48 = vpop.f32.mrb[45].mxu1 }
 0xdbf   : > { %v4354_v49 = vpop.f32.mrb[46].mxu1 }
 0xdc0   : > { %v19888_v50 = vadd.f32 %v15457_v46, %v4354_v49  ;;  %v17709_v51 = vpop.f32.mrb[47].mxu1  ;;  %17714 = vmatprep.mubr.msk.f32.mxu0 %vm1253_vm2, %v19886_v37 }
 0xdc2   : > { %v19894_v53 = vpack.i.bf16 %v19888_v50, %v19886_v37 }
 0xdc4   : > { %18340 = vrot.lane.b32.xlu1 %v19894_v53, %s21320_s1  ;;  %18335 = vrot.lane.b32.xlu0 %v19894_v53, %s21326_s26 }
 0xdc8   : > { %4559 = vrot.lane.b32.xlu1 %v19886_v37, %s21324_s22  ;;  %4561 = vrot.lane.b32.xlu0 %v19888_v50, %s21324_s22 }
 0xe36   : > { %v18341_v56 = vpop.permute.xlu1 %18340  ;;  %v18336_v57 = vpop.permute.xlu0 %18335 }
 0xe37   : > { %v18343_v58 = vunpack.i.h.bf16 %v18341_v56  ;;  %v18342_v59 = vunpack.i.l.bf16 %v18341_v56  ;;  %v18338_v60 = vunpack.i.h.bf16 %v18336_v57  ;;  %v18337_v61 = vunpack.i.l.bf16 %v18336_v57 }
 0xe39   : > { %v18102_v62 = vpack.c.bf16 %v18338_v60, %v18337_v61  ;;  %v18114_v63 = vpack.c.bf16 %v18343_v58, %v18342_v59 }
 0xe3a   : > { %v4560_v2 = vpop.permute.xlu1 %4559  ;;  %v4562_v3 = vpop.permute.xlu0 %4561 }
 0xe3b   : > { %18104 = vmatprep.subr.msk.bf16.mxu0 %vm19476_vm3, %v18102_v62 }
 0xe3c   : > { %18107 = vmatpush3.bf16.xpose.msk.msra.mxu0 %vm19476_vm3, %v18102_v62 }
 0xe3d   : > { %18116 = vmatprep.subr.msk.bf16.mxu0 %vm19476_vm3, %v18114_v63 }
 0xe43   : > { %17715 = vmatmul.mubr.msk.f32.vlgmr.msra.gmra.mrb[10].mxu0 %vm1253_vm2, %v19888_v50 }
 0xe44   : > { %18119 = vmatpush3.bf16.xpose.msk.msra.mxu0 %vm19476_vm3, %v18114_v63  ;;  %17728 = vmatprep.mubr.msk.f32.mxu0 %vm1253_vm2, %v4560_v2 }
 0xe4b   : > { %17729 = vmatmul.mubr.msk.f32.vlgmr.msra.gmra.mrb[48].mxu0 %vm1253_vm2, %v4562_v3 }
 0xf16   : > { %v17716_v24 = vpop.f32.mrb[10].mxu0 }
 0xf17   : > { %v4448_v4 = vmul.f32 0.35355338, %v17716_v24  ;;  %v4438_v6 = vpop.f32.mrb[11].mxu0 }
 0xf18   : > { %v4447_v5 = vmul.f32 0.35355338, %v4438_v6 }
 0xf19   : > { %v4452_v0 = vsel %vm1343_vm4, %v4448_v4, -inf }
 0xf1a   : > { %4453 = vmax.xlane.f32.xlu0 %v4452_v0  ;;  %v4449_v7 = vsel %vm1339_vm5, %v4447_v5, -inf }
 0xf1b   : > { %4450 = vmax.xlane.f32.xlu1 %v4449_v7 }
 0xf1e   : > { %v17730_v18 = vpop.f32.mrb[48].mxu0 }
 0xf1f   : > { %v4651_v19 = vmul.f32 0.35355338, %v17730_v18  ;;  %v4641_v12 = vpop.f32.mrb[49].mxu0 }
 0xf20   : > { %v4650_v21 = vmul.f32 0.35355338, %v4641_v12 }
 0xf21   : > { %v4655_v28 = vsel %vm1343_vm4, %v4651_v19, -inf }
 0xf22   : > { %4656 = vmax.xlane.f32.xlu1 %v4655_v28  ;;  %v4652_v29 = vsel %vm1339_vm5, %v4650_v21, -inf }
 0xf23   : > { %4653 = vmax.xlane.f32.xlu0 %v4652_v29 }
 0xfa7   : > { %v4454_v30 = vpop.xlane.xlu0 %4453 }
 0xfa8   : > { %v4456_v54 = vsub.f32 %v4448_v4, %v4454_v30  ;;  %v4451_v35 = vpop.xlane.xlu1 %4450 }
 0xfa9   : > { %v4455_v55 = vsub.f32 %v4447_v5, %v4451_v35 }
 0xfaa   : > { %v4459_v36 = vmul.f32 1.442695, %v4456_v54 }
 0xfab   : > { %v4457_v31 = vmul.f32 1.442695, %v4455_v55 }
 0xfac   : > { %19037 = vpow2.f32 %v4459_v36 }
 0xfad   : > { %19039 = vpow2.f32 %v4457_v31 }
 0xfaf   : > { %v4657_v20 = vpop.xlane.xlu1 %4656 }
 0xfb0   : > { %v4659_v33 = vsub.f32 %v4651_v19, %v4657_v20  ;;  %v4654_v25 = vpop.xlane.xlu0 %4653 }
 0xfb1   : > { %v4658_v13 = vsub.f32 %v4650_v21, %v4654_v25 }
 0xfb2   : > { %v4662_v34 = vmul.f32 1.442695, %v4659_v33 }
 0xfb3   : > { %v4660_v11 = vmul.f32 1.442695, %v4658_v13 }
 0xfb4   : > { %19041 = vpow2.f32 %v4662_v34 }
 0xfb5   : > { %19043 = vpow2.f32 %v4660_v11 }
 0xfb6   : > { %v19038_v38 = vpop.eup %19037 }
 0xfb7   : > { %v19040_v39 = vpop.eup %19039  ;;  %v4464_v8 = vsel %vm1343_vm4, %v19038_v38, 0.0 }
 0xfb8   : > { %4465 = vadd.xlane.f32.xlu1 %v4464_v8  ;;  %v4461_v40 = vsel %vm1339_vm5, %v19040_v39, 0.0 }
 0xfb9   : > { %4462 = vadd.xlane.f32.xlu0 %v4461_v40 }
 0xfbe   : > { %v19042_v41 = vpop.eup %19041 }
 0xfbf   : > { %v19044_v42 = vpop.eup %19043  ;;  %v4667_v45 = vsel %vm1343_vm4, %v19042_v41, 0.0 }
 0xfc0   : > { %4668 = vadd.xlane.f32.xlu1 %v4667_v45  ;;  %v4664_v52 = vsel %vm1339_vm5, %v19044_v42, 0.0 }
 0xfc1   : > { %4665 = vadd.xlane.f32.xlu0 %v4664_v52 }
 0xfd1   : > { %18350 = vrot.lane.b32.xlu1 %v19894_v53, %s21309_s2  ;;  %s21403_s2 = smov 72  }
 0xfd5   : > { %18355 = vrot.lane.b32.xlu1 %v19894_v53, %s21317_s23 }
 0xfd7   : > { %18345 = vrot.lane.b32.xlu0 %v19894_v53, %s21307_s7  ;;  %s21402_s7 = smov 104  }
 0xfd9   : > { %4764 = vrot.lane.b32.xlu1 %v19888_v50, %s21322_s28 }
 0xfdb   : > { %4762 = vrot.lane.b32.xlu0 %v19886_v37, %s21322_s28 }
0x1045   : > { %v4466_v47 = vpop.xlane.xlu1 %4465 }
0x1046   : > { %v4463_v46 = vpop.xlane.xlu0 %4462 }
0x1047   : > { %19045 = vrcp.f32 %v4463_v46 }
0x1048   : > { %19047 = vrcp.f32 %v4466_v47 }
0x104d   : > { %v4669_v48 = vpop.xlane.xlu1 %4668 }
0x104e   : > { %v4666_v49 = vpop.xlane.xlu0 %4665 }
0x104f   : > { %19049 = vrcp.f32 %v4666_v49 }
0x1050   : > { %19051 = vrcp.f32 %v4669_v48 }
0x1051   : > { %v19046_v51 = vpop.eup %19045  ;;  %v18351_v56 = vpop.permute.xlu1 %18350 }
0x1052   : > { %v18346_v57 = vpop.permute.xlu0 %18345  ;;  %v4469_v58 = vmul.f32 %v19046_v51, %v19040_v39  ;;  %v18353_v59 = vunpack.i.h.bf16 %v18351_v56  ;;  %v18352_v60 = vunpack.i.l.bf16 %v18351_v56  ;;  %v19048_v3 = vpop.eup %19047 }
0x1053   : > { %v18348_v61 = vunpack.i.h.bf16 %v18346_v57  ;;  %v18347_v62 = vunpack.i.l.bf16 %v18346_v57  ;;  %v4470_v0 = vmul.f32 %v19048_v3, %v19038_v38 }
0x1054   : > { %17721 = vmatprep.mubr.msk.f32.mxu1 %vm1339_vm5, %v4469_v58  ;;  %v18120_v24 = vpack.c.bf16 %v18353_v59, %v18352_v60 }
0x1055   : > { %v18108_v63 = vpack.c.bf16 %v18348_v61, %v18347_v62  ;;  %v18356_v2 = vpop.permute.xlu1 %18355 }
0x1056   : > { %v18358_v4 = vunpack.i.h.bf16 %v18356_v2  ;;  %v18357_v6 = vunpack.i.l.bf16 %v18356_v2  ;;  %v4763_v21 = vpop.permute.xlu0 %4762 }
0x1057   : > { %18110 = vmatprep.subr.msk.bf16.mxu1 %vm19513_vm8, %v18108_v63 }
0x1058   : > { %18113 = vmatpush3.bf16.msk.msra.mxu1 %vm19513_vm8, %v18108_v63  ;;  %v18126_v19 = vpack.c.bf16 %v18358_v4, %v18357_v6 }
0x1059   : > { %v19050_v5 = vpop.eup %19049  ;;  %18122 = vmatprep.subr.msk.bf16.mxu1 %vm19513_vm8, %v18120_v24  ;;  %v4765_v28 = vpop.permute.xlu1 %4764 }
0x105a   : > { %v19052_v7 = vpop.eup %19051  ;;  %v4672_v18 = vmul.f32 %v19050_v5, %v19044_v42 }
0x105b   : > { %17722 = vmatmul.mubr.msk.f32.vlgmr.msra.gmra.mrb[10].mxu1 %vm1339_vm5, %v4470_v0  ;;  %v4673_v12 = vmul.f32 %v19052_v7, %v19042_v41 }
0x105c   : > { %18125 = vmatpush3.bf16.msk.msra.mxu1 %vm19513_vm8, %v18120_v24  ;;  %17735 = vmatprep.mubr.msk.f32.mxu1 %vm1339_vm5, %v4672_v18 }
0x105d   : > { %18128 = vmatprep.subr.msk.bf16.mxu1 %vm19476_vm3, %v18126_v19 }
0x105f   : > { %17736 = vmatmul.mubr.msk.f32.vlgmr.msra.gmra.mrb[48].mxu1 %vm1339_vm5, %v4673_v12 }
0x1060   : > { %17742 = vmatprep.mubr.msk.f32.mxu1 %vm1253_vm2, %v4763_v21 }
0x1065   : > { %18131 = vmatpush3.bf16.xpose.msk.msra.mxu1 %vm19476_vm3, %v18126_v19 }
0x106c   : > { %17743 = vmatmul.mubr.msk.f32.vlgmr.msra.gmra.mrb[50].mxu1 %vm1253_vm2, %v4765_v28 }
0x112e   : > { %v19952_v29 = vpop.f32.mrb[10].mxu1 }
0x112f   : > { %v19954_v30 = vpop.f32.mrb[11].mxu1 }
0x1132   : > { %v19956_v54 = vpop.f32.mrb[48].mxu1 }
0x1133   : > { %v19958_v35 = vpop.f32.mrb[49].mxu1 }
0x1134   : > { %v18374_v55 = vpack.i.bf16 %v19956_v54, %v19958_v35  ;;  %v18594_v54 = vld [vmem:[%s21386_s21 + $0x18] sm:$0xff]  }
0x113f   : > { %v17744_v36 = vpop.f32.mrb[50].mxu1 }
0x1140   : > { %v4854_v31 = vmul.f32 0.35355338, %v17744_v36  ;;  %v4844_v20 = vpop.f32.mrb[51].mxu1 }
0x1141   : > { %v4853_v33 = vmul.f32 0.35355338, %v4844_v20 }
0x1142   : > { %v4858_v25 = vsel %vm1343_vm4, %v4854_v31, -inf }
0x1143   : > { %4859 = vmax.xlane.f32.xlu1 %v4858_v25  ;;  %v4855_v13 = vsel %vm1339_vm5, %v4853_v33, -inf }
0x1144   : > { %4856 = vmax.xlane.f32.xlu0 %v4855_v13 }
0x1154   : > { %18360 = vrot.lane.b32.xlu1 %v19894_v53, %s21401_s18 }
0x1158   : > { %4965 = vrot.lane.b32.xlu1 %v19886_v37, %s21402_s7 }
0x115c   : > { %4967 = vrot.lane.b32.xlu1 %v19888_v50, %s21402_s7 }
0x11d0   : > { %v4860_v34 = vpop.xlane.xlu1 %4859 }
0x11d1   : > { %v4862_v11 = vsub.f32 %v4854_v31, %v4860_v34  ;;  %v4857_v38 = vpop.xlane.xlu0 %4856 }
0x11d2   : > { %v4861_v39 = vsub.f32 %v4853_v33, %v4857_v38 }
0x11d3   : > { %v4865_v8 = vmul.f32 1.442695, %v4862_v11 }
0x11d4   : > { %v4863_v40 = vmul.f32 1.442695, %v4861_v39  ;;  %v18361_v41 = vpop.permute.xlu1 %18360 }
0x11d5   : > { %19053 = vpow2.f32 %v4865_v8  ;;  %v18363_v42 = vunpack.i.h.bf16 %v18361_v41  ;;  %v18362_v45 = vunpack.i.l.bf16 %v18361_v41 }
0x11d6   : > { %19055 = vpow2.f32 %v4863_v40 }
0x11d7   : > { %v18132_v52 = vpack.c.bf16 %v18363_v42, %v18362_v45 }
0x11d8   : > { %v4966_v63 = vpop.permute.xlu1 %4965 }
0x11d9   : > { %18134 = vmatprep.subr.msk.bf16.mxu0 %vm19513_vm8, %v18132_v52 }
0x11da   : > { %18137 = vmatpush3.bf16.msk.msra.mxu0 %vm19513_vm8, %v18132_v52 }
0x11dc   : > { %v4968_v2 = vpop.permute.xlu1 %4967 }
0x11df   : > { %v19054_v37 = vpop.eup %19053 }
0x11e0   : > { %v4870_v50 = vsel %vm1343_vm4, %v19054_v37, 0.0  ;;  %v19056_v46 = vpop.eup %19055 }
0x11e1   : > { %4871 = vadd.xlane.f32.xlu0 %v4870_v50  ;;  %v4867_v47 = vsel %vm1339_vm5, %v19056_v46, 0.0 }
0x11e5   : > { %4868 = vadd.xlane.f32.xlu0 %v4867_v47 }
0x11fb   : > { %18365 = vrot.lane.b32.xlu0 %v19894_v53, %s21403_s2 }
0x126e   : > { %v4872_v48 = vpop.xlane.xlu0 %4871 }
0x126f   : > { %19057 = vrcp.f32 %v4872_v48 }
0x1272   : > { %v4869_v49 = vpop.xlane.xlu0 %4868 }
0x1273   : > { %19059 = vrcp.f32 %v4869_v49 }
0x1276   : > { %v18366_v51 = vpop.permute.xlu0 %18365 }
0x1277   : > { %v18368_v56 = vunpack.i.h.bf16 %v18366_v51  ;;  %v18367_v57 = vunpack.i.l.bf16 %v18366_v51 }
0x1279   : > { %v18138_v58 = vpack.c.bf16 %v18368_v56, %v18367_v57  ;;  %v19058_v59 = vpop.eup %19057 }
0x127a   : > { %v4876_v62 = vmul.f32 %v19058_v59, %v19054_v37  ;;  %v18593_v37 = vld [vmem:[%s21386_s21 + $0x10] sm:$0xff]   ;;  %s21421_s21 = sld [smem:[#allocation17_spill]] }
0x127b   : > { %18140 = vmatprep.subr.msk.bf16.mxu0 %vm19476_vm3, %v18138_v58 }
0x127d   : > { %v19060_v60 = vpop.eup %19059 }
0x127e   : > { %v4875_v61 = vmul.f32 %v19060_v60, %v19056_v46 }
0x1280   : > { %17749 = vmatprep.mubr.msk.f32.mxu0 %vm1339_vm5, %v4875_v61 }
0x1281   : > { %17750 = vmatmul.mubr.msk.f32.vlgmr.msra.gmra.mrb[50].mxu0 %vm1339_vm5, %v4876_v62 }
0x1282   : > { %18143 = vmatpush3.bf16.xpose.msk.msra.mxu0 %vm19476_vm3, %v18138_v58  ;;  %17756 = vmatprep.mubr.msk.f32.mxu0 %vm1253_vm2, %v4966_v63 }
0x1289   : > { %17757 = vmatmul.mubr.msk.f32.vlgmr.msra.gmra.mrb[52].mxu0 %vm1253_vm2, %v4968_v2 }
0x128a   : > { %5882 = vmatprep.mubr.bf16.mxu0 %v19224_v32 }
0x1354   : > { %v17751_v3 = vpop.f32.mrb[50].mxu0 }
0x1355   : > { %v4956_v24 = vpop.f32.mrb[51].mxu0 }
0x1356   : > { %v18379_v4 = vpack.i.bf16 %v17751_v3, %v4956_v24 }
0x135c   : > { %v17758_v6 = vpop.f32.mrb[52].mxu0 }
0x135d   : > { %v5057_v5 = vmul.f32 0.35355338, %v17758_v6  ;;  %v5047_v0 = vpop.f32.mrb[53].mxu0 }
0x135e   : > { %v5056_v7 = vmul.f32 0.35355338, %v5047_v0 }
0x135f   : > { %v5061_v18 = vsel %vm1343_vm4, %v5057_v5, -inf }
0x1360   : > { %5062 = vmax.xlane.f32.xlu1 %v5061_v18  ;;  %v5058_v19 = vsel %vm1339_vm5, %v5056_v7, -inf }
0x1361   : > { %5059 = vmax.xlane.f32.xlu0 %v5058_v19 }
0x1371   : > { %18370 = vrot.lane.b32.xlu1 %v19894_v53, %s21315_s10  ;;  %s21319_s10 = sshll.u32 %s21450_s16, 3  ;;  %s21430_s16 = sld [smem:[#allocation28_spill]] }
0x1375   : > { %18380 = vrot.lane.b32.xlu1 %v18379_v4, %s21311_s0  ;;  %s21404_s0 = smov 8  }
0x13ed   : > { %v5063_v12 = vpop.xlane.xlu1 %5062 }
0x13ee   : > { %v5065_v21 = vsub.f32 %v5057_v5, %v5063_v12  ;;  %v5060_v28 = vpop.xlane.xlu0 %5059 }
0x13ef   : > { %v5064_v36 = vsub.f32 %v5056_v7, %v5060_v28 }
0x13f0   : > { %v5068_v31 = vmul.f32 1.442695, %v5065_v21 }
0x13f1   : > { %v5066_v20 = vmul.f32 1.442695, %v5064_v36  ;;  %v18371_v33 = vpop.permute.xlu1 %18370 }
0x13f2   : > { %v18373_v25 = vunpack.i.h.bf16 %v18371_v33  ;;  %v18372_v13 = vunpack.i.l.bf16 %v18371_v33 }
0x13f3   : > { %19061 = vpow2.f32 %v5066_v20 }
0x13f4   : > { %v18144_v34 = vpack.c.bf16 %v18373_v25, %v18372_v13  ;;  %19063 = vpow2.f32 %v5068_v31 }
0x13f5   : > { %v18381_v49 = vpop.permute.xlu1 %18380 }
0x13f6   : > { %18146 = vmatprep.subr.msk.bf16.mxu1 %vm19513_vm8, %v18144_v34  ;;  %v18383_v57 = vunpack.i.h.bf16 %v18381_v49  ;;  %v18382_v58 = vunpack.i.l.bf16 %v18381_v49  ;;  %v15500_v49 = vld [vmem:[%s21392_s8 + $0x118] sm:$0xff] }
0x13f7   : > { %18149 = vmatpush3.bf16.msk.msra.mxu1 %vm19513_vm8, %v18144_v34 }
0x13f8   : > { %17766 = vmatprep.subr.bf16.mxu1 %v19207_v1 }
0x13fd   : > { %v19062_v53 = vpop.eup %19061 }
0x13fe   : > { %v5070_v11 = vsel %vm1339_vm5, %v19062_v53, 0.0  ;;  %v19064_v38 = vpop.eup %19063 }
0x13ff   : > { %5071 = vadd.xlane.f32.xlu0 %v5070_v11  ;;  %v5073_v39 = vsel %vm1343_vm4, %v19064_v38, 0.0  ;;  %v15505_v11 = vld [vmem:[%s21392_s8 + $0x140] sm:$0xff] }
0x1403   : > { %5074 = vadd.xlane.f32.xlu0 %v5073_v39 }
0x1419   : > { %18375 = vrot.lane.b32.xlu0 %v18374_v55, %s21404_s0 }
0x148c   : > { %v5072_v8 = vpop.xlane.xlu0 %5071 }
0x148d   : > { %19065 = vrcp.f32 %v5072_v8  ;;  %v15506_v8 = vld [vmem:[%s21392_s8 + $0x148] sm:$0xff] }
0x1490   : > { %v5075_v40 = vpop.xlane.xlu0 %5074 }
0x1491   : > { %19067 = vrcp.f32 %v5075_v40 }
0x1494   : > { %v18376_v46 = vpop.permute.xlu0 %18375 }
0x1495   : > { %v18378_v47 = vunpack.i.h.bf16 %v18376_v46  ;;  %v18377_v48 = vunpack.i.l.bf16 %v18376_v46 }
0x1497   : > { %v19066_v41 = vpop.eup %19065  ;;  %v5193_v51 = vsel %vm1253_vm2, %v19952_v29, %v18378_v47  ;;  %v5192_v56 = vsel %vm1253_vm2, %v19954_v30, %v18377_v48  ;;  %v15489_v29 = vld [vmem:[%s21384_s25 + $0x1] ss:$0 sm:$0xff]  ;;  %v15499_v47 = vld [vmem:[%s21392_s8 + $0x110] sm:$0xff]  ;;  %s21425_s25 = sld [smem:[#allocation23_spill]] }
0x1498   : > { %v5078_v42 = vmul.f32 %v19066_v41, %v19062_v53  ;;  %v5194_v62 = vsel %vm2087_vm9, %v5192_v56, %v18382_v58  ;;  %v5195_v63 = vsel %vm2087_vm9, %v5193_v51, %v18383_v57  ;;  %v15497_v53 = vld [vmem:[%s21392_s8 + $0x100] sm:$0xff]  ;;  %v15507_v48 = vld [vmem:[%s21392_s8 + $0x150] sm:$0xff]  ;;  %v15508_v56 = vld [vmem:[%s21392_s8 + $0x158] sm:$0xff] }
0x1499   : > { %v15789_v39 = vcombine.high %v15497_v53, %v15505_v11  ;;  %v15788_v40 = vcombine.low %v15497_v53, %v15505_v11  ;;  %v15793_v51 = vcombine.high %v15499_v47, %v15507_v48  ;;  %v15792_v57 = vcombine.low %v15499_v47, %v15507_v48 }
0x149a   : > { %17763 = vmatprep.mubr.msk.f32.mxu1 %vm1339_vm5, %v5078_v42  ;;  %v15794_v58 = vcombine.low %v15500_v49, %v15508_v56 }
0x149b   : > { %v19068_v45 = vpop.eup %19067  ;;  %5850 = vmatprep.subr.bf16.mxu0 %v15789_v39  ;;  %v15517_v39 = vld [vmem:[%s21392_s8 + $0x1a0] sm:$0xff] }
0x149c   : > { %v5079_v52 = vmul.f32 %v19068_v45, %v19064_v38  ;;  %v15498_v38 = vld [vmem:[%s21392_s8 + $0x108] sm:$0xff]  ;;  %5851 = vmatpush1.bf16.msra.mxu0 %v15788_v40  ;;  %v15513_v45 = vld [vmem:[%s21392_s8 + $0x180] sm:$0xff] }
0x149d   : > { %v15790_v41 = vcombine.low %v15498_v38, %v15506_v8  ;;  %v15791_v42 = vcombine.high %v15498_v38, %v15506_v8  ;;  %v15525_v8 = vld [vmem:[%s21392_s8 + $0x1e0] sm:$0xff]  ;;  %v15518_v40 = vld [vmem:[%s21392_s8 + $0x1a8] sm:$0xff]  ;;  %v18865_v16 = vld [vmem:[%s21425_s25 + $0x10] sm:$0xff]  }
0x149e   : > { %17764 = vmatmul.mubr.msk.f32.vlgmr.msra.gmra.mrb[52].mxu1 %vm1339_vm5, %v5079_v52  ;;  %v15521_v52 = vld [vmem:[%s21392_s8 + $0x1c0] sm:$0xff] }
0x149f   : > { %17770 = vmatprep.mubr.msk.bf16.mxu1 %vm19208_vm0, %v19207_v1  ;;  %17767 = vmatpush3.bf16.msra.mxu1 %v18593_v37  ;;  %v15514_v37 = vld [vmem:[%s21392_s8 + $0x188] sm:$0xff] }
0x14a0   : > { %17768 = vmatprep.subr.bf16.mxu1 %v19207_v1 }
0x14a3   : > { %17769 = vmatpush3.bf16.msra.mxu1 %v18594_v54  ;;  %v15805_v54 = vcombine.high %v15513_v45, %v15521_v52 }
0x14a4   : > { %5893 = vmatprep.subr.bf16.mxu1 %v15791_v42 }
0x14a5   : > { %5852 = vmatprep.subr.bf16.mxu0 %v15805_v54  ;;  %v15503_v54 = vld [vmem:[%s21392_s8 + $0x130] sm:$0xff] }
0x1571   : > { %v17765_v35 = vpop.f32.mrb[52].mxu1 }
0x1572   : > { %v5159_v55 = vpop.f32.mrb[53].mxu1 }
0x1573   : > { %v18384_v50 = vpack.i.bf16 %v17765_v35, %v5159_v55  ;;  %v15522_v35 = vld [vmem:[%s21392_s8 + $0x1c8] sm:$0xff]  ;;  %v15804_v55 = vcombine.low %v15513_v45, %v15521_v52  ;;  %v15813_v52 = vcombine.high %v15517_v39, %v15525_v8 }
0x1574   : > { %v15807_v46 = vcombine.high %v15514_v37, %v15522_v35 }
0x1575   : > { %18385 = vrot.lane.b32.xlu1 %v18384_v50, %s21313_s11  ;;  %v15806_v50 = vcombine.low %v15514_v37, %v15522_v35  ;;  %5853 = vmatpush1.bf16.msra.mxu0 %v15804_v55  ;;  %v15511_v35 = vld [vmem:[%s21392_s8 + $0x170] sm:$0xff]  ;;  %v15504_v55 = vld [vmem:[%s21392_s8 + $0x138] sm:$0xff]  ;;  %s21405_s11 = sld [smem:[#allocation3_spill]] }
0x1576   : > { %5936 = vmatprep.subr.bf16.mxu0 %v15793_v51  ;;  %v15801_v48 = vcombine.high %v15503_v54, %v15511_v35  ;;  %v15519_v51 = vld [vmem:[%s21392_s8 + $0x1b0] sm:$0xff] }
0x157b   : > { %s1165_s23 = scalar_lea.vmem %s21405_s11, %s21319_s10  ;;  %s21407_s11 = smov 80  }
0x157c   : > { %s21408_s10 = smov 56  }
0x15e7   : > { %v18386_v59 = vpop.permute.xlu1 %18385 }
0x15e8   : > { %v18388_v60 = vunpack.i.h.bf16 %v18386_v59  ;;  %v18387_v61 = vunpack.i.l.bf16 %v18386_v59  ;;  %v15795_v59 = vcombine.high %v15500_v49, %v15508_v56  ;;  %v15527_v56 = vld [vmem:[%s21392_s8 + $0x1f0] sm:$0xff] }
0x15ea   : > { %v5196_v2 = vsel %vm2090_vm10, %v5194_v62, %v18387_v61  ;;  %v5197_v3 = vsel %vm2090_vm10, %v5195_v63, %v18388_v60 }
0x15eb   : > { %v5198_v24 = vpack.c.bf16 %v5197_v3, %v5196_v2 }
0x15ed   : > { %17771 = vmatmul.mubr.msk.bf16.vlgmr.msra.gmra.mrb[56].mxu1 %vm1202_vm1, %v5198_v24 }
0x15ee   : > { %5925 = vmatprep.mubr.bf16.mxu1 %v19224_v32  ;;  %5894 = vmatpush1.bf16.msra.mxu1 %v15790_v41  ;;  %v15526_v41 = vld [vmem:[%s21392_s8 + $0x1e8] sm:$0xff] }
0x15ef   : > { %5895 = vmatprep.subr.bf16.mxu1 %v15807_v46  ;;  %v15815_v37 = vcombine.high %v15518_v40, %v15526_v41  ;;  %v15812_v46 = vcombine.low %v15517_v39, %v15525_v8  ;;  %v15814_v47 = vcombine.low %v15518_v40, %v15526_v41  ;;  %v18619_v39 = vld [vmem:[%s21387_s19 + $0x470] sm:$0xff]  }
0x15f0   : > { %v18620_v8 = vld [vmem:[%s21387_s19 + $0x4f0] sm:$0xff]  }
0x15f1   : > { %v18621_v40 = vld [vmem:[%s21387_s19 + $0x430] sm:$0xff]  }
0x15f2   : > { %5896 = vmatpush1.bf16.msra.mxu1 %v15806_v50  ;;  %v15512_v50 = vld [vmem:[%s21392_s8 + $0x178] sm:$0xff]  ;;  %v18622_v41 = vld [vmem:[%s21387_s19 + $0x4b0] sm:$0xff]  }
0x15f3   : > { %5979 = vmatprep.subr.bf16.mxu1 %v15795_v59  ;;  %v15803_v49 = vcombine.high %v15504_v55, %v15512_v50  ;;  %v15800_v59 = vcombine.low %v15503_v54, %v15511_v35  ;;  %v18627_v54 = vld [vmem:[%s21387_s19 + $0x540] sm:$0xff]  }
0x15f4   : > { %v18628_v35 = vld [vmem:[%s21387_s19 + $0x5c0] sm:$0xff]  }
0x16c0   : > { %v5254_v30 = vpop.f32.mrb[56].mxu1 }
0x16c1   : > { %v5255_v4 = vadd.f32 %v15489_v29, %v5254_v30  ;;  %v17772_v6 = vpop.f32.mrb[57].mxu1  ;;  %v15495_v30 = vld [vmem:[%s21383_s29 + $0x1] ss:$0 sm:$0xff]  ;;  %s21426_s29 = sld [smem:[#allocation24_spill]] }
0x16c2   : > { %v5257_v5 = vpop.f32.mrb[58].mxu1 }
0x16c3   : > { %v5258_v0 = vadd.f32 %v15489_v29, %v5257_v5  ;;  %v17773_v7 = vpop.f32.mrb[59].mxu1  ;;  %v5261_v18 = vadd.f32 %v5255_v4, %v19878_v43 }
0x16c5   : > { %v5267_v19 = vsel %vm1202_vm1, %v5261_v18, 0.0  ;;  %v5262_v12 = vadd.f32 %v5258_v0, %v19880_v44  ;;  %v15496_v0 = vld [vmem:[%s21393_s3 + $0x1] ss:$0 sm:$0xff]  ;;  %s21413_s3 = smov 24  }
0x16c6   : > { %5268 = vadd.xlane.f32.xlu0 %v5267_v19  ;;  %v15523_v19 = vld [vmem:[%s21392_s8 + $0x1d0] sm:$0xff] }
0x16c7   : > { %v5270_v21 = vsel %vm2163_vm11, %v5262_v12, 0.0 }
0x16c8   : > { %5271 = vadd.xlane.f32.xlu1 %v5270_v21  ;;  %v15524_v21 = vld [vmem:[%s21392_s8 + $0x1d8] sm:$0xff] }
0x1753   : > { %v5269_v28 = vpop.xlane.xlu0 %5268 }
0x1754   : > { %v5273_v36 = vmul.f32 0.03125, %v5269_v28 }
0x1755   : > { %v5272_v31 = vpop.xlane.xlu1 %5271 }
0x1756   : > { %v5275_v20 = vsub.f32 %v5261_v18, %v5273_v36  ;;  %v5274_v33 = vmul.f32 0.03125, %v5272_v31  ;;  %v15515_v18 = vld [vmem:[%s21392_s8 + $0x190] sm:$0xff] }
0x1758   : > { %v5276_v25 = vsub.f32 %v5262_v12, %v5274_v33  ;;  %v5277_v13 = vmul.f32 %v5275_v20, %v5275_v20  ;;  %v15516_v12 = vld [vmem:[%s21392_s8 + $0x198] sm:$0xff] }
0x1759   : > { %v15811_v33 = vcombine.high %v15516_v12, %v15524_v21  ;;  %v15810_v53 = vcombine.low %v15516_v12, %v15524_v21  ;;  %v18606_v12 = vld [vmem:[%s21387_s19 + $0x490] sm:$0xff]   ;;  %v18607_v21 = vld [vmem:[%s21387_s19 + $0x458] sm:$0xff]  }
0x175a   : > { %v5279_v43 = vsel %vm1202_vm1, %v5277_v13, 0.0  ;;  %v5278_v34 = vmul.f32 %v5276_v25, %v5276_v25  ;;  %v15501_v13 = vld [vmem:[%s21392_s8 + $0x120] sm:$0xff] }
0x175b   : > { %5280 = vadd.xlane.f32.xlu0 %v5279_v43  ;;  %v15509_v43 = vld [vmem:[%s21392_s8 + $0x160] sm:$0xff] }
0x175c   : > { %v5282_v44 = vsel %vm2163_vm11, %v5278_v34, 0.0  ;;  %v15510_v34 = vld [vmem:[%s21392_s8 + $0x168] sm:$0xff]  ;;  %v15797_v11 = vcombine.high %v15501_v13, %v15509_v43  ;;  %v15796_v42 = vcombine.low %v15501_v13, %v15509_v43  ;;  %v18611_v13 = vld [vmem:[%s21387_s19 + $0x460] sm:$0xff]  }
0x175d   : > { %v18612_v43 = vld [vmem:[%s21387_s19 + $0x4e0] sm:$0xff]  }
0x175f   : > { %5283 = vadd.xlane.f32.xlu0 %v5282_v44  ;;  %v15808_v44 = vcombine.low %v15515_v18, %v15523_v19 }
0x17e8   : > { %v5281_v60 = vpop.xlane.xlu0 %5280 }
0x17e9   : > { %v5285_v61 = vmul.f32 0.03125, %v5281_v60  ;;  %v15802_v60 = vcombine.low %v15504_v55, %v15512_v50  ;;  %v15529_v55 = vld [vmem:[%s21389_s14 + $0x10] sm:$0xff] }
0x17ea   : > { %v5610_v50 = vrot.slane %v15529_v55, %v19695_v9 }
0x17eb   : > { %v5287_v62 = vadd.f32 1e-05, %v5285_v61  ;;  %v15817_v61 = vcombine.high %v15519_v51, %v15527_v56 }
0x17ec   : > { %v5284_v63 = vpop.xlane.xlu0 %5283 }
0x17ed   : > { %19069 = vrsqrt.f32 %v5287_v62  ;;  %v5286_v2 = vmul.f32 0.03125, %v5284_v63  ;;  %v15816_v63 = vcombine.low %v15519_v51, %v15527_v56 }
0x17ef   : > { %v5288_v3 = vadd.f32 1e-05, %v5286_v2 }
0x17f1   : > { %19071 = vrsqrt.f32 %v5288_v3  ;;  %v18595_v3 = vld [vmem:[%s21387_s19 + $0x440] sm:$0xff]  }
0x17f7   : > { %v19070_v24 = vpop.eup %19069 }
0x17f8   : > { %v5291_v29 = vmul.f32 %v19070_v24, %v5275_v20  ;;  %v15809_v20 = vcombine.high %v15515_v18, %v15523_v19  ;;  %v18596_v24 = vld [vmem:[%s21387_s19 + $0x4c0] sm:$0xff]   ;;  %v18604_v18 = vld [vmem:[%s21387_s19 + $0x4d0] sm:$0xff]  }
0x17f9   : > { %v18605_v19 = vld [vmem:[%s21387_s19 + $0x410] sm:$0xff]  }
0x17fa   : > { %v5299_v6 = vmul.f32 %v15495_v30, %v5291_v29  ;;  %v18597_v29 = vld [vmem:[%s21387_s19 + $0x400] sm:$0xff]  }
0x17fb   : > { %v19072_v4 = vpop.eup %19071 }
0x17fc   : > { %v5292_v5 = vmul.f32 %v19072_v4, %v5276_v25  ;;  %v20046_v28 = vadd.f32 %v15496_v0, %v5299_v6  ;;  %v15502_v25 = vld [vmem:[%s21392_s8 + $0x128] sm:$0xff] }
0x17fd   : > { %v15799_v38 = vcombine.high %v15502_v25, %v15510_v34  ;;  %v15798_v45 = vcombine.low %v15502_v25, %v15510_v34  ;;  %v18599_v4 = vld [vmem:[%s21387_s19 + $0x448] sm:$0xff]   ;;  %v18613_v25 = vld [vmem:[%s21387_s19 + $0x420] sm:$0xff]  }
0x17fe   : > { %v5300_v7 = vmul.f32 %v15495_v30, %v5292_v5  ;;  %v18598_v30 = vld [vmem:[%s21387_s19 + $0x480] sm:$0xff]   ;;  %v18600_v6 = vld [vmem:[%s21387_s19 + $0x4c8] sm:$0xff]  }
0x17ff   : > { %v18601_v5 = vld [vmem:[%s21387_s19 + $0x408] sm:$0xff]   ;;  %v18614_v34 = vld [vmem:[%s21387_s19 + $0x4a0] sm:$0xff]  }
0x1800   : > { %v20048_v36 = vadd.f32 %v15496_v0, %v5300_v7  ;;  %v18602_v0 = vld [vmem:[%s21387_s19 + $0x488] sm:$0xff]   ;;  %v18603_v7 = vld [vmem:[%s21387_s19 + $0x450] sm:$0xff]  }
0x1802   : > { %v20052_v31 = vpack.c.bf16 %v20048_v36, %v20046_v28 }
0x1804   : > { %15820 = vmatmul.mubr.msk.bf16.vlgmr.msra.gmra.mrb[56].mxu0 %vm1202_vm1, %v20052_v31  ;;  %15821 = vmatmul.mubr.msk.bf16.vlgmr.msra.gmra.mrb[60].mxu1 %vm1202_vm1, %v20052_v31 }
0x1805   : > { %5937 = vmatpush1.bf16.msra.mxu0 %v15792_v57  ;;  %5980 = vmatpush1.bf16.msra.mxu1 %v15794_v58  ;;  %v15520_v57 = vld [vmem:[%s21392_s8 + $0x1b8] sm:$0xff] }
0x1806   : > { %5938 = vmatprep.subr.bf16.mxu0 %v15809_v20  ;;  %5981 = vmatprep.subr.bf16.mxu1 %v15811_v33  ;;  %v15528_v58 = vld [vmem:[%s21392_s8 + $0x1f8] sm:$0xff]  ;;  %s21415_s8 = sld [smem:[#allocation21_spill]] }
0x1807   : > { %5968 = vmatprep.mubr.bf16.mxu0 %v19224_v32  ;;  %6011 = vmatprep.mubr.bf16.mxu1 %v19224_v32  ;;  %v15819_v62 = vcombine.high %v15520_v57, %v15528_v58  ;;  %v15818_v2 = vcombine.low %v15520_v57, %v15528_v58  ;;  %v18609_v20 = vld [vmem:[%s21387_s19 + $0x418] sm:$0xff]  }
0x1808   : > { %v18610_v33 = vld [vmem:[%s21387_s19 + $0x498] sm:$0xff]  }
0x1809   : > { %5939 = vmatpush1.bf16.msra.mxu0 %v15808_v44  ;;  %5982 = vmatpush1.bf16.msra.mxu1 %v15810_v53  ;;  %v18615_v44 = vld [vmem:[%s21387_s19 + $0x468] sm:$0xff]  }
0x180a   : > { %6022 = vmatprep.subr.bf16.mxu0 %v15797_v11  ;;  %6065 = vmatprep.subr.bf16.mxu1 %v15799_v38  ;;  %v18616_v53 = vld [vmem:[%s21387_s19 + $0x4e8] sm:$0xff]  }
0x180b   : > { %v18617_v11 = vld [vmem:[%s21387_s19 + $0x428] sm:$0xff]  }
0x180c   : > { %15822 = vmatmul.mubr.msk.bf16.vlgmr.msra.gmra.mrb[60].mxu0 %vm1202_vm1, %v20052_v31  ;;  %15823 = vmatmul.mubr.msk.bf16.vlgmr.msra.gmra.mrb[64].mxu1 %vm1202_vm1, %v20052_v31  ;;  %v18618_v38 = vld [vmem:[%s21387_s19 + $0x4a8] sm:$0xff]  }
0x180d   : > { %6023 = vmatpush1.bf16.msra.mxu0 %v15796_v42  ;;  %6066 = vmatpush1.bf16.msra.mxu1 %v15798_v45  ;;  %v18623_v42 = vld [vmem:[%s21387_s19 + $0x478] sm:$0xff]  }
0x180e   : > { %6024 = vmatprep.subr.bf16.mxu0 %v15813_v52  ;;  %6067 = vmatprep.subr.bf16.mxu1 %v15815_v37  ;;  %v18624_v45 = vld [vmem:[%s21387_s19 + $0x4f8] sm:$0xff]  }
0x180f   : > { %6054 = vmatprep.mubr.bf16.mxu0 %v19224_v32  ;;  %6097 = vmatprep.mubr.bf16.mxu1 %v19224_v32  ;;  %v18625_v52 = vld [vmem:[%s21387_s19 + $0x438] sm:$0xff]  }
0x1810   : > { %v18626_v37 = vld [vmem:[%s21387_s19 + $0x4b8] sm:$0xff]  }
0x1811   : > { %6025 = vmatpush1.bf16.msra.mxu0 %v15812_v46  ;;  %6068 = vmatpush1.bf16.msra.mxu1 %v15814_v47  ;;  %v5618_v46 = vrot.slane %v15529_v55, %v19697_v10  ;;  %v5614_v47 = vrot.slane %v15529_v55, %v19700_v15 }
0x1812   : > { %6108 = vmatprep.subr.bf16.mxu0 %v15801_v48  ;;  %6151 = vmatprep.subr.bf16.mxu1 %v15803_v49  ;;  %v5622_v48 = vrot.slane %v15529_v55, %v19702_v17 }
0x1814   : > { %15824 = vmatmul.mubr.msk.bf16.vlgmr.msra.gmra.mrb[64].mxu0 %vm1202_vm1, %v20052_v31  ;;  %15825 = vmatmul.mubr.msk.bf16.vlgmr.msra.gmra.mrb[68].mxu1 %vm1202_vm1, %v20052_v31 }
0x1815   : > { %6109 = vmatpush1.bf16.msra.mxu0 %v15800_v59  ;;  %6152 = vmatpush1.bf16.msra.mxu1 %v15802_v60 }
0x1816   : > { %6110 = vmatprep.subr.bf16.mxu0 %v15817_v61  ;;  %6153 = vmatprep.subr.bf16.mxu1 %v15819_v62 }
0x1817   : > { %6140 = vmatprep.mubr.bf16.mxu0 %v19224_v32  ;;  %6183 = vmatprep.mubr.bf16.mxu1 %v19224_v32 }
0x1819   : > { %6111 = vmatpush1.bf16.msra.mxu0 %v15816_v63  ;;  %6154 = vmatpush1.bf16.msra.mxu1 %v15818_v2 }
0x181a   : > { %16989 = vmatprep.subr.bf16.mxu0 %v18595_v3  ;;  %17011 = vmatprep.subr.bf16.mxu1 %v18596_v24 }
0x181c   : > { %15826 = vmatmul.mubr.msk.bf16.vlgmr.msra.gmra.mrb[68].mxu0 %vm1202_vm1, %v20052_v31  ;;  %15827 = vmatmul.mubr.msk.bf16.vlgmr.msra.gmra.mrb[72].mxu1 %vm1202_vm1, %v20052_v31  ;;  %v18608_v31 = vld [vmem:[%s21387_s19 + $0x4d8] sm:$0xff]  }
0x181d   : > { %16990 = vmatpush3.bf16.msra.mxu0 %v18597_v29  ;;  %17012 = vmatpush3.bf16.msra.mxu1 %v18598_v30  ;;  %v5626_v30 = vrot.slane %v15529_v55, %v19708_v22 }
0x181e   : > { %16991 = vmatprep.subr.bf16.mxu0 %v18599_v4  ;;  %17013 = vmatprep.subr.bf16.mxu1 %v18600_v6  ;;  %v5634_v4 = vrot.slane %v15529_v55, %v19710_v23 }
0x1821   : > { %16992 = vmatpush3.bf16.msra.mxu0 %v18601_v5  ;;  %17014 = vmatpush3.bf16.msra.mxu1 %v18602_v0  ;;  %v5630_v0 = vrot.slane %v15529_v55, %v19712_v26 }
0x1822   : > { %16993 = vmatprep.subr.bf16.mxu0 %v18603_v7  ;;  %17015 = vmatprep.subr.bf16.mxu1 %v18604_v18  ;;  %v5638_v7 = vrot.slane %v15529_v55, %v19714_v27 }
0x1825   : > { %16994 = vmatpush3.bf16.msra.mxu0 %v18605_v19  ;;  %17016 = vmatpush3.bf16.msra.mxu1 %v18606_v12 }
0x1826   : > { %16995 = vmatprep.subr.bf16.mxu0 %v18607_v21  ;;  %17017 = vmatprep.subr.bf16.mxu1 %v18608_v31 }
0x1829   : > { %16996 = vmatpush3.bf16.msra.mxu0 %v18609_v20  ;;  %17018 = vmatpush3.bf16.msra.mxu1 %v18610_v33 }
0x182a   : > { %16997 = vmatprep.subr.bf16.mxu0 %v18611_v13  ;;  %17019 = vmatprep.subr.bf16.mxu1 %v18612_v43  ;;  %v20136_v43 = vld [vmem:[%s21389_s14 + $0x18] sm:$0xff]  ;;  %s21418_s14 = sld [smem:[#allocation25_spill]] }
0x182d   : > { %16998 = vmatpush3.bf16.msra.mxu0 %v18613_v25  ;;  %17020 = vmatpush3.bf16.msra.mxu1 %v18614_v34 }
0x182e   : > { %16999 = vmatprep.subr.bf16.mxu0 %v18615_v44  ;;  %17021 = vmatprep.subr.bf16.mxu1 %v18616_v53 }
0x1831   : > { %17000 = vmatpush3.bf16.msra.mxu0 %v18617_v11  ;;  %17022 = vmatpush3.bf16.msra.mxu1 %v18618_v38 }
0x1832   : > { %17001 = vmatprep.subr.bf16.mxu0 %v18619_v39  ;;  %17023 = vmatprep.subr.bf16.mxu1 %v18620_v8  ;;  %v18629_v39 = vld [vmem:[%s21387_s19 + $0x500] sm:$0xff]  }
0x1833   : > { %v18630_v8 = vld [vmem:[%s21387_s19 + $0x580] sm:$0xff]  }
0x1835   : > { %17002 = vmatpush3.bf16.msra.mxu0 %v18621_v40  ;;  %17024 = vmatpush3.bf16.msra.mxu1 %v18622_v41 }
0x1836   : > { %17003 = vmatprep.subr.bf16.mxu0 %v18623_v42  ;;  %17025 = vmatprep.subr.bf16.mxu1 %v18624_v45 }
0x1839   : > { %17004 = vmatpush3.bf16.msra.mxu0 %v18625_v52  ;;  %17026 = vmatpush3.bf16.msra.mxu1 %v18626_v37  ;;  %v18631_v52 = vld [vmem:[%s21387_s19 + $0x548] sm:$0xff]  }
0x183a   : > { %17033 = vmatprep.subr.bf16.mxu0 %v18627_v54  ;;  %17055 = vmatprep.subr.bf16.mxu1 %v18628_v35  ;;  %v18632_v37 = vld [vmem:[%s21387_s19 + $0x5c8] sm:$0xff]   ;;  %v5642_v54 = vrot.slane %v20136_v43, %v19695_v9 }
0x18d7   : > { %v5884_v49 = vpop.f32.mrb[56].mxu0  ;;  %v5927_v51 = vpop.f32.mrb[60].mxu1 }
0x18d8   : > { %v5885_v56 = vadd.f32 %v5884_v49, %v5610_v50  ;;  %v5928_v57 = vadd.f32 %v5927_v51, %v5618_v46  ;;  %v5886_v58 = vpop.f32.mrb[57].mxu0  ;;  %v5929_v59 = vpop.f32.mrb[61].mxu1 }
0x18d9   : > { %v5887_v60 = vadd.f32 %v5886_v58, %v5614_v47  ;;  %v5930_v61 = vadd.f32 %v5929_v59, %v5622_v48  ;;  %v5888_v62 = vpop.f32.mrb[58].mxu0  ;;  %v5931_v63 = vpop.f32.mrb[62].mxu1 }
0x18da   : > { %v5889_v2 = vadd.f32 %v5888_v62, %v5610_v50  ;;  %v5932_v3 = vadd.f32 %v5931_v63, %v5618_v46  ;;  %v5890_v24 = vpop.f32.mrb[59].mxu0  ;;  %v5933_v29 = vpop.f32.mrb[63].mxu1  ;;  %v6194_v18 = vmax.f32 %v5885_v56, 0.0  ;;  %v6196_v19 = vmax.f32 %v5928_v57, 0.0 }
0x18db   : > { %v5891_v6 = vadd.f32 %v5890_v24, %v5614_v47  ;;  %v5934_v5 = vadd.f32 %v5933_v29, %v5622_v48  ;;  %v6195_v31 = vmax.f32 %v5887_v60, 0.0  ;;  %v6197_v20 = vmax.f32 %v5930_v61, 0.0  ;;  %v18633_v60 = vld [vmem:[%s21387_s19 + $0x508] sm:$0xff]   ;;  %v18635_v29 = vld [vmem:[%s21387_s19 + $0x550] sm:$0xff]  }
0x18dc   : > { %v6210_v12 = vmax.f32 %v5889_v2, 0.0  ;;  %v6212_v21 = vmax.f32 %v5932_v3, 0.0  ;;  %v5650_v47 = vrot.slane %v20136_v43, %v19697_v10  ;;  %v5646_v57 = vrot.slane %v20136_v43, %v19700_v15  ;;  %v18634_v61 = vld [vmem:[%s21387_s19 + $0x588] sm:$0xff]  }
0x18dd   : > { %v6211_v33 = vmax.f32 %v5891_v6, 0.0  ;;  %v6213_v13 = vmax.f32 %v5934_v5, 0.0  ;;  %v5654_v62 = vrot.slane %v20136_v43, %v19702_v17 }
0x18de   : > { %v6226_v25 = vpack.c.bf16 %v6210_v12, %v6194_v18  ;;  %v6228_v34 = vpack.c.bf16 %v6212_v21, %v6196_v19 }
0x18df   : > { %v6227_v44 = vpack.c.bf16 %v6211_v33, %v6195_v31  ;;  %v6229_v53 = vpack.c.bf16 %v6213_v13, %v6197_v20  ;;  %v5970_v11 = vpop.f32.mrb[60].mxu0  ;;  %v6013_v38 = vpop.f32.mrb[64].mxu1  ;;  %v18637_v20 = vld [vmem:[%s21387_s19 + $0x510] sm:$0xff]  }
0x18e0   : > { %v5971_v40 = vadd.f32 %v5970_v11, %v5626_v30  ;;  %v6014_v41 = vadd.f32 %v6013_v38, %v5634_v4  ;;  %v5972_v42 = vpop.f32.mrb[61].mxu0  ;;  %v6015_v45 = vpop.f32.mrb[65].mxu1  ;;  %v18638_v33 = vld [vmem:[%s21387_s19 + $0x590] sm:$0xff]   ;;  %v18640_v11 = vld [vmem:[%s21387_s19 + $0x5d8] sm:$0xff]  }
0x18e1   : > { %v5973_v35 = vadd.f32 %v5972_v42, %v5630_v0  ;;  %v6016_v55 = vadd.f32 %v6015_v45, %v5638_v7  ;;  %v5974_v50 = vpop.f32.mrb[62].mxu0  ;;  %v6017_v46 = vpop.f32.mrb[66].mxu1  ;;  %7048 = vmatprep.mubr.bf16.mxu0 %v6227_v44  ;;  %7089 = vmatprep.mubr.bf16.mxu1 %v6229_v53  ;;  %v18639_v53 = vld [vmem:[%s21387_s19 + $0x558] sm:$0xff]  }
0x18e2   : > { %v5975_v48 = vadd.f32 %v5974_v50, %v5626_v30  ;;  %v6018_v49 = vadd.f32 %v6017_v46, %v5634_v4  ;;  %v5976_v51 = vpop.f32.mrb[63].mxu0  ;;  %v6019_v56 = vpop.f32.mrb[67].mxu1  ;;  %7049 = vmatmul.mubr.bf16.vlgmr.msra.gmra.mrb[72].mxu0 %v6226_v25  ;;  %7090 = vmatmul.mubr.bf16.vlgmr.msra.gmra.mrb[76].mxu1 %v6228_v34  ;;  %v6198_v63 = vmax.f32 %v5971_v40, 0.0  ;;  %v6200_v2 = vmax.f32 %v6014_v41, 0.0  ;;  %v18636_v30 = vld [vmem:[%s21387_s19 + $0x5d0] sm:$0xff]  }
0x18e3   : > { %v5977_v58 = vadd.f32 %v5976_v51, %v5630_v0  ;;  %v6020_v59 = vadd.f32 %v6019_v56, %v5638_v7  ;;  %17034 = vmatpush3.bf16.msra.mxu0 %v18629_v39  ;;  %17056 = vmatpush3.bf16.msra.mxu1 %v18630_v8  ;;  %v6199_v4 = vmax.f32 %v5973_v35, 0.0  ;;  %v6201_v6 = vmax.f32 %v6016_v55, 0.0 }
0x18e4   : > { %v6214_v3 = vmax.f32 %v5975_v48, 0.0  ;;  %v6216_v24 = vmax.f32 %v6018_v49, 0.0  ;;  %17035 = vmatprep.subr.bf16.mxu0 %v18631_v52  ;;  %17057 = vmatprep.subr.bf16.mxu1 %v18632_v37  ;;  %v5658_v41 = vrot.slane %v20136_v43, %v19708_v22  ;;  %v5666_v35 = vrot.slane %v20136_v43, %v19710_v23  ;;  %v18641_v48 = vld [vmem:[%s21387_s19 + $0x518] sm:$0xff]  }
0x18e5   : > { %v6215_v5 = vmax.f32 %v5977_v58, 0.0  ;;  %v6217_v0 = vmax.f32 %v6020_v59, 0.0  ;;  %v5662_v55 = vrot.slane %v20136_v43, %v19712_v26  ;;  %v18642_v49 = vld [vmem:[%s21387_s19 + $0x598] sm:$0xff]   ;;  %v18643_v59 = vld [vmem:[%s21387_s19 + $0x560] sm:$0xff]  }
0x18e6   : > { %v20154_v7 = vpack.c.bf16 %v6214_v3, %v6198_v63  ;;  %v20156_v18 = vpack.c.bf16 %v6216_v24, %v6200_v2 }
0x18e7   : > { %v6231_v19 = vpack.c.bf16 %v6215_v5, %v6199_v4  ;;  %v6233_v12 = vpack.c.bf16 %v6217_v0, %v6201_v6  ;;  %17036 = vmatpush3.bf16.msra.mxu0 %v18633_v60  ;;  %17058 = vmatpush3.bf16.msra.mxu1 %v18634_v61  ;;  %v6056_v21 = vpop.f32.mrb[64].mxu0  ;;  %v6099_v31 = vpop.f32.mrb[68].mxu1  ;;  %v18644_v60 = vld [vmem:[%s21387_s19 + $0x5e0] sm:$0xff]  }
0x18e8   : > { %v6057_v13 = vadd.f32 %v6056_v21, %v5642_v54  ;;  %v6100_v25 = vadd.f32 %v6099_v31, %v5650_v47  ;;  %v6058_v34 = vpop.f32.mrb[65].mxu0  ;;  %v6101_v44 = vpop.f32.mrb[69].mxu1  ;;  %17037 = vmatprep.subr.bf16.mxu0 %v18635_v29  ;;  %17059 = vmatprep.subr.bf16.mxu1 %v18636_v30  ;;  %v18645_v4 = vld [vmem:[%s21387_s19 + $0x520] sm:$0xff]   ;;  %v18647_v21 = vld [vmem:[%s21387_s19 + $0x568] sm:$0xff]  }
0x18e9   : > { %v6059_v38 = vadd.f32 %v6058_v34, %v5646_v57  ;;  %v6102_v39 = vadd.f32 %v6101_v44, %v5654_v62  ;;  %v6060_v8 = vpop.f32.mrb[66].mxu0  ;;  %v6103_v40 = vpop.f32.mrb[70].mxu1  ;;  %7130 = vmatprep.mubr.bf16.mxu0 %v6231_v19  ;;  %7171 = vmatprep.mubr.bf16.mxu1 %v6233_v12  ;;  %v18646_v6 = vld [vmem:[%s21387_s19 + $0x5a0] sm:$0xff]   ;;  %v18648_v31 = vld [vmem:[%s21387_s19 + $0x5e8] sm:$0xff]  }
0x18ea   : > { %v6061_v42 = vadd.f32 %v6060_v8, %v5642_v54  ;;  %v6104_v45 = vadd.f32 %v6103_v40, %v5650_v47  ;;  %v6062_v52 = vpop.f32.mrb[67].mxu0  ;;  %v6105_v37 = vpop.f32.mrb[71].mxu1  ;;  %v5670_v54 = vrot.slane %v20136_v43, %v19714_v27  ;;  %v6202_v47 = vmax.f32 %v6057_v13, 0.0  ;;  %v18649_v8 = vld [vmem:[%s21387_s19 + $0x528] sm:$0xff]  }
0x18eb   : > { %v6063_v50 = vadd.f32 %v6062_v52, %v5646_v57  ;;  %v6106_v46 = vadd.f32 %v6105_v37, %v5654_v62  ;;  %17038 = vmatpush3.bf16.msra.mxu0 %v18637_v20  ;;  %17060 = vmatpush3.bf16.msra.mxu1 %v18638_v33  ;;  %v6204_v51 = vmax.f32 %v6100_v25, 0.0  ;;  %v6203_v61 = vmax.f32 %v6059_v38, 0.0  ;;  %v18650_v40 = vld [vmem:[%s21387_s19 + $0x5a8] sm:$0xff]  }
0x18ec   : > { %v6218_v56 = vmax.f32 %v6061_v42, 0.0  ;;  %v6220_v58 = vmax.f32 %v6104_v45, 0.0  ;;  %17039 = vmatprep.subr.bf16.mxu0 %v18639_v53  ;;  %17061 = vmatprep.subr.bf16.mxu1 %v18640_v11  ;;  %v6205_v57 = vmax.f32 %v6102_v39, 0.0 }
0x18ed   : > { %v6219_v62 = vmax.f32 %v6063_v50, 0.0  ;;  %v6221_v63 = vmax.f32 %v6106_v46, 0.0 }
0x18ee   : > { %v20174_v2 = vpack.c.bf16 %v6218_v56, %v6202_v47  ;;  %v20176_v3 = vpack.c.bf16 %v6220_v58, %v6204_v51  ;;  %v18653_v56 = vld [vmem:[%s21387_s19 + $0x530] sm:$0xff]  }
0x18ef   : > { %v20178_v43 = vpack.c.bf16 %v6219_v62, %v6203_v61  ;;  %v20180_v24 = vpack.c.bf16 %v6221_v63, %v6205_v57  ;;  %17040 = vmatpush3.bf16.msra.mxu0 %v18641_v48  ;;  %17062 = vmatpush3.bf16.msra.mxu1 %v18642_v49  ;;  %v6142_v29 = vpop.f32.mrb[68].mxu0  ;;  %v6185_v30 = vpop.f32.mrb[72].mxu1  ;;  %v18654_v58 = vld [vmem:[%s21387_s19 + $0x5b0] sm:$0xff]   ;;  %v18657_v61 = vld [vmem:[%s21387_s19 + $0x538] sm:$0xff]   ;;  %v18659_v62 = vld [vmem:[%s21387_s19 + $0x640] sm:$0xff]  }
0x18f0   : > { %v6143_v5 = vadd.f32 %v6142_v29, %v5658_v41  ;;  %v6186_v0 = vadd.f32 %v6185_v30, %v5666_v35  ;;  %v6144_v19 = vpop.f32.mrb[69].mxu0  ;;  %v6187_v12 = vpop.f32.mrb[73].mxu1  ;;  %17041 = vmatprep.subr.bf16.mxu0 %v18643_v59  ;;  %17063 = vmatprep.subr.bf16.mxu1 %v18644_v60  ;;  %v18655_v59 = vld [vmem:[%s21387_s19 + $0x578] sm:$0xff]   ;;  %v18660_v63 = vld [vmem:[%s21387_s19 + $0x6c0] sm:$0xff]  }
0x18f1   : > { %v6145_v20 = vadd.f32 %v6144_v19, %v5662_v55  ;;  %v6188_v33 = vadd.f32 %v6187_v12, %v5670_v54  ;;  %v6146_v13 = vpop.f32.mrb[70].mxu0  ;;  %v6189_v25 = vpop.f32.mrb[74].mxu1  ;;  %v18656_v60 = vld [vmem:[%s21387_s19 + $0x5f8] sm:$0xff]   ;;  %v18661_v29 = vld [vmem:[%s21387_s19 + $0x600] sm:$0xff]   ;;  %v18667_v19 = vld [vmem:[%s21387_s19 + $0x650] sm:$0xff]  }
0x18f2   : > { %v6147_v34 = vadd.f32 %v6146_v13, %v5658_v41  ;;  %v6190_v44 = vadd.f32 %v6189_v25, %v5666_v35  ;;  %v6148_v53 = vpop.f32.mrb[71].mxu0  ;;  %v6191_v11 = vpop.f32.mrb[75].mxu1  ;;  %v6206_v42 = vmax.f32 %v6143_v5, 0.0  ;;  %v6208_v45 = vmax.f32 %v6186_v0, 0.0  ;;  %v18651_v41 = vld [vmem:[%s21387_s19 + $0x570] sm:$0xff]   ;;  %v18658_v57 = vld [vmem:[%s21387_s19 + $0x5b8] sm:$0xff]  }
0x18f3   : > { %v6149_v38 = vadd.f32 %v6148_v53, %v5662_v55  ;;  %v6192_v39 = vadd.f32 %v6191_v11, %v5670_v54  ;;  %17042 = vmatpush3.bf16.msra.mxu0 %v18645_v4  ;;  %17064 = vmatpush3.bf16.msra.mxu1 %v18646_v6  ;;  %v18652_v35 = vld [vmem:[%s21387_s19 + $0x5f0] sm:$0xff]   ;;  %v6207_v50 = vmax.f32 %v6145_v20, 0.0  ;;  %v6209_v46 = vmax.f32 %v6188_v33, 0.0  ;;  %v18662_v30 = vld [vmem:[%s21387_s19 + $0x680] sm:$0xff]   ;;  %v18663_v4 = vld [vmem:[%s21387_s19 + $0x648] sm:$0xff]  }
0x18f4   : > { %v6222_v52 = vmax.f32 %v6147_v34, 0.0  ;;  %v6224_v37 = vmax.f32 %v6190_v44, 0.0  ;;  %17043 = vmatprep.subr.bf16.mxu0 %v18647_v21  ;;  %17065 = vmatprep.subr.bf16.mxu1 %v18648_v31  ;;  %v18664_v6 = vld [vmem:[%s21387_s19 + $0x6c8] sm:$0xff]   ;;  %v18671_v12 = vld [vmem:[%s21387_s19 + $0x658] sm:$0xff]   ;;  %v18675_v20 = vld [vmem:[%s21387_s19 + $0x660] sm:$0xff]  }
0x18f5   : > { %v6223_v55 = vmax.f32 %v6149_v38, 0.0  ;;  %v6225_v48 = vmax.f32 %v6192_v39, 0.0  ;;  %v18665_v5 = vld [vmem:[%s21387_s19 + $0x608] sm:$0xff]   ;;  %v18672_v21 = vld [vmem:[%s21387_s19 + $0x6d8] sm:$0xff]   ;;  %v18676_v33 = vld [vmem:[%s21387_s19 + $0x6e0] sm:$0xff]  }
0x18f6   : > { %v20190_v49 = vpack.c.bf16 %v6222_v52, %v6206_v42  ;;  %v20192_v54 = vpack.c.bf16 %v6224_v37, %v6208_v45  ;;  %v18666_v0 = vld [vmem:[%s21387_s19 + $0x688] sm:$0xff]   ;;  %v18674_v31 = vld [vmem:[%s21387_s19 + $0x698] sm:$0xff]   ;;  %v18677_v13 = vld [vmem:[%s21387_s19 + $0x620] sm:$0xff]  }
0x18f7   : > { %v20194_v47 = vpack.c.bf16 %v6223_v55, %v6207_v50  ;;  %v20196_v51 = vpack.c.bf16 %v6225_v48, %v6209_v46  ;;  %17044 = vmatpush3.bf16.msra.mxu0 %v18649_v8  ;;  %17066 = vmatpush3.bf16.msra.mxu1 %v18650_v40  ;;  %v18678_v25 = vld [vmem:[%s21387_s19 + $0x6a0] sm:$0xff]   ;;  %v18679_v34 = vld [vmem:[%s21387_s19 + $0x668] sm:$0xff]   ;;  %v18683_v38 = vld [vmem:[%s21387_s19 + $0x670] sm:$0xff]  }
0x18f8   : > { %17045 = vmatprep.subr.bf16.mxu0 %v18651_v41  ;;  %17067 = vmatprep.subr.bf16.mxu1 %v18652_v35  ;;  %v18680_v44 = vld [vmem:[%s21387_s19 + $0x6e8] sm:$0xff]   ;;  %v18684_v39 = vld [vmem:[%s21387_s19 + $0x6f0] sm:$0xff]   ;;  %v18687_v42 = vld [vmem:[%s21387_s19 + $0x678] sm:$0xff]  }
0x18f9   : > { %v18681_v53 = vld [vmem:[%s21387_s19 + $0x628] sm:$0xff]   ;;  %v18685_v8 = vld [vmem:[%s21387_s19 + $0x630] sm:$0xff]   ;;  %v18688_v45 = vld [vmem:[%s21387_s19 + $0x6f8] sm:$0xff]  }
0x18fa   : > { %v18682_v11 = vld [vmem:[%s21387_s19 + $0x6a8] sm:$0xff]   ;;  %v18686_v40 = vld [vmem:[%s21387_s19 + $0x6b0] sm:$0xff]   ;;  %v18689_v52 = vld [vmem:[%s21387_s19 + $0x638] sm:$0xff]  }
0x18fb   : > { %17046 = vmatpush3.bf16.msra.mxu0 %v18653_v56  ;;  %17068 = vmatpush3.bf16.msra.mxu1 %v18654_v58  ;;  %v18690_v37 = vld [vmem:[%s21387_s19 + $0x6b8] sm:$0xff]   ;;  %v18691_v41 = vld [vmem:[%s21387_s19 + $0x740] sm:$0xff]   ;;  %v18695_v55 = vld [vmem:[%s21387_s19 + $0x748] sm:$0xff]  }
0x18fc   : > { %17047 = vmatprep.subr.bf16.mxu0 %v18655_v59  ;;  %17069 = vmatprep.subr.bf16.mxu1 %v18656_v60  ;;  %v18692_v35 = vld [vmem:[%s21387_s19 + $0x7c0] sm:$0xff]   ;;  %v18696_v48 = vld [vmem:[%s21387_s19 + $0x7c8] sm:$0xff]   ;;  %v18699_v59 = vld [vmem:[%s21387_s19 + $0x750] sm:$0xff]  }
0x18fd   : > { %v18693_v50 = vld [vmem:[%s21387_s19 + $0x700] sm:$0xff]   ;;  %v18697_v56 = vld [vmem:[%s21387_s19 + $0x708] sm:$0xff]   ;;  %v18702_v60 = vld [vmem:[%s21387_s19 + $0x790] sm:$0xff]  }
0x18fe   : > { %v18694_v46 = vld [vmem:[%s21387_s19 + $0x780] sm:$0xff]   ;;  %v18698_v58 = vld [vmem:[%s21387_s19 + $0x788] sm:$0xff]  }
0x18ff   : > { %17048 = vmatpush3.bf16.msra.mxu0 %v18657_v61  ;;  %17070 = vmatpush3.bf16.msra.mxu1 %v18658_v57  ;;  %v18704_v61 = vld [vmem:[%s21387_s19 + $0x7d8] sm:$0xff]  }
0x1900   : > { %17077 = vmatprep.subr.bf16.mxu0 %v18659_v62  ;;  %17099 = vmatprep.subr.bf16.mxu1 %v18660_v63  ;;  %v18706_v57 = vld [vmem:[%s21387_s19 + $0x798] sm:$0xff]   ;;  %v18707_v62 = vld [vmem:[%s21387_s19 + $0x760] sm:$0xff]  }
0x1901   : > { %v18708_v63 = vld [vmem:[%s21387_s19 + $0x7e0] sm:$0xff]  }
0x1902   : > { %7131 = vmatmul.mubr.bf16.vlgmr.msra.gmra.mrb[76].mxu0 %v20154_v7  ;;  %7172 = vmatmul.mubr.bf16.vlgmr.msra.gmra.mrb[80].mxu1 %v20156_v18  ;;  %v18668_v7 = vld [vmem:[%s21387_s19 + $0x6d0] sm:$0xff]  }
0x1903   : > { %17078 = vmatpush3.bf16.msra.mxu0 %v18661_v29  ;;  %7212 = vmatprep.mubr.bf16.mxu0 %v20178_v43  ;;  %v18669_v18 = vld [vmem:[%s21387_s19 + $0x610] sm:$0xff]   ;;  %v18709_v29 = vld [vmem:[%s21387_s19 + $0x720] sm:$0xff]  }
0x1904   : > { %17100 = vmatpush3.bf16.msra.mxu1 %v18662_v30  ;;  %7253 = vmatprep.mubr.bf16.mxu1 %v20180_v24  ;;  %v18670_v43 = vld [vmem:[%s21387_s19 + $0x690] sm:$0xff]   ;;  %v18673_v24 = vld [vmem:[%s21387_s19 + $0x618] sm:$0xff]   ;;  %v18710_v30 = vld [vmem:[%s21387_s19 + $0x7a0] sm:$0xff]  }
0x1905   : > { %17079 = vmatprep.subr.bf16.mxu0 %v18663_v4  ;;  %17101 = vmatprep.subr.bf16.mxu1 %v18664_v6  ;;  %v18711_v4 = vld [vmem:[%s21387_s19 + $0x768] sm:$0xff]  }
0x1906   : > { %v18712_v6 = vld [vmem:[%s21387_s19 + $0x7e8] sm:$0xff]  }
0x1907   : > { %17080 = vmatpush3.bf16.msra.mxu0 %v18665_v5  ;;  %v18713_v5 = vld [vmem:[%s21387_s19 + $0x728] sm:$0xff]  }
0x1908   : > { %17102 = vmatpush3.bf16.msra.mxu1 %v18666_v0  ;;  %17081 = vmatprep.subr.bf16.mxu0 %v18667_v19  ;;  %v18714_v0 = vld [vmem:[%s21387_s19 + $0x7a8] sm:$0xff]   ;;  %v18715_v19 = vld [vmem:[%s21387_s19 + $0x770] sm:$0xff]  }
0x1909   : > { %17103 = vmatprep.subr.bf16.mxu1 %v18668_v7  ;;  %v18716_v7 = vld [vmem:[%s21387_s19 + $0x7f0] sm:$0xff]  }
0x190b   : > { %17082 = vmatpush3.bf16.msra.mxu0 %v18669_v18  ;;  %v18717_v18 = vld [vmem:[%s21387_s19 + $0x730] sm:$0xff]  }
0x190c   : > { %17104 = vmatpush3.bf16.msra.mxu1 %v18670_v43  ;;  %17083 = vmatprep.subr.bf16.mxu0 %v18671_v12  ;;  %v18718_v43 = vld [vmem:[%s21387_s19 + $0x7b0] sm:$0xff]   ;;  %v18719_v12 = vld [vmem:[%s21387_s19 + $0x778] sm:$0xff]  }
0x190d   : > { %17105 = vmatprep.subr.bf16.mxu1 %v18672_v21  ;;  %v18720_v21 = vld [vmem:[%s21387_s19 + $0x7f8] sm:$0xff]  }
0x190f   : > { %17084 = vmatpush3.bf16.msra.mxu0 %v18673_v24  ;;  %v18721_v24 = vld [vmem:[%s21387_s19 + $0x738] sm:$0xff]  }
0x1910   : > { %17106 = vmatpush3.bf16.msra.mxu1 %v18674_v31  ;;  %17085 = vmatprep.subr.bf16.mxu0 %v18675_v20  ;;  %v18722_v31 = vld [vmem:[%s21387_s19 + $0x7b8] sm:$0xff]   ;;  %v18723_v20 = vld [vmem:[%s19314_s27] sm:$0xff]  }
0x1911   : > { %17107 = vmatprep.subr.bf16.mxu1 %v18676_v33  ;;  %v18724_v33 = vld [vmem:[%s19314_s27 + $0x8] sm:$0xff]  }
0x1913   : > { %17086 = vmatpush3.bf16.msra.mxu0 %v18677_v13  ;;  %v20286_v13 = vld [vmem:[%s1165_s23] sm:$0xff]  ;;  %s21406_s23 = sld [smem:[#allocation18_spill]] }
0x1914   : > { %17108 = vmatpush3.bf16.msra.mxu1 %v18678_v25  ;;  %17087 = vmatprep.subr.bf16.mxu0 %v18679_v34  ;;  %v7447_v25 = vpack.c.bf16 %v20286_v13, %v20286_v13  ;;  %v15828_v34 = vld [vmem:[%s21385_s24 + $0x1] ss:$0 sm:$0xff]  ;;  %s21424_s24 = smov 88  }
0x1915   : > { %17109 = vmatprep.subr.bf16.mxu1 %v18680_v44 }
0x1917   : > { %17088 = vmatpush3.bf16.msra.mxu0 %v18681_v53 }
0x1918   : > { %17110 = vmatpush3.bf16.msra.mxu1 %v18682_v11  ;;  %17089 = vmatprep.subr.bf16.mxu0 %v18683_v38 }
0x1919   : > { %17111 = vmatprep.subr.bf16.mxu1 %v18684_v39 }
0x191b   : > { %17090 = vmatpush3.bf16.msra.mxu0 %v18685_v8 }
0x191c   : > { %17112 = vmatpush3.bf16.msra.mxu1 %v18686_v40  ;;  %17091 = vmatprep.subr.bf16.mxu0 %v18687_v42 }
0x191d   : > { %17113 = vmatprep.subr.bf16.mxu1 %v18688_v45 }
0x191f   : > { %17092 = vmatpush3.bf16.msra.mxu0 %v18689_v52 }
0x1920   : > { %17114 = vmatpush3.bf16.msra.mxu1 %v18690_v37  ;;  %17121 = vmatprep.subr.bf16.mxu0 %v18691_v41 }
0x1921   : > { %17143 = vmatprep.subr.bf16.mxu1 %v18692_v35 }
0x1922   : > { %7213 = vmatmul.mubr.bf16.vlgmr.msra.gmra.mrb[80].mxu0 %v20174_v2  ;;  %v18700_v2 = vld [vmem:[%s21387_s19 + $0x7d0] sm:$0xff]  }
0x1923   : > { %7254 = vmatmul.mubr.bf16.vlgmr.msra.gmra.mrb[84].mxu1 %v20176_v3  ;;  %17122 = vmatpush3.bf16.msra.mxu0 %v18693_v50  ;;  %v18701_v3 = vld [vmem:[%s21387_s19 + $0x710] sm:$0xff]  }
0x1924   : > { %7294 = vmatprep.mubr.bf16.mxu0 %v20194_v47  ;;  %17144 = vmatpush3.bf16.msra.mxu1 %v18694_v46  ;;  %v18703_v47 = vld [vmem:[%s21387_s19 + $0x758] sm:$0xff]  }
0x1925   : > { %7335 = vmatprep.mubr.bf16.mxu1 %v20196_v51  ;;  %17123 = vmatprep.subr.bf16.mxu0 %v18695_v55  ;;  %v18705_v51 = vld [vmem:[%s21387_s19 + $0x718] sm:$0xff]   ;;  %s21420_s19 = sld [smem:[#allocation16_spill]] }
0x1926   : > { %17145 = vmatprep.subr.bf16.mxu1 %v18696_v48 }
0x1927   : > { %17124 = vmatpush3.bf16.msra.mxu0 %v18697_v56 }
0x1928   : > { %17146 = vmatpush3.bf16.msra.mxu1 %v18698_v58  ;;  %17125 = vmatprep.subr.bf16.mxu0 %v18699_v59 }
0x1929   : > { %17147 = vmatprep.subr.bf16.mxu1 %v18700_v2 }
0x192b   : > { %17126 = vmatpush3.bf16.msra.mxu0 %v18701_v3 }
0x192c   : > { %17148 = vmatpush3.bf16.msra.mxu1 %v18702_v60  ;;  %17127 = vmatprep.subr.bf16.mxu0 %v18703_v47 }
0x192d   : > { %17149 = vmatprep.subr.bf16.mxu1 %v18704_v61 }
0x192f   : > { %17128 = vmatpush3.bf16.msra.mxu0 %v18705_v51 }
0x1930   : > { %17150 = vmatpush3.bf16.msra.mxu1 %v18706_v57  ;;  %17129 = vmatprep.subr.bf16.mxu0 %v18707_v62 }
0x1931   : > { %17151 = vmatprep.subr.bf16.mxu1 %v18708_v63 }
0x1933   : > { %17130 = vmatpush3.bf16.msra.mxu0 %v18709_v29 }
0x1934   : > { %17152 = vmatpush3.bf16.msra.mxu1 %v18710_v30  ;;  %17131 = vmatprep.subr.bf16.mxu0 %v18711_v4 }
0x1935   : > { %17153 = vmatprep.subr.bf16.mxu1 %v18712_v6 }
0x1937   : > { %17132 = vmatpush3.bf16.msra.mxu0 %v18713_v5 }
0x1938   : > { %17154 = vmatpush3.bf16.msra.mxu1 %v18714_v0  ;;  %17133 = vmatprep.subr.bf16.mxu0 %v18715_v19 }
0x1939   : > { %17155 = vmatprep.subr.bf16.mxu1 %v18716_v7 }
0x193b   : > { %17134 = vmatpush3.bf16.msra.mxu0 %v18717_v18 }
0x193c   : > { %17156 = vmatpush3.bf16.msra.mxu1 %v18718_v43  ;;  %17135 = vmatprep.subr.bf16.mxu0 %v18719_v12 }
0x193d   : > { %17157 = vmatprep.subr.bf16.mxu1 %v18720_v21 }
0x193f   : > { %17136 = vmatpush3.bf16.msra.mxu0 %v18721_v24 }
0x1940   : > { %17158 = vmatpush3.bf16.msra.mxu1 %v18722_v31  ;;  %17774 = vmatprep.subr.bf16.mxu0 %v19207_v1 }
0x1941   : > { %17782 = vmatprep.subr.mxu1 %v19207_v1 }
0x1942   : > { %7295 = vmatmul.mubr.bf16.vlgmr.msra.gmra.mrb[84].mxu0 %v20190_v49 }
0x1943   : > { %7336 = vmatmul.mubr.bf16.vlgmr.msra.gmra.mrb[88].mxu1 %v20192_v54  ;;  %17775 = vmatpush3.bf16.msra.mxu0 %v18723_v20 }
0x1944   : > { %17776 = vmatprep.subr.bf16.mxu0 %v19207_v1  ;;  %17778 = vmatprep.mubr.msk.bf16.mxu0 %vm19208_vm0, %v19207_v1 }
0x1945   : > { %17784 = vmatprep.mubr.msk.f32.mxu1 %vm19208_vm0, %v19207_v1 }
0x1947   : > { %17777 = vmatpush3.bf16.msra.mxu0 %v18724_v33 }
0x1948   : > { %17787 = vmatprep.subr.mxu0 %v19207_v1 }
0x194a   : > { %17779 = vmatmul.mubr.msk.bf16.vlgmr.msra.gmra.mrb[88].mxu0 %vm1202_vm1, %v7447_v25 }
0x194b   : > { %17789 = vmatprep.mubr.msk.f32.mxu0 %vm19208_vm0, %v19207_v1 }
0x19b5   : > { %v17005_v49 = vpop.f32.mrb[72].mxu0  ;;  %v17027_v54 = vpop.f32.mrb[76].mxu1 }
0x19b6   : > { %v17006_v44 = vpop.f32.mrb[73].mxu0  ;;  %v17028_v53 = vpop.f32.mrb[77].mxu1 }
0x19b7   : > { %v17007_v11 = vadd.f32 %v17006_v44, %v17005_v49  ;;  %v17029_v38 = vadd.f32 %v17028_v53, %v17027_v54  ;;  %v17008_v39 = vpop.f32.mrb[74].mxu0  ;;  %v17030_v8 = vpop.f32.mrb[78].mxu1 }
0x19b8   : > { %v17009_v40 = vpop.f32.mrb[75].mxu0  ;;  %v17031_v42 = vpop.f32.mrb[79].mxu1 }
0x19b9   : > { %v7051_v45 = vadd.f32 %v17007_v11, %v15828_v34  ;;  %v17010_v52 = vadd.f32 %v17009_v40, %v17008_v39  ;;  %v17032_v37 = vadd.f32 %v17031_v42, %v17030_v8 }
0x19bb   : > { %v7092_v41 = vadd.f32 %v17029_v38, %v7051_v45  ;;  %v7054_v35 = vadd.f32 %v17010_v52, %v15828_v34 }
0x19bd   : > { %v7095_v50 = vadd.f32 %v17032_v37, %v7054_v35  ;;  %v15963_v35 = vld [vmem:[%s21406_s23] ss:$0 sm:$0xff] }
0x19d5   : > { %v17049_v46 = vpop.f32.mrb[76].mxu0  ;;  %v17071_v55 = vpop.f32.mrb[80].mxu1 }
0x19d6   : > { %v17050_v48 = vpop.f32.mrb[77].mxu0  ;;  %v17072_v56 = vpop.f32.mrb[81].mxu1 }
0x19d7   : > { %v17051_v58 = vadd.f32 %v17050_v48, %v17049_v46  ;;  %v17073_v59 = vadd.f32 %v17072_v56, %v17071_v55  ;;  %v17052_v2 = vpop.f32.mrb[78].mxu0  ;;  %v17074_v3 = vpop.f32.mrb[82].mxu1 }
0x19d8   : > { %v17053_v60 = vpop.f32.mrb[79].mxu0  ;;  %v17075_v47 = vpop.f32.mrb[83].mxu1 }
0x19d9   : > { %v7133_v61 = vadd.f32 %v17051_v58, %v7092_v41  ;;  %v17054_v51 = vadd.f32 %v17053_v60, %v17052_v2  ;;  %v17076_v57 = vadd.f32 %v17075_v47, %v17074_v3 }
0x19db   : > { %v7174_v62 = vadd.f32 %v17073_v59, %v7133_v61  ;;  %v7136_v63 = vadd.f32 %v17054_v51, %v7095_v50 }
0x19dd   : > { %v7177_v29 = vadd.f32 %v17076_v57, %v7136_v63 }
0x19f5   : > { %v17093_v30 = vpop.f32.mrb[80].mxu0 }
0x19f6   : > { %v17115_v4 = vpop.f32.mrb[84].mxu1  ;;  %v17094_v6 = vpop.f32.mrb[81].mxu0 }
0x19f7   : > { %v17095_v5 = vadd.f32 %v17094_v6, %v17093_v30  ;;  %v17116_v0 = vpop.f32.mrb[85].mxu1  ;;  %v17096_v19 = vpop.f32.mrb[82].mxu0 }
0x19f8   : > { %v17117_v7 = vadd.f32 %v17116_v0, %v17115_v4  ;;  %v17118_v18 = vpop.f32.mrb[86].mxu1  ;;  %v17097_v43 = vpop.f32.mrb[83].mxu0 }
0x19f9   : > { %v7215_v12 = vadd.f32 %v17095_v5, %v7174_v62  ;;  %v17098_v21 = vadd.f32 %v17097_v43, %v17096_v19  ;;  %v17119_v24 = vpop.f32.mrb[87].mxu1 }
0x19fa   : > { %v17120_v31 = vadd.f32 %v17119_v24, %v17118_v18 }
0x19fb   : > { %v7256_v20 = vadd.f32 %v17117_v7, %v7215_v12  ;;  %v7218_v33 = vadd.f32 %v17098_v21, %v7177_v29 }
0x19fd   : > { %v7259_v25 = vadd.f32 %v17120_v31, %v7218_v33 }
0x1a15   : > { %v17137_v49 = vpop.f32.mrb[84].mxu0 }
0x1a16   : > { %v17159_v54 = vpop.f32.mrb[88].mxu1  ;;  %v17138_v34 = vpop.f32.mrb[85].mxu0 }
0x1a17   : > { %v17139_v44 = vadd.f32 %v17138_v34, %v17137_v49  ;;  %v17160_v53 = vpop.f32.mrb[89].mxu1  ;;  %v17140_v11 = vpop.f32.mrb[86].mxu0 }
0x1a18   : > { %v17161_v38 = vadd.f32 %v17160_v53, %v17159_v54  ;;  %v17162_v39 = vpop.f32.mrb[90].mxu1  ;;  %v17141_v8 = vpop.f32.mrb[87].mxu0 }
0x1a19   : > { %v7297_v40 = vadd.f32 %v17139_v44, %v7256_v20  ;;  %v17142_v42 = vadd.f32 %v17141_v8, %v17140_v11  ;;  %v17163_v45 = vpop.f32.mrb[91].mxu1 }
0x1a1a   : > { %v17164_v52 = vadd.f32 %v17163_v45, %v17162_v39 }
0x1a1b   : > { %v20300_v37 = vadd.f32 %v17161_v38, %v7297_v40  ;;  %v7300_v41 = vadd.f32 %v17142_v42, %v7259_v25 }
0x1a1d   : > { %v20303_v50 = vadd.f32 %v17164_v52, %v7300_v41  ;;  %v7503_v46 = vpop.f32.mrb[88].mxu0 }
0x1a1e   : > { %v20305_v55 = vadd.f32 %v15963_v35, %v7503_v46  ;;  %v17780_v48 = vpop.f32.mrb[89].mxu0 }
0x1a1f   : > { %v7506_v56 = vpop.f32.mrb[90].mxu0 }
0x1a20   : > { %7676 = vrot.lane.b32.xlu0 %v20305_v55, %s21320_s1  ;;  %7510 = vrot.lane.b32.xlu1 %v20305_v55, %s21326_s26  ;;  %v17781_v58 = vpop.f32.mrb[91].mxu0  ;;  %s21409_s1 = smov 64   ;;  %s21412_s26 = smov 16  }
0x1a24   : > { %7840 = vrot.lane.b32.xlu0 %v20305_v55, %s21322_s28  ;;  %7674 = vrot.lane.b32.xlu1 %v20305_v55, %s21324_s22  ;;  %s21410_s28 = smov 40   ;;  %s21411_s22 = sld [smem:[#allocation19_spill]] }
0x1a28   : > { %8006 = vrot.lane.b32.xlu0 %v20305_v55, %s21402_s7  ;;  %7842 = vrot.lane.b32.xlu1 %v20305_v55, %s21407_s11 }
0x1a2c   : > { %8008 = vrot.lane.b32.xlu1 %v20305_v55, %s21403_s2 }
0x1a92   : > { %v7511_v59 = vpop.permute.xlu1 %7510  ;;  %v7677_v2 = vpop.permute.xlu0 %7676 }
0x1a93   : > { %17783 = vmatpush3.xpose.msk.msra.mxu1 %vm1253_vm2, %v7511_v59 }
0x1a94   : > { %17792 = vmatprep.subr.mxu1 %v19207_v1 }
0x1a96   : > { %v7675_v3 = vpop.permute.xlu1 %7674  ;;  %17785 = vmatmul.mubr.msk.f32.vlgmr.msra.gmra.mrb[54].mxu1 %vm1253_vm2, %v20305_v55  ;;  %v7841_v47 = vpop.permute.xlu0 %7840 }
0x1a97   : > { %17793 = vmatpush3.xpose.msk.msra.mxu1 %vm1253_vm2, %v7677_v2  ;;  %17794 = vmatprep.mubr.msk.f32.mxu1 %vm19208_vm0, %v19207_v1 }
0x1a98   : > { %17802 = vmatprep.subr.mxu1 %v19207_v1 }
0x1a9a   : > { %v7843_v60 = vpop.permute.xlu1 %7842  ;;  %17795 = vmatmul.mubr.msk.f32.vlgmr.msra.gmra.mrb[92].mxu1 %vm1253_vm2, %v7675_v3  ;;  %v8007_v51 = vpop.permute.xlu0 %8006 }
0x1a9b   : > { %17803 = vmatpush3.xpose.msk.msra.mxu1 %vm1253_vm2, %v7843_v60  ;;  %17804 = vmatprep.mubr.msk.f32.mxu1 %vm19208_vm0, %v19207_v1 }
0x1a9c   : > { %17812 = vmatprep.subr.mxu1 %v19207_v1 }
0x1a9e   : > { %v8009_v61 = vpop.permute.xlu1 %8008  ;;  %17805 = vmatmul.mubr.msk.f32.vlgmr.msra.gmra.mrb[94].mxu1 %vm1253_vm2, %v7841_v47 }
0x1a9f   : > { %17813 = vmatpush3.xpose.msk.msra.mxu1 %vm1253_vm2, %v8009_v61  ;;  %17814 = vmatprep.mubr.msk.f32.mxu1 %vm19208_vm0, %v19207_v1 }
0x1aa0   : > { %17822 = vmatprep.subr.bf16.mxu1 %v19207_v1 }
0x1aa2   : > { %17815 = vmatmul.mubr.msk.f32.vlgmr.msra.gmra.mrb[96].mxu1 %vm1253_vm2, %v8007_v51 }
0x1aa3   : > { %17826 = vmatprep.mubr.msk.bf16.mxu1 %vm19208_vm0, %v19207_v1 }
0x1b69   : > { %v7582_v57 = vpop.f32.mrb[54].mxu1 }
0x1b6a   : > { %v7586_v62 = vmul.f32 0.35355338, %v7582_v57  ;;  %v17786_v63 = vpop.f32.mrb[55].mxu1 }
0x1b6c   : > { %v7587_v29 = vsel %vm1253_vm2, %v7586_v62, -inf }
0x1b6d   : > { %7588 = vmax.xlane.f32.xlu1 %v7587_v29  ;;  %v7748_v30 = vpop.f32.mrb[92].mxu1 }
0x1b6e   : > { %v7752_v4 = vmul.f32 0.35355338, %v7748_v30  ;;  %v17796_v6 = vpop.f32.mrb[93].mxu1 }
0x1b70   : > { %v7753_v5 = vsel %vm1253_vm2, %v7752_v4, -inf }
0x1b71   : > { %7754 = vmax.xlane.f32.xlu0 %v7753_v5  ;;  %v7914_v0 = vpop.f32.mrb[94].mxu1 }
0x1b72   : > { %v7918_v19 = vmul.f32 0.35355338, %v7914_v0  ;;  %v17806_v7 = vpop.f32.mrb[95].mxu1 }
0x1b73   : > { %v18726_v7 = vld [vmem:[%s21411_s22 + $0x8] sm:$0xff]  }
0x1b74   : > { %v7919_v18 = vsel %vm1253_vm2, %v7918_v19, -inf }
0x1b75   : > { %7920 = vmax.xlane.f32.xlu0 %v7919_v18  ;;  %v8080_v43 = vpop.f32.mrb[96].mxu1 }
0x1b76   : > { %v8084_v12 = vmul.f32 0.35355338, %v8080_v43  ;;  %v17816_v21 = vpop.f32.mrb[97].mxu1 }
0x1b78   : > { %v8085_v24 = vsel %vm1253_vm2, %v8084_v12, -inf }
0x1b79   : > { %8086 = vmax.xlane.f32.xlu1 %v8085_v24  ;;  %v7344_v24 = vadd.f32 %v20300_v37, %v20046_v28 }
0x1b8a   : > { %7764 = vrot.lane.b32.xlu1 %v20305_v55, %s21408_s10 }
0x1bfa   : > { %v7589_v31 = vpop.xlane.xlu1 %7588 }
0x1bfb   : > { %v7590_v20 = vsub.f32 %v7586_v62, %v7589_v31  ;;  %v7350_v31 = vsel %vm1202_vm1, %v7344_v24, 0.0 }
0x1bfd   : > { %v7591_v33 = vmul.f32 1.442695, %v7590_v20  ;;  %v7345_v20 = vadd.f32 %v20303_v50, %v20048_v36 }
0x1bfe   : > { %v7755_v25 = vpop.xlane.xlu0 %7754 }
0x1bff   : > { %19073 = vpow2.f32 %v7591_v33  ;;  %v7756_v49 = vsub.f32 %v7752_v4, %v7755_v25  ;;  %v7353_v33 = vsel %vm2163_vm11, %v7345_v20, 0.0 }
0x1c01   : > { %v7757_v54 = vmul.f32 1.442695, %v7756_v49 }
0x1c02   : > { %v7921_v45 = vpop.xlane.xlu0 %7920 }
0x1c03   : > { %19075 = vpow2.f32 %v7757_v54  ;;  %v7922_v52 = vsub.f32 %v7918_v19, %v7921_v45  ;;  %v18725_v19 = vld [vmem:[%s21411_s22] sm:$0xff]  }
0x1c04   : > { %17823 = vmatpush3.bf16.msra.mxu1 %v18725_v19 }
0x1c05   : > { %v7923_v41 = vmul.f32 1.442695, %v7922_v52  ;;  %17824 = vmatprep.subr.bf16.mxu1 %v19207_v1 }
0x1c06   : > { %v8087_v34 = vpop.xlane.xlu1 %8086 }
0x1c07   : > { %v8088_v44 = vsub.f32 %v8084_v12, %v8087_v34 }
0x1c08   : > { %17825 = vmatpush3.bf16.msra.mxu1 %v18726_v7 }
0x1c09   : > { %v19074_v53 = vpop.eup %19073  ;;  %v8089_v11 = vmul.f32 1.442695, %v8088_v44  ;;  %17838 = vmatprep.subr.bf16.mxu1 %v19207_v1 }
0x1c0a   : > { %v7593_v38 = vsel %vm1253_vm2, %v19074_v53, 0.0  ;;  %v7765_v48 = vpop.permute.xlu1 %7764 }
0x1c0b   : > { %19077 = vpow2.f32 %v8089_v11  ;;  %7594 = vadd.xlane.f32.xlu0 %v7593_v38 }
0x1c0c   : > { %19079 = vpow2.f32 %v7923_v41 }
0x1c0d   : > { %v19076_v39 = vpop.eup %19075 }
0x1c0e   : > { %v7759_v8 = vsel %vm1253_vm2, %v19076_v39, 0.0 }
0x1c0f   : > { %7760 = vadd.xlane.f32.xlu1 %v7759_v8 }
0x1c15   : > { %v19078_v40 = vpop.eup %19077 }
0x1c16   : > { %v8091_v42 = vsel %vm1253_vm2, %v19078_v40, 0.0  ;;  %v19080_v35 = vpop.eup %19079 }
0x1c17   : > { %8092 = vadd.xlane.f32.xlu1 %v8091_v42  ;;  %v7925_v46 = vsel %vm1253_vm2, %v19080_v35, 0.0 }
0x1c21   : > { %7598 = vrot.lane.b32.xlu0 %v20305_v55, %s21409_s1 }
0x1c28   : > { %7930 = vrot.lane.b32.xlu1 %v20305_v55, %s21401_s18 }
0x1c40   : > { %7926 = vadd.xlane.f32.xlu0 %v7925_v46 }
0x1c56   : > { %8096 = vrot.lane.b32.xlu0 %v20305_v55, %s21410_s28 }
0x1c98   : > { %v7595_v56 = vpop.xlane.xlu0 %7594 }
0x1c99   : > { %19081 = vrcp.f32 %v7595_v56 }
0x1c9c   : > { %v7599_v58 = vpop.permute.xlu0 %7598  ;;  %v7761_v59 = vpop.xlane.xlu1 %7760 }
0x1c9d   : > { %19083 = vrcp.f32 %v7761_v59  ;;  %17788 = vmatpush3.msra.mxu0 %v7599_v58 }
0x1c9e   : > { %17797 = vmatprep.subr.mxu0 %v19207_v1 }
0x1ca3   : > { %v19082_v2 = vpop.eup %19081 }
0x1ca4   : > { %v8093_v3 = vpop.xlane.xlu1 %8092  ;;  %v7597_v60 = vmul.f32 %v19082_v2, %v19074_v53 }
0x1ca6   : > { %17790 = vmatmul.mubr.msk.f32.vlgmr.msra.gmra.mrb[54].mxu0 %vm1253_vm2, %v7597_v60  ;;  %v15979_v60 = vld [vmem:[%s21414_s5] ss:$0 sm:$0xff] }
0x1ca7   : > { %v19084_v47 = vpop.eup %19083  ;;  %17798 = vmatpush3.msra.mxu0 %v7765_v48  ;;  %17799 = vmatprep.mubr.msk.f32.mxu0 %vm19208_vm0, %v19207_v1 }
0x1ca8   : > { %v7931_v55 = vpop.permute.xlu1 %7930  ;;  %17807 = vmatprep.subr.mxu0 %v19207_v1  ;;  %v7763_v61 = vmul.f32 %v19084_v47, %v19076_v39 }
0x1caa   : > { %17800 = vmatmul.mubr.msk.f32.vlgmr.msra.gmra.mrb[92].mxu0 %vm1253_vm2, %v7763_v61 }
0x1cab   : > { %17808 = vmatpush3.msra.mxu0 %v7931_v55  ;;  %17809 = vmatprep.mubr.msk.f32.mxu0 %vm19208_vm0, %v19207_v1  ;;  %v15959_v55 = vld [vmem:[%s21382_s30 + $0x1] ss:$0 sm:$0xff]  ;;  %s21427_s30 = sld [smem:[#allocation31_spill]] }
0x1cac   : > { %17817 = vmatprep.subr.mxu0 %v19207_v1 }
0x1ccd   : > { %v7927_v51 = vpop.xlane.xlu0 %7926 }
0x1cce   : > { %19085 = vrcp.f32 %v7927_v51  ;;  %v15960_v51 = vld [vmem:[%s21391_s6 + $0x1] ss:$0 sm:$0xff]  ;;  %s21416_s6 = sld [smem:[#allocation22_spill]] }
0x1ccf   : > { %19087 = vrcp.f32 %v8093_v3 }
0x1cd1   : > { %v8097_v29 = vpop.permute.xlu0 %8096 }
0x1cd8   : > { %v19086_v57 = vpop.eup %19085 }
0x1cd9   : > { %v7929_v62 = vmul.f32 %v19086_v57, %v19080_v35  ;;  %v19088_v63 = vpop.eup %19087 }
0x1cda   : > { %v8095_v30 = vmul.f32 %v19088_v63, %v19078_v40 }
0x1cdb   : > { %17810 = vmatmul.mubr.msk.f32.vlgmr.msra.gmra.mrb[94].mxu0 %vm1253_vm2, %v7929_v62 }
0x1cdc   : > { %17818 = vmatpush3.msra.mxu0 %v8097_v29  ;;  %17819 = vmatprep.mubr.msk.f32.mxu0 %vm19208_vm0, %v19207_v1 }
0x1cdd   : > { %17830 = vmatprep.subr.bf16.mxu0 %v19207_v1 }
0x1cdf   : > { %17820 = vmatmul.mubr.msk.f32.vlgmr.msra.gmra.mrb[96].mxu0 %vm1253_vm2, %v8095_v30 }
0x1ce0   : > { %17834 = vmatprep.mubr.msk.bf16.mxu0 %vm19208_vm0, %v19207_v1 }
0x1d79   : > { %v7670_v4 = vpop.f32.mrb[54].mxu0 }
0x1d7a   : > { %v17791_v6 = vpop.f32.mrb[55].mxu0 }
0x1d7d   : > { %v7836_v5 = vpop.f32.mrb[92].mxu0 }
0x1d7e   : > { %8173 = vrot.lane.b32.xlu1 %v7836_v5, %s21404_s0  ;;  %v17801_v0 = vpop.f32.mrb[93].mxu0 }
0x1dae   : > { %v8002_v18 = vpop.f32.mrb[94].mxu0 }
0x1daf   : > { %8177 = vrot.lane.b32.xlu0 %v8002_v18, %s21412_s26  ;;  %v17811_v43 = vpop.f32.mrb[95].mxu0  ;;  %v18727_v18 = vld [vmem:[%s21415_s8] sm:$0xff]  }
0x1db0   : > { %17831 = vmatpush3.bf16.msra.mxu0 %v18727_v18  ;;  %v18728_v43 = vld [vmem:[%s21415_s8 + $0x8] sm:$0xff]  }
0x1db1   : > { %17832 = vmatprep.subr.bf16.mxu0 %v19207_v1 }
0x1db2   : > { %v8168_v12 = vpop.f32.mrb[96].mxu0 }
0x1db3   : > { %8181 = vrot.lane.b32.xlu1 %v8168_v12, %s21413_s3  ;;  %v17821_v21 = vpop.f32.mrb[97].mxu0 }
0x1db4   : > { %17833 = vmatpush3.bf16.msra.mxu0 %v18728_v43 }
0x1dce   : > { %7351 = vadd.xlane.f32.xlu0 %v7350_v31 }
0x1dd7   : > { %7354 = vadd.xlane.f32.xlu1 %v7353_v33 }
0x1df0   : > { %v8174_v25 = vpop.permute.xlu1 %8173 }
0x1df1   : > { %v8184_v54 = vsel %vm1253_vm2, %v7670_v4, %v8174_v25 }
0x1e21   : > { %v8178_v49 = vpop.permute.xlu0 %8177 }
0x1e22   : > { %v8185_v34 = vsel %vm2087_vm9, %v8184_v54, %v8178_v49 }
0x1e25   : > { %v8182_v44 = vpop.permute.xlu1 %8181 }
0x1e26   : > { %v8186_v53 = vsel %vm2090_vm10, %v8185_v34, %v8182_v44 }
0x1e27   : > { %v8187_v11 = vpack.c.bf16 %v8186_v53, %v8186_v53 }
0x1e29   : > { %17827 = vmatmul.mubr.msk.bf16.vlgmr.msra.gmra.mrb[100].mxu1 %vm1202_vm1, %v8187_v11 }
0x1e2a   : > { %17842 = vmatprep.mubr.msk.bf16.mxu1 %vm19208_vm0, %v19207_v1 }
0x1e5b   : > { %v7352_v28 = vpop.xlane.xlu0 %7351 }
0x1e5c   : > { %v7356_v36 = vmul.f32 0.03125, %v7352_v28 }
0x1e5e   : > { %v7358_v37 = vsub.f32 %v7344_v24, %v7356_v36  ;;  %v15985_v36 = vld [vmem:[%s21416_s6] ss:$0 sm:$0xff] }
0x1e60   : > { %v7360_v50 = vmul.f32 %v7358_v37, %v7358_v37 }
0x1e62   : > { %v7362_v38 = vsel %vm1202_vm1, %v7360_v50, 0.0 }
0x1e63   : > { %7363 = vadd.xlane.f32.xlu0 %v7362_v38 }
0x1e64   : > { %v7355_v39 = vpop.xlane.xlu1 %7354 }
0x1e65   : > { %v7357_v8 = vmul.f32 0.03125, %v7355_v39 }
0x1e67   : > { %v7359_v40 = vsub.f32 %v7345_v20, %v7357_v8 }
0x1e69   : > { %v7361_v42 = vmul.f32 %v7359_v40, %v7359_v40 }
0x1e6b   : > { %v7365_v45 = vsel %vm2163_vm11, %v7361_v42, 0.0 }
0x1e6c   : > { %7366 = vadd.xlane.f32.xlu0 %v7365_v45 }
0x1ef0   : > { %v7364_v52 = vpop.xlane.xlu0 %7363 }
0x1ef1   : > { %v7368_v41 = vmul.f32 0.03125, %v7364_v52 }
0x1ef3   : > { %v7370_v35 = vadd.f32 1e-05, %v7368_v41 }
0x1ef5   : > { %19089 = vrsqrt.f32 %v7370_v35 }
0x1ef9   : > { %v7367_v46 = vpop.xlane.xlu0 %7366 }
0x1efa   : > { %v7369_v48 = vmul.f32 0.03125, %v7367_v46 }
0x1efc   : > { %v7371_v56 = vadd.f32 1e-05, %v7369_v48  ;;  %v8243_v58 = vpop.f32.mrb[100].mxu1 }
0x1efd   : > { %v17828_v59 = vpop.f32.mrb[101].mxu1  ;;  %v8244_v57 = vadd.f32 %v15979_v60, %v8243_v58 }
0x1efe   : > { %19091 = vrsqrt.f32 %v7371_v56  ;;  %v8246_v2 = vpop.f32.mrb[102].mxu1  ;;  %v15983_v56 = vld [vmem:[%s21418_s14] ss:$0 sm:$0xff] }
0x1eff   : > { %v19090_v3 = vpop.eup %19089  ;;  %v17829_v47 = vpop.f32.mrb[103].mxu1  ;;  %v8249_v29 = vadd.f32 %v8244_v57, %v20286_v13  ;;  %v15984_v2 = vld [vmem:[%s21419_s17] ss:$0 sm:$0xff] }
0x1f00   : > { %v7374_v61 = vmul.f32 %v19090_v3, %v7358_v37  ;;  %v15961_v3 = vld [vmem:[%s21420_s19] ss:$0 sm:$0xff]  ;;  %s21423_s19 = smov 112  }
0x1f01   : > { %v8252_v5 = vsel %vm1202_vm1, %v8249_v29, 0.0 }
0x1f02   : > { %v7382_v62 = vmul.f32 %v15959_v55, %v7374_v61 }
0x1f04   : > { %v7390_v63 = vadd.f32 %v15960_v51, %v7382_v62  ;;  %v15962_v62 = vld [vmem:[%s21421_s21] ss:$0 sm:$0xff]  ;;  %s21422_s21 = smov 120  }
0x1f06   : > { %v7394_v30 = vsel %vm1202_vm1, %v7390_v63, 0.0 }
0x1f07   : > { %7395 = vadd.xlane.f32.xlu1 %v7394_v30 }
0x1f08   : > { %v19092_v4 = vpop.eup %19091 }
0x1f09   : > { %v7375_v6 = vmul.f32 %v19092_v4, %v7359_v40 }
0x1f0b   : > { %8253 = vadd.xlane.f32.xlu1 %v8252_v5  ;;  %v7383_v0 = vmul.f32 %v15959_v55, %v7375_v6  ;;  %v19225_v6 = vmov 0.0|0.0  }
0x1f0c   : > { %18150 = vmatprep.subr.bf16.mxu0 %v19225_v6 }
0x1f0d   : > { %v7391_v19 = vadd.f32 %v15960_v51, %v7383_v0 }
0x1f0f   : > { %v7397_v7 = vsel %vm2163_vm11, %v7391_v19, 0.0 }
0x1f10   : > { %7398 = vadd.xlane.f32.xlu0 %v7397_v7 }
0x1f94   : > { %v7396_v13 = vpop.xlane.xlu1 %7395 }
0x1f95   : > { %v7400_v12 = vmul.f32 0.03125, %v7396_v13 }
0x1f97   : > { %v7402_v21 = vsub.f32 %v7390_v63, %v7400_v12 }
0x1f98   : > { %v8254_v24 = vpop.xlane.xlu1 %8253 }
0x1f99   : > { %v8255_v31 = vmul.f32 0.03125, %v8254_v24  ;;  %v7404_v20 = vmul.f32 %v7402_v21, %v7402_v21 }
0x1f9b   : > { %v8256_v33 = vsub.f32 %v8249_v29, %v8255_v31  ;;  %v7406_v25 = vsel %vm1202_vm1, %v7404_v20, 0.0 }
0x1f9c   : > { %7407 = vadd.xlane.f32.xlu0 %v7406_v25 }
0x1f9d   : > { %v7399_v49 = vpop.xlane.xlu0 %7398  ;;  %v8257_v54 = vmul.f32 %v8256_v33, %v8256_v33 }
0x1f9e   : > { %v7401_v34 = vmul.f32 0.03125, %v7399_v49 }
0x1f9f   : > { %v8258_v44 = vsel %vm1202_vm1, %v8257_v54, 0.0 }
0x1fa0   : > { %v7403_v53 = vsub.f32 %v7391_v19, %v7401_v34  ;;  %8259 = vadd.xlane.f32.xlu0 %v8258_v44 }
0x1fa2   : > { %v7405_v11 = vmul.f32 %v7403_v53, %v7403_v53 }
0x1fa4   : > { %v7409_v28 = vsel %vm2163_vm11, %v7405_v11, 0.0 }
0x1fa5   : > { %7410 = vadd.xlane.f32.xlu1 %v7409_v28 }
0x1fb6   : > { %8352 = vrot.lane.b32.xlu1 %v18727_v18, %s21417_s13  ;;  %8354 = vrot.lane.b32.xlu0 %v18728_v43, %s21417_s13 }
0x1fba   : > { %8358 = vrot.lane.b32.xlu1 %v15985_v36, %s21417_s13 }
0x2029   : > { %v7408_v37 = vpop.xlane.xlu0 %7407 }
0x202a   : > { %v7412_v50 = vmul.f32 0.03125, %v7408_v37 }
0x202c   : > { %v7414_v38 = vadd.f32 1e-05, %v7412_v50 }
0x202d   : > { %v8260_v39 = vpop.xlane.xlu0 %8259 }
0x202e   : > { %v8261_v8 = vmul.f32 0.03125, %v8260_v39  ;;  %19093 = vrsqrt.f32 %v7414_v38 }
0x2030   : > { %v8262_v40 = vadd.f32 1e-05, %v8261_v8 }
0x2031   : > { %v8355_v35 = vpop.permute.xlu0 %8354 }
0x2032   : > { %19095 = vrsqrt.f32 %v8262_v40  ;;  %v7411_v42 = vpop.xlane.xlu1 %7410 }
0x2033   : > { %v7413_v45 = vmul.f32 0.03125, %v7411_v42 }
0x2035   : > { %v7415_v52 = vadd.f32 1e-05, %v7413_v45 }
0x2036   : > { %v8353_v41 = vpop.permute.xlu1 %8352 }
0x2037   : > { %19097 = vrsqrt.f32 %v7415_v52  ;;  %17839 = vmatpush3.bf16.msra.mxu1 %v8353_v41 }
0x2038   : > { %17840 = vmatprep.subr.bf16.mxu1 %v19207_v1  ;;  %v19094_v46 = vpop.eup %19093 }
0x2039   : > { %v7418_v59 = vmul.f32 %v19094_v46, %v7402_v21 }
0x203a   : > { %v8359_v43 = vpop.permute.xlu1 %8358 }
0x203b   : > { %17841 = vmatpush3.bf16.msra.mxu1 %v8355_v35  ;;  %v7426_v61 = vmul.f32 %v15961_v3, %v7418_v59 }
0x203c   : > { %v19096_v48 = vpop.eup %19095  ;;  %18158 = vmatprep.subr.bf16.mxu1 %v19225_v6 }
0x203d   : > { %v8264_v58 = vmul.f32 %v19096_v48, %v8256_v33  ;;  %v7434_v29 = vadd.f32 %v15962_v62, %v7426_v61 }
0x203f   : > { %v8271_v60 = vmul.f32 %v15983_v56, %v8264_v58 }
0x2041   : > { %v19098_v47 = vpop.eup %19097  ;;  %v20416_v55 = vadd.f32 %v15984_v2, %v8271_v60 }
0x2042   : > { %v7419_v51 = vmul.f32 %v19098_v47, %v7403_v53 }
0x2043   : > { %v8289_v57 = vpack.c.bf16 %v20416_v55, %v20416_v55 }
0x2044   : > { %v7427_v63 = vmul.f32 %v15961_v3, %v7419_v51 }
0x2045   : > { %17835 = vmatmul.mubr.msk.bf16.vlgmr.msra.gmra.mrb[100].mxu0 %vm1202_vm1, %v8289_v57 }
0x2046   : > { %v7435_v30 = vadd.f32 %v15962_v62, %v7427_v63  ;;  %17850 = vmatprep.mubr.msk.f32.mxu0 %vm19208_vm0, %v19207_v1 }
0x2048   : > { %v20424_v4 = vpack.c.bf16 %v7435_v30, %v7434_v29 }
0x204a   : > { %17843 = vmatmul.mubr.msk.bf16.vlgmr.msra.gmra.mrb[104].mxu1 %vm1202_vm1, %v20424_v4 }
0x204b   : > { %17864 = vmatprep.mubr.msk.f32.mxu1 %vm19208_vm0, %v19207_v1 }
0x2118   : > { %v8345_v5 = vpop.f32.mrb[100].mxu0 }
0x2119   : > { %v20432_v0 = vadd.f32 %v15985_v36, %v8345_v5  ;;  %v17836_v19 = vpop.f32.mrb[101].mxu0 }
0x211a   : > { %v8348_v7 = vpop.f32.mrb[102].mxu0 }
0x211b   : > { %8576 = vrot.lane.b32.xlu0 %v20432_v0, %s21422_s21  ;;  %v17837_v18 = vpop.f32.mrb[103].mxu0 }
0x211d   : > { %v8398_v13 = vpop.f32.mrb[104].mxu1 }
0x211e   : > { %v17844_v12 = vpop.f32.mrb[105].mxu1  ;;  %v8399_v24 = vadd.f32 %v8398_v13, %v8359_v43 }
0x211f   : > { %8750 = vrot.lane.b32.xlu0 %v20432_v0, %s21423_s19  ;;  %v8401_v21 = vpop.f32.mrb[106].mxu1 }
0x2120   : > { %v8402_v31 = vadd.f32 %v8401_v21, %v8359_v43  ;;  %v17845_v20 = vpop.f32.mrb[107].mxu1 }
0x2122   : > { %v20438_v33 = vpack.i.bf16 %v8402_v31, %v8399_v24  ;;  %v18151_v25 = vpack.c.bf16 %v8402_v31, %v8399_v24 }
0x2124   : > { %18390 = vrot.lane.b32.xlu1 %v20438_v33, %s21422_s21  ;;  %18153 = vmatpush3.bf16.xpose.msk.msra.mxu0 %vm19476_vm3, %v18151_v25 }
0x2125   : > { %18154 = vmatprep.subr.bf16.mxu0 %v19225_v6 }
0x2128   : > { %18395 = vrot.lane.b32.xlu1 %v20438_v33, %s21423_s19 }
0x212b   : > { %17851 = vmatmul.mubr.msk.f32.vlgmr.msra.gmra.mrb[98].mxu0 %vm1253_vm2, %v20432_v0 }
0x212c   : > { %17857 = vmatprep.mubr.msk.f32.mxu0 %vm19208_vm0, %v19207_v1 }
0x218d   : > { %v8577_v36 = vpop.permute.xlu0 %8576 }
0x2191   : > { %v8751_v50 = vpop.permute.xlu0 %8750 }
0x2196   : > { %v18391_v49 = vpop.permute.xlu1 %18390 }
0x2197   : > { %v18393_v54 = vunpack.i.h.bf16 %v18391_v49  ;;  %v18392_v34 = vunpack.i.l.bf16 %v18391_v49 }
0x2199   : > { %v18159_v44 = vpack.c.bf16 %v18393_v54, %v18392_v34 }
0x219a   : > { %v18396_v53 = vpop.permute.xlu1 %18395 }
0x219b   : > { %18161 = vmatpush3.bf16.xpose.msk.msra.mxu1 %vm19476_vm3, %v18159_v44  ;;  %v18398_v11 = vunpack.i.h.bf16 %v18396_v53  ;;  %v18397_v28 = vunpack.i.l.bf16 %v18396_v53 }
0x219c   : > { %18166 = vmatprep.subr.bf16.mxu1 %v19225_v6 }
0x219d   : > { %v18167_v37 = vpack.c.bf16 %v18398_v11, %v18397_v28 }
0x21a2   : > { %17865 = vmatmul.mubr.msk.f32.vlgmr.msra.gmra.mrb[98].mxu1 %vm1253_vm2, %v8577_v36 }
0x21a3   : > { %18169 = vmatpush3.bf16.xpose.msk.msra.mxu1 %vm19476_vm3, %v18167_v37  ;;  %17878 = vmatprep.mubr.msk.f32.mxu1 %vm19208_vm0, %v19207_v1 }
0x21a4   : > { %18178 = vmatprep.subr.bf16.mxu1 %v19225_v6 }
0x21aa   : > { %17879 = vmatmul.mubr.msk.f32.vlgmr.msra.gmra.mrb[108].mxu1 %vm1253_vm2, %v8751_v50 }
0x21ab   : > { %17899 = vmatprep.mubr.msk.f32.mxu1 %vm19208_vm0, %v19207_v1 }
0x21fe   : > { %v8480_v38 = vpop.f32.mrb[98].mxu0 }
0x21ff   : > { %v8484_v39 = vmul.f32 0.35355338, %v8480_v38  ;;  %v17852_v8 = vpop.f32.mrb[99].mxu0 }
0x2201   : > { %v8485_v40 = vsel %vm1339_vm5, %v8484_v39, -inf }
0x2202   : > { %8486 = vmax.xlane.f32.xlu1 %v8485_v40 }
0x2275   : > { %v8654_v42 = vpop.f32.mrb[98].mxu1 }
0x2276   : > { %v8658_v45 = vmul.f32 0.35355338, %v8654_v42  ;;  %v17866_v52 = vpop.f32.mrb[99].mxu1 }
0x2278   : > { %v8659_v41 = vsel %vm1339_vm5, %v8658_v45, -inf }
0x2279   : > { %8660 = vmax.xlane.f32.xlu0 %v8659_v41 }
0x227d   : > { %v8828_v35 = vpop.f32.mrb[108].mxu1 }
0x227e   : > { %v8832_v46 = vmul.f32 0.35355338, %v8828_v35  ;;  %v17880_v48 = vpop.f32.mrb[109].mxu1 }
0x2280   : > { %v8833_v56 = vsel %vm1339_vm5, %v8832_v46, -inf }
0x2281   : > { %8834 = vmax.xlane.f32.xlu0 %v8833_v56 }
0x228f   : > { %v8487_v58 = vpop.xlane.xlu1 %8486 }
0x2290   : > { %v8488_v59 = vsub.f32 %v8484_v39, %v8487_v58 }
0x2292   : > { %v8489_v2 = vmul.f32 1.442695, %v8488_v59 }
0x2294   : > { %19099 = vpow2.f32 %v8489_v2 }
0x229e   : > { %v19100_v3 = vpop.eup %19099 }
0x229f   : > { %v8491_v60 = vsel %vm1339_vm5, %v19100_v3, 0.0 }
0x22a0   : > { %8492 = vadd.xlane.f32.xlu1 %v8491_v60 }
0x22b1   : > { %18405 = vrot.lane.b32.xlu1 %v20438_v33, %s21424_s24 }
0x22b5   : > { %18410 = vrot.lane.b32.xlu1 %v20438_v33, %s21407_s11 }
0x2306   : > { %v8661_v47 = vpop.xlane.xlu0 %8660 }
0x2307   : > { %v8662_v61 = vsub.f32 %v8658_v45, %v8661_v47 }
0x2309   : > { %v8663_v51 = vmul.f32 1.442695, %v8662_v61 }
0x230b   : > { %19101 = vpow2.f32 %v8663_v51 }
0x230e   : > { %v8835_v57 = vpop.xlane.xlu0 %8834 }
0x230f   : > { %v8836_v62 = vsub.f32 %v8832_v46, %v8835_v57 }
0x2311   : > { %v8837_v63 = vmul.f32 1.442695, %v8836_v62 }
0x2313   : > { %19103 = vpow2.f32 %v8837_v63 }
0x2315   : > { %v19102_v29 = vpop.eup %19101 }
0x2316   : > { %v8665_v30 = vsel %vm1339_vm5, %v19102_v29, 0.0 }
0x2317   : > { %8666 = vadd.xlane.f32.xlu0 %v8665_v30 }
0x231d   : > { %v19104_v5 = vpop.eup %19103 }
0x231e   : > { %v8839_v19 = vsel %vm1339_vm5, %v19104_v5, 0.0 }
0x231f   : > { %8840 = vadd.xlane.f32.xlu1 %v8839_v19  ;;  %v18729_v19 = vld [vmem:[%s21425_s25] sm:$0xff]  }
0x232d   : > { %18400 = vrot.lane.b32.xlu0 %v20438_v33, %s21417_s13  ;;  %v8493_v7 = vpop.xlane.xlu1 %8492 }
0x232e   : > { %19105 = vrcp.f32 %v8493_v7  ;;  %v18730_v7 = vld [vmem:[%s21425_s25 + $0x8] sm:$0xff]  }
0x2330   : > { %8924 = vrot.lane.b32.xlu1 %v20432_v0, %s21402_s7 }
0x2331   : > { %18415 = vrot.lane.b32.xlu0 %v20438_v33, %s21402_s7  ;;  %v18406_v18 = vpop.permute.xlu1 %18405 }
0x2332   : > { %v18408_v20 = vunpack.i.h.bf16 %v18406_v18  ;;  %v18407_v25 = vunpack.i.l.bf16 %v18406_v18 }
0x2334   : > { %v18163_v44 = vpack.c.bf16 %v18408_v20, %v18407_v25 }
0x2335   : > { %v18411_v13 = vpop.permute.xlu1 %18410 }
0x2336   : > { %v18413_v53 = vunpack.i.h.bf16 %v18411_v13  ;;  %v18412_v11 = vunpack.i.l.bf16 %v18411_v13 }
0x2338   : > { %v19106_v31 = vpop.eup %19105  ;;  %v18171_v36 = vpack.c.bf16 %v18413_v53, %v18412_v11 }
0x2339   : > { %v8495_v0 = vmul.f32 %v19106_v31, %v19100_v3 }
0x23a4   : > { %v8667_v43 = vpop.xlane.xlu0 %8666 }
0x23a5   : > { %19107 = vrcp.f32 %v8667_v43 }
0x23a8   : > { %v18401_v12 = vpop.permute.xlu0 %18400 }
0x23a9   : > { %v18403_v21 = vunpack.i.h.bf16 %v18401_v12  ;;  %v18402_v24 = vunpack.i.l.bf16 %v18401_v12 }
0x23ab   : > { %v18155_v49 = vpack.c.bf16 %v18403_v21, %v18402_v24 }
0x23ac   : > { %v8841_v54 = vpop.xlane.xlu1 %8840  ;;  %v18416_v37 = vpop.permute.xlu0 %18415 }
0x23ad   : > { %19109 = vrcp.f32 %v8841_v54  ;;  %18157 = vmatpush3.bf16.msk.msra.mxu0 %vm19513_vm8, %v18155_v49  ;;  %v18418_v39 = vunpack.i.h.bf16 %v18416_v37  ;;  %v18417_v8 = vunpack.i.l.bf16 %v18416_v37  ;;  %v16010_v49 = vld [vmem:[%s21426_s29] ss:$0 sm:$0xff] }
0x23ae   : > { %18162 = vmatprep.subr.bf16.mxu0 %v19225_v6 }
0x23af   : > { %v19108_v34 = vpop.eup %19107  ;;  %v18175_v40 = vpack.c.bf16 %v18418_v39, %v18417_v8  ;;  %v9205_v8 = vld [vmem:[%s21427_s30] sm:$0xff] }
0x23b0   : > { %17858 = vmatmul.mubr.msk.f32.vlgmr.msra.gmra.mrb[104].mxu0 %vm1339_vm5, %v8495_v0  ;;  %v8669_v28 = vmul.f32 %v19108_v34, %v19102_v29  ;;  %v8925_v42 = vpop.permute.xlu1 %8924 }
0x23b1   : > { %18165 = vmatpush3.bf16.msk.msra.mxu0 %vm19513_vm8, %v18163_v44  ;;  %17871 = vmatprep.mubr.msk.f32.mxu0 %vm19208_vm0, %v19207_v1 }
0x23b2   : > { %18170 = vmatprep.subr.bf16.mxu0 %v19225_v6 }
0x23b4   : > { %17872 = vmatmul.mubr.msk.f32.vlgmr.msra.gmra.mrb[106].mxu0 %vm1339_vm5, %v8669_v28 }
0x23b5   : > { %18173 = vmatpush3.bf16.msk.msra.mxu0 %vm19513_vm8, %v18171_v36  ;;  %17885 = vmatprep.mubr.msk.f32.mxu0 %vm19208_vm0, %v19207_v1 }
0x23b6   : > { %18174 = vmatprep.subr.bf16.mxu0 %v19225_v6 }
0x23b7   : > { %v19110_v50 = vpop.eup %19109 }
0x23b8   : > { %v8843_v38 = vmul.f32 %v19110_v50, %v19104_v5 }
0x23ba   : > { %17886 = vmatmul.mubr.msk.f32.vlgmr.msra.gmra.mrb[108].mxu0 %vm1339_vm5, %v8843_v38 }
0x23bb   : > { %17892 = vmatprep.mubr.msk.f32.mxu0 %vm19208_vm0, %v19207_v1 }
0x23be   : > { %18177 = vmatpush3.bf16.xpose.msk.msra.mxu0 %vm19476_vm3, %v18175_v40  ;;  %v9213_v40 = vld [vmem:[%s21427_s30 + $0x40] sm:$0xff] }
0x23c5   : > { %17893 = vmatmul.mubr.msk.f32.vlgmr.msra.gmra.mrb[110].mxu0 %vm1253_vm2, %v8925_v42  ;;  %v9206_v42 = vld [vmem:[%s21427_s30 + $0x8] sm:$0xff] }
0x23c6   : > { %9774 = vmatprep.mubr.bf16.mxu0 %v19224_v32 }
0x2483   : > { %v8572_v45 = vpop.f32.mrb[104].mxu0 }
0x2484   : > { %v17859_v52 = vpop.f32.mrb[105].mxu0 }
0x2485   : > { %v16016_v52 = vcombine.low %v9205_v8, %v9213_v40 }
0x2487   : > { %v8746_v41 = vpop.f32.mrb[106].mxu0 }
0x2488   : > { %v17873_v35 = vpop.f32.mrb[107].mxu0 }
0x248d   : > { %v8920_v46 = vpop.f32.mrb[108].mxu0 }
0x248e   : > { %v17887_v48 = vpop.f32.mrb[109].mxu0 }
0x248f   : > { %v9229_v48 = vld [vmem:[%s21427_s30 + $0xc0] sm:$0xff] }
0x2498   : > { %v9002_v56 = vpop.f32.mrb[110].mxu0 }
0x2499   : > { %v9006_v58 = vmul.f32 0.35355338, %v9002_v56  ;;  %v17894_v59 = vpop.f32.mrb[111].mxu0  ;;  %v9222_v56 = vld [vmem:[%s21427_s30 + $0x88] sm:$0xff] }
0x249a   : > { %v9230_v59 = vld [vmem:[%s21427_s30 + $0xc8] sm:$0xff] }
0x249b   : > { %v9007_v2 = vsel %vm1339_vm5, %v9006_v58, -inf }
0x249c   : > { %9008 = vmax.xlane.f32.xlu0 %v9007_v2 }
0x24b2   : > { %18420 = vrot.lane.b32.xlu0 %v20438_v33, %s21403_s2 }
0x24b6   : > { %9103 = vrot.lane.b32.xlu0 %v8920_v46, %s21412_s26  ;;  %v9221_v46 = vld [vmem:[%s21427_s30 + $0x80] sm:$0xff] }
0x24b7   : > { %v16032_v2 = vcombine.low %v9221_v46, %v9229_v48 }
0x2529   : > { %v9009_v3 = vpop.xlane.xlu0 %9008 }
0x252a   : > { %v9010_v60 = vsub.f32 %v9006_v58, %v9009_v3  ;;  %v16033_v58 = vcombine.high %v9221_v46, %v9229_v48  ;;  %v16034_v3 = vcombine.low %v9222_v56, %v9230_v59  ;;  %v9212_v46 = vld [vmem:[%s21427_s30 + $0x38] sm:$0xff] }
0x252b   : > { %v9220_v48 = vld [vmem:[%s21427_s30 + $0x78] sm:$0xff] }
0x252c   : > { %v9011_v47 = vmul.f32 1.442695, %v9010_v60  ;;  %v16035_v60 = vcombine.high %v9222_v56, %v9230_v59 }
0x252d   : > { %v18421_v61 = vpop.permute.xlu0 %18420 }
0x252e   : > { %19111 = vpow2.f32 %v9011_v47  ;;  %v18423_v51 = vunpack.i.h.bf16 %v18421_v61  ;;  %v18422_v57 = vunpack.i.l.bf16 %v18421_v61  ;;  %v9207_v47 = vld [vmem:[%s21427_s30 + $0x10] sm:$0xff] }
0x252f   : > { %v9215_v61 = vld [vmem:[%s21427_s30 + $0x50] sm:$0xff] }
0x2530   : > { %v18179_v62 = vpack.c.bf16 %v18423_v51, %v18422_v57  ;;  %v9208_v51 = vld [vmem:[%s21427_s30 + $0x18] sm:$0xff]  ;;  %v16020_v57 = vcombine.low %v9207_v47, %v9215_v61 }
0x2531   : > { %v9104_v21 = vpop.permute.xlu0 %9103 }
0x2532   : > { %18181 = vmatpush3.bf16.msk.msra.mxu1 %vm19513_vm8, %v18179_v62  ;;  %v16021_v62 = vcombine.high %v9207_v47, %v9215_v61  ;;  %v9228_v47 = vld [vmem:[%s21427_s30 + $0xb8] sm:$0xff] }
0x2533   : > { %17902 = vmatprep.subr.bf16.mxu1 %v19207_v1  ;;  %v9236_v61 = vld [vmem:[%s21427_s30 + $0xf8] sm:$0xff] }
0x2538   : > { %v19112_v63 = vpop.eup %19111 }
0x2539   : > { %v9013_v33 = vsel %vm1339_vm5, %v19112_v63, 0.0 }
0x253a   : > { %9014 = vadd.xlane.f32.xlu1 %v9013_v33 }
0x254b   : > { %9099 = vrot.lane.b32.xlu1 %v8746_v41, %s21404_s0 }
0x25c7   : > { %v9015_v29 = vpop.xlane.xlu1 %9014 }
0x25c8   : > { %19113 = vrcp.f32 %v9015_v29 }
0x25cb   : > { %v9100_v13 = vpop.permute.xlu1 %9099 }
0x25cc   : > { %v9110_v12 = vsel %vm1253_vm2, %v8572_v45, %v9100_v13  ;;  %v16017_v45 = vcombine.high %v9205_v8, %v9213_v40  ;;  %v16015_v13 = vld [vmem:[%s21430_s16] ss:$0 sm:$0xff]  ;;  %v9226_v8 = vld [vmem:[%s21427_s30 + $0xa8] sm:$0xff] }
0x25cd   : > { %v9111_v24 = vsel %vm2087_vm9, %v9110_v12, %v9104_v21  ;;  %v9223_v21 = vld [vmem:[%s21427_s30 + $0x90] sm:$0xff]  ;;  %v9234_v40 = vld [vmem:[%s21427_s30 + $0xe8] sm:$0xff] }
0x25ce   : > { %9742 = vmatprep.subr.bf16.mxu0 %v16017_v45 }
0x25cf   : > { %9743 = vmatpush1.bf16.msra.mxu0 %v16016_v52  ;;  %v16043_v52 = vcombine.high %v9226_v8, %v9234_v40 }
0x25d0   : > { %9744 = vmatprep.subr.bf16.mxu0 %v16033_v58  ;;  %v16042_v58 = vcombine.low %v9226_v8, %v9234_v40 }
0x25d2   : > { %v19114_v30 = vpop.eup %19113 }
0x25d3   : > { %v9017_v5 = vmul.f32 %v19114_v30, %v19112_v63  ;;  %9745 = vmatpush1.bf16.msra.mxu0 %v16032_v2  ;;  %v9216_v63 = vld [vmem:[%s21427_s30 + $0x58] sm:$0xff]  ;;  %v16031_v2 = vcombine.high %v9212_v46, %v9220_v48 }
0x25d4   : > { %v16022_v33 = vcombine.low %v9208_v51, %v9216_v63  ;;  %v16023_v29 = vcombine.high %v9208_v51, %v9216_v63  ;;  %9824 = vmatprep.subr.bf16.mxu0 %v16021_v62  ;;  %v16047_v63 = vcombine.high %v9228_v47, %v9236_v61 }
0x25d5   : > { %17900 = vmatmul.mubr.msk.f32.vlgmr.msra.gmra.mrb[110].mxu1 %vm1339_vm5, %v9017_v5 }
0x25d6   : > { %17906 = vmatprep.mubr.msk.bf16.mxu1 %vm19208_vm0, %v19207_v1  ;;  %17903 = vmatpush3.bf16.msra.mxu1 %v18729_v19 }
0x25d7   : > { %17904 = vmatprep.subr.bf16.mxu1 %v19207_v1 }
0x25da   : > { %17905 = vmatpush3.bf16.msra.mxu1 %v18730_v7 }
0x26a8   : > { %v9094_v18 = vpop.f32.mrb[110].mxu1 }
0x26a9   : > { %9107 = vrot.lane.b32.xlu1 %v9094_v18, %s21413_s3  ;;  %v17901_v43 = vpop.f32.mrb[111].mxu1  ;;  %v16014_v18 = vld [vmem:[%s21428_s15] ss:$0 sm:$0xff]  ;;  %s21431_s15 = sld [smem:[#allocation33_spill]] }
0x26af   : > { %s21432_s4 = smov %s21431_s15 }
0x26b0   : > { %v18756_v8 = vld [vmem:[%s21432_s4 + $0xf0] sm:$0xff]  }
0x26b1   : > { %v18757_v40 = vld [vmem:[%s21432_s4 + $0x30] sm:$0xff]  }
0x271b   : > { %v9108_v31 = vpop.permute.xlu1 %9107 }
0x271c   : > { %v9112_v20 = vsel %vm2090_vm10, %v9111_v24, %v9108_v31  ;;  %v9231_v24 = vld [vmem:[%s21427_s30 + $0xd0] sm:$0xff]  ;;  %v9224_v31 = vld [vmem:[%s21427_s30 + $0x98] sm:$0xff] }
0x271d   : > { %v9113_v25 = vpack.c.bf16 %v9112_v20, %v9112_v20  ;;  %v9232_v20 = vld [vmem:[%s21427_s30 + $0xd8] sm:$0xff] }
0x271f   : > { %17907 = vmatmul.mubr.msk.bf16.vlgmr.msra.gmra.mrb[112].mxu1 %vm1202_vm1, %v9113_v25 }
0x2720   : > { %9815 = vmatprep.mubr.bf16.mxu1 %v19224_v32 }
0x27f2   : > { %v9169_v54 = vpop.f32.mrb[112].mxu1 }
0x27f3   : > { %v9170_v0 = vadd.f32 %v16010_v49, %v9169_v54  ;;  %v17908_v34 = vpop.f32.mrb[113].mxu1  ;;  %v16037_v54 = vcombine.high %v9223_v21, %v9231_v24 }
0x27f4   : > { %v9172_v44 = vpop.f32.mrb[114].mxu1  ;;  %v9209_v34 = vld [vmem:[%s21427_s30 + $0x20] sm:$0xff] }
0x27f5   : > { %v9175_v53 = vadd.f32 %v9170_v0, %v20416_v55  ;;  %v17909_v11 = vpop.f32.mrb[115].mxu1  ;;  %v9214_v55 = vld [vmem:[%s21427_s30 + $0x48] sm:$0xff]  ;;  %v16039_v0 = vcombine.high %v9224_v31, %v9232_v20  ;;  %v9217_v44 = vld [vmem:[%s21427_s30 + $0x60] sm:$0xff] }
0x27f6   : > { %v16018_v41 = vcombine.low %v9206_v42, %v9214_v55  ;;  %v16019_v35 = vcombine.high %v9206_v42, %v9214_v55  ;;  %v9218_v11 = vld [vmem:[%s21427_s30 + $0x68] sm:$0xff]  ;;  %v16024_v42 = vcombine.low %v9209_v34, %v9217_v44 }
0x27f7   : > { %v9178_v28 = vsel %vm1202_vm1, %v9175_v53, 0.0 }
0x27f8   : > { %9179 = vadd.xlane.f32.xlu0 %v9178_v28  ;;  %9783 = vmatprep.subr.bf16.mxu1 %v16019_v35  ;;  %v16036_v28 = vcombine.low %v9223_v21, %v9231_v24  ;;  %v9219_v35 = vld [vmem:[%s21427_s30 + $0x70] sm:$0xff] }
0x27f9   : > { %9784 = vmatpush1.bf16.msra.mxu1 %v16018_v41  ;;  %v9211_v41 = vld [vmem:[%s21427_s30 + $0x30] sm:$0xff] }
0x27fa   : > { %9785 = vmatprep.subr.bf16.mxu1 %v16035_v60  ;;  %v16029_v59 = vcombine.high %v9211_v41, %v9219_v35  ;;  %v9235_v60 = vld [vmem:[%s21427_s30 + $0xf0] sm:$0xff]  ;;  %v16028_v51 = vcombine.low %v9211_v41, %v9219_v35  ;;  %v18762_v41 = vld [vmem:[%s21432_s4 + $0xb8] sm:$0xff]   ;;  %v18763_v35 = vld [vmem:[%s21432_s4 + $0x140] sm:$0xff]  }
0x27fb   : > { %v18739_v21 = vld [vmem:[%s21432_s4 + $0x50] sm:$0xff]  }
0x27fc   : > { %v18740_v24 = vld [vmem:[%s21432_s4 + $0xd0] sm:$0xff]  }
0x27fd   : > { %9786 = vmatpush1.bf16.msra.mxu1 %v16034_v3  ;;  %v9227_v3 = vld [vmem:[%s21427_s30 + $0xb0] sm:$0xff] }
0x27fe   : > { %9865 = vmatprep.subr.bf16.mxu1 %v16023_v29  ;;  %v16045_v62 = vcombine.high %v9227_v3, %v9235_v60  ;;  %v16046_v29 = vcombine.low %v9228_v47, %v9236_v61 }
0x2885   : > { %v9180_v36 = vpop.xlane.xlu0 %9179 }
0x2886   : > { %v9181_v37 = vmul.f32 0.03125, %v9180_v36  ;;  %v16038_v36 = vcombine.low %v9224_v31, %v9232_v20  ;;  %v18741_v31 = vld [vmem:[%s21432_s4 + $0x10] sm:$0xff]  }
0x2887   : > { %v18742_v20 = vld [vmem:[%s21432_s4 + $0x90] sm:$0xff]  }
0x2888   : > { %v9182_v50 = vsub.f32 %v9175_v53, %v9181_v37  ;;  %v9210_v53 = vld [vmem:[%s21427_s30 + $0x28] sm:$0xff]  ;;  %v16025_v37 = vcombine.high %v9209_v34, %v9217_v44  ;;  %v18746_v34 = vld [vmem:[%s21432_s4 + $0x98] sm:$0xff]   ;;  %v18747_v44 = vld [vmem:[%s21432_s4 + $0x60] sm:$0xff]  }
0x2889   : > { %v16026_v45 = vcombine.low %v9210_v53, %v9218_v11 }
0x288a   : > { %v9183_v38 = vmul.f32 %v9182_v50, %v9182_v50 }
0x288c   : > { %v9184_v39 = vsel %vm1202_vm1, %v9183_v38, 0.0  ;;  %v9225_v38 = vld [vmem:[%s21427_s30 + $0xa0] sm:$0xff] }
0x288d   : > { %9185 = vadd.xlane.f32.xlu1 %v9184_v39  ;;  %v9233_v39 = vld [vmem:[%s21427_s30 + $0xe0] sm:$0xff] }
0x288e   : > { %v16041_v55 = vcombine.high %v9225_v38, %v9233_v39  ;;  %v16040_v56 = vcombine.low %v9225_v38, %v9233_v39  ;;  %v18754_v38 = vld [vmem:[%s21432_s4 + $0xa8] sm:$0xff]   ;;  %v18755_v39 = vld [vmem:[%s21432_s4 + $0x70] sm:$0xff]  }
0x291a   : > { %v9186_v30 = vpop.xlane.xlu1 %9185 }
0x291b   : > { %v9187_v5 = vmul.f32 0.03125, %v9186_v30  ;;  %v18731_v30 = vld [vmem:[%s21431_s15 + $0x40] sm:$0xff]   ;;  %s21433_s15 = sld [smem:[#allocation32_spill]] }
0x291d   : > { %v9188_v19 = vadd.f32 1e-05, %v9187_v5  ;;  %v18732_v5 = vld [vmem:[%s21432_s4 + $0xc0] sm:$0xff]  }
0x291f   : > { %19115 = vrsqrt.f32 %v9188_v19  ;;  %v18733_v19 = vld [vmem:[%s21432_s4] sm:$0xff]  }
0x2921   : > { %s21434_s20 = smov %s21433_s15 }
0x2929   : > { %v19116_v7 = vpop.eup %19115 }
0x292a   : > { %v9190_v43 = vmul.f32 %v19116_v7, %v9182_v50  ;;  %v16027_v50 = vcombine.high %v9210_v53, %v9218_v11  ;;  %v18734_v7 = vld [vmem:[%s21432_s4 + $0x80] sm:$0xff]  }
0x292b   : > { %v18748_v53 = vld [vmem:[%s21432_s4 + $0xe0] sm:$0xff]  }
0x292c   : > { %v9197_v12 = vmul.f32 %v16014_v18, %v9190_v43  ;;  %v18735_v18 = vld [vmem:[%s21432_s4 + $0x48] sm:$0xff]   ;;  %v18749_v11 = vld [vmem:[%s21432_s4 + $0x20] sm:$0xff]  }
0x292d   : > { %v18736_v43 = vld [vmem:[%s21432_s4 + $0xc8] sm:$0xff]  }
0x292e   : > { %v20544_v25 = vadd.f32 %v16015_v13, %v9197_v12  ;;  %v18737_v13 = vld [vmem:[%s21432_s4 + $0x8] sm:$0xff]  }
0x292f   : > { %v18738_v12 = vld [vmem:[%s21432_s4 + $0x88] sm:$0xff]  }
0x2930   : > { %v20548_v49 = vpack.c.bf16 %v20544_v25, %v20544_v25 }
0x2932   : > { %16048 = vmatmul.mubr.msk.bf16.vlgmr.msra.gmra.mrb[112].mxu0 %vm1202_vm1, %v20548_v49  ;;  %16049 = vmatmul.mubr.msk.bf16.vlgmr.msra.gmra.mrb[116].mxu1 %vm1202_vm1, %v20548_v49 }
0x2933   : > { %9825 = vmatpush1.bf16.msra.mxu0 %v16020_v57  ;;  %9866 = vmatpush1.bf16.msra.mxu1 %v16022_v33  ;;  %v16030_v57 = vcombine.low %v9212_v46, %v9220_v48  ;;  %v16044_v33 = vcombine.low %v9227_v3, %v9235_v60  ;;  %v18764_v46 = vld [vmem:[%s21432_s4 + $0x1c0] sm:$0xff]  }
0x2934   : > { %9826 = vmatprep.subr.bf16.mxu0 %v16037_v54  ;;  %9867 = vmatprep.subr.bf16.mxu1 %v16039_v0  ;;  %v18744_v54 = vld [vmem:[%s21432_s4 + $0xd8] sm:$0xff]   ;;  %v20623_v48 = vld [vmem:[%s21433_s15] sm:$0xff]  ;;  %s21435_s15 = sld [smem:[#allocation34_spill]] }
0x2935   : > { %9856 = vmatprep.mubr.bf16.mxu0 %v19224_v32  ;;  %9897 = vmatprep.mubr.bf16.mxu1 %v19224_v32  ;;  %v18745_v0 = vld [vmem:[%s21432_s4 + $0x18] sm:$0xff]  }
0x2937   : > { %9827 = vmatpush1.bf16.msra.mxu0 %v16036_v28  ;;  %9868 = vmatpush1.bf16.msra.mxu1 %v16038_v36  ;;  %v18750_v28 = vld [vmem:[%s21432_s4 + $0xa0] sm:$0xff]   ;;  %v18751_v36 = vld [vmem:[%s21432_s4 + $0x68] sm:$0xff]  }
0x2938   : > { %9906 = vmatprep.subr.bf16.mxu0 %v16025_v37  ;;  %9947 = vmatprep.subr.bf16.mxu1 %v16027_v50  ;;  %v18752_v37 = vld [vmem:[%s21432_s4 + $0xe8] sm:$0xff]  }
0x2939   : > { %v18753_v50 = vld [vmem:[%s21432_s4 + $0x28] sm:$0xff]  }
0x293a   : > { %16050 = vmatmul.mubr.msk.bf16.vlgmr.msra.gmra.mrb[116].mxu0 %vm1202_vm1, %v20548_v49  ;;  %16051 = vmatmul.mubr.msk.bf16.vlgmr.msra.gmra.mrb[120].mxu1 %vm1202_vm1, %v20548_v49 }
0x293b   : > { %9907 = vmatpush1.bf16.msra.mxu0 %v16024_v42  ;;  %9948 = vmatpush1.bf16.msra.mxu1 %v16026_v45  ;;  %v18758_v42 = vld [vmem:[%s21432_s4 + $0xb0] sm:$0xff]   ;;  %v18759_v45 = vld [vmem:[%s21432_s4 + $0x78] sm:$0xff]  }
0x293c   : > { %9908 = vmatprep.subr.bf16.mxu0 %v16041_v55  ;;  %9949 = vmatprep.subr.bf16.mxu1 %v16043_v52  ;;  %v18760_v55 = vld [vmem:[%s21432_s4 + $0xf8] sm:$0xff]  }
0x293d   : > { %9938 = vmatprep.mubr.bf16.mxu0 %v19224_v32  ;;  %9979 = vmatprep.mubr.bf16.mxu1 %v19224_v32  ;;  %v18761_v52 = vld [vmem:[%s21432_s4 + $0x38] sm:$0xff]  }
0x293f   : > { %9909 = vmatpush1.bf16.msra.mxu0 %v16040_v56  ;;  %9950 = vmatpush1.bf16.msra.mxu1 %v16042_v58  ;;  %v9502_v56 = vrot.slane %v20623_v48, %v19695_v9  ;;  %v9510_v58 = vrot.slane %v20623_v48, %v19697_v10 }
0x2940   : > { %9988 = vmatprep.subr.bf16.mxu0 %v16029_v59  ;;  %10029 = vmatprep.subr.bf16.mxu1 %v16031_v2  ;;  %v9506_v59 = vrot.slane %v20623_v48, %v19700_v15  ;;  %v9514_v2 = vrot.slane %v20623_v48, %v19702_v17 }
0x2942   : > { %16052 = vmatmul.mubr.msk.bf16.vlgmr.msra.gmra.mrb[120].mxu0 %vm1202_vm1, %v20548_v49  ;;  %16053 = vmatmul.mubr.msk.bf16.vlgmr.msra.gmra.mrb[124].mxu1 %vm1202_vm1, %v20548_v49 }
0x2943   : > { %9989 = vmatpush1.bf16.msra.mxu0 %v16028_v51  ;;  %10030 = vmatpush1.bf16.msra.mxu1 %v16030_v57 }
0x2944   : > { %9990 = vmatprep.subr.bf16.mxu0 %v16045_v62  ;;  %10031 = vmatprep.subr.bf16.mxu1 %v16047_v63 }
0x2945   : > { %10020 = vmatprep.mubr.bf16.mxu0 %v19224_v32  ;;  %10061 = vmatprep.mubr.bf16.mxu1 %v19224_v32 }
0x2947   : > { %9991 = vmatpush1.bf16.msra.mxu0 %v16044_v33  ;;  %10032 = vmatpush1.bf16.msra.mxu1 %v16046_v29 }
0x2948   : > { %17220 = vmatprep.subr.bf16.mxu0 %v18731_v30  ;;  %17242 = vmatprep.subr.bf16.mxu1 %v18732_v5 }
0x294a   : > { %16054 = vmatmul.mubr.msk.bf16.vlgmr.msra.gmra.mrb[124].mxu0 %vm1202_vm1, %v20548_v49  ;;  %16055 = vmatmul.mubr.msk.bf16.vlgmr.msra.gmra.mrb[128].mxu1 %vm1202_vm1, %v20548_v49  ;;  %v18743_v49 = vld [vmem:[%s21432_s4 + $0x58] sm:$0xff]  }
0x294b   : > { %17221 = vmatpush3.bf16.msra.mxu0 %v18733_v19  ;;  %17243 = vmatpush3.bf16.msra.mxu1 %v18734_v7 }
0x294c   : > { %17222 = vmatprep.subr.bf16.mxu0 %v18735_v18  ;;  %17244 = vmatprep.subr.bf16.mxu1 %v18736_v43 }
0x294f   : > { %17223 = vmatpush3.bf16.msra.mxu0 %v18737_v13  ;;  %17245 = vmatpush3.bf16.msra.mxu1 %v18738_v12 }
0x2950   : > { %17224 = vmatprep.subr.bf16.mxu0 %v18739_v21  ;;  %17246 = vmatprep.subr.bf16.mxu1 %v18740_v24  ;;  %v9522_v21 = vrot.slane %v20623_v48, %v19712_v26  ;;  %v9530_v24 = vrot.slane %v20623_v48, %v19714_v27 }
0x2953   : > { %17225 = vmatpush3.bf16.msra.mxu0 %v18741_v31  ;;  %17247 = vmatpush3.bf16.msra.mxu1 %v18742_v20  ;;  %v18765_v31 = vld [vmem:[%s21432_s4 + $0x100] sm:$0xff]  }
0x2954   : > { %17226 = vmatprep.subr.bf16.mxu0 %v18743_v49  ;;  %17248 = vmatprep.subr.bf16.mxu1 %v18744_v54  ;;  %v18766_v20 = vld [vmem:[%s21432_s4 + $0x180] sm:$0xff]  }
0x2957   : > { %17227 = vmatpush3.bf16.msra.mxu0 %v18745_v0  ;;  %17249 = vmatpush3.bf16.msra.mxu1 %v18746_v34  ;;  %v18767_v0 = vld [vmem:[%s21432_s4 + $0x148] sm:$0xff]  }
0x2958   : > { %17228 = vmatprep.subr.bf16.mxu0 %v18747_v44  ;;  %17250 = vmatprep.subr.bf16.mxu1 %v18748_v53  ;;  %v18768_v34 = vld [vmem:[%s21432_s4 + $0x1c8] sm:$0xff]  }
0x295b   : > { %17229 = vmatpush3.bf16.msra.mxu0 %v18749_v11  ;;  %17251 = vmatpush3.bf16.msra.mxu1 %v18750_v28 }
0x295c   : > { %17230 = vmatprep.subr.bf16.mxu0 %v18751_v36  ;;  %17252 = vmatprep.subr.bf16.mxu1 %v18752_v37 }
0x295f   : > { %17231 = vmatpush3.bf16.msra.mxu0 %v18753_v50  ;;  %17253 = vmatpush3.bf16.msra.mxu1 %v18754_v38 }
0x2960   : > { %17232 = vmatprep.subr.bf16.mxu0 %v18755_v39  ;;  %17254 = vmatprep.subr.bf16.mxu1 %v18756_v8  ;;  %v18769_v39 = vld [vmem:[%s21432_s4 + $0x108] sm:$0xff]  }
0x2961   : > { %v18770_v8 = vld [vmem:[%s21432_s4 + $0x188] sm:$0xff]  }
0x2963   : > { %17233 = vmatpush3.bf16.msra.mxu0 %v18757_v40  ;;  %17255 = vmatpush3.bf16.msra.mxu1 %v18758_v42 }
0x2964   : > { %17234 = vmatprep.subr.bf16.mxu0 %v18759_v45  ;;  %17256 = vmatprep.subr.bf16.mxu1 %v18760_v55  ;;  %v18771_v45 = vld [vmem:[%s21432_s4 + $0x150] sm:$0xff]  }
0x2965   : > { %v18772_v55 = vld [vmem:[%s21432_s4 + $0x1d0] sm:$0xff]  }
0x2967   : > { %17235 = vmatpush3.bf16.msra.mxu0 %v18761_v52  ;;  %17257 = vmatpush3.bf16.msra.mxu1 %v18762_v41 }
0x2968   : > { %17264 = vmatprep.subr.bf16.mxu0 %v18763_v35  ;;  %17286 = vmatprep.subr.bf16.mxu1 %v18764_v46 }
0x2a05   : > { %v9776_v3 = vpop.f32.mrb[112].mxu0  ;;  %v9817_v60 = vpop.f32.mrb[116].mxu1 }
0x2a06   : > { %v9777_v47 = vadd.f32 %v9776_v3, %v9502_v56  ;;  %v9818_v61 = vadd.f32 %v9817_v60, %v9510_v58  ;;  %v9778_v51 = vpop.f32.mrb[113].mxu0  ;;  %v9819_v57 = vpop.f32.mrb[117].mxu1  ;;  %v18773_v56 = vld [vmem:[%s21432_s4 + $0x110] sm:$0xff]  }
0x2a07   : > { %v9779_v62 = vadd.f32 %v9778_v51, %v9506_v59  ;;  %v9820_v63 = vadd.f32 %v9819_v57, %v9514_v2  ;;  %v9780_v33 = vpop.f32.mrb[114].mxu0  ;;  %v9821_v29 = vpop.f32.mrb[118].mxu1  ;;  %v18774_v58 = vld [vmem:[%s21432_s4 + $0x190] sm:$0xff]   ;;  %v18775_v59 = vld [vmem:[%s21432_s4 + $0x158] sm:$0xff]  }
0x2a08   : > { %v10070_v30 = vmax.f32 %v9777_v47, 0.0  ;;  %v10072_v5 = vmax.f32 %v9818_v61, 0.0  ;;  %v9781_v19 = vpop.f32.mrb[115].mxu0  ;;  %v9822_v7 = vpop.f32.mrb[119].mxu1  ;;  %v18776_v2 = vld [vmem:[%s21432_s4 + $0x1d8] sm:$0xff]  }
0x2a09   : > { %v10071_v18 = vmax.f32 %v9779_v62, 0.0  ;;  %v10073_v43 = vmax.f32 %v9820_v63, 0.0  ;;  %v18777_v62 = vld [vmem:[%s21432_s4 + $0x118] sm:$0xff]   ;;  %v20662_v19 = vld [vmem:[%s21434_s20 + $0x8] sm:$0xff]  ;;  %s21438_s20 = sld [smem:[#allocation30_spill]] }
0x2a0a   : > { %v10086_v49 = vpack.c.bf16 %v10070_v30, %v10070_v30  ;;  %v10088_v54 = vpack.c.bf16 %v10072_v5, %v10072_v5  ;;  %v18778_v63 = vld [vmem:[%s21432_s4 + $0x198] sm:$0xff]   ;;  %v18779_v30 = vld [vmem:[%s21432_s4 + $0x160] sm:$0xff]   ;;  %v9558_v7 = vrot.slane %v20662_v19, %v19710_v23 }
0x2a0b   : > { %v10087_v13 = vpack.c.bf16 %v10071_v18, %v10071_v18  ;;  %v10089_v12 = vpack.c.bf16 %v10073_v43, %v10073_v43  ;;  %v18780_v5 = vld [vmem:[%s21432_s4 + $0x1e0] sm:$0xff]  }
0x2a0c   : > { %v18781_v18 = vld [vmem:[%s21432_s4 + $0x120] sm:$0xff]  }
0x2a0d   : > { %v20641_v44 = vpop.f32.mrb[116].mxu0  ;;  %v20643_v53 = vpop.f32.mrb[120].mxu1  ;;  %10908 = vmatprep.mubr.bf16.mxu0 %v10087_v13  ;;  %10948 = vmatprep.mubr.bf16.mxu1 %v10089_v12  ;;  %v18782_v43 = vld [vmem:[%s21432_s4 + $0x1a0] sm:$0xff]   ;;  %v18783_v13 = vld [vmem:[%s21432_s4 + $0x168] sm:$0xff]  }
0x2a0e   : > { %v9860_v11 = vpop.f32.mrb[117].mxu0  ;;  %v9901_v28 = vpop.f32.mrb[121].mxu1  ;;  %10909 = vmatmul.mubr.bf16.vlgmr.msra.gmra.mrb[128].mxu0 %v10086_v49  ;;  %10949 = vmatmul.mubr.bf16.vlgmr.msra.gmra.mrb[132].mxu1 %v10088_v54  ;;  %v18784_v12 = vld [vmem:[%s21432_s4 + $0x1e8] sm:$0xff]  }
0x2a0f   : > { %v9861_v36 = vadd.f32 %v9860_v11, %v9522_v21  ;;  %v9902_v37 = vadd.f32 %v9901_v28, %v9530_v24  ;;  %17265 = vmatpush3.bf16.msra.mxu0 %v18765_v31  ;;  %17287 = vmatpush3.bf16.msra.mxu1 %v18766_v20  ;;  %v9862_v50 = vpop.f32.mrb[118].mxu0  ;;  %v9903_v38 = vpop.f32.mrb[122].mxu1  ;;  %v18786_v11 = vld [vmem:[%s21432_s4 + $0x1a8] sm:$0xff]   ;;  %v9518_v28 = vrot.slane %v20623_v48, %v19708_v22 }
0x2a10   : > { %v9863_v40 = vpop.f32.mrb[119].mxu0  ;;  %v9904_v42 = vpop.f32.mrb[123].mxu1  ;;  %17266 = vmatprep.subr.bf16.mxu0 %v18767_v0  ;;  %17288 = vmatprep.subr.bf16.mxu1 %v18768_v34  ;;  %v18785_v34 = vld [vmem:[%s21432_s4 + $0x128] sm:$0xff]   ;;  %v18787_v38 = vld [vmem:[%s21432_s4 + $0x170] sm:$0xff]  }
0x2a11   : > { %v10075_v52 = vmax.f32 %v9861_v36, 0.0  ;;  %v10077_v41 = vmax.f32 %v9902_v37, 0.0  ;;  %v9526_v36 = vrot.slane %v20623_v48, %v19710_v23  ;;  %v9546_v40 = vrot.slane %v20662_v19, %v19702_v17  ;;  %v18789_v42 = vld [vmem:[%s21432_s4 + $0x130] sm:$0xff]  }
0x2a12   : > { %v18790_v48 = vld [vmem:[%s21432_s4 + $0x1b0] sm:$0xff]  }
0x2a13   : > { %v10091_v35 = vpack.c.bf16 %v10075_v52, %v10075_v52  ;;  %v10093_v46 = vpack.c.bf16 %v10077_v41, %v10077_v41  ;;  %17267 = vmatpush3.bf16.msra.mxu0 %v18769_v39  ;;  %17289 = vmatpush3.bf16.msra.mxu1 %v18770_v8  ;;  %v18788_v39 = vld [vmem:[%s21432_s4 + $0x1f0] sm:$0xff]   ;;  %v9538_v8 = vrot.slane %v20662_v19, %v19700_v15  ;;  %v18791_v52 = vld [vmem:[%s21432_s4 + $0x178] sm:$0xff]  }
0x2a14   : > { %17268 = vmatprep.subr.bf16.mxu0 %v18771_v45  ;;  %17290 = vmatprep.subr.bf16.mxu1 %v18772_v55  ;;  %v9859_v45 = vadd.f32 %v20641_v44, %v9518_v28  ;;  %v9900_v55 = vadd.f32 %v20643_v53, %v9526_v36  ;;  %v18792_v41 = vld [vmem:[%s21432_s4 + $0x1f8] sm:$0xff]   ;;  %v18795_v44 = vld [vmem:[%s21432_s4 + $0x240] sm:$0xff]  }
0x2a15   : > { %v20653_v3 = vpop.f32.mrb[120].mxu0  ;;  %v20655_v60 = vpop.f32.mrb[124].mxu1  ;;  %10988 = vmatprep.mubr.bf16.mxu0 %v10091_v35  ;;  %11028 = vmatprep.mubr.bf16.mxu1 %v10093_v46  ;;  %v18796_v53 = vld [vmem:[%s21432_s4 + $0x2c0] sm:$0xff]  }
0x2a16   : > { %v9942_v47 = vpop.f32.mrb[121].mxu0  ;;  %v9983_v61 = vpop.f32.mrb[125].mxu1  ;;  %v18811_v28 = vld [vmem:[%s21432_s4 + $0x260] sm:$0xff]  }
0x2a17   : > { %17269 = vmatpush3.bf16.msra.mxu0 %v18773_v56  ;;  %17291 = vmatpush3.bf16.msra.mxu1 %v18774_v58  ;;  %v9944_v51 = vpop.f32.mrb[122].mxu0  ;;  %v9985_v57 = vpop.f32.mrb[126].mxu1  ;;  %v9943_v35 = vadd.f32 %v9942_v47, %v9538_v8  ;;  %v9984_v46 = vadd.f32 %v9983_v61, %v9546_v40  ;;  %v18793_v56 = vld [vmem:[%s21432_s4 + $0x138] sm:$0xff]   ;;  %v18797_v47 = vld [vmem:[%s21432_s4 + $0x200] sm:$0xff]   ;;  %v18817_v8 = vld [vmem:[%s21432_s4 + $0x228] sm:$0xff]   ;;  %v9534_v40 = vrot.slane %v20662_v19, %v19695_v9 }
0x2a18   : > { %v9945_v33 = vpop.f32.mrb[123].mxu0  ;;  %v9986_v29 = vpop.f32.mrb[127].mxu1  ;;  %17270 = vmatprep.subr.bf16.mxu0 %v18775_v59  ;;  %17292 = vmatprep.subr.bf16.mxu1 %v18776_v2  ;;  %v18794_v58 = vld [vmem:[%s21432_s4 + $0x1b8] sm:$0xff]   ;;  %v10074_v59 = vmax.f32 %v9859_v45, 0.0  ;;  %v10076_v2 = vmax.f32 %v9900_v55, 0.0  ;;  %v18812_v36 = vld [vmem:[%s21432_s4 + $0x2e0] sm:$0xff]   ;;  %v9542_v45 = vrot.slane %v20662_v19, %v19697_v10 }
0x2a19   : > { %v10079_v51 = vmax.f32 %v9943_v35, 0.0  ;;  %v10081_v57 = vmax.f32 %v9984_v46, 0.0  ;;  %v18799_v29 = vld [vmem:[%s21432_s4 + $0x248] sm:$0xff]   ;;  %v18820_v55 = vld [vmem:[%s21432_s4 + $0x2f0] sm:$0xff]   ;;  %v9941_v46 = vadd.f32 %v20653_v3, %v9534_v40  ;;  %v18826_v3 = vld [vmem:[%s21432_s4 + $0x2b8] sm:$0xff]  }
0x2a1a   : > { %v10090_v61 = vpack.c.bf16 %v10074_v59, %v10074_v59  ;;  %v18821_v35 = vld [vmem:[%s21432_s4 + $0x230] sm:$0xff]   ;;  %v9982_v59 = vadd.f32 %v20655_v60, %v9542_v45  ;;  %v18828_v60 = vld [vmem:[%s21432_s4 + $0x3c0] sm:$0xff]   ;;  %v18848_v40 = vld [vmem:[%s21432_s4 + $0x3e8] sm:$0xff]  }
0x2a1b   : > { %17271 = vmatpush3.bf16.msra.mxu0 %v18777_v62  ;;  %17293 = vmatpush3.bf16.msra.mxu1 %v18778_v63  ;;  %v10092_v62 = vpack.c.bf16 %v10076_v2, %v10076_v2  ;;  %v18798_v63 = vld [vmem:[%s21432_s4 + $0x280] sm:$0xff]   ;;  %v10095_v33 = vpack.c.bf16 %v10079_v51, %v10079_v51  ;;  %v18824_v2 = vld [vmem:[%s21432_s4 + $0x2f8] sm:$0xff]   ;;  %v18850_v45 = vld [vmem:[%s21432_s4 + $0x3a8] sm:$0xff]  }
0x2a1c   : > { %17272 = vmatprep.subr.bf16.mxu0 %v18779_v30  ;;  %17294 = vmatprep.subr.bf16.mxu1 %v18780_v5  ;;  %v18800_v30 = vld [vmem:[%s21432_s4 + $0x2c8] sm:$0xff]   ;;  %v10097_v5 = vpack.c.bf16 %v10081_v57, %v10081_v57  ;;  %v18825_v51 = vld [vmem:[%s21432_s4 + $0x238] sm:$0xff]   ;;  %v10078_v57 = vmax.f32 %v9941_v46, 0.0  ;;  %v18854_v46 = vld [vmem:[%s21432_s4 + $0x3b0] sm:$0xff]  }
0x2a1d   : > { %v20670_v21 = vpop.f32.mrb[124].mxu0  ;;  %v10063_v24 = vpop.f32.mrb[128].mxu1 }
0x2a1e   : > { %v20672_v31 = vadd.f32 %v10063_v24, %v9558_v7  ;;  %v20674_v20 = vpop.f32.mrb[125].mxu0  ;;  %v20676_v49 = vpop.f32.mrb[129].mxu1  ;;  %v18801_v7 = vld [vmem:[%s21432_s4 + $0x208] sm:$0xff]   ;;  %v18806_v24 = vld [vmem:[%s21432_s4 + $0x290] sm:$0xff]  }
0x2a1f   : > { %17273 = vmatpush3.bf16.msra.mxu0 %v18781_v18  ;;  %17295 = vmatpush3.bf16.msra.mxu1 %v18782_v43  ;;  %v10026_v54 = vpop.f32.mrb[126].mxu0  ;;  %v10067_v0 = vpop.f32.mrb[130].mxu1  ;;  %v18802_v18 = vld [vmem:[%s21432_s4 + $0x288] sm:$0xff]   ;;  %v18803_v43 = vld [vmem:[%s21432_s4 + $0x250] sm:$0xff]  }
0x2a20   : > { %v10027_v37 = vpop.f32.mrb[127].mxu0  ;;  %v10068_v50 = vpop.f32.mrb[131].mxu1  ;;  %17274 = vmatprep.subr.bf16.mxu0 %v18783_v13  ;;  %17296 = vmatprep.subr.bf16.mxu1 %v18784_v12  ;;  %v18804_v13 = vld [vmem:[%s21432_s4 + $0x2d0] sm:$0xff]   ;;  %v18807_v54 = vld [vmem:[%s21432_s4 + $0x258] sm:$0xff]  }
0x2a21   : > { %v18805_v12 = vld [vmem:[%s21432_s4 + $0x210] sm:$0xff]   ;;  %v18808_v0 = vld [vmem:[%s21432_s4 + $0x2d8] sm:$0xff]   ;;  %v18813_v37 = vld [vmem:[%s21432_s4 + $0x220] sm:$0xff]  }
0x2a22   : > { %v18814_v50 = vld [vmem:[%s21432_s4 + $0x2a0] sm:$0xff]  }
0x2a23   : > { %17275 = vmatpush3.bf16.msra.mxu0 %v18785_v34  ;;  %17297 = vmatpush3.bf16.msra.mxu1 %v18786_v11  ;;  %v18809_v34 = vld [vmem:[%s21432_s4 + $0x218] sm:$0xff]  }
0x2a24   : > { %17276 = vmatprep.subr.bf16.mxu0 %v18787_v38  ;;  %17298 = vmatprep.subr.bf16.mxu1 %v18788_v39  ;;  %v18810_v11 = vld [vmem:[%s21432_s4 + $0x298] sm:$0xff]   ;;  %v18815_v38 = vld [vmem:[%s21432_s4 + $0x268] sm:$0xff]  }
0x2a25   : > { %v18816_v39 = vld [vmem:[%s21432_s4 + $0x2e8] sm:$0xff]  }
0x2a27   : > { %17277 = vmatpush3.bf16.msra.mxu0 %v18789_v42  ;;  %17299 = vmatpush3.bf16.msra.mxu1 %v18790_v48  ;;  %v18818_v42 = vld [vmem:[%s21432_s4 + $0x2a8] sm:$0xff]   ;;  %v18819_v48 = vld [vmem:[%s21432_s4 + $0x270] sm:$0xff]  }
0x2a28   : > { %17278 = vmatprep.subr.bf16.mxu0 %v18791_v52  ;;  %17300 = vmatprep.subr.bf16.mxu1 %v18792_v41  ;;  %v9554_v52 = vrot.slane %v20662_v19, %v19712_v26  ;;  %v9562_v41 = vrot.slane %v20662_v19, %v19714_v27 }
0x2a2b   : > { %17279 = vmatpush3.bf16.msra.mxu0 %v18793_v56  ;;  %17301 = vmatpush3.bf16.msra.mxu1 %v18794_v58  ;;  %v18822_v56 = vld [vmem:[%s21432_s4 + $0x2b0] sm:$0xff]   ;;  %v18823_v58 = vld [vmem:[%s21432_s4 + $0x278] sm:$0xff]  }
0x2a2c   : > { %17308 = vmatprep.subr.bf16.mxu0 %v18795_v44  ;;  %17330 = vmatprep.subr.bf16.mxu1 %v18796_v53  ;;  %v10025_v44 = vadd.f32 %v20674_v20, %v9554_v52  ;;  %v10066_v53 = vadd.f32 %v20676_v49, %v9562_v41  ;;  %v18829_v20 = vld [vmem:[%s21432_s4 + $0x300] sm:$0xff]   ;;  %v18852_v52 = vld [vmem:[%s21432_s4 + $0x3f0] sm:$0xff]  }
0x2a2d   : > { %v18830_v49 = vld [vmem:[%s21432_s4 + $0x380] sm:$0xff]   ;;  %v18853_v41 = vld [vmem:[%s21432_s4 + $0x330] sm:$0xff]  }
0x2a2e   : > { %10989 = vmatmul.mubr.bf16.vlgmr.msra.gmra.mrb[132].mxu0 %v10090_v61  ;;  %11029 = vmatmul.mubr.bf16.vlgmr.msra.gmra.mrb[136].mxu1 %v10092_v62  ;;  %v10080_v61 = vmax.f32 %v9982_v59, 0.0  ;;  %v10083_v62 = vmax.f32 %v10025_v44, 0.0  ;;  %v10084_v44 = vmax.f32 %v20672_v31, 0.0  ;;  %v16056_v31 = vld [vmem:[%s21435_s15] ss:$0 sm:$0xff]  ;;  %s21436_s15 = sld [smem:[#allocation29_spill]] }
0x2a2f   : > { %17309 = vmatpush3.bf16.msra.mxu0 %v18797_v47  ;;  %11068 = vmatprep.mubr.bf16.mxu0 %v10095_v33  ;;  %v18827_v47 = vld [vmem:[%s21432_s4 + $0x340] sm:$0xff]   ;;  %v10094_v33 = vpack.c.bf16 %v10078_v57, %v10078_v57 }
0x2a30   : > { %17331 = vmatpush3.bf16.msra.mxu1 %v18798_v63  ;;  %11108 = vmatprep.mubr.bf16.mxu1 %v10097_v5  ;;  %v10085_v63 = vmax.f32 %v10066_v53, 0.0  ;;  %v10099_v5 = vpack.c.bf16 %v10083_v62, %v10083_v62 }
0x2a31   : > { %17310 = vmatprep.subr.bf16.mxu0 %v18799_v29  ;;  %17332 = vmatprep.subr.bf16.mxu1 %v18800_v30  ;;  %v10096_v29 = vpack.c.bf16 %v10080_v61, %v10080_v61  ;;  %v18831_v30 = vld [vmem:[%s21432_s4 + $0x348] sm:$0xff]  }
0x2a33   : > { %17311 = vmatpush3.bf16.msra.mxu0 %v18801_v7  ;;  %v18832_v7 = vld [vmem:[%s21432_s4 + $0x3c8] sm:$0xff]  }
0x2a34   : > { %17333 = vmatpush3.bf16.msra.mxu1 %v18802_v18  ;;  %17312 = vmatprep.subr.bf16.mxu0 %v18803_v43  ;;  %v10101_v18 = vpack.c.bf16 %v10085_v63, %v10085_v63  ;;  %v18833_v43 = vld [vmem:[%s21432_s4 + $0x308] sm:$0xff]   ;;  %s21437_s9 = smov %s21436_s15 }
0x2a35   : > { %17334 = vmatprep.subr.bf16.mxu1 %v18804_v13  ;;  %v18834_v13 = vld [vmem:[%s21432_s4 + $0x388] sm:$0xff]  }
0x2a37   : > { %17313 = vmatpush3.bf16.msra.mxu0 %v18805_v12  ;;  %v18835_v12 = vld [vmem:[%s21432_s4 + $0x350] sm:$0xff]  }
0x2a38   : > { %17335 = vmatpush3.bf16.msra.mxu1 %v18806_v24  ;;  %17314 = vmatprep.subr.bf16.mxu0 %v18807_v54  ;;  %v18836_v24 = vld [vmem:[%s21432_s4 + $0x3d0] sm:$0xff]  }
0x2a39   : > { %17336 = vmatprep.subr.bf16.mxu1 %v18808_v0  ;;  %v18837_v54 = vld [vmem:[%s21432_s4 + $0x310] sm:$0xff]  }
0x2a3a   : > { %v18838_v0 = vld [vmem:[%s21432_s4 + $0x390] sm:$0xff]  }
0x2a3b   : > { %17315 = vmatpush3.bf16.msra.mxu0 %v18809_v34  ;;  %v18839_v34 = vld [vmem:[%s21432_s4 + $0x358] sm:$0xff]  }
0x2a3c   : > { %17337 = vmatpush3.bf16.msra.mxu1 %v18810_v11  ;;  %17316 = vmatprep.subr.bf16.mxu0 %v18811_v28  ;;  %v18840_v11 = vld [vmem:[%s21432_s4 + $0x3d8] sm:$0xff]  }
0x2a3d   : > { %17338 = vmatprep.subr.bf16.mxu1 %v18812_v36  ;;  %v18841_v28 = vld [vmem:[%s21432_s4 + $0x318] sm:$0xff]  }
0x2a3e   : > { %v18842_v36 = vld [vmem:[%s21432_s4 + $0x398] sm:$0xff]  }
0x2a3f   : > { %17317 = vmatpush3.bf16.msra.mxu0 %v18813_v37  ;;  %v18843_v37 = vld [vmem:[%s21432_s4 + $0x360] sm:$0xff]  }
0x2a40   : > { %17339 = vmatpush3.bf16.msra.mxu1 %v18814_v50  ;;  %17318 = vmatprep.subr.bf16.mxu0 %v18815_v38  ;;  %v18844_v50 = vld [vmem:[%s21432_s4 + $0x3e0] sm:$0xff]  }
0x2a41   : > { %17340 = vmatprep.subr.bf16.mxu1 %v18816_v39  ;;  %v18845_v38 = vld [vmem:[%s21432_s4 + $0x320] sm:$0xff]  }
0x2a42   : > { %v18846_v39 = vld [vmem:[%s21432_s4 + $0x3a0] sm:$0xff]  }
0x2a43   : > { %17319 = vmatpush3.bf16.msra.mxu0 %v18817_v8  ;;  %v18847_v8 = vld [vmem:[%s21432_s4 + $0x368] sm:$0xff]  }
0x2a44   : > { %17341 = vmatpush3.bf16.msra.mxu1 %v18818_v42  ;;  %17320 = vmatprep.subr.bf16.mxu0 %v18819_v48  ;;  %v18849_v42 = vld [vmem:[%s21432_s4 + $0x328] sm:$0xff]   ;;  %v9550_v48 = vrot.slane %v20662_v19, %v19708_v22  ;;  %v18857_v19 = vld [vmem:[%s21432_s4 + $0x338] sm:$0xff]  }
0x2a45   : > { %17342 = vmatprep.subr.bf16.mxu1 %v18820_v55  ;;  %v18851_v55 = vld [vmem:[%s21432_s4 + $0x370] sm:$0xff]  }
0x2a47   : > { %17321 = vmatpush3.bf16.msra.mxu0 %v18821_v35  ;;  %v10023_v35 = vadd.f32 %v20670_v21, %v9550_v48  ;;  %v10100_v21 = vpack.c.bf16 %v10084_v44, %v10084_v44 }
0x2a48   : > { %17343 = vmatpush3.bf16.msra.mxu1 %v18822_v56  ;;  %17322 = vmatprep.subr.bf16.mxu0 %v18823_v58  ;;  %v18855_v56 = vld [vmem:[%s21432_s4 + $0x378] sm:$0xff]  }
0x2a49   : > { %17344 = vmatprep.subr.bf16.mxu1 %v18824_v2  ;;  %v18856_v58 = vld [vmem:[%s21432_s4 + $0x3f8] sm:$0xff]   ;;  %v10082_v59 = vmax.f32 %v10023_v35, 0.0 }
0x2a4a   : > { %v18858_v2 = vld [vmem:[%s21432_s4 + $0x3b8] sm:$0xff]  }
0x2a4b   : > { %17323 = vmatpush3.bf16.msra.mxu0 %v18825_v51  ;;  %v10098_v53 = vpack.c.bf16 %v10082_v59, %v10082_v59 }
0x2a4c   : > { %17345 = vmatpush3.bf16.msra.mxu1 %v18826_v3  ;;  %17352 = vmatprep.subr.bf16.mxu0 %v18827_v47 }
0x2a4d   : > { %17374 = vmatprep.subr.bf16.mxu1 %v18828_v60 }
0x2a4e   : > { %11069 = vmatmul.mubr.bf16.vlgmr.msra.gmra.mrb[136].mxu0 %v10094_v33 }
0x2a4f   : > { %11109 = vmatmul.mubr.bf16.vlgmr.msra.gmra.mrb[140].mxu1 %v10096_v29  ;;  %17353 = vmatpush3.bf16.msra.mxu0 %v18829_v20 }
0x2a50   : > { %11148 = vmatprep.mubr.bf16.mxu0 %v10099_v5  ;;  %17375 = vmatpush3.bf16.msra.mxu1 %v18830_v49 }
0x2a51   : > { %11188 = vmatprep.mubr.bf16.mxu1 %v10101_v18  ;;  %17354 = vmatprep.subr.bf16.mxu0 %v18831_v30 }
0x2a52   : > { %17376 = vmatprep.subr.bf16.mxu1 %v18832_v7 }
0x2a53   : > { %17355 = vmatpush3.bf16.msra.mxu0 %v18833_v43 }
0x2a54   : > { %17377 = vmatpush3.bf16.msra.mxu1 %v18834_v13  ;;  %17356 = vmatprep.subr.bf16.mxu0 %v18835_v12 }
0x2a55   : > { %17378 = vmatprep.subr.bf16.mxu1 %v18836_v24 }
0x2a57   : > { %17357 = vmatpush3.bf16.msra.mxu0 %v18837_v54 }
0x2a58   : > { %17379 = vmatpush3.bf16.msra.mxu1 %v18838_v0  ;;  %17358 = vmatprep.subr.bf16.mxu0 %v18839_v34 }
0x2a59   : > { %17380 = vmatprep.subr.bf16.mxu1 %v18840_v11 }
0x2a5b   : > { %17359 = vmatpush3.bf16.msra.mxu0 %v18841_v28 }
0x2a5c   : > { %17381 = vmatpush3.bf16.msra.mxu1 %v18842_v36  ;;  %17360 = vmatprep.subr.bf16.mxu0 %v18843_v37 }
0x2a5d   : > { %17382 = vmatprep.subr.bf16.mxu1 %v18844_v50 }
0x2a5f   : > { %17361 = vmatpush3.bf16.msra.mxu0 %v18845_v38 }
0x2a60   : > { %17383 = vmatpush3.bf16.msra.mxu1 %v18846_v39  ;;  %17362 = vmatprep.subr.bf16.mxu0 %v18847_v8 }
0x2a61   : > { %17384 = vmatprep.subr.bf16.mxu1 %v18848_v40 }
0x2a63   : > { %17363 = vmatpush3.bf16.msra.mxu0 %v18849_v42 }
0x2a64   : > { %17385 = vmatpush3.bf16.msra.mxu1 %v18850_v45  ;;  %17364 = vmatprep.subr.bf16.mxu0 %v18851_v55 }
0x2a65   : > { %17386 = vmatprep.subr.bf16.mxu1 %v18852_v52 }
0x2a67   : > { %17365 = vmatpush3.bf16.msra.mxu0 %v18853_v41 }
0x2a68   : > { %17387 = vmatpush3.bf16.msra.mxu1 %v18854_v46  ;;  %17366 = vmatprep.subr.bf16.mxu0 %v18855_v56 }
0x2a69   : > { %17388 = vmatprep.subr.bf16.mxu1 %v18856_v58 }
0x2a6b   : > { %17367 = vmatpush3.bf16.msra.mxu0 %v18857_v19 }
0x2a6c   : > { %17389 = vmatpush3.bf16.msra.mxu1 %v18858_v2  ;;  %17910 = vmatprep.subr.bf16.mxu0 %v19207_v1 }
0x2a6d   : > { %17918 = vmatprep.subr.mxu1 %v19207_v1 }
0x2a6e   : > { %11149 = vmatmul.mubr.bf16.vlgmr.msra.gmra.mrb[140].mxu0 %v10098_v53 }
0x2a6f   : > { %11189 = vmatmul.mubr.bf16.vlgmr.msra.gmra.mrb[144].mxu1 %v10100_v21  ;;  %17914 = vmatprep.mubr.msk.bf16.mxu0 %vm19208_vm0, %v19207_v1 }
0x2a70   : > { %17920 = vmatprep.mubr.msk.f32.mxu1 %vm19208_vm0, %v19207_v1 }
0x2ae1   : > { %v17236_v51 = vpop.f32.mrb[128].mxu0  ;;  %v17258_v57 = vpop.f32.mrb[132].mxu1 }
0x2ae2   : > { %v17237_v3 = vpop.f32.mrb[129].mxu0  ;;  %v17259_v47 = vpop.f32.mrb[133].mxu1 }
0x2ae3   : > { %v17238_v61 = vadd.f32 %v17237_v3, %v17236_v51  ;;  %v17260_v60 = vadd.f32 %v17259_v47, %v17258_v57  ;;  %v17239_v62 = vpop.f32.mrb[130].mxu0  ;;  %v17261_v63 = vpop.f32.mrb[134].mxu1 }
0x2ae4   : > { %v17240_v20 = vpop.f32.mrb[131].mxu0  ;;  %v17262_v33 = vpop.f32.mrb[135].mxu1  ;;  %v18859_v62 = vld [vmem:[%s19314_s27 + $0x10] sm:$0xff]   ;;  %v18860_v63 = vld [vmem:[%s19314_s27 + $0x18] sm:$0xff]  }
0x2ae5   : > { %v10911_v49 = vadd.f32 %v17238_v61, %v16056_v31  ;;  %17911 = vmatpush3.bf16.msra.mxu0 %v18859_v62 }
0x2ae6   : > { %17912 = vmatprep.subr.bf16.mxu0 %v19207_v1 }
0x2ae7   : > { %v10951_v29 = vadd.f32 %v17260_v60, %v10911_v49 }
0x2ae9   : > { %17913 = vmatpush3.bf16.msra.mxu0 %v18860_v63 }
0x2aea   : > { %17923 = vmatprep.subr.mxu0 %v19207_v1 }
0x2b01   : > { %v17280_v30 = vpop.f32.mrb[132].mxu0  ;;  %v17302_v5 = vpop.f32.mrb[136].mxu1 }
0x2b02   : > { %v17281_v7 = vpop.f32.mrb[133].mxu0  ;;  %v17303_v18 = vpop.f32.mrb[137].mxu1 }
0x2b03   : > { %v17282_v43 = vadd.f32 %v17281_v7, %v17280_v30  ;;  %v17304_v13 = vadd.f32 %v17303_v18, %v17302_v5  ;;  %v17283_v12 = vpop.f32.mrb[134].mxu0  ;;  %v17305_v24 = vpop.f32.mrb[138].mxu1  ;;  %v16186_v5 = vld [vmem:[%s21438_s20] ss:$0 sm:$0xff] }
0x2b04   : > { %v17284_v54 = vpop.f32.mrb[135].mxu0  ;;  %v17306_v0 = vpop.f32.mrb[139].mxu1 }
0x2b05   : > { %v10991_v34 = vadd.f32 %v17282_v43, %v10951_v29  ;;  %v16185_v29 = vld [vmem:[%s21436_s15] ss:$0 sm:$0xff] }
0x2b07   : > { %v11031_v11 = vadd.f32 %v17304_v13, %v10991_v34  ;;  %v16197_v13 = vld [vmem:[%s21406_s23 + $0x1] ss:$0 sm:$0xff] }
0x2b21   : > { %v17324_v28 = vpop.f32.mrb[136].mxu0 }
0x2b22   : > { %v17346_v36 = vpop.f32.mrb[140].mxu1  ;;  %v17325_v37 = vpop.f32.mrb[137].mxu0 }
0x2b23   : > { %v17326_v50 = vadd.f32 %v17325_v37, %v17324_v28  ;;  %v17347_v38 = vpop.f32.mrb[141].mxu1  ;;  %v17327_v39 = vpop.f32.mrb[138].mxu0 }
0x2b24   : > { %v17348_v8 = vadd.f32 %v17347_v38, %v17346_v36  ;;  %v17349_v40 = vpop.f32.mrb[142].mxu1  ;;  %v17328_v42 = vpop.f32.mrb[139].mxu0 }
0x2b25   : > { %v11071_v48 = vadd.f32 %v17326_v50, %v11031_v11  ;;  %v17350_v45 = vpop.f32.mrb[143].mxu1 }
0x2b27   : > { %v11111_v55 = vadd.f32 %v17348_v8, %v11071_v48 }
0x2b41   : > { %v17368_v52 = vpop.f32.mrb[140].mxu0 }
0x2b42   : > { %v17390_v41 = vpop.f32.mrb[144].mxu1  ;;  %v17369_v35 = vpop.f32.mrb[141].mxu0 }
0x2b43   : > { %v17370_v46 = vadd.f32 %v17369_v35, %v17368_v52  ;;  %v17391_v56 = vpop.f32.mrb[145].mxu1  ;;  %v17371_v58 = vpop.f32.mrb[142].mxu0 }
0x2b44   : > { %v17392_v19 = vadd.f32 %v17391_v56, %v17390_v41  ;;  %v17393_v59 = vpop.f32.mrb[146].mxu1  ;;  %v17372_v2 = vpop.f32.mrb[143].mxu0 }
0x2b45   : > { %v11151_v44 = vadd.f32 %v17370_v46, %v11111_v55  ;;  %v17394_v53 = vpop.f32.mrb[147].mxu1 }
0x2b47   : > { %v11191_v21 = vadd.f32 %v17392_v19, %v11151_v44 }
0x2b49   : > { %v11196_v51 = vadd.f32 %v11191_v21, %v20544_v25 }
0x2b4b   : > { %v11199_v57 = vsel %vm1202_vm1, %v11196_v51, 0.0 }
0x2b4c   : > { %11200 = vadd.xlane.f32.xlu0 %v11199_v57 }
0x2bd9   : > { %v11201_v31 = vpop.xlane.xlu0 %11200 }
0x2bda   : > { %v11202_v3 = vmul.f32 0.03125, %v11201_v31 }
0x2bdc   : > { %v11203_v47 = vsub.f32 %v11196_v51, %v11202_v3 }
0x2bde   : > { %v11204_v61 = vmul.f32 %v11203_v47, %v11203_v47 }
0x2be0   : > { %v11205_v60 = vsel %vm1202_vm1, %v11204_v61, 0.0 }
0x2be1   : > { %11206 = vadd.xlane.f32.xlu0 %v11205_v60 }
0x2c6e   : > { %v11207_v25 = vpop.xlane.xlu0 %11206 }
0x2c6f   : > { %v11208_v20 = vmul.f32 0.03125, %v11207_v25 }
0x2c71   : > { %v11209_v33 = vadd.f32 1e-05, %v11208_v20 }
0x2c73   : > { %19117 = vrsqrt.f32 %v11209_v33 }
0x2c7d   : > { %v19118_v49 = vpop.eup %19117 }
0x2c7e   : > { %v11211_v30 = vmul.f32 %v19118_v49, %v11203_v47 }
0x2c80   : > { %v11218_v7 = vmul.f32 %v16185_v29, %v11211_v30 }
0x2c82   : > { %v20794_v18 = vadd.f32 %v16186_v5, %v11218_v7 }
0x2c84   : > { %v11240_v43 = vpack.c.bf16 %v20794_v18, %v20794_v18 }
0x2c86   : > { %17915 = vmatmul.mubr.msk.bf16.vlgmr.msra.gmra.mrb[144].mxu0 %vm1202_vm1, %v11240_v43 }
0x2c87   : > { %17925 = vmatprep.mubr.msk.f32.mxu0 %vm19208_vm0, %v19207_v1 }
0x2d59   : > { %v11296_v12 = vpop.f32.mrb[144].mxu0 }
0x2d5a   : > { %v20802_v24 = vadd.f32 %v16197_v13, %v11296_v12  ;;  %v17916_v54 = vpop.f32.mrb[145].mxu0 }
0x2d5b   : > { %v11299_v0 = vpop.f32.mrb[146].mxu0 }
0x2d5c   : > { %11469 = vrot.lane.b32.xlu0 %v20802_v24, %s21424_s24  ;;  %11303 = vrot.lane.b32.xlu1 %v20802_v24, %s21417_s13  ;;  %v17917_v34 = vpop.f32.mrb[147].mxu0 }
0x2d60   : > { %11633 = vrot.lane.b32.xlu0 %v20802_v24, %s21423_s19  ;;  %11467 = vrot.lane.b32.xlu1 %v20802_v24, %s21422_s21 }
0x2d64   : > { %11799 = vrot.lane.b32.xlu0 %v20802_v24, %s21402_s7  ;;  %11635 = vrot.lane.b32.xlu1 %v20802_v24, %s21407_s11 }
0x2d68   : > { %11801 = vrot.lane.b32.xlu1 %v20802_v24, %s21403_s2 }
0x2dce   : > { %v11304_v11 = vpop.permute.xlu1 %11303  ;;  %v11470_v28 = vpop.permute.xlu0 %11469 }
0x2dcf   : > { %17919 = vmatpush3.xpose.msk.msra.mxu1 %vm1253_vm2, %v11304_v11 }
0x2dd0   : > { %17928 = vmatprep.subr.mxu1 %v19207_v1 }
0x2dd2   : > { %17921 = vmatmul.mubr.msk.f32.vlgmr.msra.gmra.mrb[148].mxu1 %vm1253_vm2, %v20802_v24  ;;  %v11468_v36 = vpop.permute.xlu1 %11467  ;;  %v11634_v50 = vpop.permute.xlu0 %11633 }
0x2dd3   : > { %17929 = vmatpush3.xpose.msk.msra.mxu1 %vm1253_vm2, %v11470_v28  ;;  %17930 = vmatprep.mubr.msk.f32.mxu1 %vm19208_vm0, %v19207_v1 }
0x2dd4   : > { %17938 = vmatprep.subr.mxu1 %v19207_v1 }
0x2dd6   : > { %17931 = vmatmul.mubr.msk.f32.vlgmr.msra.gmra.mrb[150].mxu1 %vm1253_vm2, %v11468_v36  ;;  %v11636_v37 = vpop.permute.xlu1 %11635  ;;  %v11800_v39 = vpop.permute.xlu0 %11799 }
0x2dd7   : > { %17939 = vmatpush3.xpose.msk.msra.mxu1 %vm1253_vm2, %v11636_v37  ;;  %17940 = vmatprep.mubr.msk.f32.mxu1 %vm19208_vm0, %v19207_v1 }
0x2dd8   : > { %17948 = vmatprep.subr.mxu1 %v19207_v1 }
0x2dda   : > { %17941 = vmatmul.mubr.msk.f32.vlgmr.msra.gmra.mrb[152].mxu1 %vm1253_vm2, %v11634_v50  ;;  %v11802_v38 = vpop.permute.xlu1 %11801 }
0x2ddb   : > { %17949 = vmatpush3.xpose.msk.msra.mxu1 %vm1253_vm2, %v11802_v38  ;;  %17950 = vmatprep.mubr.msk.f32.mxu1 %vm19208_vm0, %v19207_v1 }
0x2ddc   : > { %17958 = vmatprep.subr.bf16.mxu1 %v19207_v1 }
0x2dde   : > { %17951 = vmatmul.mubr.msk.f32.vlgmr.msra.gmra.mrb[154].mxu1 %vm1253_vm2, %v11800_v39 }
0x2ddf   : > { %17962 = vmatprep.mubr.msk.bf16.mxu1 %vm19208_vm0, %v19207_v1 }
0x2ea5   : > { %v11375_v8 = vpop.f32.mrb[148].mxu1 }
0x2ea6   : > { %v11379_v40 = vmul.f32 0.35355338, %v11375_v8  ;;  %v17922_v42 = vpop.f32.mrb[149].mxu1 }
0x2ea8   : > { %v11380_v48 = vsel %vm1253_vm2, %v11379_v40, -inf }
0x2ea9   : > { %11381 = vmax.xlane.f32.xlu1 %v11380_v48  ;;  %v11541_v45 = vpop.f32.mrb[150].mxu1 }
0x2eaa   : > { %v11545_v55 = vmul.f32 0.35355338, %v11541_v45  ;;  %v17932_v52 = vpop.f32.mrb[151].mxu1 }
0x2eac   : > { %v11546_v41 = vsel %vm1253_vm2, %v11545_v55, -inf }
0x2ead   : > { %11547 = vmax.xlane.f32.xlu0 %v11546_v41  ;;  %v11707_v35 = vpop.f32.mrb[152].mxu1  ;;  %v18861_v41 = vld [vmem:[%s21411_s22 + $0x10] sm:$0xff]  }
0x2eae   : > { %v11711_v46 = vmul.f32 0.35355338, %v11707_v35  ;;  %v17942_v56 = vpop.f32.mrb[153].mxu1  ;;  %17959 = vmatpush3.bf16.msra.mxu1 %v18861_v41  ;;  %v18862_v35 = vld [vmem:[%s21411_s22 + $0x18] sm:$0xff]  }
0x2eaf   : > { %17960 = vmatprep.subr.bf16.mxu1 %v19207_v1 }
0x2eb0   : > { %v11712_v58 = vsel %vm1253_vm2, %v11711_v46, -inf }
0x2eb1   : > { %11713 = vmax.xlane.f32.xlu0 %v11712_v58  ;;  %v11873_v19 = vpop.f32.mrb[154].mxu1 }
0x2eb2   : > { %v11877_v59 = vmul.f32 0.35355338, %v11873_v19  ;;  %v17952_v2 = vpop.f32.mrb[155].mxu1  ;;  %17961 = vmatpush3.bf16.msra.mxu1 %v18862_v35 }
0x2eb3   : > { %17974 = vmatprep.subr.bf16.mxu1 %v19207_v1 }
0x2eb4   : > { %v11878_v44 = vsel %vm1253_vm2, %v11877_v59, -inf }
0x2eb5   : > { %11879 = vmax.xlane.f32.xlu1 %v11878_v44 }
0x2ec6   : > { %11557 = vrot.lane.b32.xlu1 %v20802_v24, %s21408_s10 }
0x2f36   : > { %v11382_v53 = vpop.xlane.xlu1 %11381 }
0x2f37   : > { %v11383_v21 = vsub.f32 %v11379_v40, %v11382_v53 }
0x2f39   : > { %v11384_v51 = vmul.f32 1.442695, %v11383_v21 }
0x2f3a   : > { %v11548_v57 = vpop.xlane.xlu0 %11547 }
0x2f3b   : > { %19119 = vpow2.f32 %v11384_v51  ;;  %v11549_v31 = vsub.f32 %v11545_v55, %v11548_v57 }
0x2f3d   : > { %v11550_v3 = vmul.f32 1.442695, %v11549_v31  ;;  %v16213_v31 = vld [vmem:[%s21414_s5 + $0x1] ss:$0 sm:$0xff] }
0x2f3e   : > { %v11714_v29 = vpop.xlane.xlu0 %11713 }
0x2f3f   : > { %19121 = vpow2.f32 %v11550_v3  ;;  %v11715_v30 = vsub.f32 %v11711_v46, %v11714_v29 }
0x2f41   : > { %v11716_v5 = vmul.f32 1.442695, %v11715_v30 }
0x2f42   : > { %v11880_v47 = vpop.xlane.xlu1 %11879 }
0x2f43   : > { %v11881_v61 = vsub.f32 %v11877_v59, %v11880_v47 }
0x2f45   : > { %v19120_v60 = vpop.eup %19119  ;;  %v11882_v62 = vmul.f32 1.442695, %v11881_v61 }
0x2f46   : > { %v11386_v63 = vsel %vm1253_vm2, %v19120_v60, 0.0  ;;  %v11558_v13 = vpop.permute.xlu1 %11557 }
0x2f47   : > { %19123 = vpow2.f32 %v11882_v62  ;;  %11387 = vadd.xlane.f32.xlu0 %v11386_v63 }
0x2f48   : > { %19125 = vpow2.f32 %v11716_v5 }
0x2f49   : > { %v19122_v25 = vpop.eup %19121 }
0x2f4a   : > { %v11552_v20 = vsel %vm1253_vm2, %v19122_v25, 0.0 }
0x2f4b   : > { %11553 = vadd.xlane.f32.xlu1 %v11552_v20  ;;  %v18863_v20 = vld [vmem:[%s21415_s8 + $0x10] sm:$0xff]  }
0x2f51   : > { %v19124_v33 = vpop.eup %19123 }
0x2f52   : > { %v11884_v49 = vsel %vm1253_vm2, %v19124_v33, 0.0  ;;  %v19126_v7 = vpop.eup %19125 }
0x2f53   : > { %11885 = vadd.xlane.f32.xlu1 %v11884_v49  ;;  %v11718_v43 = vsel %vm1253_vm2, %v19126_v7, 0.0 }
0x2f5d   : > { %11391 = vrot.lane.b32.xlu0 %v20802_v24, %s21409_s1  ;;  %s21444_s1 = sld [smem:[#allocation38_spill]] }
0x2f64   : > { %11723 = vrot.lane.b32.xlu1 %v20802_v24, %s21401_s18 }
0x2f7c   : > { %11719 = vadd.xlane.f32.xlu0 %v11718_v43  ;;  %v16231_v43 = vld [vmem:[%s21416_s6 + $0x1] ss:$0 sm:$0xff] }
0x2f92   : > { %11889 = vrot.lane.b32.xlu0 %v20802_v24, %s21410_s28  ;;  %s21443_s28 = sld [smem:[#allocation36_spill]] }
0x2fd4   : > { %v11388_v12 = vpop.xlane.xlu0 %11387 }
0x2fd5   : > { %19127 = vrcp.f32 %v11388_v12 }
0x2fd8   : > { %v11392_v54 = vpop.permute.xlu0 %11391  ;;  %v11554_v0 = vpop.xlane.xlu1 %11553 }
0x2fd9   : > { %19129 = vrcp.f32 %v11554_v0  ;;  %17924 = vmatpush3.msra.mxu0 %v11392_v54 }
0x2fda   : > { %17933 = vmatprep.subr.mxu0 %v19207_v1 }
0x2fdf   : > { %v19128_v34 = vpop.eup %19127 }
0x2fe0   : > { %v11390_v11 = vmul.f32 %v19128_v34, %v19120_v60  ;;  %v11886_v28 = vpop.xlane.xlu1 %11885 }
0x2fe2   : > { %17926 = vmatmul.mubr.msk.f32.vlgmr.msra.gmra.mrb[148].mxu0 %vm1253_vm2, %v11390_v11  ;;  %v16219_v11 = vld [vmem:[%s21418_s14 + $0x1] ss:$0 sm:$0xff] }
0x2fe3   : > { %v19130_v36 = vpop.eup %19129  ;;  %17934 = vmatpush3.msra.mxu0 %v11558_v13  ;;  %17935 = vmatprep.mubr.msk.f32.mxu0 %vm19208_vm0, %v19207_v1 }
0x2fe4   : > { %v11556_v24 = vmul.f32 %v19130_v36, %v19122_v25  ;;  %v11724_v37 = vpop.permute.xlu1 %11723  ;;  %17943 = vmatprep.subr.mxu0 %v19207_v1  ;;  %v16220_v36 = vld [vmem:[%s21419_s17 + $0x1] ss:$0 sm:$0xff] }
0x2fe6   : > { %17936 = vmatmul.mubr.msk.f32.vlgmr.msra.gmra.mrb[150].mxu0 %vm1253_vm2, %v11556_v24 }
0x2fe7   : > { %17944 = vmatpush3.msra.mxu0 %v11724_v37  ;;  %17945 = vmatprep.mubr.msk.f32.mxu0 %vm19208_vm0, %v19207_v1 }
0x2fe8   : > { %17953 = vmatprep.subr.mxu0 %v19207_v1 }
0x3009   : > { %v11720_v50 = vpop.xlane.xlu0 %11719 }
0x300a   : > { %19131 = vrcp.f32 %v11720_v50 }
0x300b   : > { %19133 = vrcp.f32 %v11886_v28 }
0x300d   : > { %v11890_v40 = vpop.permute.xlu0 %11889 }
0x3014   : > { %v19132_v38 = vpop.eup %19131 }
0x3015   : > { %v11722_v39 = vmul.f32 %v19132_v38, %v19126_v7  ;;  %v19134_v8 = vpop.eup %19133 }
0x3016   : > { %v11888_v42 = vmul.f32 %v19134_v8, %v19124_v33  ;;  %v18864_v33 = vld [vmem:[%s21415_s8 + $0x18] sm:$0xff]  }
0x3017   : > { %17946 = vmatmul.mubr.msk.f32.vlgmr.msra.gmra.mrb[152].mxu0 %vm1253_vm2, %v11722_v39 }
0x3018   : > { %17954 = vmatpush3.msra.mxu0 %v11890_v40  ;;  %17955 = vmatprep.mubr.msk.f32.mxu0 %vm19208_vm0, %v19207_v1 }
0x3019   : > { %17966 = vmatprep.subr.bf16.mxu0 %v19207_v1 }
0x301b   : > { %17956 = vmatmul.mubr.msk.f32.vlgmr.msra.gmra.mrb[154].mxu0 %vm1253_vm2, %v11888_v42 }
0x301c   : > { %17970 = vmatprep.mubr.msk.bf16.mxu0 %vm19208_vm0, %v19207_v1  ;;  %17967 = vmatpush3.bf16.msra.mxu0 %v18863_v20 }
0x301d   : > { %17968 = vmatprep.subr.bf16.mxu0 %v19207_v1 }
0x3020   : > { %17969 = vmatpush3.bf16.msra.mxu0 %v18864_v33 }
0x3021   : > { %18182 = vmatprep.subr.bf16.mxu0 %v19225_v6 }
0x30b5   : > { %v11463_v48 = vpop.f32.mrb[148].mxu0 }
0x30b6   : > { %v17927_v45 = vpop.f32.mrb[149].mxu0 }
0x30b9   : > { %v11629_v55 = vpop.f32.mrb[150].mxu0 }
0x30ba   : > { %11966 = vrot.lane.b32.xlu1 %v11629_v55, %s21404_s0  ;;  %v17937_v52 = vpop.f32.mrb[151].mxu0 }
0x30ea   : > { %v11795_v46 = vpop.f32.mrb[152].mxu0 }
0x30eb   : > { %11970 = vrot.lane.b32.xlu0 %v11795_v46, %s21412_s26  ;;  %v17947_v56 = vpop.f32.mrb[153].mxu0 }
0x30ee   : > { %v11961_v58 = vpop.f32.mrb[154].mxu0 }
0x30ef   : > { %11974 = vrot.lane.b32.xlu1 %v11961_v58, %s21413_s3  ;;  %v17957_v19 = vpop.f32.mrb[155].mxu0 }
0x312c   : > { %v11967_v59 = vpop.permute.xlu1 %11966 }
0x312d   : > { %v11977_v44 = vsel %vm1253_vm2, %v11463_v48, %v11967_v59 }
0x315d   : > { %v11971_v2 = vpop.permute.xlu0 %11970 }
0x315e   : > { %v11978_v53 = vsel %vm2087_vm9, %v11977_v44, %v11971_v2 }
0x3161   : > { %v11975_v21 = vpop.permute.xlu1 %11974 }
0x3162   : > { %v11979_v51 = vsel %vm2090_vm10, %v11978_v53, %v11975_v21 }
0x3163   : > { %v11980_v57 = vpack.c.bf16 %v11979_v51, %v11979_v51 }
0x3165   : > { %17963 = vmatmul.mubr.msk.bf16.vlgmr.msra.gmra.mrb[156].mxu1 %vm1202_vm1, %v11980_v57 }
0x3166   : > { %17978 = vmatprep.mubr.msk.bf16.mxu1 %vm19208_vm0, %v19207_v1 }
0x3238   : > { %v12036_v3 = vpop.f32.mrb[156].mxu1 }
0x3239   : > { %v12037_v47 = vadd.f32 %v16213_v31, %v12036_v3  ;;  %v17964_v61 = vpop.f32.mrb[157].mxu1 }
0x323a   : > { %v12039_v60 = vpop.f32.mrb[158].mxu1 }
0x323b   : > { %v12042_v62 = vadd.f32 %v12037_v47, %v20794_v18  ;;  %v17965_v63 = vpop.f32.mrb[159].mxu1 }
0x323d   : > { %v12047_v25 = vsel %vm1202_vm1, %v12042_v62, 0.0 }
0x323e   : > { %12048 = vadd.xlane.f32.xlu0 %v12047_v25 }
0x3254   : > { %12150 = vrot.lane.b32.xlu0 %v18863_v20, %s21417_s13 }
0x3258   : > { %12156 = vrot.lane.b32.xlu0 %v16231_v43, %s21417_s13 }
0x32cb   : > { %v12049_v49 = vpop.xlane.xlu0 %12048 }
0x32cc   : > { %v12050_v29 = vmul.f32 0.03125, %v12049_v49 }
0x32ce   : > { %v12051_v30 = vsub.f32 %v12042_v62, %v12050_v29 }
0x32cf   : > { %v12151_v7 = vpop.permute.xlu0 %12150 }
0x32d0   : > { %v12052_v5 = vmul.f32 %v12051_v30, %v12051_v30  ;;  %17975 = vmatpush3.bf16.msra.mxu1 %v12151_v7 }
0x32d1   : > { %17976 = vmatprep.subr.bf16.mxu1 %v19207_v1 }
0x32d2   : > { %v12053_v18 = vsel %vm1202_vm1, %v12052_v5, 0.0 }
0x32d3   : > { %12054 = vadd.xlane.f32.xlu1 %v12053_v18  ;;  %v12157_v38 = vpop.permute.xlu0 %12156 }
0x32e4   : > { %12152 = vrot.lane.b32.xlu1 %v18864_v33, %s21417_s13 }
0x3360   : > { %v12055_v13 = vpop.xlane.xlu1 %12054 }
0x3361   : > { %v12056_v12 = vmul.f32 0.03125, %v12055_v13 }
0x3363   : > { %v12057_v54 = vadd.f32 1e-05, %v12056_v12 }
0x3364   : > { %v12153_v0 = vpop.permute.xlu1 %12152 }
0x3365   : > { %19135 = vrsqrt.f32 %v12057_v54  ;;  %17977 = vmatpush3.bf16.msra.mxu1 %v12153_v0 }
0x3366   : > { %18190 = vmatprep.subr.bf16.mxu1 %v19225_v6 }
0x3368   : > { %17979 = vmatmul.mubr.msk.bf16.vlgmr.msra.gmra.mrb[160].mxu1 %vm1202_vm1, %v20424_v4 }
0x3369   : > { %18000 = vmatprep.mubr.msk.f32.mxu1 %vm19208_vm0, %v19207_v1 }
0x336f   : > { %v19136_v34 = vpop.eup %19135 }
0x3370   : > { %v12059_v28 = vmul.f32 %v19136_v34, %v12051_v30 }
0x3372   : > { %v12066_v24 = vmul.f32 %v16219_v11, %v12059_v28 }
0x3374   : > { %v20904_v37 = vadd.f32 %v16220_v36, %v12066_v24 }
0x3376   : > { %v12088_v50 = vpack.c.bf16 %v20904_v37, %v20904_v37 }
0x3378   : > { %17971 = vmatmul.mubr.msk.bf16.vlgmr.msra.gmra.mrb[156].mxu0 %vm1202_vm1, %v12088_v50 }
0x3379   : > { %17986 = vmatprep.mubr.msk.f32.mxu0 %vm19208_vm0, %v19207_v1 }
0x343b   : > { %v12193_v4 = vpop.f32.mrb[160].mxu1 }
0x343c   : > { %v17980_v39 = vpop.f32.mrb[161].mxu1  ;;  %v12194_v40 = vadd.f32 %v12193_v4, %v12157_v38 }
0x343d   : > { %v12196_v8 = vpop.f32.mrb[162].mxu1 }
0x343e   : > { %v12197_v42 = vadd.f32 %v12196_v8, %v12157_v38  ;;  %v17981_v48 = vpop.f32.mrb[163].mxu1 }
0x3440   : > { %v20911_v45 = vpack.i.bf16 %v12197_v42, %v12194_v40  ;;  %v18183_v55 = vpack.c.bf16 %v12197_v42, %v12194_v40 }
0x3442   : > { %18425 = vrot.lane.b32.xlu1 %v20911_v45, %s21422_s21  ;;  %18185 = vmatpush3.bf16.xpose.msk.msra.mxu0 %vm19476_vm3, %v18183_v55 }
0x3443   : > { %18186 = vmatprep.subr.bf16.mxu0 %v19225_v6 }
0x3446   : > { %18430 = vrot.lane.b32.xlu1 %v20911_v45, %s21423_s19 }
0x344b   : > { %v12144_v52 = vpop.f32.mrb[156].mxu0 }
0x344c   : > { %v20920_v41 = vadd.f32 %v16231_v43, %v12144_v52  ;;  %v17972_v35 = vpop.f32.mrb[157].mxu0 }
0x344d   : > { %v12147_v46 = vpop.f32.mrb[158].mxu0 }
0x344e   : > { %12371 = vrot.lane.b32.xlu0 %v20920_v41, %s21422_s21  ;;  %v17973_v56 = vpop.f32.mrb[159].mxu0  ;;  %17987 = vmatmul.mubr.msk.f32.vlgmr.msra.gmra.mrb[160].mxu0 %vm1253_vm2, %v20920_v41 }
0x344f   : > { %17993 = vmatprep.mubr.msk.f32.mxu0 %vm19208_vm0, %v19207_v1 }
0x3452   : > { %12545 = vrot.lane.b32.xlu0 %v20920_v41, %s21423_s19 }
0x34b4   : > { %v18426_v58 = vpop.permute.xlu1 %18425 }
0x34b5   : > { %v18428_v19 = vunpack.i.h.bf16 %v18426_v58  ;;  %v18427_v59 = vunpack.i.l.bf16 %v18426_v58 }
0x34b7   : > { %v18191_v2 = vpack.c.bf16 %v18428_v19, %v18427_v59 }
0x34b8   : > { %v18431_v44 = vpop.permute.xlu1 %18430 }
0x34b9   : > { %18193 = vmatpush3.bf16.xpose.msk.msra.mxu1 %vm19476_vm3, %v18191_v2  ;;  %v18433_v53 = vunpack.i.h.bf16 %v18431_v44  ;;  %v18432_v21 = vunpack.i.l.bf16 %v18431_v44 }
0x34ba   : > { %18198 = vmatprep.subr.bf16.mxu1 %v19225_v6 }
0x34bb   : > { %v18199_v51 = vpack.c.bf16 %v18433_v53, %v18432_v21 }
0x34c0   : > { %v12372_v57 = vpop.permute.xlu0 %12371 }
0x34c1   : > { %18001 = vmatmul.mubr.msk.f32.vlgmr.msra.gmra.mrb[164].mxu1 %vm1253_vm2, %v12372_v57 }
0x34c2   : > { %18201 = vmatpush3.bf16.xpose.msk.msra.mxu1 %vm19476_vm3, %v18199_v51  ;;  %18014 = vmatprep.mubr.msk.f32.mxu1 %vm19208_vm0, %v19207_v1 }
0x34c3   : > { %18210 = vmatprep.subr.bf16.mxu1 %v19225_v6 }
0x34c4   : > { %v12546_v31 = vpop.permute.xlu0 %12545 }
0x34c9   : > { %18015 = vmatmul.mubr.msk.f32.vlgmr.msra.gmra.mrb[166].mxu1 %vm1253_vm2, %v12546_v31 }
0x34ca   : > { %18035 = vmatprep.mubr.msk.f32.mxu1 %vm19208_vm0, %v19207_v1 }
0x3521   : > { %v12275_v3 = vpop.f32.mrb[160].mxu0 }
0x3522   : > { %v12279_v47 = vmul.f32 0.35355338, %v12275_v3  ;;  %v17988_v61 = vpop.f32.mrb[161].mxu0 }
0x3524   : > { %v12280_v60 = vsel %vm1339_vm5, %v12279_v47, -inf }
0x3525   : > { %12281 = vmax.xlane.f32.xlu1 %v12280_v60 }
0x3594   : > { %v12449_v62 = vpop.f32.mrb[164].mxu1 }
0x3595   : > { %v12453_v63 = vmul.f32 0.35355338, %v12449_v62  ;;  %v18002_v25 = vpop.f32.mrb[165].mxu1 }
0x3597   : > { %v12454_v20 = vsel %vm1339_vm5, %v12453_v63, -inf }
0x3598   : > { %12455 = vmax.xlane.f32.xlu0 %v12454_v20 }
0x359c   : > { %v12623_v33 = vpop.f32.mrb[166].mxu1 }
0x359d   : > { %v12627_v49 = vmul.f32 0.35355338, %v12623_v33  ;;  %v18016_v29 = vpop.f32.mrb[167].mxu1 }
0x359f   : > { %v12628_v30 = vsel %vm1339_vm5, %v12627_v49, -inf }
0x35a0   : > { %12629 = vmax.xlane.f32.xlu0 %v12628_v30 }
0x35b2   : > { %v12282_v5 = vpop.xlane.xlu1 %12281 }
0x35b3   : > { %v12283_v18 = vsub.f32 %v12279_v47, %v12282_v5 }
0x35b5   : > { %v12284_v7 = vmul.f32 1.442695, %v12283_v18 }
0x35b7   : > { %19137 = vpow2.f32 %v12284_v7 }
0x35c1   : > { %v19138_v43 = vpop.eup %19137 }
0x35c2   : > { %v12286_v13 = vsel %vm1339_vm5, %v19138_v43, 0.0 }
0x35c3   : > { %12287 = vadd.xlane.f32.xlu1 %v12286_v13 }
0x35d4   : > { %18440 = vrot.lane.b32.xlu1 %v20911_v45, %s21424_s24  ;;  %s21441_s24 = sld [smem:[#allocation37_spill]] }
0x35d8   : > { %18445 = vrot.lane.b32.xlu1 %v20911_v45, %s21407_s11 }
0x3625   : > { %v12456_v12 = vpop.xlane.xlu0 %12455 }
0x3626   : > { %v12457_v54 = vsub.f32 %v12453_v63, %v12456_v12 }
0x3628   : > { %v12458_v0 = vmul.f32 1.442695, %v12457_v54 }
0x362a   : > { %19139 = vpow2.f32 %v12458_v0 }
0x362d   : > { %v12630_v34 = vpop.xlane.xlu0 %12629 }
0x362e   : > { %v12631_v11 = vsub.f32 %v12627_v49, %v12630_v34 }
0x3630   : > { %v12632_v28 = vmul.f32 1.442695, %v12631_v11 }
0x3632   : > { %19141 = vpow2.f32 %v12632_v28 }
0x3634   : > { %v19140_v36 = vpop.eup %19139 }
0x3635   : > { %v12460_v24 = vsel %vm1339_vm5, %v19140_v36, 0.0 }
0x3636   : > { %12461 = vadd.xlane.f32.xlu0 %v12460_v24 }
0x363c   : > { %v19142_v50 = vpop.eup %19141 }
0x363d   : > { %v12634_v38 = vsel %vm1339_vm5, %v19142_v50, 0.0 }
0x363e   : > { %12635 = vadd.xlane.f32.xlu1 %v12634_v38 }
0x364c   : > { %18435 = vrot.lane.b32.xlu0 %v20911_v45, %s21417_s13  ;;  %s21439_s13 = sld [smem:[#allocation32_spill]] }
0x364f   : > { %12719 = vrot.lane.b32.xlu1 %v20920_v41, %s21402_s7 }
0x3650   : > { %18450 = vrot.lane.b32.xlu0 %v20911_v45, %s21402_s7  ;;  %v12288_v4 = vpop.xlane.xlu1 %12287  ;;  %s21446_s7 = sld [smem:[#allocation39_spill]] }
0x3651   : > { %19143 = vrcp.f32 %v12288_v4 }
0x3654   : > { %v18441_v39 = vpop.permute.xlu1 %18440 }
0x3655   : > { %v18443_v35 = vunpack.i.h.bf16 %v18441_v39  ;;  %v18442_v46 = vunpack.i.l.bf16 %v18441_v39 }
0x3657   : > { %v18195_v59 = vpack.c.bf16 %v18443_v35, %v18442_v46 }
0x3658   : > { %v18446_v40 = vpop.permute.xlu1 %18445 }
0x3659   : > { %v18448_v2 = vunpack.i.h.bf16 %v18446_v40  ;;  %v18447_v44 = vunpack.i.l.bf16 %v18446_v40 }
0x365b   : > { %v19144_v52 = vpop.eup %19143  ;;  %v18203_v21 = vpack.c.bf16 %v18448_v2, %v18447_v44 }
0x365c   : > { %v12290_v41 = vmul.f32 %v19144_v52, %v19138_v43 }
0x36c3   : > { %v12462_v8 = vpop.xlane.xlu0 %12461 }
0x36c4   : > { %19145 = vrcp.f32 %v12462_v8 }
0x36c7   : > { %v18436_v42 = vpop.permute.xlu0 %18435 }
0x36c8   : > { %v18438_v48 = vunpack.i.h.bf16 %v18436_v42  ;;  %v18437_v55 = vunpack.i.l.bf16 %v18436_v42 }
0x36ca   : > { %v18187_v56 = vpack.c.bf16 %v18438_v48, %v18437_v55  ;;  %v16256_v55 = vld [vmem:[%s21426_s29 + $0x1] ss:$0 sm:$0xff] }
0x36cb   : > { %v12636_v58 = vpop.xlane.xlu1 %12635  ;;  %v18451_v51 = vpop.permute.xlu0 %18450 }
0x36cc   : > { %19147 = vrcp.f32 %v12636_v58  ;;  %18189 = vmatpush3.bf16.msk.msra.mxu0 %vm19513_vm8, %v18187_v56  ;;  %v18453_v3 = vunpack.i.h.bf16 %v18451_v51  ;;  %v18452_v47 = vunpack.i.l.bf16 %v18451_v51  ;;  %v16264_v51 = vld [vmem:[%s21427_s30 + $0x100] sm:$0xff] }
0x36cd   : > { %18194 = vmatprep.subr.bf16.mxu0 %v19225_v6 }
0x36ce   : > { %v19146_v19 = vpop.eup %19145  ;;  %v18207_v61 = vpack.c.bf16 %v18453_v3, %v18452_v47 }
0x36cf   : > { %17994 = vmatmul.mubr.msk.f32.vlgmr.msra.gmra.mrb[162].mxu0 %vm1339_vm5, %v12290_v41  ;;  %v12464_v53 = vmul.f32 %v19146_v19, %v19140_v36  ;;  %v12720_v60 = vpop.permute.xlu1 %12719  ;;  %v18866_v36 = vld [vmem:[%s21425_s25 + $0x18] sm:$0xff]  }
0x36d0   : > { %18197 = vmatpush3.bf16.msk.msra.mxu0 %vm19513_vm8, %v18195_v59  ;;  %18007 = vmatprep.mubr.msk.f32.mxu0 %vm19208_vm0, %v19207_v1 }
0x36d1   : > { %18202 = vmatprep.subr.bf16.mxu0 %v19225_v6 }
0x36d3   : > { %18008 = vmatmul.mubr.msk.f32.vlgmr.msra.gmra.mrb[164].mxu0 %vm1339_vm5, %v12464_v53 }
0x36d4   : > { %18205 = vmatpush3.bf16.msk.msra.mxu0 %vm19513_vm8, %v18203_v21  ;;  %18021 = vmatprep.mubr.msk.f32.mxu0 %vm19208_vm0, %v19207_v1 }
0x36d5   : > { %18206 = vmatprep.subr.bf16.mxu0 %v19225_v6 }
0x36d6   : > { %v19148_v57 = vpop.eup %19147 }
0x36d7   : > { %v12638_v31 = vmul.f32 %v19148_v57, %v19142_v50  ;;  %v16272_v57 = vld [vmem:[%s21427_s30 + $0x140] sm:$0xff] }
0x36d8   : > { %v16556_v3 = vcombine.high %v16264_v51, %v16272_v57  ;;  %v16555_v47 = vcombine.low %v16264_v51, %v16272_v57 }
0x36d9   : > { %18022 = vmatmul.mubr.msk.f32.vlgmr.msra.gmra.mrb[166].mxu0 %vm1339_vm5, %v12638_v31  ;;  %v16265_v31 = vld [vmem:[%s21427_s30 + $0x108] sm:$0xff] }
0x36da   : > { %18028 = vmatprep.mubr.msk.f32.mxu0 %vm19208_vm0, %v19207_v1 }
0x36dd   : > { %18209 = vmatpush3.bf16.xpose.msk.msra.mxu0 %vm19476_vm3, %v18207_v61 }
0x36de   : > { %13543 = vmatprep.subr.bf16.mxu0 %v16556_v3  ;;  %v16278_v3 = vld [vmem:[%s21427_s30 + $0x170] sm:$0xff] }
0x36e4   : > { %18029 = vmatmul.mubr.msk.f32.vlgmr.msra.gmra.mrb[168].mxu0 %vm1253_vm2, %v12720_v60 }
0x36e5   : > { %13575 = vmatprep.mubr.bf16.mxu0 %v19224_v32  ;;  %13544 = vmatpush1.bf16.msra.mxu0 %v16555_v47  ;;  %v16279_v47 = vld [vmem:[%s21427_s30 + $0x178] sm:$0xff] }
0x37a2   : > { %v12367_v62 = vpop.f32.mrb[162].mxu0 }
0x37a3   : > { %v17995_v6 = vpop.f32.mrb[163].mxu0 }
0x37a4   : > { %v16288_v6 = vld [vmem:[%s21427_s30 + $0x1c0] sm:$0xff] }
0x37a6   : > { %v12541_v63 = vpop.f32.mrb[164].mxu0 }
0x37a7   : > { %v18009_v25 = vpop.f32.mrb[165].mxu0 }
0x37ac   : > { %v12715_v20 = vpop.f32.mrb[166].mxu0 }
0x37ad   : > { %v18023_v33 = vpop.f32.mrb[167].mxu0 }
0x37b7   : > { %v12797_v49 = vpop.f32.mrb[168].mxu0 }
0x37b8   : > { %v12801_v29 = vmul.f32 0.35355338, %v12797_v49  ;;  %v18030_v30 = vpop.f32.mrb[169].mxu0 }
0x37b9   : > { %v16266_v30 = vld [vmem:[%s21427_s30 + $0x110] sm:$0xff] }
0x37ba   : > { %v12802_v5 = vsel %vm1339_vm5, %v12801_v29, -inf }
0x37bb   : > { %12803 = vmax.xlane.f32.xlu0 %v12802_v5  ;;  %v16274_v5 = vld [vmem:[%s21427_s30 + $0x150] sm:$0xff] }
0x37d1   : > { %18455 = vrot.lane.b32.xlu0 %v20911_v45, %s21403_s2  ;;  %s21445_s2 = sld [smem:[#allocation41_spill]] }
0x37d5   : > { %12898 = vrot.lane.b32.xlu0 %v12715_v20, %s21412_s26  ;;  %v16289_v20 = vld [vmem:[%s21427_s30 + $0x1c8] sm:$0xff]  ;;  %s21442_s26 = sld [smem:[#allocation35_spill]] }
0x37d7   : > { %s21447_s10 = sshll.u32 %s21445_s2, 3 }
0x3848   : > { %v12804_v14 = vpop.xlane.xlu0 %12803 }
0x3849   : > { %v12805_v18 = vsub.f32 %v12801_v29, %v12804_v14  ;;  %v16267_v14 = vld [vmem:[%s21427_s30 + $0x118] sm:$0xff] }
0x384b   : > { %v12806_v7 = vmul.f32 1.442695, %v12805_v18  ;;  %v16559_v18 = vcombine.low %v16266_v30, %v16274_v5 }
0x384c   : > { %v18456_v43 = vpop.permute.xlu0 %18455 }
0x384d   : > { %19149 = vpow2.f32 %v12806_v7  ;;  %v18458_v13 = vunpack.i.h.bf16 %v18456_v43  ;;  %v18457_v12 = vunpack.i.l.bf16 %v18456_v43  ;;  %v16560_v7 = vcombine.high %v16266_v30, %v16274_v5  ;;  %v16275_v43 = vld [vmem:[%s21427_s30 + $0x158] sm:$0xff] }
0x384f   : > { %v18211_v54 = vpack.c.bf16 %v18458_v13, %v18457_v12  ;;  %v16561_v13 = vcombine.low %v16267_v14, %v16275_v43  ;;  %v16562_v12 = vcombine.high %v16267_v14, %v16275_v43  ;;  %v18868_v43 = vld [vmem:[%s21432_s4 + $0x4c0] sm:$0xff]  }
0x3850   : > { %v12899_v39 = vpop.permute.xlu0 %12898 }
0x3851   : > { %18213 = vmatpush3.bf16.msk.msra.mxu1 %vm19513_vm8, %v18211_v54 }
0x3852   : > { %18038 = vmatprep.subr.bf16.mxu1 %v19207_v1 }
0x3857   : > { %v19150_v0 = vpop.eup %19149 }
0x3858   : > { %v12808_v45 = vsel %vm1339_vm5, %v19150_v0, 0.0 }
0x3859   : > { %12809 = vadd.xlane.f32.xlu1 %v12808_v45 }
0x386a   : > { %12894 = vrot.lane.b32.xlu1 %v12541_v63, %s21404_s0  ;;  %v16281_v63 = vld [vmem:[%s21427_s30 + $0x188] sm:$0xff]  ;;  %s1169_s0 = scalar_lea.vmem %s21446_s7, %s21447_s10 }
0x386b   : > { %v16573_v49 = vcombine.low %v16281_v63, %v16289_v20  ;;  %v16574_v29 = vcombine.high %v16281_v63, %v16289_v20  ;;  %v16286_v63 = vld [vmem:[%s21427_s30 + $0x1b0] sm:$0xff]  ;;  %v16287_v20 = vld [vmem:[%s21427_s30 + $0x1b8] sm:$0xff] }
0x38e6   : > { %v12810_v34 = vpop.xlane.xlu1 %12809 }
0x38e7   : > { %19151 = vrcp.f32 %v12810_v34 }
0x38ea   : > { %v12895_v38 = vpop.permute.xlu1 %12894 }
0x38eb   : > { %v12905_v4 = vsel %vm1253_vm2, %v12367_v62, %v12895_v38  ;;  %v16280_v62 = vld [vmem:[%s21427_s30 + $0x180] sm:$0xff]  ;;  %v16283_v38 = vld [vmem:[%s21427_s30 + $0x198] sm:$0xff] }
0x38ec   : > { %v12906_v8 = vsel %vm2087_vm9, %v12905_v4, %v12899_v39  ;;  %v16572_v25 = vcombine.high %v16280_v62, %v16288_v6  ;;  %v16571_v33 = vcombine.low %v16280_v62, %v16288_v6  ;;  %v16291_v4 = vld [vmem:[%s21427_s30 + $0x1d8] sm:$0xff] }
0x38ee   : > { %13545 = vmatprep.subr.bf16.mxu0 %v16572_v25  ;;  %v16294_v25 = vld [vmem:[%s21427_s30 + $0x1f0] sm:$0xff] }
0x38ef   : > { %13546 = vmatpush1.bf16.msra.mxu0 %v16571_v33  ;;  %v16295_v33 = vld [vmem:[%s21427_s30 + $0x1f8] sm:$0xff]  ;;  %v16584_v30 = vcombine.high %v16286_v63, %v16294_v25  ;;  %v16583_v14 = vcombine.low %v16286_v63, %v16294_v25 }
0x38f0   : > { %13625 = vmatprep.subr.bf16.mxu0 %v16560_v7  ;;  %v16586_v5 = vcombine.high %v16287_v20, %v16295_v33  ;;  %v18867_v7 = vld [vmem:[%s21432_s4 + $0x440] sm:$0xff]  }
0x38f1   : > { %v19152_v11 = vpop.eup %19151 }
0x38f2   : > { %v12812_v28 = vmul.f32 %v19152_v11, %v19150_v0  ;;  %v16262_v11 = vld [vmem:[%s21429_s12 + $0x1] ss:$0 sm:$0xff] }
0x38f4   : > { %18036 = vmatmul.mubr.msk.f32.vlgmr.msra.gmra.mrb[168].mxu1 %vm1339_vm5, %v12812_v28 }
0x38f5   : > { %18042 = vmatprep.mubr.msk.bf16.mxu1 %vm19208_vm0, %v19207_v1  ;;  %18039 = vmatpush3.bf16.msra.mxu1 %v18865_v16  ;;  %v16263_v16 = vld [vmem:[%s21430_s16 + $0x1] ss:$0 sm:$0xff] }
0x38f6   : > { %18040 = vmatprep.subr.bf16.mxu1 %v19207_v1 }
0x38f9   : > { %18041 = vmatpush3.bf16.msra.mxu1 %v18866_v36 }
0x39c7   : > { %v12889_v24 = vpop.f32.mrb[168].mxu1 }
0x39c8   : > { %12902 = vrot.lane.b32.xlu1 %v12889_v24, %s21413_s3  ;;  %v18037_v50 = vpop.f32.mrb[169].mxu1  ;;  %v16282_v24 = vld [vmem:[%s21427_s30 + $0x190] sm:$0xff]  ;;  %s21440_s3 = sld [smem:[#allocation34_spill]] }
0x39c9   : > { %v16290_v50 = vld [vmem:[%s21427_s30 + $0x1d0] sm:$0xff] }
0x3a3a   : > { %v12903_v40 = vpop.permute.xlu1 %12902 }
0x3a3b   : > { %v12907_v42 = vsel %vm2090_vm10, %v12906_v8, %v12903_v40  ;;  %v16576_v40 = vcombine.high %v16282_v24, %v16290_v50 }
0x3a3c   : > { %v12908_v48 = vpack.c.bf16 %v12907_v42, %v12907_v42  ;;  %v16578_v42 = vcombine.high %v16283_v38, %v16291_v4 }
0x3a3e   : > { %18043 = vmatmul.mubr.msk.bf16.vlgmr.msra.gmra.mrb[172].mxu1 %vm1202_vm1, %v12908_v48  ;;  %v16268_v48 = vld [vmem:[%s21427_s30 + $0x120] sm:$0xff] }
0x3a3f   : > { %13616 = vmatprep.mubr.bf16.mxu1 %v19224_v32 }
0x3b11   : > { %v12964_v52 = vpop.f32.mrb[172].mxu1 }
0x3b12   : > { %v12965_v35 = vadd.f32 %v16256_v55, %v12964_v52  ;;  %v18044_v46 = vpop.f32.mrb[173].mxu1  ;;  %v16276_v55 = vld [vmem:[%s21427_s30 + $0x160] sm:$0xff]  ;;  %v16269_v52 = vld [vmem:[%s21427_s30 + $0x128] sm:$0xff] }
0x3b13   : > { %v12967_v56 = vpop.f32.mrb[174].mxu1  ;;  %v16575_v46 = vcombine.low %v16282_v24, %v16290_v50  ;;  %v18880_v24 = vld [vmem:[%s21432_s4 + $0x4d8] sm:$0xff]  }
0x3b14   : > { %v12970_v58 = vadd.f32 %v12965_v35, %v20904_v37  ;;  %v18045_v41 = vpop.f32.mrb[175].mxu1  ;;  %v16273_v37 = vld [vmem:[%s21427_s30 + $0x148] sm:$0xff]  ;;  %v16577_v56 = vcombine.low %v16283_v38, %v16291_v4  ;;  %v18881_v50 = vld [vmem:[%s21432_s4 + $0x418] sm:$0xff]   ;;  %v18883_v4 = vld [vmem:[%s21432_s4 + $0x460] sm:$0xff]  }
0x3b15   : > { %v16557_v61 = vcombine.low %v16265_v31, %v16273_v37  ;;  %v16558_v60 = vcombine.high %v16265_v31, %v16273_v37  ;;  %v16277_v35 = vld [vmem:[%s21427_s30 + $0x168] sm:$0xff]  ;;  %v16270_v31 = vld [vmem:[%s21427_s30 + $0x130] sm:$0xff]  ;;  %v16271_v37 = vld [vmem:[%s21427_s30 + $0x138] sm:$0xff] }
0x3b16   : > { %v12975_v19 = vsel %vm1202_vm1, %v12970_v58, 0.0  ;;  %v16566_v41 = vcombine.high %v16269_v52, %v16277_v35  ;;  %v16568_v62 = vcombine.high %v16270_v31, %v16278_v3  ;;  %v16570_v6 = vcombine.high %v16271_v37, %v16279_v47  ;;  %v18882_v38 = vld [vmem:[%s21432_s4 + $0x498] sm:$0xff]  }
0x3b17   : > { %12976 = vadd.xlane.f32.xlu0 %v12975_v19  ;;  %13584 = vmatprep.subr.bf16.mxu1 %v16558_v60  ;;  %v16284_v19 = vld [vmem:[%s21427_s30 + $0x1a0] sm:$0xff] }
0x3b18   : > { %13585 = vmatpush1.bf16.msra.mxu1 %v16557_v61 }
0x3b19   : > { %13586 = vmatprep.subr.bf16.mxu1 %v16574_v29  ;;  %v16569_v29 = vcombine.low %v16271_v37, %v16279_v47 }
0x3b1c   : > { %13587 = vmatpush1.bf16.msra.mxu1 %v16573_v49  ;;  %v16567_v49 = vcombine.low %v16270_v31, %v16278_v3 }
0x3b1d   : > { %13666 = vmatprep.subr.bf16.mxu1 %v16562_v12  ;;  %v18870_v12 = vld [vmem:[%s21432_s4 + $0x480] sm:$0xff]  }
0x3ba4   : > { %v12977_v59 = vpop.xlane.xlu0 %12976 }
0x3ba5   : > { %v12978_v2 = vmul.f32 0.03125, %v12977_v59  ;;  %v16292_v59 = vld [vmem:[%s21427_s30 + $0x1e0] sm:$0xff] }
0x3ba6   : > { %v16580_v51 = vcombine.high %v16284_v19, %v16292_v59  ;;  %v16579_v61 = vcombine.low %v16284_v19, %v16292_v59  ;;  %v18895_v19 = vld [vmem:[%s21432_s4 + $0x478] sm:$0xff]  }
0x3ba7   : > { %v12979_v44 = vsub.f32 %v12970_v58, %v12978_v2  ;;  %v16564_v58 = vcombine.high %v16268_v48, %v16276_v55  ;;  %v16285_v2 = vld [vmem:[%s21427_s30 + $0x1a8] sm:$0xff]  ;;  %v18896_v59 = vld [vmem:[%s21432_s4 + $0x4f8] sm:$0xff]  }
0x3ba9   : > { %v12980_v53 = vmul.f32 %v12979_v44, %v12979_v44 }
0x3bab   : > { %v12981_v21 = vsel %vm1202_vm1, %v12980_v53, 0.0  ;;  %v16563_v53 = vcombine.low %v16268_v48, %v16276_v55  ;;  %v18887_v48 = vld [vmem:[%s21432_s4 + $0x468] sm:$0xff]  }
0x3bac   : > { %12982 = vadd.xlane.f32.xlu1 %v12981_v21  ;;  %v16565_v21 = vcombine.low %v16269_v52, %v16277_v35  ;;  %v18888_v55 = vld [vmem:[%s21432_s4 + $0x4e8] sm:$0xff]  }
0x3bad   : > { %v18889_v52 = vld [vmem:[%s21432_s4 + $0x428] sm:$0xff]  }
0x3bae   : > { %v18890_v35 = vld [vmem:[%s21432_s4 + $0x4a8] sm:$0xff]  }
0x3c39   : > { %v12983_v54 = vpop.xlane.xlu1 %12982 }
0x3c3a   : > { %v12984_v0 = vmul.f32 0.03125, %v12983_v54  ;;  %v18871_v54 = vld [vmem:[%s21432_s4 + $0x448] sm:$0xff]  }
0x3c3c   : > { %v12985_v45 = vadd.f32 1e-05, %v12984_v0  ;;  %v18872_v0 = vld [vmem:[%s21432_s4 + $0x4c8] sm:$0xff]  }
0x3c3e   : > { %19153 = vrsqrt.f32 %v12985_v45  ;;  %v18874_v45 = vld [vmem:[%s21432_s4 + $0x488] sm:$0xff]  }
0x3c48   : > { %v19154_v34 = vpop.eup %19153 }
0x3c49   : > { %v12987_v28 = vmul.f32 %v19154_v34, %v12979_v44  ;;  %v16293_v44 = vld [vmem:[%s21427_s30 + $0x1e8] sm:$0xff]  ;;  %v18875_v34 = vld [vmem:[%s21432_s4 + $0x450] sm:$0xff]  }
0x3c4a   : > { %v16582_v57 = vcombine.high %v16285_v2, %v16293_v44  ;;  %v16581_v60 = vcombine.low %v16285_v2, %v16293_v44  ;;  %v18897_v2 = vld [vmem:[%s21432_s4 + $0x438] sm:$0xff]  }
0x3c4b   : > { %v12994_v36 = vmul.f32 %v16262_v11, %v12987_v28  ;;  %v18876_v11 = vld [vmem:[%s21432_s4 + $0x4d0] sm:$0xff]   ;;  %v18898_v44 = vld [vmem:[%s21432_s4 + $0x4b8] sm:$0xff]  }
0x3c4c   : > { %v18877_v28 = vld [vmem:[%s21432_s4 + $0x410] sm:$0xff]  }
0x3c4d   : > { %v21023_v39 = vadd.f32 %v16263_v16, %v12994_v36  ;;  %v18878_v16 = vld [vmem:[%s21432_s4 + $0x490] sm:$0xff]   ;;  %v18879_v36 = vld [vmem:[%s21432_s4 + $0x458] sm:$0xff]  }
0x3c4f   : > { %v21027_v8 = vpack.c.bf16 %v21023_v39, %v21023_v39 }
0x3c51   : > { %16587 = vmatmul.mubr.msk.bf16.vlgmr.msra.gmra.mrb[172].mxu0 %vm1202_vm1, %v21027_v8  ;;  %16588 = vmatmul.mubr.msk.bf16.vlgmr.msra.gmra.mrb[176].mxu1 %vm1202_vm1, %v21027_v8 }
0x3c52   : > { %13626 = vmatpush1.bf16.msra.mxu0 %v16559_v18  ;;  %13667 = vmatpush1.bf16.msra.mxu1 %v16561_v13  ;;  %v16585_v18 = vcombine.low %v16287_v20, %v16295_v33  ;;  %v18869_v13 = vld [vmem:[%s21432_s4 + $0x400] sm:$0xff]  }
0x3c53   : > { %13627 = vmatprep.subr.bf16.mxu0 %v16576_v40  ;;  %13668 = vmatprep.subr.bf16.mxu1 %v16578_v42  ;;  %v18885_v40 = vld [vmem:[%s21432_s4 + $0x420] sm:$0xff]  }
0x3c54   : > { %13657 = vmatprep.mubr.bf16.mxu0 %v19224_v32  ;;  %13698 = vmatprep.mubr.bf16.mxu1 %v19224_v32  ;;  %v18886_v42 = vld [vmem:[%s21432_s4 + $0x4a0] sm:$0xff]  }
0x3c56   : > { %13628 = vmatpush1.bf16.msra.mxu0 %v16575_v46  ;;  %13669 = vmatpush1.bf16.msra.mxu1 %v16577_v56  ;;  %v18891_v46 = vld [vmem:[%s21432_s4 + $0x470] sm:$0xff]  }
0x3c57   : > { %13707 = vmatprep.subr.bf16.mxu0 %v16564_v58  ;;  %13748 = vmatprep.subr.bf16.mxu1 %v16566_v41  ;;  %v18892_v56 = vld [vmem:[%s21432_s4 + $0x4f0] sm:$0xff]  }
0x3c58   : > { %v18893_v58 = vld [vmem:[%s21432_s4 + $0x430] sm:$0xff]  }
0x3c59   : > { %16589 = vmatmul.mubr.msk.bf16.vlgmr.msra.gmra.mrb[176].mxu0 %vm1202_vm1, %v21027_v8  ;;  %16590 = vmatmul.mubr.msk.bf16.vlgmr.msra.gmra.mrb[180].mxu1 %vm1202_vm1, %v21027_v8  ;;  %v18894_v41 = vld [vmem:[%s21432_s4 + $0x4b0] sm:$0xff]  }
0x3c5a   : > { %13708 = vmatpush1.bf16.msra.mxu0 %v16563_v53  ;;  %13749 = vmatpush1.bf16.msra.mxu1 %v16565_v21  ;;  %v18899_v53 = vld [vmem:[%s21432_s4 + $0x540] sm:$0xff]  }
0x3c5b   : > { %13709 = vmatprep.subr.bf16.mxu0 %v16580_v51  ;;  %13750 = vmatprep.subr.bf16.mxu1 %v16582_v57  ;;  %v18900_v21 = vld [vmem:[%s21432_s4 + $0x5c0] sm:$0xff]   ;;  %v21102_v51 = vld [vmem:[%s21439_s13 + $0x10] sm:$0xff] }
0x3c5c   : > { %13739 = vmatprep.mubr.bf16.mxu0 %v19224_v32  ;;  %13780 = vmatprep.mubr.bf16.mxu1 %v19224_v32  ;;  %v13303_v57 = vrot.slane %v21102_v51, %v19695_v9  ;;  %v13311_v31 = vrot.slane %v21102_v51, %v19697_v10  ;;  %v13307_v3 = vrot.slane %v21102_v51, %v19700_v15 }
0x3c5d   : > { %v13315_v37 = vrot.slane %v21102_v51, %v19702_v17 }
0x3c5e   : > { %13710 = vmatpush1.bf16.msra.mxu0 %v16579_v61  ;;  %13751 = vmatpush1.bf16.msra.mxu1 %v16581_v60 }
0x3c5f   : > { %13789 = vmatprep.subr.bf16.mxu0 %v16568_v62  ;;  %13830 = vmatprep.subr.bf16.mxu1 %v16570_v6 }
0x3c61   : > { %16591 = vmatmul.mubr.msk.bf16.vlgmr.msra.gmra.mrb[180].mxu0 %vm1202_vm1, %v21027_v8  ;;  %16592 = vmatmul.mubr.msk.bf16.vlgmr.msra.gmra.mrb[184].mxu1 %vm1202_vm1, %v21027_v8 }
0x3c62   : > { %13790 = vmatpush1.bf16.msra.mxu0 %v16567_v49  ;;  %13831 = vmatpush1.bf16.msra.mxu1 %v16569_v29 }
0x3c63   : > { %13791 = vmatprep.subr.bf16.mxu0 %v16584_v30  ;;  %13832 = vmatprep.subr.bf16.mxu1 %v16586_v5 }
0x3c64   : > { %13821 = vmatprep.mubr.bf16.mxu0 %v19224_v32  ;;  %13862 = vmatprep.mubr.bf16.mxu1 %v19224_v32  ;;  %v18873_v32 = vld [vmem:[%s21432_s4 + $0x408] sm:$0xff]  }
0x3c66   : > { %13792 = vmatpush1.bf16.msra.mxu0 %v16583_v14  ;;  %13833 = vmatpush1.bf16.msra.mxu1 %v16585_v18 }
0x3c67   : > { %17451 = vmatprep.subr.bf16.mxu0 %v18867_v7  ;;  %17473 = vmatprep.subr.bf16.mxu1 %v18868_v43 }
0x3c69   : > { %16593 = vmatmul.mubr.msk.bf16.vlgmr.msra.gmra.mrb[184].mxu0 %vm1202_vm1, %v21027_v8  ;;  %16594 = vmatmul.mubr.msk.bf16.vlgmr.msra.gmra.mrb[188].mxu1 %vm1202_vm1, %v21027_v8  ;;  %v18884_v8 = vld [vmem:[%s21432_s4 + $0x4e0] sm:$0xff]  }
0x3c6a   : > { %17452 = vmatpush3.bf16.msra.mxu0 %v18869_v13  ;;  %17474 = vmatpush3.bf16.msra.mxu1 %v18870_v12  ;;  %v13323_v12 = vrot.slane %v21102_v51, %v19712_v26 }
0x3c6b   : > { %17453 = vmatprep.subr.bf16.mxu0 %v18871_v54  ;;  %17475 = vmatprep.subr.bf16.mxu1 %v18872_v0  ;;  %v13331_v54 = vrot.slane %v21102_v51, %v19714_v27  ;;  %v18901_v0 = vld [vmem:[%s21432_s4 + $0x500] sm:$0xff]  }
0x3c6e   : > { %17454 = vmatpush3.bf16.msra.mxu0 %v18873_v32  ;;  %17476 = vmatpush3.bf16.msra.mxu1 %v18874_v45  ;;  %v18902_v32 = vld [vmem:[%s21432_s4 + $0x580] sm:$0xff]  }
0x3c6f   : > { %17455 = vmatprep.subr.bf16.mxu0 %v18875_v34  ;;  %17477 = vmatprep.subr.bf16.mxu1 %v18876_v11  ;;  %v18903_v11 = vld [vmem:[%s21432_s4 + $0x548] sm:$0xff]  }
0x3c72   : > { %17456 = vmatpush3.bf16.msra.mxu0 %v18877_v28  ;;  %17478 = vmatpush3.bf16.msra.mxu1 %v18878_v16  ;;  %v18904_v28 = vld [vmem:[%s21432_s4 + $0x5c8] sm:$0xff]  }
0x3c73   : > { %17457 = vmatprep.subr.bf16.mxu0 %v18879_v36  ;;  %17479 = vmatprep.subr.bf16.mxu1 %v18880_v24 }
0x3c76   : > { %17458 = vmatpush3.bf16.msra.mxu0 %v18881_v50  ;;  %17480 = vmatpush3.bf16.msra.mxu1 %v18882_v38 }
0x3c77   : > { %17459 = vmatprep.subr.bf16.mxu0 %v18883_v4  ;;  %17481 = vmatprep.subr.bf16.mxu1 %v18884_v8 }
0x3c7a   : > { %17460 = vmatpush3.bf16.msra.mxu0 %v18885_v40  ;;  %17482 = vmatpush3.bf16.msra.mxu1 %v18886_v42  ;;  %v18905_v42 = vld [vmem:[%s21432_s4 + $0x508] sm:$0xff]  }
0x3c7b   : > { %17461 = vmatprep.subr.bf16.mxu0 %v18887_v48  ;;  %17483 = vmatprep.subr.bf16.mxu1 %v18888_v55  ;;  %v18906_v48 = vld [vmem:[%s21432_s4 + $0x588] sm:$0xff]  }
0x3c7e   : > { %17462 = vmatpush3.bf16.msra.mxu0 %v18889_v52  ;;  %17484 = vmatpush3.bf16.msra.mxu1 %v18890_v35  ;;  %v18907_v35 = vld [vmem:[%s21432_s4 + $0x550] sm:$0xff]  }
0x3c7f   : > { %17463 = vmatprep.subr.bf16.mxu0 %v18891_v46  ;;  %17485 = vmatprep.subr.bf16.mxu1 %v18892_v56  ;;  %v18908_v46 = vld [vmem:[%s21432_s4 + $0x5d0] sm:$0xff]  }
0x3c82   : > { %17464 = vmatpush3.bf16.msra.mxu0 %v18893_v58  ;;  %17486 = vmatpush3.bf16.msra.mxu1 %v18894_v41 }
0x3c83   : > { %17465 = vmatprep.subr.bf16.mxu0 %v18895_v19  ;;  %17487 = vmatprep.subr.bf16.mxu1 %v18896_v59  ;;  %v18909_v59 = vld [vmem:[%s21432_s4 + $0x510] sm:$0xff]  }
0x3c86   : > { %17466 = vmatpush3.bf16.msra.mxu0 %v18897_v2  ;;  %17488 = vmatpush3.bf16.msra.mxu1 %v18898_v44  ;;  %v18910_v2 = vld [vmem:[%s21432_s4 + $0x590] sm:$0xff]   ;;  %v18911_v44 = vld [vmem:[%s21432_s4 + $0x558] sm:$0xff]  }
0x3c87   : > { %17495 = vmatprep.subr.bf16.mxu0 %v18899_v53  ;;  %17517 = vmatprep.subr.bf16.mxu1 %v18900_v21  ;;  %v18912_v53 = vld [vmem:[%s21432_s4 + $0x5d8] sm:$0xff]  }
0x3d24   : > { %v13577_v47 = vpop.f32.mrb[172].mxu0  ;;  %v13618_v61 = vpop.f32.mrb[176].mxu1 }
0x3d25   : > { %v13578_v60 = vadd.f32 %v13577_v47, %v13303_v57  ;;  %v13619_v62 = vadd.f32 %v13618_v61, %v13311_v31  ;;  %v13579_v6 = vpop.f32.mrb[173].mxu0  ;;  %v13620_v63 = vpop.f32.mrb[177].mxu1  ;;  %v18913_v61 = vld [vmem:[%s21432_s4 + $0x518] sm:$0xff]  }
0x3d26   : > { %v13580_v25 = vadd.f32 %v13579_v6, %v13307_v3  ;;  %v13621_v20 = vadd.f32 %v13620_v63, %v13315_v37  ;;  %v13581_v33 = vpop.f32.mrb[174].mxu0  ;;  %v13622_v49 = vpop.f32.mrb[178].mxu1  ;;  %v18915_v63 = vld [vmem:[%s21432_s4 + $0x560] sm:$0xff]  }
0x3d27   : > { %v13871_v29 = vmax.f32 %v13578_v60, 0.0  ;;  %v13873_v30 = vmax.f32 %v13619_v62, 0.0  ;;  %v13582_v5 = vpop.f32.mrb[175].mxu0  ;;  %v13623_v14 = vpop.f32.mrb[179].mxu1  ;;  %v18914_v60 = vld [vmem:[%s21432_s4 + $0x598] sm:$0xff]   ;;  %v18917_v49 = vld [vmem:[%s21432_s4 + $0x520] sm:$0xff]  }
0x3d28   : > { %v13872_v18 = vmax.f32 %v13580_v25, 0.0  ;;  %v13874_v7 = vmax.f32 %v13621_v20, 0.0  ;;  %v18916_v25 = vld [vmem:[%s21432_s4 + $0x5e0] sm:$0xff]   ;;  %v21141_v20 = vld [vmem:[%s21439_s13 + $0x18] sm:$0xff]  ;;  %v18920_v5 = vld [vmem:[%s21432_s4 + $0x5e8] sm:$0xff]  }
0x3d29   : > { %v13887_v45 = vpack.c.bf16 %v13871_v29, %v13871_v29  ;;  %v13889_v34 = vpack.c.bf16 %v13873_v30, %v13873_v30  ;;  %v13359_v33 = vrot.slane %v21141_v20, %v19710_v23  ;;  %v18918_v29 = vld [vmem:[%s21432_s4 + $0x5a0] sm:$0xff]   ;;  %v18919_v30 = vld [vmem:[%s21432_s4 + $0x568] sm:$0xff]  }
0x3d2a   : > { %v13888_v43 = vpack.c.bf16 %v13872_v18, %v13872_v18  ;;  %v13890_v13 = vpack.c.bf16 %v13874_v7, %v13874_v7 }
0x3d2c   : > { %v21120_v16 = vpop.f32.mrb[176].mxu0  ;;  %v21122_v36 = vpop.f32.mrb[180].mxu1  ;;  %14709 = vmatprep.mubr.bf16.mxu0 %v13888_v43  ;;  %14749 = vmatprep.mubr.bf16.mxu1 %v13890_v13 }
0x3d2d   : > { %v13661_v24 = vpop.f32.mrb[177].mxu0  ;;  %v13702_v50 = vpop.f32.mrb[181].mxu1  ;;  %14710 = vmatmul.mubr.bf16.vlgmr.msra.gmra.mrb[188].mxu0 %v13887_v45  ;;  %14750 = vmatmul.mubr.bf16.vlgmr.msra.gmra.mrb[192].mxu1 %v13889_v34  ;;  %v13319_v45 = vrot.slane %v21102_v51, %v19708_v22  ;;  %v13327_v34 = vrot.slane %v21102_v51, %v19710_v23  ;;  %v18926_v23 = vld [vmem:[%s21432_s4 + $0x5b0] sm:$0xff]  }
0x3d2e   : > { %v13662_v38 = vadd.f32 %v13661_v24, %v13323_v12  ;;  %v13703_v4 = vadd.f32 %v13702_v50, %v13331_v54  ;;  %17496 = vmatpush3.bf16.msra.mxu0 %v18901_v0  ;;  %17518 = vmatpush3.bf16.msra.mxu1 %v18902_v32  ;;  %v13663_v8 = vpop.f32.mrb[178].mxu0  ;;  %v13704_v40 = vpop.f32.mrb[182].mxu1  ;;  %v18921_v0 = vld [vmem:[%s21432_s4 + $0x528] sm:$0xff]   ;;  %v18923_v24 = vld [vmem:[%s21432_s4 + $0x570] sm:$0xff]  }
0x3d2f   : > { %v13664_v55 = vpop.f32.mrb[179].mxu0  ;;  %v13705_v52 = vpop.f32.mrb[183].mxu1  ;;  %17497 = vmatprep.subr.bf16.mxu0 %v18903_v11  ;;  %17519 = vmatprep.subr.bf16.mxu1 %v18904_v28  ;;  %v18922_v32 = vld [vmem:[%s21432_s4 + $0x5a8] sm:$0xff]   ;;  %v18924_v50 = vld [vmem:[%s21432_s4 + $0x5f0] sm:$0xff]   ;;  %v13660_v51 = vadd.f32 %v21120_v16, %v13319_v45  ;;  %v13701_v40 = vadd.f32 %v21122_v36, %v13327_v34  ;;  %v18931_v16 = vld [vmem:[%s21432_s4 + $0x640] sm:$0xff]  }
0x3d30   : > { %v13876_v56 = vmax.f32 %v13662_v38, 0.0  ;;  %v13878_v58 = vmax.f32 %v13703_v4, 0.0  ;;  %v13339_v38 = vrot.slane %v21141_v20, %v19700_v15  ;;  %v13347_v4 = vrot.slane %v21141_v20, %v19702_v17  ;;  %v18925_v8 = vld [vmem:[%s21432_s4 + $0x530] sm:$0xff]   ;;  %v18929_v17 = vld [vmem:[%s21432_s4 + $0x538] sm:$0xff]   ;;  %v18932_v36 = vld [vmem:[%s21432_s4 + $0x6c0] sm:$0xff]  }
0x3d31   : > { %v18930_v52 = vld [vmem:[%s21432_s4 + $0x5b8] sm:$0xff]   ;;  %v18954_v45 = vld [vmem:[%s21432_s4 + $0x6a8] sm:$0xff]   ;;  %v18955_v34 = vld [vmem:[%s21432_s4 + $0x670] sm:$0xff]  }
0x3d32   : > { %v13892_v41 = vpack.c.bf16 %v13876_v56, %v13876_v56  ;;  %v13894_v19 = vpack.c.bf16 %v13878_v58, %v13878_v58  ;;  %17498 = vmatpush3.bf16.msra.mxu0 %v18905_v42  ;;  %17520 = vmatpush3.bf16.msra.mxu1 %v18906_v48  ;;  %v18927_v42 = vld [vmem:[%s21432_s4 + $0x578] sm:$0xff]  }
0x3d33   : > { %17499 = vmatprep.subr.bf16.mxu0 %v18907_v35  ;;  %17521 = vmatprep.subr.bf16.mxu1 %v18908_v46  ;;  %v18928_v48 = vld [vmem:[%s21432_s4 + $0x5f8] sm:$0xff]   ;;  %v13875_v35 = vmax.f32 %v13660_v51, 0.0  ;;  %v13877_v46 = vmax.f32 %v13701_v40, 0.0 }
0x3d34   : > { %v21132_v21 = vpop.f32.mrb[180].mxu0  ;;  %v21134_v57 = vpop.f32.mrb[184].mxu1  ;;  %14789 = vmatprep.mubr.bf16.mxu0 %v13892_v41  ;;  %14829 = vmatprep.mubr.bf16.mxu1 %v13894_v19  ;;  %v18933_v41 = vld [vmem:[%s21432_s4 + $0x600] sm:$0xff]   ;;  %v18961_v51 = vld [vmem:[%s21432_s4 + $0x638] sm:$0xff]  }
0x3d35   : > { %v13743_v31 = vpop.f32.mrb[181].mxu0  ;;  %v13784_v3 = vpop.f32.mrb[185].mxu1  ;;  %v13891_v19 = vpack.c.bf16 %v13875_v35, %v13875_v35  ;;  %v18967_v35 = vld [vmem:[%s21432_s4 + $0x748] sm:$0xff]  }
0x3d36   : > { %17500 = vmatpush3.bf16.msra.mxu0 %v18909_v59  ;;  %17522 = vmatpush3.bf16.msra.mxu1 %v18910_v2  ;;  %v13745_v37 = vpop.f32.mrb[182].mxu0  ;;  %v13786_v47 = vpop.f32.mrb[186].mxu1  ;;  %v13744_v15 = vadd.f32 %v13743_v31, %v13339_v38  ;;  %v13785_v55 = vadd.f32 %v13784_v3, %v13347_v4  ;;  %v13893_v59 = vpack.c.bf16 %v13877_v46, %v13877_v46  ;;  %v18934_v2 = vld [vmem:[%s21432_s4 + $0x680] sm:$0xff]   ;;  %v18936_v31 = vld [vmem:[%s21432_s4 + $0x6c8] sm:$0xff]   ;;  %v18958_v4 = vld [vmem:[%s21432_s4 + $0x6b0] sm:$0xff]  }
0x3d37   : > { %v13746_v62 = vpop.f32.mrb[183].mxu0  ;;  %v13787_v6 = vpop.f32.mrb[187].mxu1  ;;  %17501 = vmatprep.subr.bf16.mxu0 %v18911_v44  ;;  %17523 = vmatprep.subr.bf16.mxu1 %v18912_v53  ;;  %v18935_v53 = vld [vmem:[%s21432_s4 + $0x648] sm:$0xff]  }
0x3d38   : > { %v13880_v56 = vmax.f32 %v13744_v15, 0.0  ;;  %v13882_v58 = vmax.f32 %v13785_v55, 0.0  ;;  %v18937_v37 = vld [vmem:[%s21432_s4 + $0x608] sm:$0xff]   ;;  %v18941_v62 = vld [vmem:[%s21432_s4 + $0x610] sm:$0xff]  }
0x3d39   : > { %v18938_v47 = vld [vmem:[%s21432_s4 + $0x688] sm:$0xff]   ;;  %v18942_v6 = vld [vmem:[%s21432_s4 + $0x690] sm:$0xff]  }
0x3d3a   : > { %17502 = vmatpush3.bf16.msra.mxu0 %v18913_v61  ;;  %17524 = vmatpush3.bf16.msra.mxu1 %v18914_v60  ;;  %v13896_v44 = vpack.c.bf16 %v13880_v56, %v13880_v56  ;;  %v13898_v3 = vpack.c.bf16 %v13882_v58, %v13882_v58  ;;  %v18939_v61 = vld [vmem:[%s21432_s4 + $0x650] sm:$0xff]   ;;  %v18969_v56 = vld [vmem:[%s21432_s4 + $0x708] sm:$0xff]  }
0x3d3b   : > { %17503 = vmatprep.subr.bf16.mxu0 %v18915_v63  ;;  %17525 = vmatprep.subr.bf16.mxu1 %v18916_v25  ;;  %v18940_v60 = vld [vmem:[%s21432_s4 + $0x6d0] sm:$0xff]   ;;  %v18943_v63 = vld [vmem:[%s21432_s4 + $0x658] sm:$0xff]   ;;  %v18970_v58 = vld [vmem:[%s21432_s4 + $0x788] sm:$0xff]  }
0x3d3c   : > { %v21149_v14 = vpop.f32.mrb[184].mxu0  ;;  %v13864_v18 = vpop.f32.mrb[188].mxu1  ;;  %v18944_v25 = vld [vmem:[%s21432_s4 + $0x6d8] sm:$0xff]  }
0x3d3d   : > { %v21151_v7 = vadd.f32 %v13864_v18, %v13359_v33  ;;  %v21153_v43 = vpop.f32.mrb[185].mxu0  ;;  %v21155_v13 = vpop.f32.mrb[189].mxu1  ;;  %v18945_v33 = vld [vmem:[%s21432_s4 + $0x618] sm:$0xff]   ;;  %v18950_v18 = vld [vmem:[%s21432_s4 + $0x6a0] sm:$0xff]  }
0x3d3e   : > { %17504 = vmatpush3.bf16.msra.mxu0 %v18917_v49  ;;  %17526 = vmatpush3.bf16.msra.mxu1 %v18918_v29  ;;  %v13827_v12 = vpop.f32.mrb[186].mxu0  ;;  %v13868_v54 = vpop.f32.mrb[190].mxu1  ;;  %v18946_v49 = vld [vmem:[%s21432_s4 + $0x698] sm:$0xff]   ;;  %v18947_v29 = vld [vmem:[%s21432_s4 + $0x660] sm:$0xff]  }
0x3d3f   : > { %v13828_v11 = vpop.f32.mrb[187].mxu0  ;;  %v13869_v28 = vpop.f32.mrb[191].mxu1  ;;  %17505 = vmatprep.subr.bf16.mxu0 %v18919_v30  ;;  %17527 = vmatprep.subr.bf16.mxu1 %v18920_v5  ;;  %v18948_v30 = vld [vmem:[%s21432_s4 + $0x6e0] sm:$0xff]   ;;  %v18951_v12 = vld [vmem:[%s21432_s4 + $0x668] sm:$0xff]  }
0x3d40   : > { %v18949_v5 = vld [vmem:[%s21432_s4 + $0x620] sm:$0xff]   ;;  %v18952_v54 = vld [vmem:[%s21432_s4 + $0x6e8] sm:$0xff]   ;;  %v13343_v11 = vrot.slane %v21141_v20, %v19697_v10  ;;  %v18956_v28 = vld [vmem:[%s21432_s4 + $0x6f0] sm:$0xff]  }
0x3d41   : > { %v18959_v10 = vld [vmem:[%s21432_s4 + $0x678] sm:$0xff]  }
0x3d42   : > { %17506 = vmatpush3.bf16.msra.mxu0 %v18921_v0  ;;  %17528 = vmatpush3.bf16.msra.mxu1 %v18922_v32  ;;  %v18953_v0 = vld [vmem:[%s21432_s4 + $0x628] sm:$0xff]   ;;  %v13335_v32 = vrot.slane %v21141_v20, %v19695_v9  ;;  %v18957_v9 = vld [vmem:[%s21432_s4 + $0x630] sm:$0xff]  }
0x3d43   : > { %17507 = vmatprep.subr.bf16.mxu0 %v18923_v24  ;;  %17529 = vmatprep.subr.bf16.mxu1 %v18924_v50  ;;  %v13355_v24 = vrot.slane %v21141_v20, %v19712_v26  ;;  %v13363_v50 = vrot.slane %v21141_v20, %v19714_v27 }
0x3d44   : > { %v13742_v38 = vadd.f32 %v21132_v21, %v13335_v32  ;;  %v18962_v21 = vld [vmem:[%s21432_s4 + $0x6b8] sm:$0xff]   ;;  %v13885_v32 = vmax.f32 %v21151_v7, 0.0 }
0x3d45   : > { %v13826_v26 = vadd.f32 %v21153_v43, %v13355_v24  ;;  %v13867_v27 = vadd.f32 %v21155_v13, %v13363_v50  ;;  %v18965_v43 = vld [vmem:[%s21432_s4 + $0x700] sm:$0xff]  }
0x3d46   : > { %17508 = vmatpush3.bf16.msra.mxu0 %v18925_v8  ;;  %17530 = vmatpush3.bf16.msra.mxu1 %v18926_v23  ;;  %v13783_v8 = vadd.f32 %v21134_v57, %v13343_v11  ;;  %v18960_v23 = vld [vmem:[%s21432_s4 + $0x6f8] sm:$0xff]   ;;  %v13879_v40 = vmax.f32 %v13742_v38, 0.0  ;;  %v18964_v57 = vld [vmem:[%s21432_s4 + $0x7c0] sm:$0xff]  }
0x3d47   : > { %17509 = vmatprep.subr.bf16.mxu0 %v18927_v42  ;;  %17531 = vmatprep.subr.bf16.mxu1 %v18928_v48  ;;  %v18963_v42 = vld [vmem:[%s21432_s4 + $0x740] sm:$0xff]   ;;  %v13884_v15 = vmax.f32 %v13826_v26, 0.0  ;;  %v13886_v55 = vmax.f32 %v13867_v27, 0.0 }
0x3d48   : > { %v13881_v48 = vmax.f32 %v13783_v8, 0.0  ;;  %v18966_v13 = vld [vmem:[%s21432_s4 + $0x780] sm:$0xff]  }
0x3d49   : > { %v13900_v46 = vpack.c.bf16 %v13884_v15, %v13884_v15 }
0x3d4a   : > { %17510 = vmatpush3.bf16.msra.mxu0 %v18929_v17  ;;  %17532 = vmatpush3.bf16.msra.mxu1 %v18930_v52  ;;  %v13895_v17 = vpack.c.bf16 %v13879_v40, %v13879_v40  ;;  %v13897_v52 = vpack.c.bf16 %v13881_v48, %v13881_v48 }
0x3d4b   : > { %17539 = vmatprep.subr.bf16.mxu0 %v18931_v16  ;;  %17561 = vmatprep.subr.bf16.mxu1 %v18932_v36  ;;  %v18968_v16 = vld [vmem:[%s21432_s4 + $0x7c8] sm:$0xff]   ;;  %v13902_v36 = vpack.c.bf16 %v13886_v55, %v13886_v55 }
0x3d4d   : > { %14790 = vmatmul.mubr.bf16.vlgmr.msra.gmra.mrb[192].mxu0 %v13891_v19  ;;  %14830 = vmatmul.mubr.bf16.vlgmr.msra.gmra.mrb[196].mxu1 %v13893_v59  ;;  %v18972_v19 = vld [vmem:[%s21432_s4 + $0x7d0] sm:$0xff]  }
0x3d4e   : > { %17540 = vmatpush3.bf16.msra.mxu0 %v18933_v41  ;;  %14869 = vmatprep.mubr.bf16.mxu0 %v13896_v44  ;;  %v18971_v41 = vld [vmem:[%s21432_s4 + $0x750] sm:$0xff]   ;;  %v18975_v44 = vld [vmem:[%s21432_s4 + $0x758] sm:$0xff]  }
0x3d4f   : > { %17562 = vmatpush3.bf16.msra.mxu1 %v18934_v2  ;;  %14909 = vmatprep.mubr.bf16.mxu1 %v13898_v3  ;;  %v18973_v59 = vld [vmem:[%s21432_s4 + $0x710] sm:$0xff]   ;;  %v18978_v3 = vld [vmem:[%s21432_s4 + $0x798] sm:$0xff]  }
0x3d50   : > { %17541 = vmatprep.subr.bf16.mxu0 %v18935_v53  ;;  %17563 = vmatprep.subr.bf16.mxu1 %v18936_v31  ;;  %v18974_v2 = vld [vmem:[%s21432_s4 + $0x790] sm:$0xff]   ;;  %v18976_v53 = vld [vmem:[%s21432_s4 + $0x7d8] sm:$0xff]  }
0x3d51   : > { %v18977_v31 = vld [vmem:[%s21432_s4 + $0x718] sm:$0xff]  }
0x3d52   : > { %17542 = vmatpush3.bf16.msra.mxu0 %v18937_v37  ;;  %v18979_v37 = vld [vmem:[%s21432_s4 + $0x760] sm:$0xff]  }
0x3d53   : > { %17564 = vmatpush3.bf16.msra.mxu1 %v18938_v47  ;;  %17543 = vmatprep.subr.bf16.mxu0 %v18939_v61  ;;  %v18980_v47 = vld [vmem:[%s21432_s4 + $0x7e0] sm:$0xff]  }
0x3d54   : > { %17565 = vmatprep.subr.bf16.mxu1 %v18940_v60  ;;  %v18981_v61 = vld [vmem:[%s21432_s4 + $0x720] sm:$0xff]  }
0x3d55   : > { %v18982_v60 = vld [vmem:[%s21432_s4 + $0x7a0] sm:$0xff]  }
0x3d56   : > { %17544 = vmatpush3.bf16.msra.mxu0 %v18941_v62  ;;  %v18983_v62 = vld [vmem:[%s21432_s4 + $0x768] sm:$0xff]  }
0x3d57   : > { %17566 = vmatpush3.bf16.msra.mxu1 %v18942_v6  ;;  %17545 = vmatprep.subr.bf16.mxu0 %v18943_v63  ;;  %v18984_v6 = vld [vmem:[%s21432_s4 + $0x7e8] sm:$0xff]  }
0x3d58   : > { %17567 = vmatprep.subr.bf16.mxu1 %v18944_v25  ;;  %v18985_v63 = vld [vmem:[%s21432_s4 + $0x728] sm:$0xff]   ;;  %v13351_v25 = vrot.slane %v21141_v20, %v19708_v22  ;;  %v18993_v22 = vld [vmem:[%s21432_s4 + $0x738] sm:$0xff]  }
0x3d5a   : > { %17546 = vmatpush3.bf16.msra.mxu0 %v18945_v33  ;;  %v18986_v33 = vld [vmem:[%s21432_s4 + $0x7a8] sm:$0xff]  }
0x3d5b   : > { %17568 = vmatpush3.bf16.msra.mxu1 %v18946_v49  ;;  %17547 = vmatprep.subr.bf16.mxu0 %v18947_v29  ;;  %v18987_v49 = vld [vmem:[%s21432_s4 + $0x770] sm:$0xff]  }
0x3d5c   : > { %17569 = vmatprep.subr.bf16.mxu1 %v18948_v30  ;;  %v18988_v29 = vld [vmem:[%s21432_s4 + $0x7f0] sm:$0xff]  }
0x3d5d   : > { %v18989_v30 = vld [vmem:[%s21432_s4 + $0x730] sm:$0xff]  }
0x3d5e   : > { %17548 = vmatpush3.bf16.msra.mxu0 %v18949_v5  ;;  %v13824_v5 = vadd.f32 %v21149_v14, %v13351_v25  ;;  %v13901_v14 = vpack.c.bf16 %v13885_v32, %v13885_v32 }
0x3d5f   : > { %17570 = vmatpush3.bf16.msra.mxu1 %v18950_v18  ;;  %17549 = vmatprep.subr.bf16.mxu0 %v18951_v12  ;;  %v18990_v18 = vld [vmem:[%s21432_s4 + $0x7b0] sm:$0xff]   ;;  %v18991_v12 = vld [vmem:[%s21432_s4 + $0x778] sm:$0xff]  }
0x3d60   : > { %17571 = vmatprep.subr.bf16.mxu1 %v18952_v54  ;;  %v18992_v54 = vld [vmem:[%s21432_s4 + $0x7f8] sm:$0xff]   ;;  %v13883_v20 = vmax.f32 %v13824_v5, 0.0 }
0x3d62   : > { %17550 = vmatpush3.bf16.msra.mxu0 %v18953_v0  ;;  %v18994_v0 = vld [vmem:[%s21432_s4 + $0x7b8] sm:$0xff]  }
0x3d63   : > { %17572 = vmatpush3.bf16.msra.mxu1 %v18954_v45  ;;  %17551 = vmatprep.subr.bf16.mxu0 %v18955_v34  ;;  %v13899_v45 = vpack.c.bf16 %v13883_v20, %v13883_v20 }
0x3d64   : > { %17573 = vmatprep.subr.bf16.mxu1 %v18956_v28  ;;  %v16595_v28 = vld [vmem:[%s21440_s3 + $0x1] ss:$0 sm:$0xff] }
0x3d66   : > { %17552 = vmatpush3.bf16.msra.mxu0 %v18957_v9 }
0x3d67   : > { %17574 = vmatpush3.bf16.msra.mxu1 %v18958_v4  ;;  %17553 = vmatprep.subr.bf16.mxu0 %v18959_v10 }
0x3d68   : > { %17575 = vmatprep.subr.bf16.mxu1 %v18960_v23 }
0x3d6a   : > { %17554 = vmatpush3.bf16.msra.mxu0 %v18961_v51 }
0x3d6b   : > { %17576 = vmatpush3.bf16.msra.mxu1 %v18962_v21  ;;  %17583 = vmatprep.subr.bf16.mxu0 %v18963_v42 }
0x3d6c   : > { %17605 = vmatprep.subr.bf16.mxu1 %v18964_v57 }
0x3d6d   : > { %14870 = vmatmul.mubr.bf16.vlgmr.msra.gmra.mrb[196].mxu0 %v13895_v17 }
0x3d6e   : > { %14910 = vmatmul.mubr.bf16.vlgmr.msra.gmra.mrb[200].mxu1 %v13897_v52  ;;  %17584 = vmatpush3.bf16.msra.mxu0 %v18965_v43 }
0x3d6f   : > { %14949 = vmatprep.mubr.bf16.mxu0 %v13900_v46  ;;  %17606 = vmatpush3.bf16.msra.mxu1 %v18966_v13 }
0x3d70   : > { %14989 = vmatprep.mubr.bf16.mxu1 %v13902_v36  ;;  %17585 = vmatprep.subr.bf16.mxu0 %v18967_v35 }
0x3d71   : > { %17607 = vmatprep.subr.bf16.mxu1 %v18968_v16 }
0x3d72   : > { %17586 = vmatpush3.bf16.msra.mxu0 %v18969_v56 }
0x3d73   : > { %17608 = vmatpush3.bf16.msra.mxu1 %v18970_v58  ;;  %17587 = vmatprep.subr.bf16.mxu0 %v18971_v41 }
0x3d74   : > { %17609 = vmatprep.subr.bf16.mxu1 %v18972_v19 }
0x3d76   : > { %17588 = vmatpush3.bf16.msra.mxu0 %v18973_v59 }
0x3d77   : > { %17610 = vmatpush3.bf16.msra.mxu1 %v18974_v2  ;;  %17589 = vmatprep.subr.bf16.mxu0 %v18975_v44 }
0x3d78   : > { %17611 = vmatprep.subr.bf16.mxu1 %v18976_v53 }
0x3d7a   : > { %17590 = vmatpush3.bf16.msra.mxu0 %v18977_v31 }
0x3d7b   : > { %17612 = vmatpush3.bf16.msra.mxu1 %v18978_v3  ;;  %17591 = vmatprep.subr.bf16.mxu0 %v18979_v37 }
0x3d7c   : > { %17613 = vmatprep.subr.bf16.mxu1 %v18980_v47 }
0x3d7e   : > { %17592 = vmatpush3.bf16.msra.mxu0 %v18981_v61 }
0x3d7f   : > { %17614 = vmatpush3.bf16.msra.mxu1 %v18982_v60  ;;  %17593 = vmatprep.subr.bf16.mxu0 %v18983_v62 }
0x3d80   : > { %17615 = vmatprep.subr.bf16.mxu1 %v18984_v6 }
0x3d82   : > { %17594 = vmatpush3.bf16.msra.mxu0 %v18985_v63 }
0x3d83   : > { %17616 = vmatpush3.bf16.msra.mxu1 %v18986_v33  ;;  %17595 = vmatprep.subr.bf16.mxu0 %v18987_v49 }
0x3d84   : > { %17617 = vmatprep.subr.bf16.mxu1 %v18988_v29 }
0x3d86   : > { %17596 = vmatpush3.bf16.msra.mxu0 %v18989_v30 }
0x3d87   : > { %17618 = vmatpush3.bf16.msra.mxu1 %v18990_v18  ;;  %17597 = vmatprep.subr.bf16.mxu0 %v18991_v12 }
0x3d88   : > { %17619 = vmatprep.subr.bf16.mxu1 %v18992_v54 }
0x3d8a   : > { %17598 = vmatpush3.bf16.msra.mxu0 %v18993_v22 }
0x3d8b   : > { %17620 = vmatpush3.bf16.msra.mxu1 %v18994_v0  ;;  %18046 = vmatprep.subr.bf16.mxu0 %v19207_v1 }
0x3d8d   : > { %14950 = vmatmul.mubr.bf16.vlgmr.msra.gmra.mrb[200].mxu0 %v13899_v45  ;;  %v16726_v45 = vld [vmem:[%s21437_s9 + $0x1] ss:$0 sm:$0xff] }
0x3d8e   : > { %14990 = vmatmul.mubr.bf16.vlgmr.msra.gmra.mrb[204].mxu1 %v13901_v14  ;;  %18050 = vmatprep.mubr.msk.bf16.mxu0 %vm19208_vm0, %v19207_v1  ;;  %v16727_v14 = vld [vmem:[%s21438_s20 + $0x1] ss:$0 sm:$0xff] }
0x3e00   : > { %v17467_v34 = vpop.f32.mrb[188].mxu0  ;;  %v17489_v11 = vpop.f32.mrb[192].mxu1 }
0x3e01   : > { %v17468_v24 = vpop.f32.mrb[189].mxu0  ;;  %v17490_v50 = vpop.f32.mrb[193].mxu1 }
0x3e02   : > { %v17469_v9 = vadd.f32 %v17468_v24, %v17467_v34  ;;  %v17491_v38 = vadd.f32 %v17490_v50, %v17489_v11  ;;  %v17470_v7 = vpop.f32.mrb[190].mxu0  ;;  %v17492_v4 = vpop.f32.mrb[194].mxu1 }
0x3e03   : > { %v17471_v10 = vpop.f32.mrb[191].mxu0  ;;  %v17493_v8 = vpop.f32.mrb[195].mxu1  ;;  %v18995_v4 = vld [vmem:[%s21441_s24] sm:$0xff]  }
0x3e04   : > { %v14712_v23 = vadd.f32 %v17469_v9, %v16595_v28  ;;  %18047 = vmatpush3.bf16.msra.mxu0 %v18995_v4  ;;  %v18996_v10 = vld [vmem:[%s21441_s24 + $0x8] sm:$0xff]  }
0x3e05   : > { %18048 = vmatprep.subr.bf16.mxu0 %v19207_v1 }
0x3e06   : > { %v14752_v26 = vadd.f32 %v17491_v38, %v14712_v23 }
0x3e08   : > { %18049 = vmatpush3.bf16.msra.mxu0 %v18996_v10 }
0x3e20   : > { %v17511_v27 = vpop.f32.mrb[192].mxu0  ;;  %v17533_v51 = vpop.f32.mrb[196].mxu1 }
0x3e21   : > { %v17512_v40 = vpop.f32.mrb[193].mxu0  ;;  %v17534_v21 = vpop.f32.mrb[197].mxu1 }
0x3e22   : > { %v17513_v42 = vadd.f32 %v17512_v40, %v17511_v27  ;;  %v17535_v48 = vadd.f32 %v17534_v21, %v17533_v51  ;;  %v17514_v57 = vpop.f32.mrb[194].mxu0  ;;  %v17536_v15 = vpop.f32.mrb[198].mxu1  ;;  %v16728_v51 = vld [vmem:[%s21442_s26] ss:$0 sm:$0xff] }
0x3e23   : > { %v17515_v55 = vpop.f32.mrb[195].mxu0  ;;  %v17537_v43 = vpop.f32.mrb[199].mxu1  ;;  %v16729_v21 = vld [vmem:[%s21443_s28] ss:$0 sm:$0xff] }
0x3e24   : > { %v14792_v17 = vadd.f32 %v17513_v42, %v14752_v26  ;;  %v16730_v15 = vld [vmem:[%s21444_s1] ss:$0 sm:$0xff] }
0x3e26   : > { %v14832_v13 = vadd.f32 %v17535_v48, %v14792_v17 }
0x3e40   : > { %v17555_v52 = vpop.f32.mrb[196].mxu0 }
0x3e41   : > { %v17577_v35 = vpop.f32.mrb[200].mxu1  ;;  %v17556_v46 = vpop.f32.mrb[197].mxu0 }
0x3e42   : > { %v17557_v16 = vadd.f32 %v17556_v46, %v17555_v52  ;;  %v17578_v36 = vpop.f32.mrb[201].mxu1  ;;  %v17558_v56 = vpop.f32.mrb[198].mxu0 }
0x3e43   : > { %v17579_v58 = vadd.f32 %v17578_v36, %v17577_v35  ;;  %v17580_v41 = vpop.f32.mrb[202].mxu1  ;;  %v17559_v19 = vpop.f32.mrb[199].mxu0 }
0x3e44   : > { %v14872_v59 = vadd.f32 %v17557_v16, %v14832_v13  ;;  %v17581_v2 = vpop.f32.mrb[203].mxu1 }
0x3e46   : > { %v14912_v44 = vadd.f32 %v17579_v58, %v14872_v59 }
0x3e60   : > { %v17599_v53 = vpop.f32.mrb[200].mxu0 }
0x3e61   : > { %v17621_v31 = vpop.f32.mrb[204].mxu1  ;;  %v17600_v3 = vpop.f32.mrb[201].mxu0 }
0x3e62   : > { %v17601_v37 = vadd.f32 %v17600_v3, %v17599_v53  ;;  %v17622_v47 = vpop.f32.mrb[205].mxu1  ;;  %v17602_v61 = vpop.f32.mrb[202].mxu0 }
0x3e63   : > { %v17623_v60 = vadd.f32 %v17622_v47, %v17621_v31  ;;  %v17624_v62 = vpop.f32.mrb[206].mxu1  ;;  %v17603_v6 = vpop.f32.mrb[203].mxu0 }
0x3e64   : > { %v14952_v63 = vadd.f32 %v17601_v37, %v14912_v44  ;;  %v17625_v25 = vpop.f32.mrb[207].mxu1 }
0x3e66   : > { %v14992_v33 = vadd.f32 %v17623_v60, %v14952_v63 }
0x3e68   : > { %v14997_v49 = vadd.f32 %v14992_v33, %v21023_v39 }
0x3e6a   : > { %v15002_v29 = vsel %vm1202_vm1, %v14997_v49, 0.0 }
0x3e6b   : > { %15003 = vadd.xlane.f32.xlu0 %v15002_v29 }
0x3ef8   : > { %v15004_v30 = vpop.xlane.xlu0 %15003 }
0x3ef9   : > { %v15005_v5 = vmul.f32 0.03125, %v15004_v30 }
0x3efb   : > { %v15006_v18 = vsub.f32 %v14997_v49, %v15005_v5 }
0x3efd   : > { %v15007_v12 = vmul.f32 %v15006_v18, %v15006_v18 }
0x3eff   : > { %v15008_v54 = vsel %vm1202_vm1, %v15007_v12, 0.0 }
0x3f00   : > { %15009 = vadd.xlane.f32.xlu0 %v15008_v54 }
0x3f8d   : > { %v15010_v22 = vpop.xlane.xlu0 %15009 }
0x3f8e   : > { %v15011_v20 = vmul.f32 0.03125, %v15010_v22 }
0x3f90   : > { %v15012_v0 = vadd.f32 1e-05, %v15011_v20 }
0x3f92   : > { %19155 = vrsqrt.f32 %v15012_v0 }
0x3f9c   : > { %v19156_v32 = vpop.eup %19155 }
0x3f9d   : > { %v15014_v39 = vmul.f32 %v19156_v32, %v15006_v18 }
0x3f9f   : > { %v15021_v34 = vmul.f32 %v16726_v45, %v15014_v39 }
0x3fa1   : > { %v15028_v11 = vadd.f32 %v16727_v14, %v15021_v34 }
0x3fa3   : > { %v15031_v28 = vsel %vm1202_vm1, %v15028_v11, 0.0 }
0x3fa4   : > { %15032 = vadd.xlane.f32.xlu1 %v15031_v28 }
0x4031   : > { %v15033_v24 = vpop.xlane.xlu1 %15032 }
0x4032   : > { %v15034_v50 = vmul.f32 0.03125, %v15033_v24 }
0x4034   : > { %v15035_v9 = vsub.f32 %v15028_v11, %v15034_v50 }
0x4036   : > { %v15036_v38 = vmul.f32 %v15035_v9, %v15035_v9 }
0x4038   : > { %v15037_v7 = vsel %vm1202_vm1, %v15036_v38, 0.0 }
0x4039   : > { %15038 = vadd.xlane.f32.xlu0 %v15037_v7 }
0x40c6   : > { %v15039_v8 = vpop.xlane.xlu0 %15038 }
0x40c7   : > { %v15040_v23 = vmul.f32 0.03125, %v15039_v8 }
0x40c9   : > { %v15041_v26 = vadd.f32 1e-05, %v15040_v23 }
0x40cb   : > { %19157 = vrsqrt.f32 %v15041_v26 }
0x40d5   : > { %v19158_v27 = vpop.eup %19157 }
0x40d6   : > { %v15043_v40 = vmul.f32 %v19158_v27, %v15035_v9 }
0x40d8   : > { %v15050_v42 = vmul.f32 %v16728_v51, %v15043_v40 }
0x40da   : > { %v15057_v48 = vadd.f32 %v16729_v21, %v15050_v42 }
0x40dc   : > { %v15062_v57 = vpack.c.bf16 %v15057_v48, %v15057_v48 }
0x40de   : > { %18051 = vmatmul.mubr.msk.bf16.vlgmr.msra.gmra.mrb[204].mxu0 %vm1202_vm1, %v15062_v57 }
0x41b1   : > { %v15119_v55 = vpop.f32.mrb[204].mxu0 }
0x41b2   : > { %v15120_v43 = vadd.f32 %v16730_v15, %v15119_v55  ;;  %v18052_v1 = vpop.f32.mrb[205].mxu0 }
0x41b3   : > { %v15122_v17 = vpop.f32.mrb[206].mxu0 }
0x41b4   : > { %15125 = vst [vmem:[%s1169_s0] sm:$0xff] %v15120_v43  ;;  %v18053_v13 = vpop.f32.mrb[207].mxu0 }
0x41b5 PF: > { %s21448_s18 = sld [smem:[#allocation40_spill]] }
0x41bb   : > { %s87_s15 = sadd.s32 1, %s21448_s18  }
0x41bc   : > { %p84_p4 = scmp.ge.s32.totalorder %s87_s15, 4  }
0x41be   :  { %86 = sbr.rel (!%p84_p4) target bundleno = 85 (0x55), region = 273 }

</bundles_post_ra>
